<compile_context>
chip_gen: v6e
topology: v6e:2x2x1
jax: 0.10.0
libtpu: 0.0.40
codegen_flags: <defaults>
</compile_context>

<pallas_src>
import functools

import jax
import jax.numpy as jnp
from jax.experimental import pallas as pl
from jax.experimental.pallas import tpu as pltpu

_EPS = 1e-5
_USE_BF16_MATMUL = True   # bf16 MXU path (v6e/v7x). Set False for a strict-f32 path (v5e).


# ---------------------------------------------------------------------------
# In-kernel helpers
# ---------------------------------------------------------------------------
def _conv_taps(x_ref, w_ref, *, p, e, w):
    """3x3, stride-1, pad-1 conv of one image held in padded-flat layout.

    x_ref : (PE, C)       image rows, flattened (H+2)*(W+2) with E zero slack rows on
                          each end so every tap is an in-bounds static slice.
    w_ref : (9, C, Cout)  per-tap weights, tap index = kh*3 + kw.
    Returns (P, Cout) f32 conv output over the padded-flat P-domain.  Rows belonging
    to the zero-pad ring carry junk values; callers mask / ignore them.
    """
    wp = w + 2
    cout = w_ref.shape[-1]
    acc = jnp.zeros((p, cout), jnp.float32)
    for kh in range(3):
        for kw in range(3):
            shift = (kh - 1) * wp + (kw - 1)
            patch = x_ref[e + shift: e + shift + p, :]
            w_t = w_ref[kh * 3 + kw]
            if _USE_BF16_MATMUL:
                patch = patch.astype(jnp.bfloat16)
                w_t = w_t.astype(jnp.bfloat16)
            acc = acc + jnp.dot(patch, w_t, preferred_element_type=jnp.float32)
    return acc


def _stats_kernel(x_ref, w_ref, mask_ref, sum_ref, sumsq_ref, *, p, e, w):
    """Per-image partial (sum, sumsq) of the conv output for training-mode BN stats."""
    acc = _conv_taps(x_ref, w_ref, p=p, e=e, w=w)
    m = mask_ref[...]                       # (P, 1): 1.0 on real pixels, 0.0 on pad ring
    sum_ref[...] = jnp.sum(acc * m, axis=0, keepdims=True)
    sumsq_ref[...] = jnp.sum(acc * acc * m, axis=0, keepdims=True)


def _conv_bn_relu_kernel(x_ref, w_ref, mask_ref, scale_ref, shift_ref, o_ref, *, p, e, w):
    """y1 = relu(conv(x) * scale + shift), written back in padded-flat-extended layout
    (zero pad ring + zero slack rows) so stage 2 consumes it directly as conv input."""
    acc = _conv_taps(x_ref, w_ref, p=p, e=e, w=w)
    y = jnp.maximum(acc * scale_ref[...] + shift_ref[...], 0.0) * mask_ref[...]
    c = o_ref.shape[-1]
    o_ref[0:e, :] = jnp.zeros((e, c), o_ref.dtype)
    o_ref[e:e + p, :] = y.astype(o_ref.dtype)
    o_ref[e + p:e + p + e, :] = jnp.zeros((e, c), o_ref.dtype)


def _conv_bn_add_relu_kernel(x_ref, w_ref, scale_ref, shift_ref, res_ref, o_ref, *, p, e, w):
    """out = relu(conv(y1) * scale + shift + residual); residual streamed in the same
    padded-flat layout (its pad ring is zero, so no extra masking is needed)."""
    acc = _conv_taps(x_ref, w_ref, p=p, e=e, w=w)
    resid = res_ref[e:e + p, :]
    y = jnp.maximum(acc * scale_ref[...] + shift_ref[...] + resid, 0.0)
    o_ref[...] = y.astype(o_ref.dtype)


# ---------------------------------------------------------------------------
# Wrapper-side glue (tiny, no 9x expansion)
# ---------------------------------------------------------------------------
def _interior_mask(h, w):
    """(P, 1) f32 mask: 1.0 at real (interior) pixel rows of the padded-flat layout."""
    wp = w + 2
    idx = jnp.arange((h + 2) * wp, dtype=jnp.int32)
    r = idx // wp
    c = idx % wp
    ok = (r >= 1) & (r <= h) & (c >= 1) & (c <= w)
    return ok.astype(jnp.float32)[:, None]


def _bn_scale_shift(s, ss, count, gamma2d, beta2d):
    """Fold training-mode BN (batch mean / biased var, eps) + gamma/beta into
    a per-channel affine y = x * scale + shift."""
    mean = s / count
    var = jnp.maximum(ss / count - mean * mean, 0.0)
    rstd = jax.lax.rsqrt(var + _EPS)
    scale = gamma2d * rstd
    shift = beta2d - mean * scale
    return scale, shift


@jax.jit
def residual_block_forward(x_nchw, w_oihw, gamma, beta):
    n, cin, h, w = x_nchw.shape
    cout = w_oihw.shape[0]
    assert cin == cout, "residual add requires in_channels == out_channels"
    c = cin

    wp = w + 2
    p = (h + 2) * wp                       # padded-flat rows per image
    e = ((w + 3 + 7) // 8) * 8             # slack rows so every tap slice is in bounds (8-aligned)
    pe = p + 2 * e
    count = n * h * w                      # BN reduces over N*H*W

    # NHWC, spatial zero-pad (only ~1.02x glue, not 9x im2col), flatten, add slack rows.
    x_nhwc = jnp.transpose(x_nchw, (0, 2, 3, 1)).astype(jnp.float32)
    xpe = jnp.pad(x_nhwc, ((0, 0), (1, 1), (1, 1), (0, 0))).reshape(n, p, c)
    xpe = jnp.pad(xpe, ((0, 0), (e, e), (0, 0)))                       # (N, PE, C)

    # (Cout, Cin, 3, 3) -> (9, Cin, Cout), tap index = kh*3 + kw
    w_taps = jnp.transpose(w_oihw, (2, 3, 1, 0)).reshape(9, c, cout).astype(jnp.float32)
    mask = _interior_mask(h, w)                                        # (P, 1)
    gamma2d = gamma.reshape(1, cout).astype(jnp.float32)
    beta2d = beta.reshape(1, cout).astype(jnp.float32)

    # BlockSpecs: one image per grid step (pipelined); tiny constants pinned (constant
    # index_map => fetched once, not re-DMA'd every step).
    img_spec = pl.BlockSpec((None, pe, c), lambda i: (i, 0, 0))
    w_spec = pl.BlockSpec((9, c, cout), lambda i: (0, 0, 0))
    mask_spec = pl.BlockSpec((p, 1), lambda i: (0, 0))
    vec_spec = pl.BlockSpec((1, cout), lambda i: (0, 0))
    stat_spec = pl.BlockSpec((None, 1, cout), lambda i: (i, 0, 0))
    ype_spec = pl.BlockSpec((None, pe, cout), lambda i: (i, 0, 0))
    out_spec = pl.BlockSpec((None, p, cout), lambda i: (i, 0, 0))

    cparams = pltpu.CompilerParams(
        dimension_semantics=("parallel",),          # megacore: images sharded across TCs
        vmem_limit_bytes=32 * 1024 * 1024,          # explicit limit; per-step usage is tiny
    )

    def conv_batch_stats(inp):
        sums, sumsqs = pl.pallas_call(
            functools.partial(_stats_kernel, p=p, e=e, w=w),
            grid=(n,),
            in_specs=[img_spec, w_spec, mask_spec],
            out_specs=(stat_spec, stat_spec),
            out_shape=(jax.ShapeDtypeStruct((n, 1, cout), jnp.float32),
                       jax.ShapeDtypeStruct((n, 1, cout), jnp.float32)),
            compiler_params=cparams,
        )(inp, w_taps, mask)
        # cross-tile (cross-image) BN reduction on tiny (N, 1, C) partials
        return sums.sum(axis=0), sumsqs.sum(axis=0)

    # ---- stage 1: conv -> BN(batch stats) -> ReLU ----
    s1, ss1 = conv_batch_stats(xpe)
    scale1, shift1 = _bn_scale_shift(s1, ss1, count, gamma2d, beta2d)
    y1pe = pl.pallas_call(
        functools.partial(_conv_bn_relu_kernel, p=p, e=e, w=w),
        grid=(n,),
        in_specs=[img_spec, w_spec, mask_spec, vec_spec, vec_spec],
        out_specs=ype_spec,
        out_shape=jax.ShapeDtypeStruct((n, pe, cout), jnp.float32),
        compiler_params=cparams,
    )(xpe, w_taps, mask, scale1, shift1)

    # ---- stage 2: same conv -> same BN -> + residual -> ReLU ----
    s2, ss2 = conv_batch_stats(y1pe)
    scale2, shift2 = _bn_scale_shift(s2, ss2, count, gamma2d, beta2d)
    out_p = pl.pallas_call(
        functools.partial(_conv_bn_add_relu_kernel, p=p, e=e, w=w),
        grid=(n,),
        in_specs=[img_spec, w_spec, vec_spec, vec_spec, img_spec],
        out_specs=out_spec,
        out_shape=jax.ShapeDtypeStruct((n, p, cout), jnp.float32),
        compiler_params=cparams,
    )(y1pe, w_taps, scale2, shift2, xpe)

    out = out_p.reshape(n, h + 2, w + 2, cout)[:, 1:h + 1, 1:w + 1, :]
    return jnp.transpose(out, (0, 3, 1, 2))                            # back to NCHW


# ---------------------------------------------------------------------------
# Independent pure-JAX reference (lax.conv + explicit training-mode BN)
# ---------------------------------------------------------------------------
def _reference_forward(x_nchw, w_oihw, gamma, beta):
    x = x_nchw.astype(jnp.float32)
    wf = w_oihw.astype(jnp.float32)

    def conv(z):
        return jax.lax.conv_general_dilated(
            z, wf, window_strides=(1, 1), padding=((1, 1), (1, 1)),
            dimension_numbers=("NCHW", "OIHW", "NCHW"))

    def bn(z):
        mean = jnp.mean(z, axis=(0, 2, 3), keepdims=True)
        var = jnp.mean((z - mean) ** 2, axis=(0, 2, 3), keepdims=True)
        zn = (z - mean) * jax.lax.rsqrt(var + _EPS)
        return gamma.reshape(1, -1, 1, 1) * zn + beta.reshape(1, -1, 1, 1)

    y = jnp.maximum(bn(conv(x)), 0.0)
    y = bn(conv(y)) + x
    return jnp.maximum(y, 0.0)


if __name__ == "__main__":
    key = jax.random.PRNGKey(0)
    kx, kw_ = jax.random.split(key)

    N, C, H, W = 2, 4, 16, 16
    x = jax.random.normal(kx, (N, C, H, W), dtype=jnp.float32)
    w = jax.random.normal(kw_, (C, C, 3, 3), dtype=jnp.float32) * 0.2   # Conv2d(bias=False) weight
    gamma = jnp.ones((C,), dtype=jnp.float32)                           # BatchNorm2d default init
    beta = jnp.zeros((C,), dtype=jnp.float32)

    out = jax.block_until_ready(residual_block_forward(x, w, gamma, beta))
    ref = jax.block_until_ready(_reference_forward(x, w, gamma, beta))

    assert out.shape == (N, C, H, W)
    max_err = float(jnp.max(jnp.abs(out - ref)))
    assert max_err < 3e-2, f"mismatch vs reference: max abs err = {max_err}"

    print("KERNEL_OK")
</pallas_src>

<mosaic_0001>
module attributes {stable_mosaic.version = 11 : i64} {
  func.func @_conv_bn_relu_kernel(%arg0: i32, %arg1: memref<1x372x4xf32, #tpu.memory_space<vmem>>, %arg2: memref<9x4x4xf32, #tpu.memory_space<vmem>>, %arg3: memref<324x1xf32, #tpu.memory_space<vmem>>, %arg4: memref<1x4xf32, #tpu.memory_space<vmem>>, %arg5: memref<1x4xf32, #tpu.memory_space<vmem>>, %arg6: memref<1x372x4xf32, #tpu.memory_space<vmem>>) attributes {dimension_semantics = [#tpu.dimension_semantics<parallel>], iteration_bounds = array<i64: 2>, scalar_prefetch = 0 : i64, scratch_operands = 0 : i64, tpu.core_type = #tpu.core_type<tc>, window_params = [{transform_indices = @transform_0, window_bounds = array<i64: 1, 372, 4>}, {pipeline_mode = #tpu.pipeline_mode<synchronous>, transform_indices = @transform_1, window_bounds = array<i64: 9, 4, 4>}, {pipeline_mode = #tpu.pipeline_mode<synchronous>, transform_indices = @transform_2, window_bounds = array<i64: 324, 1>}, {pipeline_mode = #tpu.pipeline_mode<synchronous>, transform_indices = @transform_3, window_bounds = array<i64: 1, 4>}, {pipeline_mode = #tpu.pipeline_mode<synchronous>, transform_indices = @transform_4, window_bounds = array<i64: 1, 4>}, {transform_indices = @transform_5, window_bounds = array<i64: 1, 372, 4>}]} {
    %cst = arith.constant 0.000000e+00 : f32
    %0 = vector.broadcast %cst : f32 to vector<324x4xf32>
    %c0 = arith.constant 0 : index
    %c5 = arith.constant 5 : index
    %c0_0 = arith.constant 0 : index
    %1 = vector.load %arg1[%c0, %c5, %c0_0] : memref<1x372x4xf32, #tpu.memory_space<vmem>>, vector<1x324x4xf32>
    %2 = vector.shape_cast %1 : vector<1x324x4xf32> to vector<324x4xf32>
    %c0_1 = arith.constant 0 : index
    %c0_2 = arith.constant 0 : index
    %c0_3 = arith.constant 0 : index
    %3 = vector.load %arg2[%c0_1, %c0_2, %c0_3] : memref<9x4x4xf32, #tpu.memory_space<vmem>>, vector<1x4x4xf32>
    %4 = vector.shape_cast %3 : vector<1x4x4xf32> to vector<4x4xf32>
    %5 = arith.truncf %2 : vector<324x4xf32> to vector<324x4xbf16>
    %6 = arith.truncf %4 : vector<4x4xf32> to vector<4x4xbf16>
    %cst_4 = arith.constant dense<0.000000e+00> : vector<324x4xf32>
    %7 = tpu.matmul %5, %6, %cst_4 {dimension_numbers = #tpu.dot_dimension_numbers<[1], [0], [0], [1], [0, 0, 1, 1], [], []>} : vector<324x4xbf16>, vector<4x4xbf16>, vector<324x4xf32> -> vector<324x4xf32>
    %8 = arith.addf %0, %7 : vector<324x4xf32>
    %c0_5 = arith.constant 0 : index
    %c6 = arith.constant 6 : index
    %c0_6 = arith.constant 0 : index
    %9 = vector.load %arg1[%c0_5, %c6, %c0_6] : memref<1x372x4xf32, #tpu.memory_space<vmem>>, vector<1x324x4xf32>
    %10 = vector.shape_cast %9 : vector<1x324x4xf32> to vector<324x4xf32>
    %c1 = arith.constant 1 : index
    %c0_7 = arith.constant 0 : index
    %c0_8 = arith.constant 0 : index
    %11 = vector.load %arg2[%c1, %c0_7, %c0_8] : memref<9x4x4xf32, #tpu.memory_space<vmem>>, vector<1x4x4xf32>
    %12 = vector.shape_cast %11 : vector<1x4x4xf32> to vector<4x4xf32>
    %13 = arith.truncf %10 : vector<324x4xf32> to vector<324x4xbf16>
    %14 = arith.truncf %12 : vector<4x4xf32> to vector<4x4xbf16>
    %cst_9 = arith.constant dense<0.000000e+00> : vector<324x4xf32>
    %15 = tpu.matmul %13, %14, %cst_9 {dimension_numbers = #tpu.dot_dimension_numbers<[1], [0], [0], [1], [0, 0, 1, 1], [], []>} : vector<324x4xbf16>, vector<4x4xbf16>, vector<324x4xf32> -> vector<324x4xf32>
    %16 = arith.addf %8, %15 : vector<324x4xf32>
    %c0_10 = arith.constant 0 : index
    %c7 = arith.constant 7 : index
    %c0_11 = arith.constant 0 : index
    %17 = vector.load %arg1[%c0_10, %c7, %c0_11] : memref<1x372x4xf32, #tpu.memory_space<vmem>>, vector<1x324x4xf32>
    %18 = vector.shape_cast %17 : vector<1x324x4xf32> to vector<324x4xf32>
    %c2 = arith.constant 2 : index
    %c0_12 = arith.constant 0 : index
    %c0_13 = arith.constant 0 : index
    %19 = vector.load %arg2[%c2, %c0_12, %c0_13] : memref<9x4x4xf32, #tpu.memory_space<vmem>>, vector<1x4x4xf32>
    %20 = vector.shape_cast %19 : vector<1x4x4xf32> to vector<4x4xf32>
    %21 = arith.truncf %18 : vector<324x4xf32> to vector<324x4xbf16>
    %22 = arith.truncf %20 : vector<4x4xf32> to vector<4x4xbf16>
    %cst_14 = arith.constant dense<0.000000e+00> : vector<324x4xf32>
    %23 = tpu.matmul %21, %22, %cst_14 {dimension_numbers = #tpu.dot_dimension_numbers<[1], [0], [0], [1], [0, 0, 1, 1], [], []>} : vector<324x4xbf16>, vector<4x4xbf16>, vector<324x4xf32> -> vector<324x4xf32>
    %24 = arith.addf %16, %23 : vector<324x4xf32>
    %c0_15 = arith.constant 0 : index
    %c23 = arith.constant 23 : index
    %c0_16 = arith.constant 0 : index
    %25 = vector.load %arg1[%c0_15, %c23, %c0_16] : memref<1x372x4xf32, #tpu.memory_space<vmem>>, vector<1x324x4xf32>
    %26 = vector.shape_cast %25 : vector<1x324x4xf32> to vector<324x4xf32>
    %c3 = arith.constant 3 : index
    %c0_17 = arith.constant 0 : index
    %c0_18 = arith.constant 0 : index
    %27 = vector.load %arg2[%c3, %c0_17, %c0_18] : memref<9x4x4xf32, #tpu.memory_space<vmem>>, vector<1x4x4xf32>
    %28 = vector.shape_cast %27 : vector<1x4x4xf32> to vector<4x4xf32>
    %29 = arith.truncf %26 : vector<324x4xf32> to vector<324x4xbf16>
    %30 = arith.truncf %28 : vector<4x4xf32> to vector<4x4xbf16>
    %cst_19 = arith.constant dense<0.000000e+00> : vector<324x4xf32>
    %31 = tpu.matmul %29, %30, %cst_19 {dimension_numbers = #tpu.dot_dimension_numbers<[1], [0], [0], [1], [0, 0, 1, 1], [], []>} : vector<324x4xbf16>, vector<4x4xbf16>, vector<324x4xf32> -> vector<324x4xf32>
    %32 = arith.addf %24, %31 : vector<324x4xf32>
    %c0_20 = arith.constant 0 : index
    %c24 = arith.constant 24 : index
    %c0_21 = arith.constant 0 : index
    %33 = vector.load %arg1[%c0_20, %c24, %c0_21] : memref<1x372x4xf32, #tpu.memory_space<vmem>>, vector<1x324x4xf32>
    %34 = vector.shape_cast %33 : vector<1x324x4xf32> to vector<324x4xf32>
    %c4 = arith.constant 4 : index
    %c0_22 = arith.constant 0 : index
    %c0_23 = arith.constant 0 : index
    %35 = vector.load %arg2[%c4, %c0_22, %c0_23] : memref<9x4x4xf32, #tpu.memory_space<vmem>>, vector<1x4x4xf32>
    %36 = vector.shape_cast %35 : vector<1x4x4xf32> to vector<4x4xf32>
    %37 = arith.truncf %34 : vector<324x4xf32> to vector<324x4xbf16>
    %38 = arith.truncf %36 : vector<4x4xf32> to vector<4x4xbf16>
    %cst_24 = arith.constant dense<0.000000e+00> : vector<324x4xf32>
    %39 = tpu.matmul %37, %38, %cst_24 {dimension_numbers = #tpu.dot_dimension_numbers<[1], [0], [0], [1], [0, 0, 1, 1], [], []>} : vector<324x4xbf16>, vector<4x4xbf16>, vector<324x4xf32> -> vector<324x4xf32>
    %40 = arith.addf %32, %39 : vector<324x4xf32>
    %c0_25 = arith.constant 0 : index
    %c25 = arith.constant 25 : index
    %c0_26 = arith.constant 0 : index
    %41 = vector.load %arg1[%c0_25, %c25, %c0_26] : memref<1x372x4xf32, #tpu.memory_space<vmem>>, vector<1x324x4xf32>
    %42 = vector.shape_cast %41 : vector<1x324x4xf32> to vector<324x4xf32>
    %c5_27 = arith.constant 5 : index
    %c0_28 = arith.constant 0 : index
    %c0_29 = arith.constant 0 : index
    %43 = vector.load %arg2[%c5_27, %c0_28, %c0_29] : memref<9x4x4xf32, #tpu.memory_space<vmem>>, vector<1x4x4xf32>
    %44 = vector.shape_cast %43 : vector<1x4x4xf32> to vector<4x4xf32>
    %45 = arith.truncf %42 : vector<324x4xf32> to vector<324x4xbf16>
    %46 = arith.truncf %44 : vector<4x4xf32> to vector<4x4xbf16>
    %cst_30 = arith.constant dense<0.000000e+00> : vector<324x4xf32>
    %47 = tpu.matmul %45, %46, %cst_30 {dimension_numbers = #tpu.dot_dimension_numbers<[1], [0], [0], [1], [0, 0, 1, 1], [], []>} : vector<324x4xbf16>, vector<4x4xbf16>, vector<324x4xf32> -> vector<324x4xf32>
    %48 = arith.addf %40, %47 : vector<324x4xf32>
    %c0_31 = arith.constant 0 : index
    %c41 = arith.constant 41 : index
    %c0_32 = arith.constant 0 : index
    %49 = vector.load %arg1[%c0_31, %c41, %c0_32] : memref<1x372x4xf32, #tpu.memory_space<vmem>>, vector<1x324x4xf32>
    %50 = vector.shape_cast %49 : vector<1x324x4xf32> to vector<324x4xf32>
    %c6_33 = arith.constant 6 : index
    %c0_34 = arith.constant 0 : index
    %c0_35 = arith.constant 0 : index
    %51 = vector.load %arg2[%c6_33, %c0_34, %c0_35] : memref<9x4x4xf32, #tpu.memory_space<vmem>>, vector<1x4x4xf32>
    %52 = vector.shape_cast %51 : vector<1x4x4xf32> to vector<4x4xf32>
    %53 = arith.truncf %50 : vector<324x4xf32> to vector<324x4xbf16>
    %54 = arith.truncf %52 : vector<4x4xf32> to vector<4x4xbf16>
    %cst_36 = arith.constant dense<0.000000e+00> : vector<324x4xf32>
    %55 = tpu.matmul %53, %54, %cst_36 {dimension_numbers = #tpu.dot_dimension_numbers<[1], [0], [0], [1], [0, 0, 1, 1], [], []>} : vector<324x4xbf16>, vector<4x4xbf16>, vector<324x4xf32> -> vector<324x4xf32>
    %56 = arith.addf %48, %55 : vector<324x4xf32>
    %c0_37 = arith.constant 0 : index
    %c42 = arith.constant 42 : index
    %c0_38 = arith.constant 0 : index
    %57 = vector.load %arg1[%c0_37, %c42, %c0_38] : memref<1x372x4xf32, #tpu.memory_space<vmem>>, vector<1x324x4xf32>
    %58 = vector.shape_cast %57 : vector<1x324x4xf32> to vector<324x4xf32>
    %c7_39 = arith.constant 7 : index
    %c0_40 = arith.constant 0 : index
    %c0_41 = arith.constant 0 : index
    %59 = vector.load %arg2[%c7_39, %c0_40, %c0_41] : memref<9x4x4xf32, #tpu.memory_space<vmem>>, vector<1x4x4xf32>
    %60 = vector.shape_cast %59 : vector<1x4x4xf32> to vector<4x4xf32>
    %61 = arith.truncf %58 : vector<324x4xf32> to vector<324x4xbf16>
    %62 = arith.truncf %60 : vector<4x4xf32> to vector<4x4xbf16>
    %cst_42 = arith.constant dense<0.000000e+00> : vector<324x4xf32>
    %63 = tpu.matmul %61, %62, %cst_42 {dimension_numbers = #tpu.dot_dimension_numbers<[1], [0], [0], [1], [0, 0, 1, 1], [], []>} : vector<324x4xbf16>, vector<4x4xbf16>, vector<324x4xf32> -> vector<324x4xf32>
    %64 = arith.addf %56, %63 : vector<324x4xf32>
    %c0_43 = arith.constant 0 : index
    %c43 = arith.constant 43 : index
    %c0_44 = arith.constant 0 : index
    %65 = vector.load %arg1[%c0_43, %c43, %c0_44] : memref<1x372x4xf32, #tpu.memory_space<vmem>>, vector<1x324x4xf32>
    %66 = vector.shape_cast %65 : vector<1x324x4xf32> to vector<324x4xf32>
    %c8 = arith.constant 8 : index
    %c0_45 = arith.constant 0 : index
    %c0_46 = arith.constant 0 : index
    %67 = vector.load %arg2[%c8, %c0_45, %c0_46] : memref<9x4x4xf32, #tpu.memory_space<vmem>>, vector<1x4x4xf32>
    %68 = vector.shape_cast %67 : vector<1x4x4xf32> to vector<4x4xf32>
    %69 = arith.truncf %66 : vector<324x4xf32> to vector<324x4xbf16>
    %70 = arith.truncf %68 : vector<4x4xf32> to vector<4x4xbf16>
    %cst_47 = arith.constant dense<0.000000e+00> : vector<324x4xf32>
    %71 = tpu.matmul %69, %70, %cst_47 {dimension_numbers = #tpu.dot_dimension_numbers<[1], [0], [0], [1], [0, 0, 1, 1], [], []>} : vector<324x4xbf16>, vector<4x4xbf16>, vector<324x4xf32> -> vector<324x4xf32>
    %72 = arith.addf %64, %71 : vector<324x4xf32>
    %c0_48 = arith.constant 0 : index
    %c0_49 = arith.constant 0 : index
    %73 = vector.load %arg4[%c0_48, %c0_49] : memref<1x4xf32, #tpu.memory_space<vmem>>, vector<1x4xf32>
    %74 = vector.broadcast %73 : vector<1x4xf32> to vector<324x4xf32>
    %75 = arith.mulf %72, %74 : vector<324x4xf32>
    %c0_50 = arith.constant 0 : index
    %c0_51 = arith.constant 0 : index
    %76 = vector.load %arg5[%c0_50, %c0_51] : memref<1x4xf32, #tpu.memory_space<vmem>>, vector<1x4xf32>
    %77 = vector.broadcast %76 : vector<1x4xf32> to vector<324x4xf32>
    %78 = arith.addf %75, %77 : vector<324x4xf32>
    %cst_52 = arith.constant 0.000000e+00 : f32
    %79 = vector.broadcast %cst_52 : f32 to vector<324x4xf32>
    %80 = arith.maximumf %78, %79 : vector<324x4xf32>
    %c0_53 = arith.constant 0 : index
    %c0_54 = arith.constant 0 : index
    %81 = vector.load %arg3[%c0_53, %c0_54] : memref<324x1xf32, #tpu.memory_space<vmem>>, vector<324x1xf32>
    %82 = vector.broadcast %81 : vector<324x1xf32> to vector<324x4xf32>
    %83 = arith.mulf %80, %82 : vector<324x4xf32>
    %cst_55 = arith.constant 0.000000e+00 : f32
    %84 = vector.broadcast %cst_55 : f32 to vector<24x4xf32>
    %c0_56 = arith.constant 0 : index
    %c0_57 = arith.constant 0 : index
    %c0_58 = arith.constant 0 : index
    %85 = vector.load %arg6[%c0_56, %c0_57, %c0_58] : memref<1x372x4xf32, #tpu.memory_space<vmem>>, vector<1x24x4xf32>
    %86 = vector.shape_cast %85 : vector<1x24x4xf32> to vector<24x4xf32>
    %87 = vector.shape_cast %84 : vector<24x4xf32> to vector<1x24x4xf32>
    tpu.vector_store %arg6[%c0_56, %c0_57, %c0_58], %87 {strides = array<i32>} : memref<1x372x4xf32, #tpu.memory_space<vmem>>, vector<1x24x4xf32>,
    %c0_59 = arith.constant 0 : index
    %c24_60 = arith.constant 24 : index
    %c0_61 = arith.constant 0 : index
    %88 = vector.load %arg6[%c0_59, %c24_60, %c0_61] : memref<1x372x4xf32, #tpu.memory_space<vmem>>, vector<1x324x4xf32>
    %89 = vector.shape_cast %88 : vector<1x324x4xf32> to vector<324x4xf32>
    %90 = vector.shape_cast %83 : vector<324x4xf32> to vector<1x324x4xf32>
    tpu.vector_store %arg6[%c0_59, %c24_60, %c0_61], %90 {strides = array<i32>} : memref<1x372x4xf32, #tpu.memory_space<vmem>>, vector<1x324x4xf32>,
    %cst_62 = arith.constant 0.000000e+00 : f32
    %91 = vector.broadcast %cst_62 : f32 to vector<24x4xf32>
    %c0_63 = arith.constant 0 : index
    %c348 = arith.constant 348 : index
    %c0_64 = arith.constant 0 : index
    %92 = vector.load %arg6[%c0_63, %c348, %c0_64] : memref<1x372x4xf32, #tpu.memory_space<vmem>>, vector<1x24x4xf32>
    %93 = vector.shape_cast %92 : vector<1x24x4xf32> to vector<24x4xf32>
    %94 = vector.shape_cast %91 : vector<24x4xf32> to vector<1x24x4xf32>
    tpu.vector_store %arg6[%c0_63, %c348, %c0_64], %94 {strides = array<i32>} : memref<1x372x4xf32, #tpu.memory_space<vmem>>, vector<1x24x4xf32>,
    return
  }
  func.func @transform_0(%arg0: i32) -> (i32, i32, i32) {
    %c0_i32 = arith.constant 0 : i32
    %c0_i32_0 = arith.constant 0 : i32
    %c0_i32_1 = arith.constant 0 : i32
    return %arg0, %c0_i32, %c0_i32_0 : i32, i32, i32
  }
  func.func @transform_1(%arg0: i32) -> (i32, i32, i32) {
    %c0_i32 = arith.constant 0 : i32
    %c0_i32_0 = arith.constant 0 : i32
    %c0_i32_1 = arith.constant 0 : i32
    %c0_i32_2 = arith.constant 0 : i32
    return %c0_i32, %c0_i32_0, %c0_i32_1 : i32, i32, i32
  }
  func.func @transform_2(%arg0: i32) -> (i32, i32) {
    %c0_i32 = arith.constant 0 : i32
    %c0_i32_0 = arith.constant 0 : i32
    %c0_i32_1 = arith.constant 0 : i32
    return %c0_i32, %c0_i32_0 : i32, i32
  }
  func.func @transform_3(%arg0: i32) -> (i32, i32) {
    %c0_i32 = arith.constant 0 : i32
    %c0_i32_0 = arith.constant 0 : i32
    %c0_i32_1 = arith.constant 0 : i32
    return %c0_i32, %c0_i32_0 : i32, i32
  }
  func.func @transform_4(%arg0: i32) -> (i32, i32) {
    %c0_i32 = arith.constant 0 : i32
    %c0_i32_0 = arith.constant 0 : i32
    %c0_i32_1 = arith.constant 0 : i32
    return %c0_i32, %c0_i32_0 : i32, i32
  }
  func.func @transform_5(%arg0: i32) -> (i32, i32, i32) {
    %c0_i32 = arith.constant 0 : i32
    %c0_i32_0 = arith.constant 0 : i32
    %c0_i32_1 = arith.constant 0 : i32
    return %arg0, %c0_i32, %c0_i32_0 : i32, i32, i32
  }
}

module attributes {stable_mosaic.version = 11 : i64} {
  func.func @_stats_kernel(%arg0: i32, %arg1: memref<1x372x4xf32, #tpu.memory_space<vmem>>, %arg2: memref<9x4x4xf32, #tpu.memory_space<vmem>>, %arg3: memref<324x1xf32, #tpu.memory_space<vmem>>, %arg4: memref<1x1x4xf32, #tpu.memory_space<vmem>>, %arg5: memref<1x1x4xf32, #tpu.memory_space<vmem>>) attributes {dimension_semantics = [#tpu.dimension_semantics<parallel>], iteration_bounds = array<i64: 2>, scalar_prefetch = 0 : i64, scratch_operands = 0 : i64, tpu.core_type = #tpu.core_type<tc>, window_params = [{transform_indices = @transform_0, window_bounds = array<i64: 1, 372, 4>}, {pipeline_mode = #tpu.pipeline_mode<synchronous>, transform_indices = @transform_1, window_bounds = array<i64: 9, 4, 4>}, {pipeline_mode = #tpu.pipeline_mode<synchronous>, transform_indices = @transform_2, window_bounds = array<i64: 324, 1>}, {transform_indices = @transform_3, window_bounds = array<i64: 1, 1, 4>}, {transform_indices = @transform_4, window_bounds = array<i64: 1, 1, 4>}]} {
    %cst = arith.constant 0.000000e+00 : f32
    %0 = vector.broadcast %cst : f32 to vector<324x4xf32>
    %c0 = arith.constant 0 : index
    %c5 = arith.constant 5 : index
    %c0_0 = arith.constant 0 : index
    %1 = vector.load %arg1[%c0, %c5, %c0_0] : memref<1x372x4xf32, #tpu.memory_space<vmem>>, vector<1x324x4xf32>
    %2 = vector.shape_cast %1 : vector<1x324x4xf32> to vector<324x4xf32>
    %c0_1 = arith.constant 0 : index
    %c0_2 = arith.constant 0 : index
    %c0_3 = arith.constant 0 : index
    %3 = vector.load %arg2[%c0_1, %c0_2, %c0_3] : memref<9x4x4xf32, #tpu.memory_space<vmem>>, vector<1x4x4xf32>
    %4 = vector.shape_cast %3 : vector<1x4x4xf32> to vector<4x4xf32>
    %5 = arith.truncf %2 : vector<324x4xf32> to vector<324x4xbf16>
    %6 = arith.truncf %4 : vector<4x4xf32> to vector<4x4xbf16>
    %cst_4 = arith.constant dense<0.000000e+00> : vector<324x4xf32>
    %7 = tpu.matmul %5, %6, %cst_4 {dimension_numbers = #tpu.dot_dimension_numbers<[1], [0], [0], [1], [0, 0, 1, 1], [], []>} : vector<324x4xbf16>, vector<4x4xbf16>, vector<324x4xf32> -> vector<324x4xf32>
    %8 = arith.addf %0, %7 : vector<324x4xf32>
    %c0_5 = arith.constant 0 : index
    %c6 = arith.constant 6 : index
    %c0_6 = arith.constant 0 : index
    %9 = vector.load %arg1[%c0_5, %c6, %c0_6] : memref<1x372x4xf32, #tpu.memory_space<vmem>>, vector<1x324x4xf32>
    %10 = vector.shape_cast %9 : vector<1x324x4xf32> to vector<324x4xf32>
    %c1 = arith.constant 1 : index
    %c0_7 = arith.constant 0 : index
    %c0_8 = arith.constant 0 : index
    %11 = vector.load %arg2[%c1, %c0_7, %c0_8] : memref<9x4x4xf32, #tpu.memory_space<vmem>>, vector<1x4x4xf32>
    %12 = vector.shape_cast %11 : vector<1x4x4xf32> to vector<4x4xf32>
    %13 = arith.truncf %10 : vector<324x4xf32> to vector<324x4xbf16>
    %14 = arith.truncf %12 : vector<4x4xf32> to vector<4x4xbf16>
    %cst_9 = arith.constant dense<0.000000e+00> : vector<324x4xf32>
    %15 = tpu.matmul %13, %14, %cst_9 {dimension_numbers = #tpu.dot_dimension_numbers<[1], [0], [0], [1], [0, 0, 1, 1], [], []>} : vector<324x4xbf16>, vector<4x4xbf16>, vector<324x4xf32> -> vector<324x4xf32>
    %16 = arith.addf %8, %15 : vector<324x4xf32>
    %c0_10 = arith.constant 0 : index
    %c7 = arith.constant 7 : index
    %c0_11 = arith.constant 0 : index
    %17 = vector.load %arg1[%c0_10, %c7, %c0_11] : memref<1x372x4xf32, #tpu.memory_space<vmem>>, vector<1x324x4xf32>
    %18 = vector.shape_cast %17 : vector<1x324x4xf32> to vector<324x4xf32>
    %c2 = arith.constant 2 : index
    %c0_12 = arith.constant 0 : index
    %c0_13 = arith.constant 0 : index
    %19 = vector.load %arg2[%c2, %c0_12, %c0_13] : memref<9x4x4xf32, #tpu.memory_space<vmem>>, vector<1x4x4xf32>
    %20 = vector.shape_cast %19 : vector<1x4x4xf32> to vector<4x4xf32>
    %21 = arith.truncf %18 : vector<324x4xf32> to vector<324x4xbf16>
    %22 = arith.truncf %20 : vector<4x4xf32> to vector<4x4xbf16>
    %cst_14 = arith.constant dense<0.000000e+00> : vector<324x4xf32>
    %23 = tpu.matmul %21, %22, %cst_14 {dimension_numbers = #tpu.dot_dimension_numbers<[1], [0], [0], [1], [0, 0, 1, 1], [], []>} : vector<324x4xbf16>, vector<4x4xbf16>, vector<324x4xf32> -> vector<324x4xf32>
    %24 = arith.addf %16, %23 : vector<324x4xf32>
    %c0_15 = arith.constant 0 : index
    %c23 = arith.constant 23 : index
    %c0_16 = arith.constant 0 : index
    %25 = vector.load %arg1[%c0_15, %c23, %c0_16] : memref<1x372x4xf32, #tpu.memory_space<vmem>>, vector<1x324x4xf32>
    %26 = vector.shape_cast %25 : vector<1x324x4xf32> to vector<324x4xf32>
    %c3 = arith.constant 3 : index
    %c0_17 = arith.constant 0 : index
    %c0_18 = arith.constant 0 : index
    %27 = vector.load %arg2[%c3, %c0_17, %c0_18] : memref<9x4x4xf32, #tpu.memory_space<vmem>>, vector<1x4x4xf32>
    %28 = vector.shape_cast %27 : vector<1x4x4xf32> to vector<4x4xf32>
    %29 = arith.truncf %26 : vector<324x4xf32> to vector<324x4xbf16>
    %30 = arith.truncf %28 : vector<4x4xf32> to vector<4x4xbf16>
    %cst_19 = arith.constant dense<0.000000e+00> : vector<324x4xf32>
    %31 = tpu.matmul %29, %30, %cst_19 {dimension_numbers = #tpu.dot_dimension_numbers<[1], [0], [0], [1], [0, 0, 1, 1], [], []>} : vector<324x4xbf16>, vector<4x4xbf16>, vector<324x4xf32> -> vector<324x4xf32>
    %32 = arith.addf %24, %31 : vector<324x4xf32>
    %c0_20 = arith.constant 0 : index
    %c24 = arith.constant 24 : index
    %c0_21 = arith.constant 0 : index
    %33 = vector.load %arg1[%c0_20, %c24, %c0_21] : memref<1x372x4xf32, #tpu.memory_space<vmem>>, vector<1x324x4xf32>
    %34 = vector.shape_cast %33 : vector<1x324x4xf32> to vector<324x4xf32>
    %c4 = arith.constant 4 : index
    %c0_22 = arith.constant 0 : index
    %c0_23 = arith.constant 0 : index
    %35 = vector.load %arg2[%c4, %c0_22, %c0_23] : memref<9x4x4xf32, #tpu.memory_space<vmem>>, vector<1x4x4xf32>
    %36 = vector.shape_cast %35 : vector<1x4x4xf32> to vector<4x4xf32>
    %37 = arith.truncf %34 : vector<324x4xf32> to vector<324x4xbf16>
    %38 = arith.truncf %36 : vector<4x4xf32> to vector<4x4xbf16>
    %cst_24 = arith.constant dense<0.000000e+00> : vector<324x4xf32>
    %39 = tpu.matmul %37, %38, %cst_24 {dimension_numbers = #tpu.dot_dimension_numbers<[1], [0], [0], [1], [0, 0, 1, 1], [], []>} : vector<324x4xbf16>, vector<4x4xbf16>, vector<324x4xf32> -> vector<324x4xf32>
    %40 = arith.addf %32, %39 : vector<324x4xf32>
    %c0_25 = arith.constant 0 : index
    %c25 = arith.constant 25 : index
    %c0_26 = arith.constant 0 : index
    %41 = vector.load %arg1[%c0_25, %c25, %c0_26] : memref<1x372x4xf32, #tpu.memory_space<vmem>>, vector<1x324x4xf32>
    %42 = vector.shape_cast %41 : vector<1x324x4xf32> to vector<324x4xf32>
    %c5_27 = arith.constant 5 : index
    %c0_28 = arith.constant 0 : index
    %c0_29 = arith.constant 0 : index
    %43 = vector.load %arg2[%c5_27, %c0_28, %c0_29] : memref<9x4x4xf32, #tpu.memory_space<vmem>>, vector<1x4x4xf32>
    %44 = vector.shape_cast %43 : vector<1x4x4xf32> to vector<4x4xf32>
    %45 = arith.truncf %42 : vector<324x4xf32> to vector<324x4xbf16>
    %46 = arith.truncf %44 : vector<4x4xf32> to vector<4x4xbf16>
    %cst_30 = arith.constant dense<0.000000e+00> : vector<324x4xf32>
    %47 = tpu.matmul %45, %46, %cst_30 {dimension_numbers = #tpu.dot_dimension_numbers<[1], [0], [0], [1], [0, 0, 1, 1], [], []>} : vector<324x4xbf16>, vector<4x4xbf16>, vector<324x4xf32> -> vector<324x4xf32>
    %48 = arith.addf %40, %47 : vector<324x4xf32>
    %c0_31 = arith.constant 0 : index
    %c41 = arith.constant 41 : index
    %c0_32 = arith.constant 0 : index
    %49 = vector.load %arg1[%c0_31, %c41, %c0_32] : memref<1x372x4xf32, #tpu.memory_space<vmem>>, vector<1x324x4xf32>
    %50 = vector.shape_cast %49 : vector<1x324x4xf32> to vector<324x4xf32>
    %c6_33 = arith.constant 6 : index
    %c0_34 = arith.constant 0 : index
    %c0_35 = arith.constant 0 : index
    %51 = vector.load %arg2[%c6_33, %c0_34, %c0_35] : memref<9x4x4xf32, #tpu.memory_space<vmem>>, vector<1x4x4xf32>
    %52 = vector.shape_cast %51 : vector<1x4x4xf32> to vector<4x4xf32>
    %53 = arith.truncf %50 : vector<324x4xf32> to vector<324x4xbf16>
    %54 = arith.truncf %52 : vector<4x4xf32> to vector<4x4xbf16>
    %cst_36 = arith.constant dense<0.000000e+00> : vector<324x4xf32>
    %55 = tpu.matmul %53, %54, %cst_36 {dimension_numbers = #tpu.dot_dimension_numbers<[1], [0], [0], [1], [0, 0, 1, 1], [], []>} : vector<324x4xbf16>, vector<4x4xbf16>, vector<324x4xf32> -> vector<324x4xf32>
    %56 = arith.addf %48, %55 : vector<324x4xf32>
    %c0_37 = arith.constant 0 : index
    %c42 = arith.constant 42 : index
    %c0_38 = arith.constant 0 : index
    %57 = vector.load %arg1[%c0_37, %c42, %c0_38] : memref<1x372x4xf32, #tpu.memory_space<vmem>>, vector<1x324x4xf32>
    %58 = vector.shape_cast %57 : vector<1x324x4xf32> to vector<324x4xf32>
    %c7_39 = arith.constant 7 : index
    %c0_40 = arith.constant 0 : index
    %c0_41 = arith.constant 0 : index
    %59 = vector.load %arg2[%c7_39, %c0_40, %c0_41] : memref<9x4x4xf32, #tpu.memory_space<vmem>>, vector<1x4x4xf32>
    %60 = vector.shape_cast %59 : vector<1x4x4xf32> to vector<4x4xf32>
    %61 = arith.truncf %58 : vector<324x4xf32> to vector<324x4xbf16>
    %62 = arith.truncf %60 : vector<4x4xf32> to vector<4x4xbf16>
    %cst_42 = arith.constant dense<0.000000e+00> : vector<324x4xf32>
    %63 = tpu.matmul %61, %62, %cst_42 {dimension_numbers = #tpu.dot_dimension_numbers<[1], [0], [0], [1], [0, 0, 1, 1], [], []>} : vector<324x4xbf16>, vector<4x4xbf16>, vector<324x4xf32> -> vector<324x4xf32>
    %64 = arith.addf %56, %63 : vector<324x4xf32>
    %c0_43 = arith.constant 0 : index
    %c43 = arith.constant 43 : index
    %c0_44 = arith.constant 0 : index
    %65 = vector.load %arg1[%c0_43, %c43, %c0_44] : memref<1x372x4xf32, #tpu.memory_space<vmem>>, vector<1x324x4xf32>
    %66 = vector.shape_cast %65 : vector<1x324x4xf32> to vector<324x4xf32>
    %c8 = arith.constant 8 : index
    %c0_45 = arith.constant 0 : index
    %c0_46 = arith.constant 0 : index
    %67 = vector.load %arg2[%c8, %c0_45, %c0_46] : memref<9x4x4xf32, #tpu.memory_space<vmem>>, vector<1x4x4xf32>
    %68 = vector.shape_cast %67 : vector<1x4x4xf32> to vector<4x4xf32>
    %69 = arith.truncf %66 : vector<324x4xf32> to vector<324x4xbf16>
    %70 = arith.truncf %68 : vector<4x4xf32> to vector<4x4xbf16>
    %cst_47 = arith.constant dense<0.000000e+00> : vector<324x4xf32>
    %71 = tpu.matmul %69, %70, %cst_47 {dimension_numbers = #tpu.dot_dimension_numbers<[1], [0], [0], [1], [0, 0, 1, 1], [], []>} : vector<324x4xbf16>, vector<4x4xbf16>, vector<324x4xf32> -> vector<324x4xf32>
    %72 = arith.addf %64, %71 : vector<324x4xf32>
    %c0_48 = arith.constant 0 : index
    %c0_49 = arith.constant 0 : index
    %73 = vector.load %arg3[%c0_48, %c0_49] : memref<324x1xf32, #tpu.memory_space<vmem>>, vector<324x1xf32>
    %74 = vector.broadcast %73 : vector<324x1xf32> to vector<324x4xf32>
    %75 = arith.mulf %72, %74 : vector<324x4xf32>
    %cst_50 = arith.constant dense<0.000000e+00> : vector<4xf32>
    %76 = vector.multi_reduction <add>, %75, %cst_50 [0] : vector<324x4xf32> to vector<4xf32>
    %77 = vector.shape_cast %76 : vector<4xf32> to vector<1x4xf32>
    %c0_51 = arith.constant 0 : index
    %c0_52 = arith.constant 0 : index
    %c0_53 = arith.constant 0 : index
    %78 = vector.load %arg4[%c0_51, %c0_52, %c0_53] : memref<1x1x4xf32, #tpu.memory_space<vmem>>, vector<1x1x4xf32>
    %79 = vector.shape_cast %78 : vector<1x1x4xf32> to vector<1x4xf32>
    %80 = vector.shape_cast %77 : vector<1x4xf32> to vector<1x1x4xf32>
    tpu.vector_store %arg4[%c0_51, %c0_52, %c0_53], %80 {strides = array<i32>} : memref<1x1x4xf32, #tpu.memory_space<vmem>>, vector<1x1x4xf32>,
    %81 = arith.mulf %72, %72 : vector<324x4xf32>
    %82 = vector.broadcast %73 : vector<324x1xf32> to vector<324x4xf32>
    %83 = arith.mulf %81, %82 : vector<324x4xf32>
    %cst_54 = arith.constant dense<0.000000e+00> : vector<4xf32>
    %84 = vector.multi_reduction <add>, %83, %cst_54 [0] : vector<324x4xf32> to vector<4xf32>
    %85 = vector.shape_cast %84 : vector<4xf32> to vector<1x4xf32>
    %c0_55 = arith.constant 0 : index
    %c0_56 = arith.constant 0 : index
    %c0_57 = arith.constant 0 : index
    %86 = vector.load %arg5[%c0_55, %c0_56, %c0_57] : memref<1x1x4xf32, #tpu.memory_space<vmem>>, vector<1x1x4xf32>
    %87 = vector.shape_cast %86 : vector<1x1x4xf32> to vector<1x4xf32>
    %88 = vector.shape_cast %85 : vector<1x4xf32> to vector<1x1x4xf32>
    tpu.vector_store %arg5[%c0_55, %c0_56, %c0_57], %88 {strides = array<i32>} : memref<1x1x4xf32, #tpu.memory_space<vmem>>, vector<1x1x4xf32>,
    return
  }
  func.func @transform_0(%arg0: i32) -> (i32, i32, i32) {
    %c0_i32 = arith.constant 0 : i32
    %c0_i32_0 = arith.constant 0 : i32
    %c0_i32_1 = arith.constant 0 : i32
    return %arg0, %c0_i32, %c0_i32_0 : i32, i32, i32
  }
  func.func @transform_1(%arg0: i32) -> (i32, i32, i32) {
    %c0_i32 = arith.constant 0 : i32
    %c0_i32_0 = arith.constant 0 : i32
    %c0_i32_1 = arith.constant 0 : i32
    %c0_i32_2 = arith.constant 0 : i32
    return %c0_i32, %c0_i32_0, %c0_i32_1 : i32, i32, i32
  }
  func.func @transform_2(%arg0: i32) -> (i32, i32) {
    %c0_i32 = arith.constant 0 : i32
    %c0_i32_0 = arith.constant 0 : i32
    %c0_i32_1 = arith.constant 0 : i32
    return %c0_i32, %c0_i32_0 : i32, i32
  }
  func.func @transform_3(%arg0: i32) -> (i32, i32, i32) {
    %c0_i32 = arith.constant 0 : i32
    %c0_i32_0 = arith.constant 0 : i32
    %c0_i32_1 = arith.constant 0 : i32
    return %arg0, %c0_i32, %c0_i32_0 : i32, i32, i32
  }
  func.func @transform_4(%arg0: i32) -> (i32, i32, i32) {
    %c0_i32 = arith.constant 0 : i32
    %c0_i32_0 = arith.constant 0 : i32
    %c0_i32_1 = arith.constant 0 : i32
    return %arg0, %c0_i32, %c0_i32_0 : i32, i32, i32
  }
}

module attributes {stable_mosaic.version = 11 : i64} {
  func.func @_conv_bn_add_relu_kernel(%arg0: i32, %arg1: memref<1x372x4xf32, #tpu.memory_space<vmem>>, %arg2: memref<9x4x4xf32, #tpu.memory_space<vmem>>, %arg3: memref<1x4xf32, #tpu.memory_space<vmem>>, %arg4: memref<1x4xf32, #tpu.memory_space<vmem>>, %arg5: memref<1x372x4xf32, #tpu.memory_space<vmem>>, %arg6: memref<1x324x4xf32, #tpu.memory_space<vmem>>) attributes {dimension_semantics = [#tpu.dimension_semantics<parallel>], iteration_bounds = array<i64: 2>, scalar_prefetch = 0 : i64, scratch_operands = 0 : i64, tpu.core_type = #tpu.core_type<tc>, window_params = [{transform_indices = @transform_0, window_bounds = array<i64: 1, 372, 4>}, {pipeline_mode = #tpu.pipeline_mode<synchronous>, transform_indices = @transform_1, window_bounds = array<i64: 9, 4, 4>}, {pipeline_mode = #tpu.pipeline_mode<synchronous>, transform_indices = @transform_2, window_bounds = array<i64: 1, 4>}, {pipeline_mode = #tpu.pipeline_mode<synchronous>, transform_indices = @transform_3, window_bounds = array<i64: 1, 4>}, {transform_indices = @transform_4, window_bounds = array<i64: 1, 372, 4>}, {transform_indices = @transform_5, window_bounds = array<i64: 1, 324, 4>}]} {
    %cst = arith.constant 0.000000e+00 : f32
    %0 = vector.broadcast %cst : f32 to vector<324x4xf32>
    %c0 = arith.constant 0 : index
    %c5 = arith.constant 5 : index
    %c0_0 = arith.constant 0 : index
    %1 = vector.load %arg1[%c0, %c5, %c0_0] : memref<1x372x4xf32, #tpu.memory_space<vmem>>, vector<1x324x4xf32>
    %2 = vector.shape_cast %1 : vector<1x324x4xf32> to vector<324x4xf32>
    %c0_1 = arith.constant 0 : index
    %c0_2 = arith.constant 0 : index
    %c0_3 = arith.constant 0 : index
    %3 = vector.load %arg2[%c0_1, %c0_2, %c0_3] : memref<9x4x4xf32, #tpu.memory_space<vmem>>, vector<1x4x4xf32>
    %4 = vector.shape_cast %3 : vector<1x4x4xf32> to vector<4x4xf32>
    %5 = arith.truncf %2 : vector<324x4xf32> to vector<324x4xbf16>
    %6 = arith.truncf %4 : vector<4x4xf32> to vector<4x4xbf16>
    %cst_4 = arith.constant dense<0.000000e+00> : vector<324x4xf32>
    %7 = tpu.matmul %5, %6, %cst_4 {dimension_numbers = #tpu.dot_dimension_numbers<[1], [0], [0], [1], [0, 0, 1, 1], [], []>} : vector<324x4xbf16>, vector<4x4xbf16>, vector<324x4xf32> -> vector<324x4xf32>
    %8 = arith.addf %0, %7 : vector<324x4xf32>
    %c0_5 = arith.constant 0 : index
    %c6 = arith.constant 6 : index
    %c0_6 = arith.constant 0 : index
    %9 = vector.load %arg1[%c0_5, %c6, %c0_6] : memref<1x372x4xf32, #tpu.memory_space<vmem>>, vector<1x324x4xf32>
    %10 = vector.shape_cast %9 : vector<1x324x4xf32> to vector<324x4xf32>
    %c1 = arith.constant 1 : index
    %c0_7 = arith.constant 0 : index
    %c0_8 = arith.constant 0 : index
    %11 = vector.load %arg2[%c1, %c0_7, %c0_8] : memref<9x4x4xf32, #tpu.memory_space<vmem>>, vector<1x4x4xf32>
    %12 = vector.shape_cast %11 : vector<1x4x4xf32> to vector<4x4xf32>
    %13 = arith.truncf %10 : vector<324x4xf32> to vector<324x4xbf16>
    %14 = arith.truncf %12 : vector<4x4xf32> to vector<4x4xbf16>
    %cst_9 = arith.constant dense<0.000000e+00> : vector<324x4xf32>
    %15 = tpu.matmul %13, %14, %cst_9 {dimension_numbers = #tpu.dot_dimension_numbers<[1], [0], [0], [1], [0, 0, 1, 1], [], []>} : vector<324x4xbf16>, vector<4x4xbf16>, vector<324x4xf32> -> vector<324x4xf32>
    %16 = arith.addf %8, %15 : vector<324x4xf32>
    %c0_10 = arith.constant 0 : index
    %c7 = arith.constant 7 : index
    %c0_11 = arith.constant 0 : index
    %17 = vector.load %arg1[%c0_10, %c7, %c0_11] : memref<1x372x4xf32, #tpu.memory_space<vmem>>, vector<1x324x4xf32>
    %18 = vector.shape_cast %17 : vector<1x324x4xf32> to vector<324x4xf32>
    %c2 = arith.constant 2 : index
    %c0_12 = arith.constant 0 : index
    %c0_13 = arith.constant 0 : index
    %19 = vector.load %arg2[%c2, %c0_12, %c0_13] : memref<9x4x4xf32, #tpu.memory_space<vmem>>, vector<1x4x4xf32>
    %20 = vector.shape_cast %19 : vector<1x4x4xf32> to vector<4x4xf32>
    %21 = arith.truncf %18 : vector<324x4xf32> to vector<324x4xbf16>
    %22 = arith.truncf %20 : vector<4x4xf32> to vector<4x4xbf16>
    %cst_14 = arith.constant dense<0.000000e+00> : vector<324x4xf32>
    %23 = tpu.matmul %21, %22, %cst_14 {dimension_numbers = #tpu.dot_dimension_numbers<[1], [0], [0], [1], [0, 0, 1, 1], [], []>} : vector<324x4xbf16>, vector<4x4xbf16>, vector<324x4xf32> -> vector<324x4xf32>
    %24 = arith.addf %16, %23 : vector<324x4xf32>
    %c0_15 = arith.constant 0 : index
    %c23 = arith.constant 23 : index
    %c0_16 = arith.constant 0 : index
    %25 = vector.load %arg1[%c0_15, %c23, %c0_16] : memref<1x372x4xf32, #tpu.memory_space<vmem>>, vector<1x324x4xf32>
    %26 = vector.shape_cast %25 : vector<1x324x4xf32> to vector<324x4xf32>
    %c3 = arith.constant 3 : index
    %c0_17 = arith.constant 0 : index
    %c0_18 = arith.constant 0 : index
    %27 = vector.load %arg2[%c3, %c0_17, %c0_18] : memref<9x4x4xf32, #tpu.memory_space<vmem>>, vector<1x4x4xf32>
    %28 = vector.shape_cast %27 : vector<1x4x4xf32> to vector<4x4xf32>
    %29 = arith.truncf %26 : vector<324x4xf32> to vector<324x4xbf16>
    %30 = arith.truncf %28 : vector<4x4xf32> to vector<4x4xbf16>
    %cst_19 = arith.constant dense<0.000000e+00> : vector<324x4xf32>
    %31 = tpu.matmul %29, %30, %cst_19 {dimension_numbers = #tpu.dot_dimension_numbers<[1], [0], [0], [1], [0, 0, 1, 1], [], []>} : vector<324x4xbf16>, vector<4x4xbf16>, vector<324x4xf32> -> vector<324x4xf32>
    %32 = arith.addf %24, %31 : vector<324x4xf32>
    %c0_20 = arith.constant 0 : index
    %c24 = arith.constant 24 : index
    %c0_21 = arith.constant 0 : index
    %33 = vector.load %arg1[%c0_20, %c24, %c0_21] : memref<1x372x4xf32, #tpu.memory_space<vmem>>, vector<1x324x4xf32>
    %34 = vector.shape_cast %33 : vector<1x324x4xf32> to vector<324x4xf32>
    %c4 = arith.constant 4 : index
    %c0_22 = arith.constant 0 : index
    %c0_23 = arith.constant 0 : index
    %35 = vector.load %arg2[%c4, %c0_22, %c0_23] : memref<9x4x4xf32, #tpu.memory_space<vmem>>, vector<1x4x4xf32>
    %36 = vector.shape_cast %35 : vector<1x4x4xf32> to vector<4x4xf32>
    %37 = arith.truncf %34 : vector<324x4xf32> to vector<324x4xbf16>
    %38 = arith.truncf %36 : vector<4x4xf32> to vector<4x4xbf16>
    %cst_24 = arith.constant dense<0.000000e+00> : vector<324x4xf32>
    %39 = tpu.matmul %37, %38, %cst_24 {dimension_numbers = #tpu.dot_dimension_numbers<[1], [0], [0], [1], [0, 0, 1, 1], [], []>} : vector<324x4xbf16>, vector<4x4xbf16>, vector<324x4xf32> -> vector<324x4xf32>
    %40 = arith.addf %32, %39 : vector<324x4xf32>
    %c0_25 = arith.constant 0 : index
    %c25 = arith.constant 25 : index
    %c0_26 = arith.constant 0 : index
    %41 = vector.load %arg1[%c0_25, %c25, %c0_26] : memref<1x372x4xf32, #tpu.memory_space<vmem>>, vector<1x324x4xf32>
    %42 = vector.shape_cast %41 : vector<1x324x4xf32> to vector<324x4xf32>
    %c5_27 = arith.constant 5 : index
    %c0_28 = arith.constant 0 : index
    %c0_29 = arith.constant 0 : index
    %43 = vector.load %arg2[%c5_27, %c0_28, %c0_29] : memref<9x4x4xf32, #tpu.memory_space<vmem>>, vector<1x4x4xf32>
    %44 = vector.shape_cast %43 : vector<1x4x4xf32> to vector<4x4xf32>
    %45 = arith.truncf %42 : vector<324x4xf32> to vector<324x4xbf16>
    %46 = arith.truncf %44 : vector<4x4xf32> to vector<4x4xbf16>
    %cst_30 = arith.constant dense<0.000000e+00> : vector<324x4xf32>
    %47 = tpu.matmul %45, %46, %cst_30 {dimension_numbers = #tpu.dot_dimension_numbers<[1], [0], [0], [1], [0, 0, 1, 1], [], []>} : vector<324x4xbf16>, vector<4x4xbf16>, vector<324x4xf32> -> vector<324x4xf32>
    %48 = arith.addf %40, %47 : vector<324x4xf32>
    %c0_31 = arith.constant 0 : index
    %c41 = arith.constant 41 : index
    %c0_32 = arith.constant 0 : index
    %49 = vector.load %arg1[%c0_31, %c41, %c0_32] : memref<1x372x4xf32, #tpu.memory_space<vmem>>, vector<1x324x4xf32>
    %50 = vector.shape_cast %49 : vector<1x324x4xf32> to vector<324x4xf32>
    %c6_33 = arith.constant 6 : index
    %c0_34 = arith.constant 0 : index
    %c0_35 = arith.constant 0 : index
    %51 = vector.load %arg2[%c6_33, %c0_34, %c0_35] : memref<9x4x4xf32, #tpu.memory_space<vmem>>, vector<1x4x4xf32>
    %52 = vector.shape_cast %51 : vector<1x4x4xf32> to vector<4x4xf32>
    %53 = arith.truncf %50 : vector<324x4xf32> to vector<324x4xbf16>
    %54 = arith.truncf %52 : vector<4x4xf32> to vector<4x4xbf16>
    %cst_36 = arith.constant dense<0.000000e+00> : vector<324x4xf32>
    %55 = tpu.matmul %53, %54, %cst_36 {dimension_numbers = #tpu.dot_dimension_numbers<[1], [0], [0], [1], [0, 0, 1, 1], [], []>} : vector<324x4xbf16>, vector<4x4xbf16>, vector<324x4xf32> -> vector<324x4xf32>
    %56 = arith.addf %48, %55 : vector<324x4xf32>
    %c0_37 = arith.constant 0 : index
    %c42 = arith.constant 42 : index
    %c0_38 = arith.constant 0 : index
    %57 = vector.load %arg1[%c0_37, %c42, %c0_38] : memref<1x372x4xf32, #tpu.memory_space<vmem>>, vector<1x324x4xf32>
    %58 = vector.shape_cast %57 : vector<1x324x4xf32> to vector<324x4xf32>
    %c7_39 = arith.constant 7 : index
    %c0_40 = arith.constant 0 : index
    %c0_41 = arith.constant 0 : index
    %59 = vector.load %arg2[%c7_39, %c0_40, %c0_41] : memref<9x4x4xf32, #tpu.memory_space<vmem>>, vector<1x4x4xf32>
    %60 = vector.shape_cast %59 : vector<1x4x4xf32> to vector<4x4xf32>
    %61 = arith.truncf %58 : vector<324x4xf32> to vector<324x4xbf16>
    %62 = arith.truncf %60 : vector<4x4xf32> to vector<4x4xbf16>
    %cst_42 = arith.constant dense<0.000000e+00> : vector<324x4xf32>
    %63 = tpu.matmul %61, %62, %cst_42 {dimension_numbers = #tpu.dot_dimension_numbers<[1], [0], [0], [1], [0, 0, 1, 1], [], []>} : vector<324x4xbf16>, vector<4x4xbf16>, vector<324x4xf32> -> vector<324x4xf32>
    %64 = arith.addf %56, %63 : vector<324x4xf32>
    %c0_43 = arith.constant 0 : index
    %c43 = arith.constant 43 : index
    %c0_44 = arith.constant 0 : index
    %65 = vector.load %arg1[%c0_43, %c43, %c0_44] : memref<1x372x4xf32, #tpu.memory_space<vmem>>, vector<1x324x4xf32>
    %66 = vector.shape_cast %65 : vector<1x324x4xf32> to vector<324x4xf32>
    %c8 = arith.constant 8 : index
    %c0_45 = arith.constant 0 : index
    %c0_46 = arith.constant 0 : index
    %67 = vector.load %arg2[%c8, %c0_45, %c0_46] : memref<9x4x4xf32, #tpu.memory_space<vmem>>, vector<1x4x4xf32>
    %68 = vector.shape_cast %67 : vector<1x4x4xf32> to vector<4x4xf32>
    %69 = arith.truncf %66 : vector<324x4xf32> to vector<324x4xbf16>
    %70 = arith.truncf %68 : vector<4x4xf32> to vector<4x4xbf16>
    %cst_47 = arith.constant dense<0.000000e+00> : vector<324x4xf32>
    %71 = tpu.matmul %69, %70, %cst_47 {dimension_numbers = #tpu.dot_dimension_numbers<[1], [0], [0], [1], [0, 0, 1, 1], [], []>} : vector<324x4xbf16>, vector<4x4xbf16>, vector<324x4xf32> -> vector<324x4xf32>
    %72 = arith.addf %64, %71 : vector<324x4xf32>
    %c0_48 = arith.constant 0 : index
    %c24_49 = arith.constant 24 : index
    %c0_50 = arith.constant 0 : index
    %73 = vector.load %arg5[%c0_48, %c24_49, %c0_50] : memref<1x372x4xf32, #tpu.memory_space<vmem>>, vector<1x324x4xf32>
    %74 = vector.shape_cast %73 : vector<1x324x4xf32> to vector<324x4xf32>
    %c0_51 = arith.constant 0 : index
    %c0_52 = arith.constant 0 : index
    %75 = vector.load %arg3[%c0_51, %c0_52] : memref<1x4xf32, #tpu.memory_space<vmem>>, vector<1x4xf32>
    %76 = vector.broadcast %75 : vector<1x4xf32> to vector<324x4xf32>
    %77 = arith.mulf %72, %76 : vector<324x4xf32>
    %c0_53 = arith.constant 0 : index
    %c0_54 = arith.constant 0 : index
    %78 = vector.load %arg4[%c0_53, %c0_54] : memref<1x4xf32, #tpu.memory_space<vmem>>, vector<1x4xf32>
    %79 = vector.broadcast %78 : vector<1x4xf32> to vector<324x4xf32>
    %80 = arith.addf %77, %79 : vector<324x4xf32>
    %81 = arith.addf %80, %74 : vector<324x4xf32>
    %cst_55 = arith.constant 0.000000e+00 : f32
    %82 = vector.broadcast %cst_55 : f32 to vector<324x4xf32>
    %83 = arith.maximumf %81, %82 : vector<324x4xf32>
    %c0_56 = arith.constant 0 : index
    %c0_57 = arith.constant 0 : index
    %c0_58 = arith.constant 0 : index
    %84 = vector.load %arg6[%c0_56, %c0_57, %c0_58] : memref<1x324x4xf32, #tpu.memory_space<vmem>>, vector<1x324x4xf32>
    %85 = vector.shape_cast %84 : vector<1x324x4xf32> to vector<324x4xf32>
    %86 = vector.shape_cast %83 : vector<324x4xf32> to vector<1x324x4xf32>
    tpu.vector_store %arg6[%c0_56, %c0_57, %c0_58], %86 {strides = array<i32>} : memref<1x324x4xf32, #tpu.memory_space<vmem>>, vector<1x324x4xf32>,
    return
  }
  func.func @transform_0(%arg0: i32) -> (i32, i32, i32) {
    %c0_i32 = arith.constant 0 : i32
    %c0_i32_0 = arith.constant 0 : i32
    %c0_i32_1 = arith.constant 0 : i32
    return %arg0, %c0_i32, %c0_i32_0 : i32, i32, i32
  }
  func.func @transform_1(%arg0: i32) -> (i32, i32, i32) {
    %c0_i32 = arith.constant 0 : i32
    %c0_i32_0 = arith.constant 0 : i32
    %c0_i32_1 = arith.constant 0 : i32
    %c0_i32_2 = arith.constant 0 : i32
    return %c0_i32, %c0_i32_0, %c0_i32_1 : i32, i32, i32
  }
  func.func @transform_2(%arg0: i32) -> (i32, i32) {
    %c0_i32 = arith.constant 0 : i32
    %c0_i32_0 = arith.constant 0 : i32
    %c0_i32_1 = arith.constant 0 : i32
    return %c0_i32, %c0_i32_0 : i32, i32
  }
  func.func @transform_3(%arg0: i32) -> (i32, i32) {
    %c0_i32 = arith.constant 0 : i32
    %c0_i32_0 = arith.constant 0 : i32
    %c0_i32_1 = arith.constant 0 : i32
    return %c0_i32, %c0_i32_0 : i32, i32
  }
  func.func @transform_4(%arg0: i32) -> (i32, i32, i32) {
    %c0_i32 = arith.constant 0 : i32
    %c0_i32_0 = arith.constant 0 : i32
    %c0_i32_1 = arith.constant 0 : i32
    return %arg0, %c0_i32, %c0_i32_0 : i32, i32, i32
  }
  func.func @transform_5(%arg0: i32) -> (i32, i32, i32) {
    %c0_i32 = arith.constant 0 : i32
    %c0_i32_0 = arith.constant 0 : i32
    %c0_i32_1 = arith.constant 0 : i32
    return %arg0, %c0_i32, %c0_i32_0 : i32, i32, i32
  }
}

</mosaic_0001>

<bundles_post_ra>
// kernel: residual_block_forward.4
= control target key start
LH: loop header
LB: loop body
LE: loop exit
PB: predicated region body
PF: predicated region fallthrough
CT: control target
= control target key end

     0   :  { %s5319_s15 = smov 0   ;;  %s7023_s0 = inlined_call_operand.vmem [shape: f32[2,372,4], index: 0, kind: input, shape index: {}]   ;;  %s7024_s1 = inlined_call_operand.vmem [shape: f32[9,4,4], index: 1, kind: input, shape index: {}]   ;;  %s7025_s2 = inlined_call_operand.vmem [shape: f32[324,1], index: 2, kind: input, shape index: {}]   ;;  %s7026_s3 = inlined_call_operand.vmem [shape: f32[2,1,4], index: 3, kind: output, shape index: {0}]   ;;  %s7027_s4 = inlined_call_operand.vmem [shape: f32[2,1,4], index: 4, kind: output, shape index: {1}]  }
   0x1 LB: > { %s4090_s16 = sadd.s32 4294967295, %s5289_s15   ;;  %p4094_p0 = scmp.ge.s32.totalorder %s5289_s15, 1  ;;  %s5289_s15 = sphi %s5319_s15, %s15_s15  }
   0x2   : > { %p165_p1 = scmp.lt.s32.totalorder %s5289_s15, 3 }
   0x4   : > { %p166_p2 = pnand %p4094_p0, %p165_p1 }
   0x6   : > { %169 = sbr.rel (%p166_p2) target bundleno = 987 (0x3db), region = 32 }
   0xb   : > { %v4096_v0 = vld [vmem:[%s7024_s1 + $0x4] sm:$0xf]  ;;  %vm397_vm0 = vcmask 1041408   ;;  %p192_p3 = scmp.lt.s32.totalorder %s4090_s16, 1  ;;  %v5291_v1 = vmov 0.0   ;;  %vm5292_vm1 = vmmov 0  }
   0xc   : > { %4493 = vmatprep.subr.bf16.mxu0 %v5291_v1  ;;  %5267 = vmatprep.subr.bf16.mxu1 %v5291_v1  ;;  %v332_v2 = vpack.c.bf16 %v4096_v0, %v4096_v0  ;;  %v4139_v3 = vld [vmem:[%s7024_s1 + $0x8] sm:$0xf]  ;;  %v245_v4 = vld [vmem:[%s7024_s1] sm:$0xf]  ;;  %vm333_vm2 = vcmask 31744   ;;  %vm3837_vm3 = vcmask 27648  }
   0xd   : > { %4495 = vmatprep.mubr.msk.bf16.mxu0 %vm5292_vm1, %v5291_v1  ;;  %4539 = vmatprep.mubr.msk.bf16.mxu1 %vm5292_vm1, %v5291_v1  ;;  %s7045_s16 = smov (!%p192_p3, %s4090_s16), 1  ;;  %v931_v6 = vpack.c.bf16 %v4139_v3, %v4139_v3  ;;  %v267_v7 = vpack.c.bf16 %v245_v4, %v245_v4  ;;  %vm3846_vm4 = vcmask 24576  }
   0xe   : > { %v399_v5 = vsel %vm397_vm0, %v332_v2, 0  ;;  %s5269_s23 = smul.u32 376, %s7045_s16  ;;  %s199_s30 = scalar_lea.vmem %s7026_s3, %s7045_s16 }
   0xf   : > { %4494 = vmatpush3.bf16.msra.mxu0 %v399_v5  ;;  %5268 = vmatpush3.bf16.msra.mxu1 %v399_v5  ;;  %v996_v13 = vsel %vm397_vm0, %v931_v6, 0  ;;  %v665_v15 = vsel %vm397_vm0, %v267_v7, 0  ;;  %v4161_v6 = vld [vmem:[%s7024_s1 + $0xc] sm:$0xf]  ;;  %s202_s7 = scalar_lea.vmem %s7027_s4, %s7045_s16 }
  0x10   : > { %4665 = vmatprep.subr.bf16.mxu0 %v5291_v1  ;;  %4579 = vmatprep.subr.bf16.mxu1 %v5291_v1  ;;  %s5351_s26 = scalar_lea.vmem %s7023_s0, %s5269_s23 }
  0x11   : > { %v268_v8 = vld [vmem:[%s5351_s26 + $0x6] sm:$0xff]  ;;  %v269_v9 = vld [vmem:[%s5351_s26 + $0xe] sm:$0xff]  ;;  %v290_v10 = vld [vmem:[%s5351_s26 + $0xb6] sm:$0xff] }
  0x12   : > { %v311_v11 = vpack.c.bf16 %v269_v9, %v268_v8  ;;  %v291_v12 = vld [vmem:[%s5351_s26 + $0xbe] sm:$0xff]  ;;  %v270_v16 = vld [vmem:[%s5351_s26 + $0x16] sm:$0xff]  ;;  %v292_v18 = vld [vmem:[%s5351_s26 + $0xc6] sm:$0xff] }
  0x13   : > { %v322_v14 = vpack.c.bf16 %v291_v12, %v290_v10  ;;  %v271_v17 = vld [vmem:[%s5351_s26 + $0x1e] sm:$0xff]  ;;  %v293_v19 = vld [vmem:[%s5351_s26 + $0xce] sm:$0xff]  ;;  %v272_v22 = vld [vmem:[%s5351_s26 + $0x26] sm:$0xff] }
  0x14   : > { %4496 = vmatmul.mubr.msk.bf16.vlgmr.msra.gmra.mxu0 %vm333_vm2, %v311_v11  ;;  %v312_v20 = vpack.c.bf16 %v271_v17, %v270_v16  ;;  %v323_v21 = vpack.c.bf16 %v293_v19, %v292_v18  ;;  %v273_v23 = vld [vmem:[%s5351_s26 + $0x2e] sm:$0xff]  ;;  %v294_v24 = vld [vmem:[%s5351_s26 + $0xd6] sm:$0xff]  ;;  %v295_v25 = vld [vmem:[%s5351_s26 + $0xde] sm:$0xff]  ;;  %v1303_v11 = vpack.c.bf16 %v4161_v6, %v4161_v6 }
  0x15   : > { %4540 = vmatmul.mubr.msk.bf16.vlgmr.msra.gmra.mxu1 %vm333_vm2, %v322_v14  ;;  %4666 = vmatpush3.bf16.msra.mxu0 %v996_v13  ;;  %v313_v26 = vpack.c.bf16 %v273_v23, %v272_v22  ;;  %v324_v27 = vpack.c.bf16 %v295_v25, %v294_v24  ;;  %v274_v28 = vld [vmem:[%s5351_s26 + $0x36] sm:$0xff]  ;;  %v275_v29 = vld [vmem:[%s5351_s26 + $0x3e] sm:$0xff]  ;;  %v296_v30 = vld [vmem:[%s5351_s26 + $0xe6] sm:$0xff] }
  0x16   : > { %4580 = vmatpush3.bf16.msra.mxu1 %v665_v15  ;;  %4499 = vmatprep.mubr.msk.bf16.mxu0 %vm5292_vm1, %v5291_v1  ;;  %v297_v31 = vld [vmem:[%s5351_s26 + $0xee] sm:$0xff]  ;;  %v314_v32 = vpack.c.bf16 %v275_v29, %v274_v28  ;;  %v276_v34 = vld [vmem:[%s5351_s26 + $0x46] sm:$0xff]  ;;  %v298_v36 = vld [vmem:[%s5351_s26 + $0xf6] sm:$0xff]  ;;  %v1368_v14 = vsel %vm397_vm0, %v1303_v11, 0 }
  0x17   : > { %4543 = vmatprep.mubr.msk.bf16.mxu1 %vm5292_vm1, %v5291_v1  ;;  %4751 = vmatprep.subr.bf16.mxu1 %v5291_v1  ;;  %v325_v33 = vpack.c.bf16 %v297_v31, %v296_v30  ;;  %v277_v35 = vld [vmem:[%s5351_s26 + $0x4e] sm:$0xff]  ;;  %v299_v37 = vld [vmem:[%s5351_s26 + $0xfe] sm:$0xff]  ;;  %v278_v40 = vld [vmem:[%s5351_s26 + $0x56] sm:$0xff] }
  0x18   : > { %4837 = vmatprep.subr.bf16.mxu0 %v5291_v1  ;;  %v315_v38 = vpack.c.bf16 %v277_v35, %v276_v34  ;;  %v326_v39 = vpack.c.bf16 %v299_v37, %v298_v36  ;;  %v279_v41 = vld [vmem:[%s5351_s26 + $0x5e] sm:$0xff]  ;;  %v300_v42 = vld [vmem:[%s5351_s26 + $0x106] sm:$0xff]  ;;  %v301_v43 = vld [vmem:[%s5351_s26 + $0x10e] sm:$0xff] }
  0x19   : > { %v316_v44 = vpack.c.bf16 %v279_v41, %v278_v40  ;;  %v327_v45 = vpack.c.bf16 %v301_v43, %v300_v42  ;;  %v280_v46 = vld [vmem:[%s5351_s26 + $0x66] sm:$0xff]  ;;  %v281_v47 = vld [vmem:[%s5351_s26 + $0x6e] sm:$0xff]  ;;  %v302_v48 = vld [vmem:[%s5351_s26 + $0x116] sm:$0xff] }
  0x1a   : > { %v303_v49 = vld [vmem:[%s5351_s26 + $0x11e] sm:$0xff]  ;;  %v317_v50 = vpack.c.bf16 %v281_v47, %v280_v46  ;;  %v282_v52 = vld [vmem:[%s5351_s26 + $0x76] sm:$0xff]  ;;  %v304_v54 = vld [vmem:[%s5351_s26 + $0x126] sm:$0xff] }
  0x1b   : > { %v328_v51 = vpack.c.bf16 %v303_v49, %v302_v48  ;;  %v283_v53 = vld [vmem:[%s5351_s26 + $0x7e] sm:$0xff]  ;;  %v305_v55 = vld [vmem:[%s5351_s26 + $0x12e] sm:$0xff]  ;;  %v284_v58 = vld [vmem:[%s5351_s26 + $0x86] sm:$0xff] }
  0x1c   : > { %4500 = vmatmul.mubr.msk.bf16.gmra.mxu0 %vm333_vm2, %v312_v20  ;;  %v318_v56 = vpack.c.bf16 %v283_v53, %v282_v52  ;;  %v329_v57 = vpack.c.bf16 %v305_v55, %v304_v54  ;;  %v285_v59 = vld [vmem:[%s5351_s26 + $0x8e] sm:$0xff]  ;;  %v306_v60 = vld [vmem:[%s5351_s26 + $0x136] sm:$0xff]  ;;  %v307_v61 = vld [vmem:[%s5351_s26 + $0x13e] sm:$0xff] }
  0x1d   : > { %4544 = vmatmul.mubr.msk.bf16.gmra.mxu1 %vm333_vm2, %v323_v21  ;;  %4503 = vmatprep.mubr.msk.bf16.mxu0 %vm5292_vm1, %v5291_v1  ;;  %v319_v62 = vpack.c.bf16 %v285_v59, %v284_v58  ;;  %v330_v63 = vpack.c.bf16 %v307_v61, %v306_v60  ;;  %v286_v0 = vld [vmem:[%s5351_s26 + $0x96] sm:$0xff]  ;;  %v287_v2 = vld [vmem:[%s5351_s26 + $0x9e] sm:$0xff]  ;;  %v308_v3 = vld [vmem:[%s5351_s26 + $0x146] sm:$0xf] }
  0x1e   : > { %4547 = vmatprep.mubr.msk.bf16.mxu1 %vm5292_vm1, %v5291_v1  ;;  %v320_v4 = vpack.c.bf16 %v287_v2, %v286_v0  ;;  %v331_v5 = vpack.c.bf16 %v308_v3, %v308_v3  ;;  %v288_v7 = vld [vmem:[%s5351_s26 + $0xa6] sm:$0xff]  ;;  %v289_v8 = vld [vmem:[%s5351_s26 + $0xae] sm:$0xff]  ;;  %v207_v19 = vld [vmem:[%s5351_s26 + $0x1d] sm:$0xff] }
  0x1f   : > { %v204_v9 = vld [vmem:[%s5351_s26 + $0x5] sm:$0xff]  ;;  %v205_v10 = vld [vmem:[%s5351_s26 + $0xd] sm:$0xff]  ;;  %v321_v12 = vpack.c.bf16 %v289_v8, %v288_v7  ;;  %v206_v18 = vld [vmem:[%s5351_s26 + $0x15] sm:$0xff] }
  0x20   : > { %v246_v13 = vpack.c.bf16 %v205_v10, %v204_v9  ;;  %v4183_v15 = vld [vmem:[%s7024_s1 + $0x10] sm:$0xf]  ;;  %v867_v16 = vld [vmem:[%s5351_s26 + $0x7] sm:$0xff]  ;;  %v247_v22 = vpack.c.bf16 %v207_v19, %v206_v18  ;;  %v869_v24 = vld [vmem:[%s5351_s26 + $0x17] sm:$0xff] }
  0x21   : > { %v868_v17 = vld [vmem:[%s5351_s26 + $0xf] sm:$0xff]  ;;  %v1675_v20 = vpack.c.bf16 %v4183_v15, %v4183_v15  ;;  %v870_v25 = vld [vmem:[%s5351_s26 + $0x1f] sm:$0xff]  ;;  %v871_v30 = vld [vmem:[%s5351_s26 + $0x27] sm:$0xff] }
  0x22   : > { %v910_v21 = vpack.c.bf16 %v868_v17, %v867_v16  ;;  %v5490_v28 = vpack.c.bf16 %v870_v25, %v869_v24  ;;  %v872_v31 = vld [vmem:[%s5351_s26 + $0x2f] sm:$0xff]  ;;  %v873_v36 = vld [vmem:[%s5351_s26 + $0x37] sm:$0xff]  ;;  %v874_v37 = vld [vmem:[%s5351_s26 + $0x3f] sm:$0xff] }
  0x23   : > { %v1740_v23 = vsel %vm397_vm0, %v1675_v20, 0  ;;  %v5503_v34 = vpack.c.bf16 %v872_v31, %v871_v30  ;;  %v5516_v40 = vpack.c.bf16 %v874_v37, %v873_v36  ;;  %v875_v42 = vld [vmem:[%s5351_s26 + $0x47] sm:$0xff]  ;;  %v876_v43 = vld [vmem:[%s5351_s26 + $0x4f] sm:$0xff]  ;;  %v877_v48 = vld [vmem:[%s5351_s26 + $0x57] sm:$0xff] }
  0x24   : > { %4504 = vmatmul.mubr.msk.bf16.gmra.mxu0 %vm333_vm2, %v313_v26  ;;  %v208_v26 = vld [vmem:[%s5351_s26 + $0x25] sm:$0xff]  ;;  %v5529_v46 = vpack.c.bf16 %v876_v43, %v875_v42  ;;  %v880_v55 = vld [vmem:[%s5351_s26 + $0x6f] sm:$0xff]  ;;  %v881_v60 = vld [vmem:[%s5351_s26 + $0x77] sm:$0xff] }
  0x25   : > { %4548 = vmatmul.mubr.msk.bf16.gmra.mxu1 %vm333_vm2, %v324_v27  ;;  %4507 = vmatprep.mubr.msk.bf16.mxu0 %vm5292_vm1, %v5291_v1  ;;  %v209_v27 = vld [vmem:[%s5351_s26 + $0x2d] sm:$0xff]  ;;  %v878_v49 = vld [vmem:[%s5351_s26 + $0x5f] sm:$0xff]  ;;  %v885_v9 = vld [vmem:[%s5351_s26 + $0x97] sm:$0xff] }
  0x26   : > { %4551 = vmatprep.mubr.msk.bf16.mxu1 %vm5292_vm1, %v5291_v1  ;;  %v248_v29 = vpack.c.bf16 %v209_v27, %v208_v26  ;;  %v5542_v52 = vpack.c.bf16 %v878_v49, %v877_v48  ;;  %v879_v54 = vld [vmem:[%s5351_s26 + $0x67] sm:$0xff]  ;;  %v882_v61 = vld [vmem:[%s5351_s26 + $0x7f] sm:$0xff]  ;;  %v888_v16 = vld [vmem:[%s5351_s26 + $0xaf] sm:$0xff] }
  0x27   : > { %v5555_v58 = vpack.c.bf16 %v880_v55, %v879_v54  ;;  %v5568_v0 = vpack.c.bf16 %v882_v61, %v881_v60  ;;  %v883_v3 = vld [vmem:[%s5351_s26 + $0x87] sm:$0xff]  ;;  %v223_v6 = vld [vmem:[%s5351_s26 + $0x9d] sm:$0xff]  ;;  %v226_v17 = vld [vmem:[%s5351_s26 + $0xb5] sm:$0xff] }
  0x28   : > { %v886_v10 = vld [vmem:[%s5351_s26 + $0x9f] sm:$0xff]  ;;  %v887_v15 = vld [vmem:[%s5351_s26 + $0xa7] sm:$0xff]  ;;  %v230_v30 = vld [vmem:[%s5351_s26 + $0xd5] sm:$0xff] }
  0x29   : > { %v224_v11 = vld [vmem:[%s5351_s26 + $0xa5] sm:$0xff]  ;;  %v227_v18 = vld [vmem:[%s5351_s26 + $0xbd] sm:$0xff]  ;;  %v5607_v19 = vpack.c.bf16 %v888_v16, %v887_v15  ;;  %v229_v24 = vld [vmem:[%s5351_s26 + $0xcd] sm:$0xff] }
  0x2a   : > { %v257_v20 = vpack.c.bf16 %v227_v18, %v226_v17  ;;  %v891_v27 = vld [vmem:[%s5351_s26 + $0xc7] sm:$0xff]  ;;  %v231_v31 = vld [vmem:[%s5351_s26 + $0xdd] sm:$0xff]  ;;  %v234_v48 = vld [vmem:[%s5351_s26 + $0xf5] sm:$0xff] }
  0x2b   : > { %v894_v36 = vld [vmem:[%s5351_s26 + $0xdf] sm:$0xff]  ;;  %v897_v61 = vld [vmem:[%s5351_s26 + $0xf7] sm:$0xff]  ;;  %v899_v15 = vld [vmem:[%s5351_s26 + $0x107] sm:$0xff] }
  0x2c   : > { %4508 = vmatmul.mubr.msk.bf16.gmra.mxu0 %vm333_vm2, %v314_v32  ;;  %v210_v32 = vld [vmem:[%s5351_s26 + $0x35] sm:$0xff]  ;;  %v232_v37 = vld [vmem:[%s5351_s26 + $0xe5] sm:$0xff]  ;;  %v235_v49 = vld [vmem:[%s5351_s26 + $0xfd] sm:$0xff] }
  0x2d   : > { %4552 = vmatmul.mubr.msk.bf16.gmra.mxu1 %vm333_vm2, %v325_v33  ;;  %4511 = vmatprep.mubr.msk.bf16.mxu0 %vm5292_vm1, %v5291_v1  ;;  %v211_v33 = vld [vmem:[%s5351_s26 + $0x3d] sm:$0xff]  ;;  %v261_v55 = vpack.c.bf16 %v235_v49, %v234_v48  ;;  %v900_v16 = vld [vmem:[%s5351_s26 + $0x10f] sm:$0xff] }
  0x2e   : > { %4555 = vmatprep.mubr.msk.bf16.mxu1 %vm5292_vm1, %v5291_v1  ;;  %v249_v35 = vpack.c.bf16 %v211_v33, %v210_v32  ;;  %v259_v33 = vpack.c.bf16 %v231_v31, %v230_v30  ;;  %v238_v18 = vld [vmem:[%s5351_s26 + $0x115] sm:$0xff] }
  0x34   : > { %4512 = vmatmul.mubr.msk.bf16.gmra.mxu0 %vm333_vm2, %v315_v38  ;;  %v212_v38 = vld [vmem:[%s5351_s26 + $0x45] sm:$0xff] }
  0x35   : > { %4556 = vmatmul.mubr.msk.bf16.gmra.mxu1 %vm333_vm2, %v326_v39  ;;  %4515 = vmatprep.mubr.msk.bf16.mxu0 %vm5292_vm1, %v5291_v1  ;;  %v213_v39 = vld [vmem:[%s5351_s26 + $0x4d] sm:$0xff] }
  0x36   : > { %4559 = vmatprep.mubr.msk.bf16.mxu1 %vm5292_vm1, %v5291_v1  ;;  %v250_v41 = vpack.c.bf16 %v213_v39, %v212_v38  ;;  %v233_v38 = vld [vmem:[%s5351_s26 + $0xed] sm:$0xff] }
  0x3c   : > { %4516 = vmatmul.mubr.msk.bf16.gmra.mxu0 %vm333_vm2, %v316_v44  ;;  %v214_v44 = vld [vmem:[%s5351_s26 + $0x55] sm:$0xff] }
  0x3d   : > { %4560 = vmatmul.mubr.msk.bf16.gmra.mxu1 %vm333_vm2, %v327_v45  ;;  %4519 = vmatprep.mubr.msk.bf16.mxu0 %vm5292_vm1, %v5291_v1  ;;  %v215_v45 = vld [vmem:[%s5351_s26 + $0x5d] sm:$0xff] }
  0x3e   : > { %4563 = vmatprep.mubr.msk.bf16.mxu1 %vm5292_vm1, %v5291_v1  ;;  %v251_v47 = vpack.c.bf16 %v215_v45, %v214_v44  ;;  %v895_v44 = vld [vmem:[%s5351_s26 + $0xe7] sm:$0xff]  ;;  %v896_v45 = vld [vmem:[%s5351_s26 + $0xef] sm:$0xff] }
  0x44   : > { %4520 = vmatmul.mubr.msk.bf16.gmra.mxu0 %vm333_vm2, %v317_v50  ;;  %v216_v50 = vld [vmem:[%s5351_s26 + $0x65] sm:$0xff] }
  0x45   : > { %4564 = vmatmul.mubr.msk.bf16.gmra.mxu1 %vm333_vm2, %v328_v51  ;;  %4523 = vmatprep.mubr.msk.bf16.mxu0 %vm5292_vm1, %v5291_v1  ;;  %v217_v51 = vld [vmem:[%s5351_s26 + $0x6d] sm:$0xff] }
  0x46   : > { %4567 = vmatprep.mubr.msk.bf16.mxu1 %vm5292_vm1, %v5291_v1  ;;  %v252_v53 = vpack.c.bf16 %v217_v51, %v216_v50 }
  0x4c   : > { %4524 = vmatmul.mubr.msk.bf16.gmra.mxu0 %vm333_vm2, %v318_v56  ;;  %v218_v56 = vld [vmem:[%s5351_s26 + $0x75] sm:$0xff] }
  0x4d   : > { %4568 = vmatmul.mubr.msk.bf16.gmra.mxu1 %vm333_vm2, %v329_v57  ;;  %4527 = vmatprep.mubr.msk.bf16.mxu0 %vm5292_vm1, %v5291_v1  ;;  %v219_v57 = vld [vmem:[%s5351_s26 + $0x7d] sm:$0xff] }
  0x4e   : > { %4571 = vmatprep.mubr.msk.bf16.mxu1 %vm5292_vm1, %v5291_v1  ;;  %v253_v59 = vpack.c.bf16 %v219_v57, %v218_v56 }
  0x54   : > { %4528 = vmatmul.mubr.msk.bf16.gmra.mxu0 %vm333_vm2, %v319_v62  ;;  %v220_v62 = vld [vmem:[%s5351_s26 + $0x85] sm:$0xff] }
  0x55   : > { %4572 = vmatmul.mubr.msk.bf16.gmra.mxu1 %vm333_vm2, %v330_v63  ;;  %4531 = vmatprep.mubr.msk.bf16.mxu0 %vm5292_vm1, %v5291_v1  ;;  %v221_v63 = vld [vmem:[%s5351_s26 + $0x8d] sm:$0xff] }
  0x56   : > { %4575 = vmatprep.mubr.msk.bf16.mxu1 %vm5292_vm1, %v5291_v1  ;;  %v254_v2 = vpack.c.bf16 %v221_v63, %v220_v62  ;;  %v898_v62 = vld [vmem:[%s5351_s26 + $0xff] sm:$0xff] }
  0x5c   : > { %4532 = vmatmul.mubr.msk.bf16.gmra.mxu0 %vm333_vm2, %v320_v4  ;;  %v884_v4 = vld [vmem:[%s5351_s26 + $0x8f] sm:$0xff] }
  0x5d   : > { %4576 = vmatmul.mubr.msk.bf16.gmra.mxu1 %vm333_vm2, %v331_v5  ;;  %4535 = vmatprep.mubr.msk.bf16.mxu0 %vm5292_vm1, %v5291_v1  ;;  %v222_v5 = vld [vmem:[%s5351_s26 + $0x95] sm:$0xff]  ;;  %v5581_v7 = vpack.c.bf16 %v884_v4, %v883_v3  ;;  %v237_v3 = vld [vmem:[%s5351_s26 + $0x10d] sm:$0xff] }
  0x5e   : > { %4581 = vmatprep.mubr.msk.bf16.mxu1 %vm5292_vm1, %v5291_v1  ;;  %v255_v8 = vpack.c.bf16 %v223_v6, %v222_v5  ;;  %v5686_v6 = vpack.c.bf16 %v898_v62, %v897_v61  ;;  %v904_v61 = vld [vmem:[%s5351_s26 + $0x12f] sm:$0xff] }
  0x64   : > { %4536 = vmatmul.mubr.msk.bf16.gmra.mxu0 %vm333_vm2, %v321_v12  ;;  %v225_v12 = vld [vmem:[%s5351_s26 + $0xad] sm:$0xff] }
  0x65   : > { %4582 = vmatmul.mubr.msk.bf16.vlgmr.msra.gmra.mxu1 %vm333_vm2, %v246_v13  ;;  %4667 = vmatprep.mubr.msk.bf16.mxu0 %vm5292_vm1, %v5291_v1  ;;  %v5594_v13 = vpack.c.bf16 %v886_v10, %v885_v9 }
  0x66   : > { %4752 = vmatpush3.bf16.msra.mxu1 %v1368_v14  ;;  %4585 = vmatprep.mubr.msk.bf16.mxu1 %vm5292_vm1, %v5291_v1  ;;  %v256_v14 = vpack.c.bf16 %v225_v12, %v224_v11 }
  0x67   : > { %4923 = vmatprep.subr.bf16.mxu1 %v5291_v1 }
  0x6c   : > { %4668 = vmatmul.mubr.msk.bf16.vlgmr.msra.gmra.mxu0 %vm333_vm2, %v910_v21  ;;  %v889_v21 = vld [vmem:[%s5351_s26 + $0xb7] sm:$0xff] }
  0x6d   : > { %4586 = vmatmul.mubr.msk.bf16.gmra.mxu1 %vm333_vm2, %v247_v22  ;;  %4838 = vmatpush3.bf16.msra.mxu0 %v1740_v23  ;;  %v890_v22 = vld [vmem:[%s5351_s26 + $0xbf] sm:$0xff] }
  0x6e   : > { %4589 = vmatprep.mubr.msk.bf16.mxu1 %vm5292_vm1, %v5291_v1  ;;  %4671 = vmatprep.mubr.msk.bf16.mxu0 %vm5292_vm1, %v5291_v1  ;;  %v228_v23 = vld [vmem:[%s5351_s26 + $0xc5] sm:$0xff]  ;;  %v5620_v25 = vpack.c.bf16 %v890_v22, %v889_v21 }
  0x6f   : > { %5009 = vmatprep.subr.bf16.mxu0 %v5291_v1  ;;  %v258_v26 = vpack.c.bf16 %v229_v24, %v228_v23  ;;  %v5707_v23 = vpack.c.bf16 %v900_v16, %v899_v15 }
  0x74   : > { %4672 = vmatmul.mubr.msk.bf16.gmra.mxu0 %vm333_vm2, %v5490_v28 }
  0x75   : > { %4590 = vmatmul.mubr.msk.bf16.gmra.mxu1 %vm333_vm2, %v248_v29  ;;  %4675 = vmatprep.mubr.msk.bf16.mxu0 %vm5292_vm1, %v5291_v1  ;;  %v892_v29 = vld [vmem:[%s5351_s26 + $0xcf] sm:$0xff] }
  0x76   : > { %4593 = vmatprep.mubr.msk.bf16.mxu1 %vm5292_vm1, %v5291_v1  ;;  %v5633_v32 = vpack.c.bf16 %v892_v29, %v891_v27 }
  0x7c   : > { %4676 = vmatmul.mubr.msk.bf16.gmra.mxu0 %vm333_vm2, %v5503_v34 }
  0x7d   : > { %4594 = vmatmul.mubr.msk.bf16.gmra.mxu1 %vm333_vm2, %v249_v35  ;;  %4679 = vmatprep.mubr.msk.bf16.mxu0 %vm5292_vm1, %v5291_v1  ;;  %v893_v35 = vld [vmem:[%s5351_s26 + $0xd7] sm:$0xff] }
  0x7e   : > { %4597 = vmatprep.mubr.msk.bf16.mxu1 %vm5292_vm1, %v5291_v1  ;;  %v5646_v39 = vpack.c.bf16 %v894_v36, %v893_v35  ;;  %v902_v35 = vld [vmem:[%s5351_s26 + $0x11f] sm:$0xff] }
  0x84   : > { %4680 = vmatmul.mubr.msk.bf16.gmra.mxu0 %vm333_vm2, %v5516_v40 }
  0x85   : > { %4598 = vmatmul.mubr.msk.bf16.gmra.mxu1 %vm333_vm2, %v250_v41  ;;  %4683 = vmatprep.mubr.msk.bf16.mxu0 %vm5292_vm1, %v5291_v1  ;;  %v260_v41 = vpack.c.bf16 %v233_v38, %v232_v37  ;;  %v240_v37 = vld [vmem:[%s5351_s26 + $0x125] sm:$0xff]  ;;  %v241_v38 = vld [vmem:[%s5351_s26 + $0x12d] sm:$0xff] }
  0x86   : > { %4601 = vmatprep.mubr.msk.bf16.mxu1 %vm5292_vm1, %v5291_v1  ;;  %v264_v48 = vpack.c.bf16 %v241_v38, %v240_v37 }
  0x8c   : > { %4684 = vmatmul.mubr.msk.bf16.gmra.mxu0 %vm333_vm2, %v5529_v46 }
  0x8d   : > { %4602 = vmatmul.mubr.msk.bf16.gmra.mxu1 %vm333_vm2, %v251_v47  ;;  %4687 = vmatprep.mubr.msk.bf16.mxu0 %vm5292_vm1, %v5291_v1 }
  0x8e   : > { %4605 = vmatprep.mubr.msk.bf16.mxu1 %vm5292_vm1, %v5291_v1 }
  0x94   : > { %4688 = vmatmul.mubr.msk.bf16.gmra.mxu0 %vm333_vm2, %v5542_v52 }
  0x95   : > { %4606 = vmatmul.mubr.msk.bf16.gmra.mxu1 %vm333_vm2, %v252_v53  ;;  %4691 = vmatprep.mubr.msk.bf16.mxu0 %vm5292_vm1, %v5291_v1  ;;  %v5665_v53 = vpack.c.bf16 %v896_v45, %v895_v44 }
  0x96   : > { %4609 = vmatprep.mubr.msk.bf16.mxu1 %vm5292_vm1, %v5291_v1 }
  0x9c   : > { %4692 = vmatmul.mubr.msk.bf16.gmra.mxu0 %vm333_vm2, %v5555_v58 }
  0x9d   : > { %4610 = vmatmul.mubr.msk.bf16.gmra.mxu1 %vm333_vm2, %v253_v59  ;;  %4695 = vmatprep.mubr.msk.bf16.mxu0 %vm5292_vm1, %v5291_v1 }
  0x9e   : > { %4613 = vmatprep.mubr.msk.bf16.mxu1 %vm5292_vm1, %v5291_v1 }
  0xa4   : > { %4696 = vmatmul.mubr.msk.bf16.gmra.mxu0 %vm333_vm2, %v5568_v0 }
  0xa5   : > { %4614 = vmatmul.mubr.msk.bf16.gmra.mxu1 %vm333_vm2, %v254_v2  ;;  %4699 = vmatprep.mubr.msk.bf16.mxu0 %vm5292_vm1, %v5291_v1  ;;  %v236_v2 = vld [vmem:[%s5351_s26 + $0x105] sm:$0xff] }
  0xa6   : > { %4617 = vmatprep.mubr.msk.bf16.mxu1 %vm5292_vm1, %v5291_v1  ;;  %v262_v9 = vpack.c.bf16 %v237_v3, %v236_v2  ;;  %v243_v2 = vld [vmem:[%s5351_s26 + $0x13d] sm:$0xff] }
  0xac   : > { %4700 = vmatmul.mubr.msk.bf16.gmra.mxu0 %vm333_vm2, %v5581_v7 }
  0xad   : > { %4618 = vmatmul.mubr.msk.bf16.gmra.mxu1 %vm333_vm2, %v255_v8  ;;  %4703 = vmatprep.mubr.msk.bf16.mxu0 %vm5292_vm1, %v5291_v1 }
  0xae   : > { %4621 = vmatprep.mubr.msk.bf16.mxu1 %vm5292_vm1, %v5291_v1 }
  0xb4   : > { %4704 = vmatmul.mubr.msk.bf16.gmra.mxu0 %vm333_vm2, %v5594_v13 }
  0xb5   : > { %4622 = vmatmul.mubr.msk.bf16.gmra.mxu1 %vm333_vm2, %v256_v14  ;;  %4707 = vmatprep.mubr.msk.bf16.mxu0 %vm5292_vm1, %v5291_v1 }
  0xb6   : > { %4625 = vmatprep.mubr.msk.bf16.mxu1 %vm5292_vm1, %v5291_v1 }
  0xbc   : > { %4708 = vmatmul.mubr.msk.bf16.gmra.mxu0 %vm333_vm2, %v5607_v19 }
  0xbd   : > { %4626 = vmatmul.mubr.msk.bf16.gmra.mxu1 %vm333_vm2, %v257_v20  ;;  %4711 = vmatprep.mubr.msk.bf16.mxu0 %vm5292_vm1, %v5291_v1  ;;  %v239_v20 = vld [vmem:[%s5351_s26 + $0x11d] sm:$0xff] }
  0xbe   : > { %4629 = vmatprep.mubr.msk.bf16.mxu1 %vm5292_vm1, %v5291_v1 }
  0xc4   : > { %4712 = vmatmul.mubr.msk.bf16.gmra.mxu0 %vm333_vm2, %v5620_v25 }
  0xc5   : > { %4630 = vmatmul.mubr.msk.bf16.gmra.mxu1 %vm333_vm2, %v258_v26  ;;  %4715 = vmatprep.mubr.msk.bf16.mxu0 %vm5292_vm1, %v5291_v1  ;;  %v263_v26 = vpack.c.bf16 %v239_v20, %v238_v18  ;;  %v905_v20 = vld [vmem:[%s5351_s26 + $0x137] sm:$0xff] }
  0xc6   : > { %4633 = vmatprep.mubr.msk.bf16.mxu1 %vm5292_vm1, %v5291_v1 }
  0xcc   : > { %4716 = vmatmul.mubr.msk.bf16.gmra.mxu0 %vm333_vm2, %v5633_v32 }
  0xcd   : > { %4634 = vmatmul.mubr.msk.bf16.gmra.mxu1 %vm333_vm2, %v259_v33  ;;  %4719 = vmatprep.mubr.msk.bf16.mxu0 %vm5292_vm1, %v5291_v1  ;;  %v901_v33 = vld [vmem:[%s5351_s26 + $0x117] sm:$0xff] }
  0xce   : > { %4637 = vmatprep.mubr.msk.bf16.mxu1 %vm5292_vm1, %v5291_v1  ;;  %v5728_v45 = vpack.c.bf16 %v902_v35, %v901_v33 }
  0xd4   : > { %v5648_v42 = vpop.f32.mrf.mxu0  ;;  %4720 = vmatmul.mubr.msk.bf16.gmra.mxu0 %vm333_vm2, %v5646_v39 }
  0xd5   : > { %v5652_v43 = vpop.f32.mrf.mxu1  ;;  %4638 = vmatmul.mubr.msk.bf16.gmra.mxu1 %vm333_vm2, %v260_v41  ;;  %4723 = vmatprep.mubr.msk.bf16.mxu0 %vm5292_vm1, %v5291_v1 }
  0xd6   : > { %v4497_v47 = vpop.f32.mrf.mxu0  ;;  %4641 = vmatprep.mubr.msk.bf16.mxu1 %vm5292_vm1, %v5291_v1 }
  0xd7   : > { %v4541_v50 = vpop.f32.mrf.mxu1 }
  0xd8   : > { %v5663_v51 = vpop.f32.mrf.mxu0 }
  0xd9   : > { %v5667_v54 = vpop.f32.mrf.mxu1 }
  0xda   : > { %v4498_v56 = vpop.f32.mrf.mxu0 }
  0xdb   : > { %v4542_v57 = vpop.f32.mrf.mxu1 }
  0xdc   : > { %v5669_v59 = vpop.f32.mrf.mxu0  ;;  %4724 = vmatmul.mubr.msk.bf16.gmra.mxu0 %vm333_vm2, %v5665_v53  ;;  %v903_v57 = vld [vmem:[%s5351_s26 + $0x127] sm:$0xff] }
  0xdd   : > { %v5673_v60 = vpop.f32.mrf.mxu1  ;;  %4642 = vmatmul.mubr.msk.bf16.gmra.mxu1 %vm333_vm2, %v261_v55  ;;  %4727 = vmatprep.mubr.msk.bf16.mxu0 %vm5292_vm1, %v5291_v1 }
  0xde   : > { %v4501_v63 = vpop.f32.mrf.mxu0  ;;  %4645 = vmatprep.mubr.msk.bf16.mxu1 %vm5292_vm1, %v5291_v1 }
  0xdf   : > { %v4545_v4 = vpop.f32.mrf.mxu1  ;;  %v242_v63 = vld [vmem:[%s5351_s26 + $0x135] sm:$0xff] }
  0xe0   : > { %v5684_v5 = vpop.f32.mrf.mxu0 }
  0xe1   : > { %v5688_v8 = vpop.f32.mrf.mxu1 }
  0xe2   : > { %v4502_v10 = vpop.f32.mrf.mxu0 }
  0xe3   : > { %v4546_v11 = vpop.f32.mrf.mxu1 }
  0xe4   : > { %v5690_v12 = vpop.f32.mrf.mxu0  ;;  %4728 = vmatmul.mubr.msk.bf16.gmra.mxu0 %vm333_vm2, %v5686_v6  ;;  %v265_v11 = vpack.c.bf16 %v243_v2, %v242_v63 }
  0xe5   : > { %v5694_v14 = vpop.f32.mrf.mxu1  ;;  %4646 = vmatmul.mubr.msk.bf16.gmra.mxu1 %vm333_vm2, %v262_v9  ;;  %4731 = vmatprep.mubr.msk.bf16.mxu0 %vm5292_vm1, %v5291_v1  ;;  %v5749_v9 = vpack.c.bf16 %v904_v61, %v903_v57  ;;  %v907_v57 = vld [vmem:[%s5351_s26 + $0x147] sm:$0xf] }
  0xe6   : > { %v4505_v17 = vpop.f32.mrf.mxu0  ;;  %4649 = vmatprep.mubr.msk.bf16.mxu1 %vm5292_vm1, %v5291_v1 }
  0xe7   : > { %v4549_v21 = vpop.f32.mrf.mxu1 }
  0xe8   : > { %v5705_v22 = vpop.f32.mrf.mxu0  ;;  %v906_v21 = vld [vmem:[%s5351_s26 + $0x13f] sm:$0xff] }
  0xe9   : > { %v5709_v24 = vpop.f32.mrf.mxu1  ;;  %v5769_v35 = vpack.c.bf16 %v906_v21, %v905_v20  ;;  %v4227_v21 = vld [vmem:[%s7024_s1 + $0x18] sm:$0xf] }
  0xea   : > { %v4506_v27 = vpop.f32.mrf.mxu0 }
  0xeb   : > { %v4550_v29 = vpop.f32.mrf.mxu1  ;;  %v244_v27 = vld [vmem:[%s5351_s26 + $0x145] sm:$0xf] }
  0xec   : > { %v5711_v30 = vpop.f32.mrf.mxu0  ;;  %4732 = vmatmul.mubr.msk.bf16.gmra.mxu0 %vm333_vm2, %v5707_v23  ;;  %v266_v37 = vpack.c.bf16 %v244_v27, %v244_v27 }
  0xed   : > { %v5715_v31 = vpop.f32.mrf.mxu1  ;;  %4650 = vmatmul.mubr.msk.bf16.gmra.mxu1 %vm333_vm2, %v263_v26  ;;  %4735 = vmatprep.mubr.msk.bf16.mxu0 %vm5292_vm1, %v5291_v1 }
  0xee   : > { %v4509_v36 = vpop.f32.mrf.mxu0  ;;  %4653 = vmatprep.mubr.msk.bf16.mxu1 %vm5292_vm1, %v5291_v1 }
  0xef   : > { %v4553_v41 = vpop.f32.mrf.mxu1 }
  0xf0   : > { %v5726_v44 = vpop.f32.mrf.mxu0 }
  0xf1   : > { %v5730_v47 = vpop.f32.mrf.mxu1 }
  0xf2   : > { %v4510_v49 = vpop.f32.mrf.mxu0 }
  0xf3   : > { %v4554_v50 = vpop.f32.mrf.mxu1  ;;  %v4205_v49 = vld [vmem:[%s7024_s1 + $0x14] sm:$0xf] }
  0xf4   : > { %v5732_v55 = vpop.f32.mrf.mxu0  ;;  %4736 = vmatmul.mubr.msk.bf16.gmra.mxu0 %vm333_vm2, %v5728_v45  ;;  %v2047_v63 = vpack.c.bf16 %v4205_v49, %v4205_v49 }
  0xf5   : > { %v5736_v56 = vpop.f32.mrf.mxu1  ;;  %4654 = vmatmul.mubr.msk.bf16.gmra.mxu1 %vm333_vm2, %v264_v48  ;;  %4739 = vmatprep.mubr.msk.bf16.mxu0 %vm5292_vm1, %v5291_v1 }
  0xf6   : > { %v4513_v62 = vpop.f32.mrf.mxu0  ;;  %4657 = vmatprep.mubr.msk.bf16.mxu1 %vm5292_vm1, %v5291_v1  ;;  %v2112_v20 = vsel %vm397_vm0, %v2047_v63, 0 }
  0xf7   : > { %v4557_v3 = vpop.f32.mrf.mxu1 }
  0xf8   : > { %v5747_v4 = vpop.f32.mrf.mxu0  ;;  %v930_v3 = vpack.c.bf16 %v907_v57, %v907_v57 }
  0xf9   : > { %v5751_v10 = vpop.f32.mrf.mxu1 }
  0xfa   : > { %v4514_v15 = vpop.f32.mrf.mxu0 }
  0xfb   : > { %v4558_v16 = vpop.f32.mrf.mxu1 }
  0xfc   : > { %v5753_v17 = vpop.f32.mrf.mxu0  ;;  %4740 = vmatmul.mubr.msk.bf16.gmra.mxu0 %vm333_vm2, %v5749_v9 }
  0xfd   : > { %v5757_v18 = vpop.f32.mrf.mxu1  ;;  %4658 = vmatmul.mubr.msk.bf16.gmra.mxu1 %vm333_vm2, %v265_v11  ;;  %4743 = vmatprep.mubr.msk.bf16.mxu0 %vm5292_vm1, %v5291_v1 }
  0xfe   : > { %v4517_v26 = vpop.f32.mrf.mxu0  ;;  %4661 = vmatprep.mubr.msk.bf16.mxu1 %vm5292_vm1, %v5291_v1 }
  0xff   : > { %v4561_v29 = vpop.f32.mrf.mxu1 }
 0x100   : > { %v5767_v33 = vpop.f32.mrf.mxu0  ;;  %v1611_v29 = vld [vmem:[%s5351_s26 + $0x18] sm:$0xff] }
 0x101   : > { %v5771_v36 = vpop.f32.mrf.mxu1 }
 0x102   : > { %v4518_v38 = vpop.f32.mrf.mxu0 }
 0x103   : > { %v4562_v41 = vpop.f32.mrf.mxu1 }
 0x104   : > { %v5773_v48 = vpop.f32.mrf.mxu0  ;;  %4744 = vmatmul.mubr.msk.bf16.gmra.mxu0 %vm333_vm2, %v5769_v35  ;;  %v2419_v41 = vpack.c.bf16 %v4227_v21, %v4227_v21  ;;  %v1614_v21 = vld [vmem:[%s5351_s26 + $0x30] sm:$0xff] }
 0x105   : > { %v5780_v50 = vpop.f32.mrf.mxu1  ;;  %4662 = vmatmul.mubr.msk.bf16.gmra.mxu1 %vm333_vm2, %v266_v37  ;;  %4747 = vmatprep.mubr.msk.bf16.mxu0 %vm5292_vm1, %v5291_v1  ;;  %v1612_v37 = vld [vmem:[%s5351_s26 + $0x20] sm:$0xff] }
 0x106   : > { %7028 = vst [vmem:[#allocation2_spill] sm:$0xff] %v5780_v50  ;;  %v4521_v61 = vpop.f32.mrf.mxu0  ;;  %4753 = vmatprep.mubr.msk.bf16.mxu1 %vm5292_vm1, %v5291_v1  ;;  %v2484_v63 = vsel %vm397_vm0, %v2419_v41, 0 }
 0x107   : > { %v4565_v62 = vpop.f32.mrf.mxu1  ;;  %v1654_v61 = vpack.c.bf16 %v1612_v37, %v1611_v29 }
 0x108   : > { %v5788_v2 = vpop.f32.mrf.mxu0 }
 0x109   : > { %v5790_v11 = vpop.f32.mrf.mxu1 }
 0x10a   : > { %7029 = vst [vmem:[#allocation3_spill] sm:$0xff] %v5790_v11  ;;  %v4522_v15 = vpop.f32.mrf.mxu0 }
 0x10b   : > { %v4566_v16 = vpop.f32.mrf.mxu1 }
 0x10c   : > { %v5796_v26 = vpop.f32.mrf.mxu0  ;;  %4748 = vmatmul.mubr.msk.bf16.gmra.mxu0 %vm333_vm2, %v930_v3 }
 0x10d   : > { %v5799_v27 = vpop.f32.mrf.mxu1  ;;  %4754 = vmatmul.mubr.msk.bf16.vlgmr.msra.gmra.mxu1 %vm333_vm2, %v5490_v28  ;;  %4839 = vmatprep.mubr.msk.bf16.mxu0 %vm5292_vm1, %v5291_v1 }
 0x10e   : > { %7030 = vst [vmem:[#allocation4_spill] sm:$0xff] %v5799_v27  ;;  %v4525_v38 = vpop.f32.mrf.mxu0  ;;  %4924 = vmatpush3.bf16.msra.mxu1 %v2112_v20  ;;  %4757 = vmatprep.mubr.msk.bf16.mxu1 %vm5292_vm1, %v5291_v1  ;;  %v1613_v20 = vld [vmem:[%s5351_s26 + $0x28] sm:$0xff] }
 0x10f   : > { %v4569_v49 = vpop.f32.mrf.mxu1  ;;  %5095 = vmatprep.subr.bf16.mxu1 %v5291_v1  ;;  %v1655_v41 = vpack.c.bf16 %v1614_v21, %v1613_v20  ;;  %v1616_v20 = vld [vmem:[%s5351_s26 + $0x40] sm:$0xff] }
 0x110   : > { %v5810_v57 = vpop.f32.mrf.mxu0 }
 0x111   : > { %v5812_v28 = vpop.f32.mrf.mxu1 }
 0x112   : > { %7031 = vst [vmem:[#allocation5_spill] sm:$0xff] %v5812_v28  ;;  %v4526_v62 = vpop.f32.mrf.mxu0 }
 0x113   : > { %v4570_v3 = vpop.f32.mrf.mxu1 }
 0x114   : > { %v5815_v15 = vpop.f32.mrf.mxu0  ;;  %4840 = vmatmul.mubr.msk.bf16.vlgmr.msra.gmra.mxu0 %vm333_vm2, %v1654_v61  ;;  %v1615_v3 = vld [vmem:[%s5351_s26 + $0x38] sm:$0xff] }
 0x115   : > { %v5818_v16 = vpop.f32.mrf.mxu1  ;;  %4758 = vmatmul.mubr.msk.bf16.gmra.mxu1 %vm333_vm2, %v5503_v34  ;;  %5010 = vmatpush3.bf16.msra.mxu0 %v2484_v63 }
 0x116   : > { %7032 = vst [vmem:[#allocation6_spill] sm:$0xff] %v5818_v16  ;;  %v4529_v29 = vpop.f32.mrf.mxu0  ;;  %4761 = vmatprep.mubr.msk.bf16.mxu1 %vm5292_vm1, %v5291_v1  ;;  %4843 = vmatprep.mubr.msk.bf16.mxu0 %vm5292_vm1, %v5291_v1  ;;  %v1618_v16 = vld [vmem:[%s5351_s26 + $0x50] sm:$0xff] }
 0x117   : > { %v4573_v37 = vpop.f32.mrf.mxu1  ;;  %5181 = vmatprep.subr.bf16.mxu0 %v5291_v1 }
 0x118   : > { %v5829_v38 = vpop.f32.mrf.mxu0 }
 0x119   : > { %v5831_v49 = vpop.f32.mrf.mxu1 }
 0x11a   : > { %7033 = vst [vmem:[#allocation7_spill] sm:$0xff] %v5831_v49  ;;  %v4530_v34 = vpop.f32.mrf.mxu0 }
 0x11b   : > { %v4574_v61 = vpop.f32.mrf.mxu1 }
 0x11c   : > { %v5833_v62 = vpop.f32.mrf.mxu0  ;;  %4844 = vmatmul.mubr.msk.bf16.gmra.mxu0 %vm333_vm2, %v1655_v41  ;;  %v1656_v41 = vpack.c.bf16 %v1616_v20, %v1615_v3 }
 0x11d   : > { %v5836_v63 = vpop.f32.mrf.mxu1  ;;  %4762 = vmatmul.mubr.msk.bf16.gmra.mxu1 %vm333_vm2, %v5516_v40  ;;  %4847 = vmatprep.mubr.msk.bf16.mxu0 %vm5292_vm1, %v5291_v1 }
 0x11e   : > { %7034 = vst [vmem:[#allocation8_spill] sm:$0xff] %v5836_v63  ;;  %v4533_v21 = vpop.f32.mrf.mxu0  ;;  %4765 = vmatprep.mubr.msk.bf16.mxu1 %vm5292_vm1, %v5291_v1 }
 0x11f   : > { %v4577_v29 = vpop.f32.mrf.mxu1  ;;  %v1617_v21 = vld [vmem:[%s5351_s26 + $0x48] sm:$0xff] }
 0x120   : > { %v5846_v37 = vpop.f32.mrf.mxu0  ;;  %v1657_v20 = vpack.c.bf16 %v1618_v16, %v1617_v21 }
 0x121   : > { %v598_v34 = vpop.f32.mrf.mxu1 }
 0x122   : > { %v4534_v61 = vpop.f32.mrf.mxu0 }
 0x123   : > { %v4578_v63 = vpop.f32.mrf.mxu1 }
 0x124   : > { %v5848_v49 = vpop.f32.mrf.mxu0  ;;  %4848 = vmatmul.mubr.msk.bf16.gmra.mxu0 %vm333_vm2, %v1656_v41 }
 0x125   : > { %v701_v40 = vpop.f32.mrf.mxu1  ;;  %4766 = vmatmul.mubr.msk.bf16.gmra.mxu1 %vm333_vm2, %v5529_v46  ;;  %4851 = vmatprep.mubr.msk.bf16.mxu0 %vm5292_vm1, %v5291_v1 }
 0x126   : > { %v4537_v29 = vpop.f32.mrf.mxu0  ;;  %4769 = vmatprep.mubr.msk.bf16.mxu1 %vm5292_vm1, %v5291_v1  ;;  %v702_v61 = vadd.f32 %v701_v40, %v5648_v42 }
 0x127   : > { %v4583_v63 = vpop.f32.mrf.mxu1  ;;  %v1619_v29 = vld [vmem:[%s5351_s26 + $0x58] sm:$0xff] }
 0x128   : > { %v5859_v3 = vpop.f32.mrf.mxu0  ;;  %v1620_v63 = vld [vmem:[%s5351_s26 + $0x60] sm:$0xff] }
 0x129   : > { %v704_v41 = vpop.f32.mrf.mxu1 }
 0x12a   : > { %v4538_v34 = vpop.f32.mrf.mxu0  ;;  %v705_v42 = vadd.f32 %v704_v41, %v5663_v51  ;;  %v1621_v51 = vld [vmem:[%s5351_s26 + $0x68] sm:$0xff]  ;;  %v1622_v41 = vld [vmem:[%s5351_s26 + $0x70] sm:$0xff] }
 0x12b   : > { %v4584_v46 = vpop.f32.mrf.mxu1 }
 0x12c   : > { %v1032_v28 = vpop.f32.mrf.mxu0  ;;  %4852 = vmatmul.mubr.msk.bf16.gmra.mxu0 %vm333_vm2, %v1657_v20 }
 0x12d   : > { %v709_v27 = vpop.f32.mrf.mxu1  ;;  %v5863_v11 = vadd.f32 %v1032_v28, %v702_v61  ;;  %4770 = vmatmul.mubr.msk.bf16.gmra.mxu1 %vm333_vm2, %v5542_v52  ;;  %4855 = vmatprep.mubr.msk.bf16.mxu0 %vm5292_vm1, %v5291_v1  ;;  %v1658_v28 = vpack.c.bf16 %v1620_v63, %v1619_v29 }
 0x12e   : > { %v4669_v16 = vpop.f32.mrf.mxu0  ;;  %4773 = vmatprep.mubr.msk.bf16.mxu1 %vm5292_vm1, %v5291_v1  ;;  %v710_v61 = vadd.f32 %v709_v27, %v5669_v59 }
 0x12f   : > { %7035 = vst [vmem:[#allocation9_spill] sm:$0xff] %v5863_v11  ;;  %v4587_v40 = vpop.f32.mrf.mxu1 }
 0x130   : > { %v1035_v21 = vpop.f32.mrf.mxu0 }
 0x131   : > { %v712_v20 = vpop.f32.mrf.mxu1  ;;  %v5874_v34 = vadd.f32 %v1035_v21, %v705_v42 }
 0x132   : > { %v4670_v52 = vpop.f32.mrf.mxu0  ;;  %v713_v59 = vadd.f32 %v712_v20, %v5684_v5  ;;  %v1623_v5 = vld [vmem:[%s5351_s26 + $0x78] sm:$0xff]  ;;  %v1624_v20 = vld [vmem:[%s5351_s26 + $0x80] sm:$0xff] }
 0x133   : > { %v4588_v46 = vpop.f32.mrf.mxu1 }
 0x134   : > { %v1040_v11 = vpop.f32.mrf.mxu0  ;;  %4856 = vmatmul.mubr.msk.bf16.gmra.mxu0 %vm333_vm2, %v1658_v28 }
 0x135   : > { %v717_v16 = vpop.f32.mrf.mxu1  ;;  %v5878_v50 = vadd.f32 %v1040_v11, %v710_v61  ;;  %4774 = vmatmul.mubr.msk.bf16.gmra.mxu1 %vm333_vm2, %v5555_v58  ;;  %4859 = vmatprep.mubr.msk.bf16.mxu0 %vm5292_vm1, %v5291_v1  ;;  %v1659_v11 = vpack.c.bf16 %v1622_v41, %v1621_v51 }
 0x136   : > { %v4673_v29 = vpop.f32.mrf.mxu0  ;;  %4777 = vmatprep.mubr.msk.bf16.mxu1 %vm5292_vm1, %v5291_v1  ;;  %v718_v21 = vadd.f32 %v717_v16, %v5690_v12 }
 0x137   : > { %v4591_v27 = vpop.f32.mrf.mxu1  ;;  %v1660_v29 = vpack.c.bf16 %v1624_v20, %v1623_v5 }
 0x138   : > { %v1043_v63 = vpop.f32.mrf.mxu0 }
 0x139   : > { %v720_v42 = vpop.f32.mrf.mxu1  ;;  %v5889_v40 = vadd.f32 %v1043_v63, %v713_v59 }
 0x13a   : > { %v4674_v58 = vpop.f32.mrf.mxu0  ;;  %v721_v12 = vadd.f32 %v720_v42, %v5705_v22  ;;  %v1625_v22 = vld [vmem:[%s5351_s26 + $0x88] sm:$0xff]  ;;  %v1626_v42 = vld [vmem:[%s5351_s26 + $0x90] sm:$0xff] }
 0x13b   : > { %v4592_v28 = vpop.f32.mrf.mxu1  ;;  %v1661_v20 = vpack.c.bf16 %v1626_v42, %v1625_v22 }
 0x13c   : > { %v1048_v52 = vpop.f32.mrf.mxu0  ;;  %4860 = vmatmul.mubr.msk.bf16.gmra.mxu0 %vm333_vm2, %v1659_v11 }
 0x13d   : > { %v725_v61 = vpop.f32.mrf.mxu1  ;;  %v5893_v46 = vadd.f32 %v1048_v52, %v718_v21  ;;  %4778 = vmatmul.mubr.msk.bf16.gmra.mxu1 %vm333_vm2, %v5568_v0  ;;  %4863 = vmatprep.mubr.msk.bf16.mxu0 %vm5292_vm1, %v5291_v1 }
 0x13e   : > { %v4677_v51 = vpop.f32.mrf.mxu0  ;;  %4781 = vmatprep.mubr.msk.bf16.mxu1 %vm5292_vm1, %v5291_v1  ;;  %v726_v63 = vadd.f32 %v725_v61, %v5711_v30 }
 0x13f   : > { %v4595_v16 = vpop.f32.mrf.mxu1 }
 0x140   : > { %v1051_v41 = vpop.f32.mrf.mxu0 }
 0x141   : > { %v728_v59 = vpop.f32.mrf.mxu1  ;;  %v5904_v27 = vadd.f32 %v1051_v41, %v721_v12 }
 0x142   : > { %v4678_v0 = vpop.f32.mrf.mxu0  ;;  %v729_v30 = vadd.f32 %v728_v59, %v5726_v44  ;;  %v1627_v44 = vld [vmem:[%s5351_s26 + $0x98] sm:$0xff]  ;;  %v1628_v59 = vld [vmem:[%s5351_s26 + $0xa0] sm:$0xff] }
 0x143   : > { %v4596_v11 = vpop.f32.mrf.mxu1  ;;  %v1662_v22 = vpack.c.bf16 %v1628_v59, %v1627_v44 }
 0x144   : > { %v1056_v58 = vpop.f32.mrf.mxu0  ;;  %4864 = vmatmul.mubr.msk.bf16.gmra.mxu0 %vm333_vm2, %v1660_v29 }
 0x145   : > { %v733_v21 = vpop.f32.mrf.mxu1  ;;  %v5908_v28 = vadd.f32 %v1056_v58, %v726_v63  ;;  %4782 = vmatmul.mubr.msk.bf16.gmra.mxu1 %vm333_vm2, %v5581_v7  ;;  %4867 = vmatprep.mubr.msk.bf16.mxu0 %vm5292_vm1, %v5291_v1 }
 0x146   : > { %v4681_v52 = vpop.f32.mrf.mxu0  ;;  %4785 = vmatprep.mubr.msk.bf16.mxu1 %vm5292_vm1, %v5291_v1  ;;  %v734_v16 = vadd.f32 %v733_v21, %v5732_v55 }
 0x147   : > { %v4599_v61 = vpop.f32.mrf.mxu1 }
 0x148   : > { %v1059_v5 = vpop.f32.mrf.mxu0 }
 0x149   : > { %v736_v51 = vpop.f32.mrf.mxu1  ;;  %v5919_v12 = vadd.f32 %v1059_v5, %v729_v30 }
 0x14a   : > { %v4682_v7 = vpop.f32.mrf.mxu0  ;;  %v737_v55 = vadd.f32 %v736_v51, %v5747_v4  ;;  %v1629_v4 = vld [vmem:[%s5351_s26 + $0xa8] sm:$0xff]  ;;  %v1630_v51 = vld [vmem:[%s5351_s26 + $0xb0] sm:$0xff] }
 0x14b   : > { %v4600_v41 = vpop.f32.mrf.mxu1 }
 0x14c   : > { %v1064_v29 = vpop.f32.mrf.mxu0  ;;  %4868 = vmatmul.mubr.msk.bf16.gmra.mxu0 %vm333_vm2, %v1661_v20 }
 0x14d   : > { %v741_v0 = vpop.f32.mrf.mxu1  ;;  %v5923_v63 = vadd.f32 %v1064_v29, %v734_v16  ;;  %4786 = vmatmul.mubr.msk.bf16.gmra.mxu1 %vm333_vm2, %v5594_v13  ;;  %4871 = vmatprep.mubr.msk.bf16.mxu0 %vm5292_vm1, %v5291_v1 }
 0x14e   : > { %v4685_v11 = vpop.f32.mrf.mxu0  ;;  %4789 = vmatprep.mubr.msk.bf16.mxu1 %vm5292_vm1, %v5291_v1  ;;  %v742_v30 = vadd.f32 %v741_v0, %v5753_v17  ;;  %v1663_v0 = vpack.c.bf16 %v1630_v51, %v1629_v4 }
 0x14f   : > { %v4603_v58 = vpop.f32.mrf.mxu1 }
 0x150   : > { %v1067_v21 = vpop.f32.mrf.mxu0 }
 0x151   : > { %v744_v42 = vpop.f32.mrf.mxu1  ;;  %v5934_v52 = vadd.f32 %v1067_v21, %v737_v55 }
 0x152   : > { %v4686_v13 = vpop.f32.mrf.mxu0  ;;  %v745_v17 = vadd.f32 %v744_v42, %v5767_v33  ;;  %v1631_v33 = vld [vmem:[%s5351_s26 + $0xb8] sm:$0xff]  ;;  %v1632_v42 = vld [vmem:[%s5351_s26 + $0xc0] sm:$0xff] }
 0x153   : > { %v4604_v61 = vpop.f32.mrf.mxu1 }
 0x154   : > { %v1072_v5 = vpop.f32.mrf.mxu0  ;;  %4872 = vmatmul.mubr.msk.bf16.gmra.mxu0 %vm333_vm2, %v1662_v22 }
 0x155   : > { %v749_v20 = vpop.f32.mrf.mxu1  ;;  %v5938_v7 = vadd.f32 %v1072_v5, %v742_v30  ;;  %4790 = vmatmul.mubr.msk.bf16.gmra.mxu1 %vm333_vm2, %v5607_v19  ;;  %4875 = vmatprep.mubr.msk.bf16.mxu0 %vm5292_vm1, %v5291_v1  ;;  %v1664_v5 = vpack.c.bf16 %v1632_v42, %v1631_v33 }
 0x156   : > { %v4689_v16 = vpop.f32.mrf.mxu0  ;;  %4793 = vmatprep.mubr.msk.bf16.mxu1 %vm5292_vm1, %v5291_v1  ;;  %v750_v11 = vadd.f32 %v749_v20, %v5773_v48 }
 0x157   : > { %v4607_v41 = vpop.f32.mrf.mxu1 }
 0x158   : > { %v1075_v29 = vpop.f32.mrf.mxu0 }
 0x159   : > { %v752_v44 = vpop.f32.mrf.mxu1  ;;  %v5949_v59 = vadd.f32 %v1075_v29, %v745_v17 }
 0x15a   : > { %v4690_v19 = vpop.f32.mrf.mxu0  ;;  %v753_v48 = vadd.f32 %v752_v44, %v5788_v2  ;;  %v1633_v2 = vld [vmem:[%s5351_s26 + $0xc8] sm:$0xff] }
 0x15b   : > { %v4608_v55 = vpop.f32.mrf.mxu1 }
 0x15c   : > { %v1080_v58 = vpop.f32.mrf.mxu0  ;;  %4876 = vmatmul.mubr.msk.bf16.gmra.mxu0 %vm333_vm2, %v1663_v0  ;;  %v1634_v0 = vld [vmem:[%s5351_s26 + $0xd0] sm:$0xff] }
 0x15d   : > { %v757_v21 = vpop.f32.mrf.mxu1  ;;  %v5953_v22 = vadd.f32 %v1080_v58, %v750_v11  ;;  %4794 = vmatmul.mubr.msk.bf16.gmra.mxu1 %vm333_vm2, %v5620_v25  ;;  %4879 = vmatprep.mubr.msk.bf16.mxu0 %vm5292_vm1, %v5291_v1  ;;  %v1665_v55 = vpack.c.bf16 %v1634_v0, %v1633_v2 }
 0x15e   : > { %v4693_v13 = vpop.f32.mrf.mxu0  ;;  %4797 = vmatprep.mubr.msk.bf16.mxu1 %vm5292_vm1, %v5291_v1  ;;  %v758_v51 = vadd.f32 %v757_v21, %v5796_v26 }
 0x15f   : > { %v4611_v30 = vpop.f32.mrf.mxu1 }
 0x160   : > { %v1083_v61 = vpop.f32.mrf.mxu0 }
 0x161   : > { %v760_v20 = vpop.f32.mrf.mxu1  ;;  %v5964_v4 = vadd.f32 %v1083_v61, %v753_v48  ;;  %v1636_v61 = vld [vmem:[%s5351_s26 + $0xe0] sm:$0xff] }
 0x162   : > { %v4694_v25 = vpop.f32.mrf.mxu0  ;;  %v761_v26 = vadd.f32 %v760_v20, %v5810_v57  ;;  %v1635_v57 = vld [vmem:[%s5351_s26 + $0xd8] sm:$0xff] }
 0x163   : > { %v4612_v16 = vpop.f32.mrf.mxu1 }
 0x164   : > { %v1088_v17 = vpop.f32.mrf.mxu0  ;;  %4880 = vmatmul.mubr.msk.bf16.gmra.mxu0 %vm333_vm2, %v1664_v5 }
 0x165   : > { %v765_v41 = vpop.f32.mrf.mxu1  ;;  %v5968_v29 = vadd.f32 %v1088_v17, %v758_v51  ;;  %4798 = vmatmul.mubr.msk.bf16.gmra.mxu1 %vm333_vm2, %v5633_v32  ;;  %4883 = vmatprep.mubr.msk.bf16.mxu0 %vm5292_vm1, %v5291_v1  ;;  %v1666_v51 = vpack.c.bf16 %v1636_v61, %v1635_v57 }
 0x166   : > { %v4697_v44 = vpop.f32.mrf.mxu0  ;;  %4801 = vmatprep.mubr.msk.bf16.mxu1 %vm5292_vm1, %v5291_v1  ;;  %v766_v33 = vadd.f32 %v765_v41, %v5815_v15 }
 0x167   : > { %v4615_v19 = vpop.f32.mrf.mxu1 }
 0x168   : > { %v1091_v11 = vpop.f32.mrf.mxu0  ;;  %v1638_v19 = vld [vmem:[%s5351_s26 + $0xf0] sm:$0xff] }
 0x169   : > { %v768_v58 = vpop.f32.mrf.mxu1  ;;  %v5979_v21 = vadd.f32 %v1091_v11, %v761_v26 }
 0x16a   : > { %v4698_v32 = vpop.f32.mrf.mxu0  ;;  %v769_v15 = vadd.f32 %v768_v58, %v5829_v38  ;;  %v1637_v38 = vld [vmem:[%s5351_s26 + $0xe8] sm:$0xff] }
 0x16b   : > { %v4616_v42 = vpop.f32.mrf.mxu1  ;;  %v1667_v32 = vpack.c.bf16 %v1638_v19, %v1637_v38 }
 0x16c   : > { %v1096_v13 = vpop.f32.mrf.mxu0  ;;  %4884 = vmatmul.mubr.msk.bf16.gmra.mxu0 %vm333_vm2, %v1665_v55 }
 0x16d   : > { %v773_v48 = vpop.f32.mrf.mxu1  ;;  %v5983_v30 = vadd.f32 %v1096_v13, %v766_v33  ;;  %4802 = vmatmul.mubr.msk.bf16.gmra.mxu1 %vm333_vm2, %v5646_v39  ;;  %4887 = vmatprep.mubr.msk.bf16.mxu0 %vm5292_vm1, %v5291_v1 }
 0x16e   : > { %v4701_v5 = vpop.f32.mrf.mxu0  ;;  %4805 = vmatprep.mubr.msk.bf16.mxu1 %vm5292_vm1, %v5291_v1  ;;  %v774_v41 = vadd.f32 %v773_v48, %v5833_v62 }
 0x16f   : > { %v4619_v20 = vpop.f32.mrf.mxu1 }
 0x170   : > { %v1099_v25 = vpop.f32.mrf.mxu0 }
 0x171   : > { %v776_v16 = vpop.f32.mrf.mxu1  ;;  %v5994_v17 = vadd.f32 %v1099_v25, %v769_v15  ;;  %v1640_v15 = vld [vmem:[%s5351_s26 + $0x100] sm:$0xff] }
 0x172   : > { %v4702_v39 = vpop.f32.mrf.mxu0  ;;  %v777_v62 = vadd.f32 %v776_v16, %v5846_v37  ;;  %v1639_v37 = vld [vmem:[%s5351_s26 + $0xf8] sm:$0xff] }
 0x173   : > { %v4620_v2 = vpop.f32.mrf.mxu1  ;;  %v1668_v16 = vpack.c.bf16 %v1640_v15, %v1639_v37  ;;  %v1644_v15 = vld [vmem:[%s5351_s26 + $0x120] sm:$0xff] }
 0x174   : > { %v1104_v0 = vpop.f32.mrf.mxu0  ;;  %4888 = vmatmul.mubr.msk.bf16.gmra.mxu0 %vm333_vm2, %v1666_v51 }
 0x175   : > { %v781_v44 = vpop.f32.mrf.mxu1  ;;  %v5998_v26 = vadd.f32 %v1104_v0, %v774_v41  ;;  %4806 = vmatmul.mubr.msk.bf16.gmra.mxu1 %vm333_vm2, %v5665_v53  ;;  %4891 = vmatprep.mubr.msk.bf16.mxu0 %vm5292_vm1, %v5291_v1 }
 0x176   : > { %v4705_v11 = vpop.f32.mrf.mxu0  ;;  %4809 = vmatprep.mubr.msk.bf16.mxu1 %vm5292_vm1, %v5291_v1  ;;  %v782_v13 = vadd.f32 %v781_v44, %v5848_v49 }
 0x177   : > { %v4623_v55 = vpop.f32.mrf.mxu1  ;;  %v1642_v11 = vld [vmem:[%s5351_s26 + $0x110] sm:$0xff] }
 0x178   : > { %v1107_v58 = vpop.f32.mrf.mxu0 }
 0x179   : > { %v784_v33 = vpop.f32.mrf.mxu1  ;;  %v6009_v42 = vadd.f32 %v1107_v58, %v777_v62 }
 0x17a   : > { %v4706_v53 = vpop.f32.mrf.mxu0  ;;  %v785_v49 = vadd.f32 %v784_v33, %v5859_v3  ;;  %v1641_v3 = vld [vmem:[%s5351_s26 + $0x108] sm:$0xff] }
 0x17b   : > { %v4624_v48 = vpop.f32.mrf.mxu1 }
 0x17c   : > { %v1112_v57 = vpop.f32.mrf.mxu0  ;;  %4892 = vmatmul.mubr.msk.bf16.gmra.mxu0 %vm333_vm2, %v1667_v32  ;;  %v1669_v32 = vpack.c.bf16 %v1642_v11, %v1641_v3  ;;  %v1646_v3 = vld [vmem:[%s5351_s26 + $0x130] sm:$0xff] }
 0x17d   : > { %v789_v61 = vpop.f32.mrf.mxu1  ;;  %v6013_v5 = vadd.f32 %v1112_v57, %v782_v13  ;;  %4810 = vmatmul.mubr.msk.bf16.gmra.mxu1 %vm333_vm2, %v5686_v6  ;;  %4895 = vmatprep.mubr.msk.bf16.mxu0 %vm5292_vm1, %v5291_v1 }
 0x17e   : > { %v4709_v20 = vpop.f32.mrf.mxu0  ;;  %4813 = vmatprep.mubr.msk.bf16.mxu1 %vm5292_vm1, %v5291_v1  ;;  %v790_v2 = vadd.f32 %v789_v61, %v5652_v43 }
 0x17f   : > { %v4627_v25 = vpop.f32.mrf.mxu1 }
 0x180   : > { %v1115_v51 = vpop.f32.mrf.mxu0 }
 0x181   : > { %v792_v39 = vpop.f32.mrf.mxu1  ;;  %v6024_v41 = vadd.f32 %v1115_v51, %v785_v49 }
 0x182   : > { %v4710_v6 = vpop.f32.mrf.mxu0  ;;  %v793_v43 = vadd.f32 %v792_v39, %v5667_v54  ;;  %v1643_v54 = vld [vmem:[%s5351_s26 + $0x118] sm:$0xff] }
 0x183   : > { %v4628_v0 = vpop.f32.mrf.mxu1  ;;  %v1670_v51 = vpack.c.bf16 %v1644_v15, %v1643_v54  ;;  %v1278_v15 = vld [vmem:[%s5351_s26 + $0x14f] sm:$0xff] }
 0x184   : > { %v1120_v44 = vpop.f32.mrf.mxu0  ;;  %4896 = vmatmul.mubr.msk.bf16.gmra.mxu0 %vm333_vm2, %v1668_v16 }
 0x185   : > { %v797_v38 = vpop.f32.mrf.mxu1  ;;  %v6028_v19 = vadd.f32 %v1120_v44, %v790_v2  ;;  %4814 = vmatmul.mubr.msk.bf16.gmra.mxu1 %vm333_vm2, %v5707_v23  ;;  %4899 = vmatprep.mubr.msk.bf16.mxu0 %vm5292_vm1, %v5291_v1 }
 0x186   : > { %v4713_v62 = vpop.f32.mrf.mxu0  ;;  %4817 = vmatprep.mubr.msk.bf16.mxu1 %vm5292_vm1, %v5291_v1  ;;  %v798_v13 = vadd.f32 %v797_v38, %v5673_v60 }
 0x187   : > { %v4631_v55 = vpop.f32.mrf.mxu1 }
 0x188   : > { %v1123_v58 = vpop.f32.mrf.mxu0 }
 0x189   : > { %v800_v33 = vpop.f32.mrf.mxu1  ;;  %v6039_v53 = vadd.f32 %v1123_v58, %v793_v43 }
 0x18a   : > { %v4714_v23 = vpop.f32.mrf.mxu0  ;;  %v801_v60 = vadd.f32 %v800_v33, %v5688_v8  ;;  %v1645_v8 = vld [vmem:[%s5351_s26 + $0x128] sm:$0xff] }
 0x18b   : > { %v4632_v48 = vpop.f32.mrf.mxu1  ;;  %v1671_v55 = vpack.c.bf16 %v1646_v3, %v1645_v8  ;;  %v1650_v3 = vld [vmem:[%s5351_s26 + $0x150] sm:$0xff] }
 0x18c   : > { %v1128_v57 = vpop.f32.mrf.mxu0  ;;  %4900 = vmatmul.mubr.msk.bf16.gmra.mxu0 %vm333_vm2, %v1669_v32 }
 0x18d   : > { %v805_v61 = vpop.f32.mrf.mxu1  ;;  %v6043_v37 = vadd.f32 %v1128_v57, %v798_v13  ;;  %4818 = vmatmul.mubr.msk.bf16.gmra.mxu1 %vm333_vm2, %v5728_v45  ;;  %4903 = vmatprep.mubr.msk.bf16.mxu0 %vm5292_vm1, %v5291_v1 }
 0x18e   : > { %v4717_v20 = vpop.f32.mrf.mxu0  ;;  %4821 = vmatprep.mubr.msk.bf16.mxu1 %vm5292_vm1, %v5291_v1  ;;  %v806_v6 = vadd.f32 %v805_v61, %v5694_v14  ;;  %v1648_v61 = vld [vmem:[%s5351_s26 + $0x140] sm:$0xff] }
 0x18f   : > { %v4635_v49 = vpop.f32.mrf.mxu1 }
 0x190   : > { %v1131_v25 = vpop.f32.mrf.mxu0 }
 0x191   : > { %v808_v16 = vpop.f32.mrf.mxu1  ;;  %v6054_v39 = vadd.f32 %v1131_v25, %v801_v60 }
 0x192   : > { %v4718_v45 = vpop.f32.mrf.mxu0  ;;  %v809_v14 = vadd.f32 %v808_v16, %v5709_v24  ;;  %v1647_v24 = vld [vmem:[%s5351_s26 + $0x138] sm:$0xff] }
 0x193   : > { %v4636_v2 = vpop.f32.mrf.mxu1  ;;  %v1672_v25 = vpack.c.bf16 %v1648_v61, %v1647_v24 }
 0x194   : > { %v1136_v0 = vpop.f32.mrf.mxu0  ;;  %4904 = vmatmul.mubr.msk.bf16.gmra.mxu0 %vm333_vm2, %v1670_v51 }
 0x195   : > { %v813_v44 = vpop.f32.mrf.mxu1  ;;  %v6058_v38 = vadd.f32 %v1136_v0, %v806_v6  ;;  %4822 = vmatmul.mubr.msk.bf16.gmra.mxu1 %vm333_vm2, %v5749_v9  ;;  %4907 = vmatprep.mubr.msk.bf16.mxu0 %vm5292_vm1, %v5291_v1 }
 0x196   : > { %v4721_v11 = vpop.f32.mrf.mxu0  ;;  %4825 = vmatprep.mubr.msk.bf16.mxu1 %vm5292_vm1, %v5291_v1  ;;  %v814_v33 = vadd.f32 %v813_v44, %v5715_v31  ;;  %v1277_v31 = vld [vmem:[%s5351_s26 + $0x147] sm:$0xff] }
 0x197   : > { %v4639_v62 = vpop.f32.mrf.mxu1  ;;  %v1301_v16 = vpack.c.bf16 %v1278_v15, %v1277_v31  ;;  %v1651_v31 = vld [vmem:[%s5351_s26 + $0x158] sm:$0xf] }
 0x198   : > { %v1139_v43 = vpop.f32.mrf.mxu0 }
 0x199   : > { %v816_v58 = vpop.f32.mrf.mxu1  ;;  %v6069_v9 = vadd.f32 %v1139_v43, %v809_v14  ;;  %v1279_v14 = vld [vmem:[%s5351_s26 + $0x157] sm:$0xf] }
 0x19a   : > { %v4722_v32 = vpop.f32.mrf.mxu0  ;;  %v817_v20 = vadd.f32 %v816_v58, %v5730_v47  ;;  %v1649_v47 = vld [vmem:[%s5351_s26 + $0x148] sm:$0xff] }
 0x19b   : > { %v4640_v23 = vpop.f32.mrf.mxu1 }
 0x19c   : > { %v1144_v13 = vpop.f32.mrf.mxu0  ;;  %4908 = vmatmul.mubr.msk.bf16.gmra.mxu0 %vm333_vm2, %v1671_v55  ;;  %v1673_v55 = vpack.c.bf16 %v1650_v3, %v1649_v47 }
 0x19d   : > { %v821_v48 = vpop.f32.mrf.mxu1  ;;  %v6073_v57 = vadd.f32 %v1144_v13, %v814_v33  ;;  %4826 = vmatmul.mubr.msk.bf16.gmra.mxu1 %vm333_vm2, %v5769_v35  ;;  %4911 = vmatprep.mubr.msk.bf16.mxu0 %vm5292_vm1, %v5291_v1  ;;  %v1302_v33 = vpack.c.bf16 %v1279_v14, %v1279_v14 }
 0x19e   : > { %v4725_v54 = vpop.f32.mrf.mxu0  ;;  %4829 = vmatprep.mubr.msk.bf16.mxu1 %vm5292_vm1, %v5291_v1  ;;  %v822_v6 = vadd.f32 %v821_v48, %v5736_v56 }
 0x19f   : > { %v4643_v60 = vpop.f32.mrf.mxu1 }
 0x1a0   : > { %v1147_v49 = vpop.f32.mrf.mxu0 }
 0x1a1   : > { %v824_v51 = vpop.f32.mrf.mxu1  ;;  %v6086_v35 = vadd.f32 %v1147_v49, %v817_v20  ;;  %v1984_v20 = vld [vmem:[%s5351_s26 + $0x21] sm:$0xff] }
 0x1a2   : > { %v4726_v45 = vpop.f32.mrf.mxu0  ;;  %v825_v56 = vadd.f32 %v824_v51, %v5751_v10  ;;  %v4249_v10 = vld [vmem:[%s7024_s1 + $0x1c] sm:$0xf] }
 0x1a3   : > { %v4644_v2 = vpop.f32.mrf.mxu1 }
 0x1a4   : > { %v1152_v0 = vpop.f32.mrf.mxu0  ;;  %4912 = vmatmul.mubr.msk.bf16.gmra.mxu0 %vm333_vm2, %v1672_v25  ;;  %v2791_v25 = vpack.c.bf16 %v4249_v10, %v4249_v10 }
 0x1a5   : > { %v829_v44 = vpop.f32.mrf.mxu1  ;;  %v6090_v8 = vadd.f32 %v1152_v0, %v822_v6  ;;  %4830 = vmatmul.mubr.msk.bf16.gmra.mxu1 %vm333_vm2, %v1301_v16  ;;  %4915 = vmatprep.mubr.msk.bf16.mxu0 %vm5292_vm1, %v5291_v1  ;;  %v1674_v16 = vpack.c.bf16 %v1651_v31, %v1651_v31 }
 0x1a6   : > { %v4729_v11 = vpop.f32.mrf.mxu0  ;;  %4833 = vmatprep.mubr.msk.bf16.mxu1 %vm5292_vm1, %v5291_v1  ;;  %v830_v13 = vadd.f32 %v829_v44, %v5757_v18  ;;  %v1983_v18 = vld [vmem:[%s5351_s26 + $0x19] sm:$0xff] }
 0x1a7   : > { %v4647_v62 = vpop.f32.mrf.mxu1  ;;  %v2026_v2 = vpack.c.bf16 %v1984_v20, %v1983_v18  ;;  %v7036_v44 = vld [vmem:[#allocation2_spill] sm:$0xff]  ;;  %v2856_v11 = vsel %vm397_vm0, %v2791_v25, 0  ;;  %v7038_v20 = vld [vmem:[#allocation4_spill] sm:$0xff] }
 0x1a8   : > { %v1155_v43 = vpop.f32.mrf.mxu0 }
 0x1a9   : > { %v832_v58 = vpop.f32.mrf.mxu1  ;;  %v6101_v32 = vadd.f32 %v1155_v43, %v825_v56  ;;  %v1985_v43 = vld [vmem:[%s5351_s26 + $0x29] sm:$0xff] }
 0x1aa   : > { %v4730_v23 = vpop.f32.mrf.mxu0  ;;  %v833_v60 = vadd.f32 %v832_v58, %v5771_v36  ;;  %v4271_v36 = vld [vmem:[%s7024_s1 + $0x20] sm:$0xf] }
 0x1ab   : > { %v4648_v48 = vpop.f32.mrf.mxu1  ;;  %v7037_v23 = vld [vmem:[#allocation3_spill] sm:$0xff] }
 0x1ac   : > { %v1160_v24 = vpop.f32.mrf.mxu0  ;;  %4916 = vmatmul.mubr.msk.bf16.gmra.mxu0 %vm333_vm2, %v1673_v55  ;;  %v1986_v55 = vld [vmem:[%s5351_s26 + $0x31] sm:$0xff] }
 0x1ad   : > { %v837_v61 = vpop.f32.mrf.mxu1  ;;  %v6108_v54 = vadd.f32 %v1160_v24, %v830_v13  ;;  %4834 = vmatmul.mubr.msk.bf16.gmra.mxu1 %vm333_vm2, %v1302_v33  ;;  %4919 = vmatprep.mubr.msk.bf16.mxu0 %vm5292_vm1, %v5291_v1  ;;  %v3163_v33 = vpack.c.bf16 %v4271_v36, %v4271_v36  ;;  %v2027_v10 = vpack.c.bf16 %v1986_v55, %v1985_v43  ;;  %v7040_v55 = vld [vmem:[#allocation6_spill] sm:$0xff] }
 0x1ae   : > { %v4733_v15 = vpop.f32.mrf.mxu0  ;;  %4925 = vmatprep.mubr.msk.bf16.mxu1 %vm5292_vm1, %v5291_v1  ;;  %v838_v47 = vadd.f32 %v837_v61, %v7036_v44  ;;  %v7039_v44 = vld [vmem:[#allocation5_spill] sm:$0xff] }
 0x1af   : > { %v4651_v49 = vpop.f32.mrf.mxu1  ;;  %v3228_v18 = vsel %vm397_vm0, %v3163_v33, 0 }
 0x1b0   : > { %v1163_v51 = vpop.f32.mrf.mxu0 }
 0x1b1   : > { %v840_v45 = vpop.f32.mrf.mxu1  ;;  %v6119_v6 = vadd.f32 %v1163_v51, %v833_v60 }
 0x1b2   : > { %v4734_v0 = vpop.f32.mrf.mxu0  ;;  %v841_v13 = vadd.f32 %v840_v45, %v7037_v23  ;;  %v1987_v45 = vld [vmem:[%s5351_s26 + $0x39] sm:$0xff] }
 0x1b3   : > { %v4652_v3 = vpop.f32.mrf.mxu1 }
 0x1b4   : > { %v1168_v14 = vpop.f32.mrf.mxu0  ;;  %4920 = vmatmul.mubr.msk.bf16.gmra.mxu0 %vm333_vm2, %v1674_v16 }
 0x1b5   : > { %v845_v56 = vpop.f32.mrf.mxu1  ;;  %v6127_v62 = vadd.f32 %v1168_v14, %v838_v47  ;;  %4926 = vmatmul.mubr.msk.bf16.vlgmr.msra.gmra.mxu1 %vm333_vm2, %v2026_v2  ;;  %5011 = vmatprep.mubr.msk.bf16.mxu0 %vm5292_vm1, %v5291_v1  ;;  %v1988_v2 = vld [vmem:[%s5351_s26 + $0x41] sm:$0xff] }
 0x1b6   : > { %v4737_v58 = vpop.f32.mrf.mxu0  ;;  %5096 = vmatpush3.bf16.msra.mxu1 %v2856_v11  ;;  %4929 = vmatprep.mubr.msk.bf16.mxu1 %vm5292_vm1, %v5291_v1  ;;  %v846_v60 = vadd.f32 %v845_v56, %v7038_v20  ;;  %v2028_v36 = vpack.c.bf16 %v1988_v2, %v1987_v45  ;;  %v7042_v2 = vld [vmem:[#allocation8_spill] sm:$0xff] }
 0x1b7   : > { %v4655_v48 = vpop.f32.mrf.mxu1 }
 0x1b8   : > { %v1171_v24 = vpop.f32.mrf.mxu0 }
 0x1b9   : > { %v848_v61 = vpop.f32.mrf.mxu1  ;;  %v6137_v31 = vadd.f32 %v1171_v24, %v841_v13  ;;  %v1989_v24 = vld [vmem:[%s5351_s26 + $0x49] sm:$0xff] }
 0x1ba   : > { %v4738_v15 = vpop.f32.mrf.mxu0  ;;  %v849_v47 = vadd.f32 %v848_v61, %v7039_v44 }
 0x1bb   : > { %v4656_v49 = vpop.f32.mrf.mxu1  ;;  %v7041_v15 = vld [vmem:[#allocation7_spill] sm:$0xff] }
 0x1bc   : > { %v1176_v25 = vpop.f32.mrf.mxu0  ;;  %5012 = vmatmul.mubr.msk.bf16.vlgmr.msra.gmra.mxu0 %vm333_vm2, %v2027_v10 }
 0x1bd   : > { %v853_v51 = vpop.f32.mrf.mxu1  ;;  %v6142_v16 = vadd.f32 %v1176_v25, %v846_v60  ;;  %4930 = vmatmul.mubr.msk.bf16.gmra.mxu1 %vm333_vm2, %v2027_v10  ;;  %5182 = vmatpush3.bf16.msra.mxu0 %v3228_v18  ;;  %v1990_v10 = vld [vmem:[%s5351_s26 + $0x51] sm:$0xff] }
 0x1be   : > { %v4741_v0 = vpop.f32.mrf.mxu0  ;;  %4933 = vmatprep.mubr.msk.bf16.mxu1 %vm5292_vm1, %v5291_v1  ;;  %5015 = vmatprep.mubr.msk.bf16.mxu0 %vm5292_vm1, %v5291_v1  ;;  %v854_v58 = vadd.f32 %v853_v51, %v7040_v55  ;;  %v2029_v49 = vpack.c.bf16 %v1990_v10, %v1989_v24 }
 0x1bf   : > { %v4659_v3 = vpop.f32.mrf.mxu1 }
 0x1c0   : > { %v1179_v11 = vpop.f32.mrf.mxu0 }
 0x1c1   : > { %v856_v14 = vpop.f32.mrf.mxu1  ;;  %v6152_v56 = vadd.f32 %v1179_v11, %v849_v47 }
 0x1c2   : > { %v4742_v43 = vpop.f32.mrf.mxu0  ;;  %v857_v18 = vadd.f32 %v856_v14, %v7041_v15  ;;  %v1992_v14 = vld [vmem:[%s5351_s26 + $0x61] sm:$0xff] }
 0x1c3   : > { %v4660_v33 = vpop.f32.mrf.mxu1  ;;  %v7043_v43 = vld [vmem:[#allocation9_spill] sm:$0xff] }
 0x1c4   : > { %v1184_v23 = vpop.f32.mrf.mxu0  ;;  %5016 = vmatmul.mubr.msk.bf16.gmra.mxu0 %vm333_vm2, %v2028_v36 }
 0x1c5   : > { %v861_v13 = vpop.f32.mrf.mxu1  ;;  %v6156_v48 = vadd.f32 %v1184_v23, %v854_v58  ;;  %4934 = vmatmul.mubr.msk.bf16.gmra.mxu1 %vm333_vm2, %v2028_v36  ;;  %5019 = vmatprep.mubr.msk.bf16.mxu0 %vm5292_vm1, %v5291_v1  ;;  %v1991_v36 = vld [vmem:[%s5351_s26 + $0x59] sm:$0xff] }
 0x1c6   : > { %v4745_v61 = vpop.f32.mrf.mxu0  ;;  %4937 = vmatprep.mubr.msk.bf16.mxu1 %vm5292_vm1, %v5291_v1  ;;  %v862_v0 = vadd.f32 %v861_v13, %v7042_v2  ;;  %v2030_v13 = vpack.c.bf16 %v1992_v14, %v1991_v36 }
 0x1c7   : > { %v4663_v20 = vpop.f32.mrf.mxu1 }
 0x1c8   : > { %v1187_v60 = vpop.f32.mrf.mxu0 }
 0x1c9   : > { %v864_v25 = vpop.f32.mrf.mxu1  ;;  %v6166_v51 = vadd.f32 %v1187_v60, %v857_v18 }
 0x1ca   : > { %v4746_v45 = vpop.f32.mrf.mxu0  ;;  %v1994_v25 = vld [vmem:[%s5351_s26 + $0x71] sm:$0xff] }
 0x1cb   : > { %v4664_v44 = vpop.f32.mrf.mxu1 }
 0x1cc   : > { %v1192_v47 = vpop.f32.mrf.mxu0  ;;  %5020 = vmatmul.mubr.msk.bf16.gmra.mxu0 %vm333_vm2, %v2029_v49 }
 0x1cd   : > { %v6170_v3 = vadd.f32 %v1192_v47, %v862_v0  ;;  %v1404_v11 = vpop.f32.mrf.mxu1  ;;  %4938 = vmatmul.mubr.msk.bf16.gmra.mxu1 %vm333_vm2, %v2029_v49  ;;  %5023 = vmatprep.mubr.msk.bf16.mxu0 %vm5292_vm1, %v5291_v1  ;;  %v1993_v49 = vld [vmem:[%s5351_s26 + $0x69] sm:$0xff] }
 0x1ce   : > { %v1570_v55 = vadd.f32 %v1404_v11, %v7043_v43  ;;  %v4749_v58 = vpop.f32.mrf.mxu0  ;;  %4941 = vmatprep.mubr.msk.bf16.mxu1 %vm5292_vm1, %v5291_v1  ;;  %v2031_v44 = vpack.c.bf16 %v1994_v25, %v1993_v49 }
 0x1cf   : > { %v4755_v33 = vpop.f32.mrf.mxu1 }
 0x1d0   : > { %v1195_v23 = vpop.f32.mrf.mxu0  ;;  %v1995_v33 = vld [vmem:[%s5351_s26 + $0x79] sm:$0xff] }
 0x1d1   : > { %v1407_v24 = vpop.f32.mrf.mxu1  ;;  %v1996_v23 = vld [vmem:[%s5351_s26 + $0x81] sm:$0xff] }
 0x1d2   : > { %v1571_v10 = vadd.f32 %v1407_v24, %v5874_v34  ;;  %v4750_v61 = vpop.f32.mrf.mxu0 }
 0x1d3   : > { %v4756_v15 = vpop.f32.mrf.mxu1  ;;  %v2032_v61 = vpack.c.bf16 %v1996_v23, %v1995_v33 }
 0x1d4   : > { %v1776_v18 = vpop.f32.mrf.mxu0  ;;  %5024 = vmatmul.mubr.msk.bf16.gmra.mxu0 %vm333_vm2, %v2030_v13 }
 0x1d5   : > { %v1412_v20 = vpop.f32.mrf.mxu1  ;;  %v6182_v60 = vadd.f32 %v1776_v18, %v1570_v55  ;;  %4942 = vmatmul.mubr.msk.bf16.gmra.mxu1 %vm333_vm2, %v2030_v13  ;;  %5027 = vmatprep.mubr.msk.bf16.mxu0 %vm5292_vm1, %v5291_v1 }
 0x1d6   : > { %v1572_v45 = vadd.f32 %v1412_v20, %v5878_v50  ;;  %v4841_v2 = vpop.f32.mrf.mxu0  ;;  %4945 = vmatprep.mubr.msk.bf16.mxu1 %vm5292_vm1, %v5291_v1 }
 0x1d7   : > { %v4759_v34 = vpop.f32.mrf.mxu1 }
 0x1d8   : > { %v1779_v0 = vpop.f32.mrf.mxu0  ;;  %v1997_v34 = vld [vmem:[%s5351_s26 + $0x89] sm:$0xff] }
 0x1d9   : > { %v1415_v47 = vpop.f32.mrf.mxu1  ;;  %v6192_v11 = vadd.f32 %v1779_v0, %v1571_v10  ;;  %v1998_v0 = vld [vmem:[%s5351_s26 + $0x91] sm:$0xff] }
 0x1da   : > { %v1573_v36 = vadd.f32 %v1415_v47, %v5889_v40  ;;  %v4842_v14 = vpop.f32.mrf.mxu0 }
 0x1db   : > { %v4760_v43 = vpop.f32.mrf.mxu1  ;;  %v2033_v14 = vpack.c.bf16 %v1998_v0, %v1997_v34 }
 0x1dc   : > { %v1784_v55 = vpop.f32.mrf.mxu0  ;;  %5028 = vmatmul.mubr.msk.bf16.gmra.mxu0 %vm333_vm2, %v2031_v44 }
 0x1dd   : > { %v1420_v50 = vpop.f32.mrf.mxu1  ;;  %v6196_v58 = vadd.f32 %v1784_v55, %v1572_v45  ;;  %4946 = vmatmul.mubr.msk.bf16.gmra.mxu1 %vm333_vm2, %v2031_v44  ;;  %5031 = vmatprep.mubr.msk.bf16.mxu0 %vm5292_vm1, %v5291_v1 }
 0x1de   : > { %v1574_v13 = vadd.f32 %v1420_v50, %v5893_v46  ;;  %v4845_v24 = vpop.f32.mrf.mxu0  ;;  %4949 = vmatprep.mubr.msk.bf16.mxu1 %vm5292_vm1, %v5291_v1 }
 0x1df   : > { %v4763_v40 = vpop.f32.mrf.mxu1 }
 0x1e0   : > { %v1787_v10 = vpop.f32.mrf.mxu0  ;;  %v1999_v40 = vld [vmem:[%s5351_s26 + $0x99] sm:$0xff] }
 0x1e1   : > { %v1423_v15 = vpop.f32.mrf.mxu1  ;;  %v6206_v18 = vadd.f32 %v1787_v10, %v1573_v36  ;;  %v2000_v10 = vld [vmem:[%s5351_s26 + $0xa1] sm:$0xff] }
 0x1e2   : > { %v1575_v20 = vadd.f32 %v1423_v15, %v5904_v27  ;;  %v4846_v49 = vpop.f32.mrf.mxu0 }
 0x1e3   : > { %v4764_v25 = vpop.f32.mrf.mxu1  ;;  %v2034_v49 = vpack.c.bf16 %v2000_v10, %v1999_v40 }
 0x1e4   : > { %v1792_v45 = vpop.f32.mrf.mxu0  ;;  %5032 = vmatmul.mubr.msk.bf16.gmra.mxu0 %vm333_vm2, %v2032_v61 }
 0x1e5   : > { %v1428_v46 = vpop.f32.mrf.mxu1  ;;  %v6210_v2 = vadd.f32 %v1792_v45, %v1574_v13  ;;  %4950 = vmatmul.mubr.msk.bf16.gmra.mxu1 %vm333_vm2, %v2032_v61  ;;  %5035 = vmatprep.mubr.msk.bf16.mxu0 %vm5292_vm1, %v5291_v1 }
 0x1e6   : > { %v1576_v44 = vadd.f32 %v1428_v46, %v5908_v28  ;;  %v4849_v47 = vpop.f32.mrf.mxu0  ;;  %4953 = vmatprep.mubr.msk.bf16.mxu1 %vm5292_vm1, %v5291_v1 }
 0x1e7   : > { %v4767_v27 = vpop.f32.mrf.mxu1 }
 0x1e8   : > { %v1795_v36 = vpop.f32.mrf.mxu0  ;;  %v2001_v27 = vld [vmem:[%s5351_s26 + $0xa9] sm:$0xff] }
 0x1e9   : > { %v1431_v43 = vpop.f32.mrf.mxu1  ;;  %v6220_v55 = vadd.f32 %v1795_v36, %v1575_v20  ;;  %v2002_v36 = vld [vmem:[%s5351_s26 + $0xb1] sm:$0xff] }
 0x1ea   : > { %v1577_v50 = vadd.f32 %v1431_v43, %v5919_v12  ;;  %v4850_v33 = vpop.f32.mrf.mxu0 }
 0x1eb   : > { %v4768_v23 = vpop.f32.mrf.mxu1  ;;  %v2035_v33 = vpack.c.bf16 %v2002_v36, %v2001_v27 }
 0x1ec   : > { %v1800_v13 = vpop.f32.mrf.mxu0  ;;  %5036 = vmatmul.mubr.msk.bf16.gmra.mxu0 %vm333_vm2, %v2033_v14 }
 0x1ed   : > { %v1436_v28 = vpop.f32.mrf.mxu1  ;;  %v6224_v24 = vadd.f32 %v1800_v13, %v1576_v44  ;;  %4954 = vmatmul.mubr.msk.bf16.gmra.mxu1 %vm333_vm2, %v2033_v14  ;;  %5039 = vmatprep.mubr.msk.bf16.mxu0 %vm5292_vm1, %v5291_v1 }
 0x1ee   : > { %v1578_v61 = vadd.f32 %v1436_v28, %v5923_v63  ;;  %v4853_v15 = vpop.f32.mrf.mxu0  ;;  %4957 = vmatprep.mubr.msk.bf16.mxu1 %vm5292_vm1, %v5291_v1 }
 0x1ef   : > { %v4771_v12 = vpop.f32.mrf.mxu1 }
 0x1f0   : > { %v1803_v20 = vpop.f32.mrf.mxu0  ;;  %v2003_v12 = vld [vmem:[%s5351_s26 + $0xb9] sm:$0xff] }
 0x1f1   : > { %v1439_v25 = vpop.f32.mrf.mxu1  ;;  %v6234_v45 = vadd.f32 %v1803_v20, %v1577_v50  ;;  %v2004_v20 = vld [vmem:[%s5351_s26 + $0xc1] sm:$0xff] }
 0x1f2   : > { %v1579_v46 = vadd.f32 %v1439_v25, %v5934_v52  ;;  %v4854_v34 = vpop.f32.mrf.mxu0 }
 0x1f3   : > { %v4772_v0 = vpop.f32.mrf.mxu1  ;;  %v2036_v34 = vpack.c.bf16 %v2004_v20, %v2003_v12 }
 0x1f4   : > { %v1808_v44 = vpop.f32.mrf.mxu0  ;;  %5040 = vmatmul.mubr.msk.bf16.gmra.mxu0 %vm333_vm2, %v2034_v49 }
 0x1f5   : > { %v1444_v63 = vpop.f32.mrf.mxu1  ;;  %v6238_v47 = vadd.f32 %v1808_v44, %v1578_v61  ;;  %4958 = vmatmul.mubr.msk.bf16.gmra.mxu1 %vm333_vm2, %v2034_v49  ;;  %5043 = vmatprep.mubr.msk.bf16.mxu0 %vm5292_vm1, %v5291_v1 }
 0x1f6   : > { %v1580_v14 = vadd.f32 %v1444_v63, %v5938_v7  ;;  %v4857_v43 = vpop.f32.mrf.mxu0  ;;  %4961 = vmatprep.mubr.msk.bf16.mxu1 %vm5292_vm1, %v5291_v1 }
 0x1f7   : > { %v4775_v52 = vpop.f32.mrf.mxu1 }
 0x1f8   : > { %v1811_v50 = vpop.f32.mrf.mxu0  ;;  %v2005_v52 = vld [vmem:[%s5351_s26 + $0xc9] sm:$0xff] }
 0x1f9   : > { %v1447_v23 = vpop.f32.mrf.mxu1  ;;  %v6248_v13 = vadd.f32 %v1811_v50, %v1579_v46  ;;  %v2006_v50 = vld [vmem:[%s5351_s26 + $0xd1] sm:$0xff] }
 0x1fa   : > { %v1581_v28 = vadd.f32 %v1447_v23, %v5949_v59  ;;  %v4858_v40 = vpop.f32.mrf.mxu0 }
 0x1fb   : > { %v4776_v10 = vpop.f32.mrf.mxu1  ;;  %v2037_v40 = vpack.c.bf16 %v2006_v50, %v2005_v52 }
 0x1fc   : > { %v1816_v61 = vpop.f32.mrf.mxu0  ;;  %5044 = vmatmul.mubr.msk.bf16.gmra.mxu0 %vm333_vm2, %v2035_v33 }
 0x1fd   : > { %v1452_v7 = vpop.f32.mrf.mxu1  ;;  %v6252_v15 = vadd.f32 %v1816_v61, %v1580_v14  ;;  %4962 = vmatmul.mubr.msk.bf16.gmra.mxu1 %vm333_vm2, %v2035_v33  ;;  %5047 = vmatprep.mubr.msk.bf16.mxu0 %vm5292_vm1, %v5291_v1 }
 0x1fe   : > { %v1582_v49 = vadd.f32 %v1452_v7, %v5953_v22  ;;  %v4861_v25 = vpop.f32.mrf.mxu0  ;;  %4965 = vmatprep.mubr.msk.bf16.mxu1 %vm5292_vm1, %v5291_v1 }
 0x1ff   : > { %v4779_v59 = vpop.f32.mrf.mxu1 }
 0x200   : > { %v1819_v46 = vpop.f32.mrf.mxu0  ;;  %v2007_v59 = vld [vmem:[%s5351_s26 + $0xd9] sm:$0xff] }
 0x201   : > { %v1455_v0 = vpop.f32.mrf.mxu1  ;;  %v6262_v44 = vadd.f32 %v1819_v46, %v1581_v28  ;;  %v2008_v46 = vld [vmem:[%s5351_s26 + $0xe1] sm:$0xff] }
 0x202   : > { %v1583_v63 = vadd.f32 %v1455_v0, %v5964_v4  ;;  %v4862_v27 = vpop.f32.mrf.mxu0 }
 0x203   : > { %v4780_v36 = vpop.f32.mrf.mxu1  ;;  %v2038_v27 = vpack.c.bf16 %v2008_v46, %v2007_v59 }
 0x204   : > { %v1824_v14 = vpop.f32.mrf.mxu0  ;;  %5048 = vmatmul.mubr.msk.bf16.gmra.mxu0 %vm333_vm2, %v2036_v34 }
 0x205   : > { %v1460_v22 = vpop.f32.mrf.mxu1  ;;  %v6266_v43 = vadd.f32 %v1824_v14, %v1582_v49  ;;  %4966 = vmatmul.mubr.msk.bf16.gmra.mxu1 %vm333_vm2, %v2036_v34  ;;  %5051 = vmatprep.mubr.msk.bf16.mxu0 %vm5292_vm1, %v5291_v1 }
 0x206   : > { %v1584_v33 = vadd.f32 %v1460_v22, %v5968_v29  ;;  %v4865_v23 = vpop.f32.mrf.mxu0  ;;  %4969 = vmatprep.mubr.msk.bf16.mxu1 %vm5292_vm1, %v5291_v1 }
 0x207   : > { %v4783_v4 = vpop.f32.mrf.mxu1 }
 0x208   : > { %v1827_v28 = vpop.f32.mrf.mxu0  ;;  %v2009_v4 = vld [vmem:[%s5351_s26 + $0xe9] sm:$0xff] }
 0x209   : > { %v1463_v10 = vpop.f32.mrf.mxu1  ;;  %v6276_v61 = vadd.f32 %v1827_v28, %v1583_v63  ;;  %v2010_v28 = vld [vmem:[%s5351_s26 + $0xf1] sm:$0xff] }
 0x20a   : > { %v1585_v7 = vadd.f32 %v1463_v10, %v5979_v21  ;;  %v4866_v12 = vpop.f32.mrf.mxu0 }
 0x20b   : > { %v4784_v20 = vpop.f32.mrf.mxu1  ;;  %v2039_v12 = vpack.c.bf16 %v2010_v28, %v2009_v4 }
 0x20c   : > { %v1832_v49 = vpop.f32.mrf.mxu0  ;;  %5052 = vmatmul.mubr.msk.bf16.gmra.mxu0 %vm333_vm2, %v2037_v40 }
 0x20d   : > { %v1468_v29 = vpop.f32.mrf.mxu1  ;;  %v6280_v25 = vadd.f32 %v1832_v49, %v1584_v33  ;;  %4970 = vmatmul.mubr.msk.bf16.gmra.mxu1 %vm333_vm2, %v2037_v40  ;;  %5055 = vmatprep.mubr.msk.bf16.mxu0 %vm5292_vm1, %v5291_v1 }
 0x20e   : > { %v1586_v34 = vadd.f32 %v1468_v29, %v5983_v30  ;;  %v4869_v0 = vpop.f32.mrf.mxu0  ;;  %4973 = vmatprep.mubr.msk.bf16.mxu1 %vm5292_vm1, %v5291_v1 }
 0x20f   : > { %v4787_v21 = vpop.f32.mrf.mxu1 }
 0x210   : > { %v1835_v63 = vpop.f32.mrf.mxu0  ;;  %v2011_v21 = vld [vmem:[%s5351_s26 + $0xf9] sm:$0xff] }
 0x211   : > { %v1471_v36 = vpop.f32.mrf.mxu1  ;;  %v6290_v14 = vadd.f32 %v1835_v63, %v1585_v7  ;;  %v2012_v63 = vld [vmem:[%s5351_s26 + $0x101] sm:$0xff] }
 0x212   : > { %v1587_v22 = vadd.f32 %v1471_v36, %v5994_v17  ;;  %v4870_v52 = vpop.f32.mrf.mxu0 }
 0x213   : > { %v4788_v50 = vpop.f32.mrf.mxu1  ;;  %v2040_v52 = vpack.c.bf16 %v2012_v63, %v2011_v21 }
 0x214   : > { %v1840_v33 = vpop.f32.mrf.mxu0  ;;  %5056 = vmatmul.mubr.msk.bf16.gmra.mxu0 %vm333_vm2, %v2038_v27 }
 0x215   : > { %v1476_v30 = vpop.f32.mrf.mxu1  ;;  %v6294_v23 = vadd.f32 %v1840_v33, %v1586_v34  ;;  %4974 = vmatmul.mubr.msk.bf16.gmra.mxu1 %vm333_vm2, %v2038_v27  ;;  %5059 = vmatprep.mubr.msk.bf16.mxu0 %vm5292_vm1, %v5291_v1 }
 0x216   : > { %v1588_v40 = vadd.f32 %v1476_v30, %v5998_v26  ;;  %v4873_v10 = vpop.f32.mrf.mxu0  ;;  %4977 = vmatprep.mubr.msk.bf16.mxu1 %vm5292_vm1, %v5291_v1 }
 0x217   : > { %v4791_v17 = vpop.f32.mrf.mxu1 }
 0x218   : > { %v1843_v7 = vpop.f32.mrf.mxu0  ;;  %v2013_v17 = vld [vmem:[%s5351_s26 + $0x109] sm:$0xff] }
 0x219   : > { %v1479_v20 = vpop.f32.mrf.mxu1  ;;  %v6304_v49 = vadd.f32 %v1843_v7, %v1587_v22  ;;  %v2014_v7 = vld [vmem:[%s5351_s26 + $0x111] sm:$0xff] }
 0x21a   : > { %v1589_v29 = vadd.f32 %v1479_v20, %v6009_v42  ;;  %v4874_v59 = vpop.f32.mrf.mxu0 }
 0x21b   : > { %v4792_v46 = vpop.f32.mrf.mxu1  ;;  %v2041_v59 = vpack.c.bf16 %v2014_v7, %v2013_v17 }
 0x21c   : > { %v1848_v34 = vpop.f32.mrf.mxu0  ;;  %5060 = vmatmul.mubr.msk.bf16.gmra.mxu0 %vm333_vm2, %v2039_v12 }
 0x21d   : > { %v1484_v26 = vpop.f32.mrf.mxu1  ;;  %v6308_v0 = vadd.f32 %v1848_v34, %v1588_v40  ;;  %4978 = vmatmul.mubr.msk.bf16.gmra.mxu1 %vm333_vm2, %v2039_v12  ;;  %5063 = vmatprep.mubr.msk.bf16.mxu0 %vm5292_vm1, %v5291_v1 }
 0x21e   : > { %v1590_v27 = vadd.f32 %v1484_v26, %v6013_v5  ;;  %v4877_v36 = vpop.f32.mrf.mxu0  ;;  %4981 = vmatprep.mubr.msk.bf16.mxu1 %vm5292_vm1, %v5291_v1 }
 0x21f   : > { %v4795_v42 = vpop.f32.mrf.mxu1 }
 0x220   : > { %v1851_v22 = vpop.f32.mrf.mxu0 }
 0x221   : > { %v1487_v50 = vpop.f32.mrf.mxu1  ;;  %v6318_v33 = vadd.f32 %v1851_v22, %v1589_v29 }
 0x222   : > { %v1591_v30 = vadd.f32 %v1487_v50, %v6024_v41  ;;  %v4878_v4 = vpop.f32.mrf.mxu0 }
 0x223   : > { %v4796_v28 = vpop.f32.mrf.mxu1 }
 0x224   : > { %v1856_v40 = vpop.f32.mrf.mxu0  ;;  %5064 = vmatmul.mubr.msk.bf16.gmra.mxu0 %vm333_vm2, %v2040_v52  ;;  %v3472_v28 = vld [vmem:[%s7025_s2 + $0x8] sm:$0xff] }
 0x225   : > { %v1492_v5 = vpop.f32.mrf.mxu1  ;;  %v6322_v10 = vadd.f32 %v1856_v40, %v1590_v27  ;;  %4982 = vmatmul.mubr.msk.bf16.gmra.mxu1 %vm333_vm2, %v2040_v52  ;;  %5067 = vmatprep.mubr.msk.bf16.mxu0 %vm5292_vm1, %v5291_v1  ;;  %v5293_v27 = vmov 0   ;;  %v2016_v52 = vld [vmem:[%s5351_s26 + $0x121] sm:$0xff] }
 0x226   : > { %v1592_v12 = vadd.f32 %v1492_v5, %v6028_v19  ;;  %v4881_v20 = vpop.f32.mrf.mxu0  ;;  %4985 = vmatprep.mubr.msk.bf16.mxu1 %vm5292_vm1, %v5291_v1  ;;  %5281 = vset.pattern.permute.xlu0 %v5293_v27  ;;  %v3471_v19 = vld [vmem:[%s7025_s2] sm:$0xff] }
 0x227   : > { %v4799_v41 = vpop.f32.mrf.mxu1  ;;  %5282 = vset.pattern.permute.xlu1 %v5293_v27  ;;  %3514 = vperm.xlu0 %5281, %v3471_v19  }
 0x228   : > { %v1859_v29 = vpop.f32.mrf.mxu0  ;;  %v3473_v41 = vld [vmem:[%s7025_s2 + $0x10] sm:$0xff] }
 0x229   : > { %v1495_v46 = vpop.f32.mrf.mxu1  ;;  %v6332_v34 = vadd.f32 %v1859_v29, %v1591_v30  ;;  %v3475_v29 = vld [vmem:[%s7025_s2 + $0x20] sm:$0xff]  ;;  %3524 = vperm.xlu1 %5282, %v3473_v41  }
 0x22a   : > { %v1593_v26 = vadd.f32 %v1495_v46, %v6039_v53  ;;  %v4882_v21 = vpop.f32.mrf.mxu0  ;;  %v2015_v53 = vld [vmem:[%s5351_s26 + $0x119] sm:$0xff] }
 0x22b   : > { %v4800_v63 = vpop.f32.mrf.mxu1  ;;  %v2042_v5 = vpack.c.bf16 %v2016_v52, %v2015_v53  ;;  %3519 = vperm.xlu0 %5281, %v3472_v28  }
 0x22c   : > { %v1864_v36 = vpop.f32.mrf.mxu0  ;;  %5068 = vmatmul.mubr.msk.bf16.gmra.mxu0 %vm333_vm2, %v2041_v59 }
 0x22d   : > { %v1500_v42 = vpop.f32.mrf.mxu1  ;;  %v6339_v22 = vadd.f32 %v1864_v36, %v1592_v12  ;;  %4986 = vmatmul.mubr.msk.bf16.gmra.mxu1 %vm333_vm2, %v2041_v59  ;;  %5071 = vmatprep.mubr.msk.bf16.mxu0 %vm5292_vm1, %v5291_v1  ;;  %v3474_v36 = vld [vmem:[%s7025_s2 + $0x18] sm:$0xff] }
 0x22e   : > { %v1594_v50 = vadd.f32 %v1500_v42, %v6043_v37  ;;  %v4885_v30 = vpop.f32.mrf.mxu0  ;;  %4989 = vmatprep.mubr.msk.bf16.mxu1 %vm5292_vm1, %v5291_v1  ;;  %v3477_v42 = vld [vmem:[%s7025_s2 + $0x30] sm:$0xff]  ;;  %3529 = vperm.xlu1 %5282, %v3474_v36  }
 0x22f   : > { %v4803_v4 = vpop.f32.mrf.mxu1  ;;  %3534 = vperm.xlu0 %5281, %v3475_v29  }
 0x230   : > { %v1867_v40 = vpop.f32.mrf.mxu0 }
 0x231   : > { %v1503_v17 = vpop.f32.mrf.mxu1  ;;  %v6352_v7 = vadd.f32 %v1867_v40, %v1593_v26  ;;  %v2018_v26 = vld [vmem:[%s5351_s26 + $0x131] sm:$0xff]  ;;  %v3476_v40 = vld [vmem:[%s7025_s2 + $0x28] sm:$0xff] }
 0x232   : > { %v1595_v12 = vadd.f32 %v1503_v17, %v6054_v39  ;;  %v4886_v37 = vpop.f32.mrf.mxu0  ;;  %v2017_v39 = vld [vmem:[%s5351_s26 + $0x129] sm:$0xff]  ;;  %3539 = vperm.xlu1 %5282, %v3476_v40  }
 0x233   : > { %v4804_v20 = vpop.f32.mrf.mxu1  ;;  %v2043_v52 = vpack.c.bf16 %v2018_v26, %v2017_v39  ;;  %3544 = vperm.xlu0 %5281, %v3477_v42   ;;  %v3481_v39 = vld [vmem:[%s7025_s2 + $0x50] sm:$0xff] }
 0x234   : > { %v1872_v59 = vpop.f32.mrf.mxu0  ;;  %5072 = vmatmul.mubr.msk.bf16.gmra.mxu0 %vm333_vm2, %v2042_v5  ;;  %v2020_v20 = vld [vmem:[%s5351_s26 + $0x141] sm:$0xff] }
 0x235   : > { %v1508_v46 = vpop.f32.mrf.mxu1  ;;  %v6362_v21 = vadd.f32 %v1872_v59, %v1594_v50  ;;  %4990 = vmatmul.mubr.msk.bf16.gmra.mxu1 %vm333_vm2, %v2042_v5  ;;  %5075 = vmatprep.mubr.msk.bf16.mxu0 %vm5292_vm1, %v5291_v1  ;;  %v3479_v5 = vld [vmem:[%s7025_s2 + $0x40] sm:$0xff] }
 0x236   : > { %v1596_v63 = vadd.f32 %v1508_v46, %v6058_v38  ;;  %v4889_v27 = vpop.f32.mrf.mxu0  ;;  %4993 = vmatprep.mubr.msk.bf16.mxu1 %vm5292_vm1, %v5291_v1  ;;  %v3478_v46 = vld [vmem:[%s7025_s2 + $0x38] sm:$0xff] }
 0x237   : > { %v4807_v19 = vpop.f32.mrf.mxu1  ;;  %3554 = vperm.xlu0 %5281, %v3479_v5   ;;  %3549 = vperm.xlu1 %5282, %v3478_v46  }
 0x238   : > { %v1875_v53 = vpop.f32.mrf.mxu0 }
 0x239   : > { %v1511_v50 = vpop.f32.mrf.mxu1  ;;  %v6378_v38 = vadd.f32 %v1875_v53, %v1595_v12  ;;  %v3480_v53 = vld [vmem:[%s7025_s2 + $0x48] sm:$0xff] }
 0x23a   : > { %v1597_v30 = vadd.f32 %v1511_v50, %v6069_v9  ;;  %v4890_v4 = vpop.f32.mrf.mxu0  ;;  %v2019_v9 = vld [vmem:[%s5351_s26 + $0x139] sm:$0xff] }
 0x23b   : > { %v4808_v28 = vpop.f32.mrf.mxu1  ;;  %3564 = vperm.xlu0 %5281, %v3481_v39   ;;  %3559 = vperm.xlu1 %5282, %v3480_v53  }
 0x23c   : > { %v1880_v17 = vpop.f32.mrf.mxu0  ;;  %5076 = vmatmul.mubr.msk.bf16.gmra.mxu0 %vm333_vm2, %v2043_v52  ;;  %v2022_v28 = vld [vmem:[%s5351_s26 + $0x151] sm:$0xff] }
 0x23d   : > { %v1516_v37 = vpop.f32.mrf.mxu1  ;;  %v6388_v12 = vadd.f32 %v1880_v17, %v1596_v63  ;;  %4994 = vmatmul.mubr.msk.bf16.gmra.mxu1 %vm333_vm2, %v2043_v52  ;;  %5079 = vmatprep.mubr.msk.bf16.mxu0 %vm5292_vm1, %v5291_v1  ;;  %v2044_v63 = vpack.c.bf16 %v2020_v20, %v2019_v9  ;;  %v3483_v52 = vld [vmem:[%s7025_s2 + $0x60] sm:$0xff]  ;;  %v3485_v9 = vld [vmem:[%s7025_s2 + $0x70] sm:$0xff] }
 0x23e   : > { %v1598_v41 = vadd.f32 %v1516_v37, %v6073_v57  ;;  %v4893_v29 = vpop.f32.mrf.mxu0  ;;  %4997 = vmatprep.mubr.msk.bf16.mxu1 %vm5292_vm1, %v5291_v1  ;;  %v3482_v37 = vld [vmem:[%s7025_s2 + $0x58] sm:$0xff] }
 0x23f   : > { %v4811_v59 = vpop.f32.mrf.mxu1  ;;  %3574 = vperm.xlu0 %5281, %v3483_v52   ;;  %3569 = vperm.xlu1 %5282, %v3482_v37  }
 0x240   : > { %v1883_v26 = vpop.f32.mrf.mxu0 }
 0x241   : > { %v1519_v27 = vpop.f32.mrf.mxu1  ;;  %v6404_v57 = vadd.f32 %v1883_v26, %v1597_v30  ;;  %v3484_v26 = vld [vmem:[%s7025_s2 + $0x68] sm:$0xff] }
 0x242   : > { %v1599_v19 = vadd.f32 %v1519_v27, %v6086_v35  ;;  %v4894_v36 = vpop.f32.mrf.mxu0  ;;  %v2021_v35 = vld [vmem:[%s5351_s26 + $0x149] sm:$0xff] }
 0x243   : > { %v4812_v42 = vpop.f32.mrf.mxu1  ;;  %3584 = vperm.xlu0 %5281, %v3485_v9   ;;  %3579 = vperm.xlu1 %5282, %v3484_v26  }
 0x244   : > { %v1888_v50 = vpop.f32.mrf.mxu0  ;;  %5080 = vmatmul.mubr.msk.bf16.gmra.mxu0 %vm333_vm2, %v2044_v63  ;;  %v2394_v42 = vld [vmem:[%s5351_s26 + $0x161] sm:$0xff] }
 0x245   : > { %v1524_v4 = vpop.f32.mrf.mxu1  ;;  %v6414_v30 = vadd.f32 %v1888_v50, %v1598_v41  ;;  %4998 = vmatmul.mubr.msk.bf16.gmra.mxu1 %vm333_vm2, %v2044_v63  ;;  %5083 = vmatprep.mubr.msk.bf16.mxu0 %vm5292_vm1, %v5291_v1  ;;  %v2045_v41 = vpack.c.bf16 %v2022_v28, %v2021_v35  ;;  %v3487_v63 = vld [vmem:[%s7025_s2 + $0x80] sm:$0xff]  ;;  %v2023_v50 = vld [vmem:[%s5351_s26 + $0x159] sm:$0xf]  ;;  %v3489_v28 = vld [vmem:[%s7025_s2 + $0x90] sm:$0xff] }
 0x246   : > { %v1600_v40 = vadd.f32 %v1524_v4, %v6090_v8  ;;  %v4897_v5 = vpop.f32.mrf.mxu0  ;;  %5001 = vmatprep.mubr.msk.bf16.mxu1 %vm5292_vm1, %v5291_v1  ;;  %v3486_v35 = vld [vmem:[%s7025_s2 + $0x78] sm:$0xff]  ;;  %v2046_v37 = vpack.c.bf16 %v2023_v50, %v2023_v50 }
 0x247   : > { %v4815_v17 = vpop.f32.mrf.mxu1  ;;  %3594 = vperm.xlu0 %5281, %v3487_v63   ;;  %3589 = vperm.xlu1 %5282, %v3486_v35  }
 0x248   : > { %v1891_v20 = vpop.f32.mrf.mxu0 }
 0x249   : > { %v1527_v29 = vpop.f32.mrf.mxu1  ;;  %v6430_v8 = vadd.f32 %v1891_v20, %v1599_v19 }
 0x24a   : > { %v1601_v59 = vadd.f32 %v1527_v29, %v6101_v32  ;;  %v4898_v46 = vpop.f32.mrf.mxu0  ;;  %v2393_v32 = vld [vmem:[%s5351_s26 + $0x159] sm:$0xff]  ;;  %v3488_v29 = vld [vmem:[%s7025_s2 + $0x88] sm:$0xff] }
 0x24b   : > { %v4816_v39 = vpop.f32.mrf.mxu1  ;;  %v2417_v5 = vpack.c.bf16 %v2394_v42, %v2393_v32  ;;  %3604 = vperm.xlu0 %5281, %v3489_v28   ;;  %v3491_v46 = vld [vmem:[%s7025_s2 + $0xa0] sm:$0xff]  ;;  %3599 = vperm.xlu1 %5282, %v3488_v29   ;;  %v2728_v32 = vld [vmem:[%s5351_s26 + $0x32] sm:$0xff] }
 0x24c   : > { %v1896_v27 = vpop.f32.mrf.mxu0  ;;  %5084 = vmatmul.mubr.msk.bf16.gmra.mxu0 %vm333_vm2, %v2045_v41 }
 0x24d   : > { %v1532_v19 = vpop.f32.mrf.mxu1  ;;  %v6440_v36 = vadd.f32 %v1896_v27, %v1600_v40  ;;  %5002 = vmatmul.mubr.msk.bf16.gmra.mxu1 %vm333_vm2, %v2045_v41  ;;  %5087 = vmatprep.mubr.msk.bf16.mxu0 %vm5292_vm1, %v5291_v1 }
 0x24e   : > { %v1602_v53 = vadd.f32 %v1532_v19, %v6108_v54  ;;  %v4901_v52 = vpop.f32.mrf.mxu0  ;;  %5005 = vmatprep.mubr.msk.bf16.mxu1 %vm5292_vm1, %v5291_v1  ;;  %v2727_v19 = vld [vmem:[%s5351_s26 + $0x2a] sm:$0xff] }
 0x24f   : > { %v4819_v4 = vpop.f32.mrf.mxu1  ;;  %3614 = vperm.xlu0 %5281, %v3491_v46   ;;  %v3493_v52 = vld [vmem:[%s7025_s2 + $0xb0] sm:$0xff]  ;;  %v2770_v28 = vpack.c.bf16 %v2728_v32, %v2727_v19 }
 0x250   : > { %v1899_v40 = vpop.f32.mrf.mxu0  ;;  %v3100_v46 = vld [vmem:[%s5351_s26 + $0x33] sm:$0xff] }
 0x251   : > { %v1535_v17 = vpop.f32.mrf.mxu1  ;;  %v6457_v54 = vadd.f32 %v1899_v40, %v1601_v59  ;;  %v3497_v32 = vld [vmem:[%s7025_s2 + $0xd0] sm:$0xff] }
 0x252   : > { %v1603_v9 = vadd.f32 %v1535_v17, %v6119_v6  ;;  %v4902_v20 = vpop.f32.mrf.mxu0  ;;  %v2395_v6 = vld [vmem:[%s5351_s26 + $0x169] sm:$0xf] }
 0x253   : > { %v4820_v41 = vpop.f32.mrf.mxu1  ;;  %v2418_v4 = vpack.c.bf16 %v2395_v6, %v2395_v6  ;;  %3624 = vperm.xlu0 %5281, %v3493_v52   ;;  %v3495_v20 = vld [vmem:[%s7025_s2 + $0xc0] sm:$0xff] }
 0x254   : > { %v1904_v39 = vpop.f32.mrf.mxu0  ;;  %5088 = vmatmul.mubr.msk.bf16.gmra.mxu0 %vm333_vm2, %v2417_v5  ;;  %v2729_v6 = vld [vmem:[%s5351_s26 + $0x3a] sm:$0xff] }
 0x255   : > { %v1540_v59 = vpop.f32.mrf.mxu1  ;;  %v6467_v26 = vadd.f32 %v1904_v39, %v1602_v53  ;;  %5006 = vmatmul.mubr.msk.bf16.gmra.mxu1 %vm333_vm2, %v2046_v37  ;;  %5091 = vmatprep.mubr.msk.bf16.mxu0 %vm5292_vm1, %v5291_v1  ;;  %v3490_v53 = vld [vmem:[%s7025_s2 + $0x98] sm:$0xff]  ;;  %v3492_v37 = vld [vmem:[%s7025_s2 + $0xa8] sm:$0xff] }
 0x256   : > { %v1604_v63 = vadd.f32 %v1540_v59, %v6127_v62  ;;  %v4905_v27 = vpop.f32.mrf.mxu0  ;;  %5097 = vmatprep.mubr.msk.bf16.mxu1 %vm5292_vm1, %v5291_v1  ;;  %3609 = vperm.xlu1 %5282, %v3490_v53  }
 0x257   : > { %v4823_v42 = vpop.f32.mrf.mxu1  ;;  %v2730_v27 = vld [vmem:[%s5351_s26 + $0x42] sm:$0xff]  ;;  %3634 = vperm.xlu0 %5281, %v3495_v20  }
 0x258   : > { %v1907_v50 = vpop.f32.mrf.mxu0 }
 0x259   : > { %v1543_v62 = vpop.f32.mrf.mxu1  ;;  %v6484_v35 = vadd.f32 %v1907_v50, %v1603_v9  ;;  %v2771_v50 = vpack.c.bf16 %v2730_v27, %v2729_v6  ;;  %v3501_v27 = vld [vmem:[%s7025_s2 + $0xf0] sm:$0xff] }
 0x25a   : > { %v1605_v40 = vadd.f32 %v1543_v62, %v6137_v31  ;;  %v4906_v5 = vpop.f32.mrf.mxu0  ;;  %3619 = vperm.xlu1 %5282, %v3492_v37   ;;  %v3099_v31 = vld [vmem:[%s5351_s26 + $0x2b] sm:$0xff] }
 0x25b   : > { %v4824_v17 = vpop.f32.mrf.mxu1  ;;  %v3142_v53 = vpack.c.bf16 %v3100_v46, %v3099_v31  ;;  %3644 = vperm.xlu0 %5281, %v3497_v32   ;;  %v3496_v5 = vld [vmem:[%s7025_s2 + $0xc8] sm:$0xff] }
 0x25c   : > { %v1912_v41 = vpop.f32.mrf.mxu0  ;;  %5092 = vmatmul.mubr.msk.bf16.gmra.mxu0 %vm333_vm2, %v2418_v4  ;;  %v3499_v17 = vld [vmem:[%s7025_s2 + $0xe0] sm:$0xff]  ;;  %v2731_v46 = vld [vmem:[%s5351_s26 + $0x4a] sm:$0xff] }
 0x25d   : > { %v1548_v9 = vpop.f32.mrf.mxu1  ;;  %v6494_v29 = vadd.f32 %v1912_v41, %v1604_v63  ;;  %5098 = vmatmul.mubr.msk.bf16.vlgmr.msra.gmra.mxu1 %vm333_vm2, %v2770_v28  ;;  %5183 = vmatprep.mubr.msk.bf16.mxu0 %vm5292_vm1, %v5291_v1  ;;  %v3494_v63 = vld [vmem:[%s7025_s2 + $0xb8] sm:$0xff]  ;;  %v3102_v41 = vld [vmem:[%s5351_s26 + $0x43] sm:$0xff] }
 0x25e   : > { %v1606_v39 = vadd.f32 %v1548_v9, %v6142_v16  ;;  %v4909_v59 = vpop.f32.mrf.mxu0  ;;  %5101 = vmatprep.mubr.msk.bf16.mxu1 %vm5292_vm1, %v5291_v1  ;;  %3629 = vperm.xlu1 %5282, %v3494_v63  }
 0x25f   : > { %v4827_v19 = vpop.f32.mrf.mxu1  ;;  %v2732_v59 = vld [vmem:[%s5351_s26 + $0x52] sm:$0xff]  ;;  %3654 = vperm.xlu0 %5281, %v3499_v17  }
 0x260   : > { %v1915_v42 = vpop.f32.mrf.mxu0 }
 0x261   : > { %v1551_v16 = vpop.f32.mrf.mxu1  ;;  %v6512_v52 = vadd.f32 %v1915_v42, %v1605_v40  ;;  %v2772_v42 = vpack.c.bf16 %v2732_v59, %v2731_v46  ;;  %v3505_v59 = vld [vmem:[%s7025_s2 + $0x110] sm:$0xff] }
 0x262   : > { %v1607_v4 = vadd.f32 %v1551_v16, %v6152_v56  ;;  %v4910_v62 = vpop.f32.mrf.mxu0  ;;  %3639 = vperm.xlu1 %5282, %v3496_v5   ;;  %v3101_v56 = vld [vmem:[%s5351_s26 + $0x3b] sm:$0xff] }
 0x263   : > { %v4828_v28 = vpop.f32.mrf.mxu1  ;;  %v3143_v63 = vpack.c.bf16 %v3102_v41, %v3101_v56  ;;  %3664 = vperm.xlu0 %5281, %v3501_v27   ;;  %v3500_v62 = vld [vmem:[%s7025_s2 + $0xe8] sm:$0xff]  ;;  %v2733_v41 = vld [vmem:[%s5351_s26 + $0x5a] sm:$0xff] }
 0x264   : > { %v1920_v37 = vpop.f32.mrf.mxu0  ;;  %5184 = vmatmul.mubr.msk.bf16.vlgmr.msra.gmra.mxu0 %vm333_vm2, %v3142_v53  ;;  %v3503_v28 = vld [vmem:[%s7025_s2 + $0x100] sm:$0xff] }
 0x265   : > { %v1556_v40 = vpop.f32.mrf.mxu1  ;;  %v6522_v20 = vadd.f32 %v1920_v37, %v1606_v39  ;;  %5102 = vmatmul.mubr.msk.bf16.gmra.mxu1 %vm333_vm2, %v2771_v50  ;;  %5187 = vmatprep.mubr.msk.bf16.mxu0 %vm5292_vm1, %v5291_v1  ;;  %v3498_v39 = vld [vmem:[%s7025_s2 + $0xd8] sm:$0xff] }
 0x266   : > { %v1608_v9 = vadd.f32 %v1556_v40, %v6156_v48  ;;  %v4913_v31 = vpop.f32.mrf.mxu0  ;;  %5105 = vmatprep.mubr.msk.bf16.mxu1 %vm5292_vm1, %v5291_v1  ;;  %3649 = vperm.xlu1 %5282, %v3498_v39   ;;  %v3104_v37 = vld [vmem:[%s5351_s26 + $0x53] sm:$0xff] }
 0x267   : > { %v4831_v6 = vpop.f32.mrf.mxu1  ;;  %v2734_v31 = vld [vmem:[%s5351_s26 + $0x62] sm:$0xff]  ;;  %3674 = vperm.xlu0 %5281, %v3503_v28  }
 0x268   : > { %v1923_v19 = vpop.f32.mrf.mxu0  ;;  %v3105_v28 = vld [vmem:[%s5351_s26 + $0x5b] sm:$0xff] }
 0x269   : > { %v1559_v48 = vpop.f32.mrf.mxu1  ;;  %v6540_v32 = vadd.f32 %v1923_v19, %v1607_v4  ;;  %v2773_v19 = vpack.c.bf16 %v2734_v31, %v2733_v41  ;;  %v3509_v31 = vld [vmem:[%s7025_s2 + $0x130] sm:$0xff] }
 0x26a   : > { %v1609_v53 = vadd.f32 %v1559_v48, %v6166_v51  ;;  %v4914_v16 = vpop.f32.mrf.mxu0  ;;  %3659 = vperm.xlu1 %5282, %v3500_v62   ;;  %v3103_v51 = vld [vmem:[%s5351_s26 + $0x4b] sm:$0xff] }
 0x26b   : > { %v4832_v50 = vpop.f32.mrf.mxu1  ;;  %v3144_v39 = vpack.c.bf16 %v3104_v37, %v3103_v51  ;;  %3684 = vperm.xlu0 %5281, %v3505_v59   ;;  %v3507_v16 = vld [vmem:[%s7025_s2 + $0x120] sm:$0xff]  ;;  %v2735_v37 = vld [vmem:[%s5351_s26 + $0x6a] sm:$0xff] }
 0x26c   : > { %v1928_v5 = vpop.f32.mrf.mxu0  ;;  %5188 = vmatmul.mubr.msk.bf16.gmra.mxu0 %vm333_vm2, %v3143_v63 }
 0x26d   : > { %v1564_v4 = vpop.f32.mrf.mxu1  ;;  %v6550_v17 = vadd.f32 %v1928_v5, %v1608_v9  ;;  %5106 = vmatmul.mubr.msk.bf16.gmra.mxu1 %vm333_vm2, %v2772_v42  ;;  %5191 = vmatprep.mubr.msk.bf16.mxu0 %vm5292_vm1, %v5291_v1  ;;  %v3502_v9 = vld [vmem:[%s7025_s2 + $0xf8] sm:$0xff]  ;;  %v3504_v42 = vld [vmem:[%s7025_s2 + $0x108] sm:$0xff] }
 0x26e   : > { %v1610_v40 = vadd.f32 %v1564_v4, %v6170_v3  ;;  %v4917_v56 = vpop.f32.mrf.mxu0  ;;  %5109 = vmatprep.mubr.msk.bf16.mxu1 %vm5292_vm1, %v5291_v1  ;;  %3669 = vperm.xlu1 %5282, %v3502_v9   ;;  %v3106_v5 = vld [vmem:[%s5351_s26 + $0x63] sm:$0xff] }
 0x26f   : > { %v4835_v46 = vpop.f32.mrf.mxu1  ;;  %v2736_v56 = vld [vmem:[%s5351_s26 + $0x72] sm:$0xff]  ;;  %3694 = vperm.xlu0 %5281, %v3507_v16   ;;  %v3145_v9 = vpack.c.bf16 %v3106_v5, %v3105_v28  ;;  %v2737_v5 = vld [vmem:[%s5351_s26 + $0x7a] sm:$0xff] }
 0x270   : > { %v1931_v6 = vpop.f32.mrf.mxu0  ;;  %v2774_v59 = vpack.c.bf16 %v2736_v56, %v2735_v37 }
 0x271   : > { %v1567_v3 = vpop.f32.mrf.mxu1  ;;  %v6568_v27 = vadd.f32 %v1931_v6, %v1609_v53 }
 0x272   : > { %v4918_v63 = vpop.f32.mrf.mxu0  ;;  %3679 = vperm.xlu1 %5282, %v3504_v42  }
 0x273   : > { %v4836_v48 = vpop.f32.mrf.mxu1  ;;  %3704 = vperm.xlu0 %5281, %v3509_v31   ;;  %v3511_v63 = vld [vmem:[%s7025_s2 + $0x140] sm:$0xf] }
 0x274   : > { %v1936_v50 = vpop.f32.mrf.mxu0  ;;  %5192 = vmatmul.mubr.msk.bf16.gmra.mxu0 %vm333_vm2, %v3144_v39 }
 0x275   : > { %v6577_v53 = vadd.f32 %v1936_v50, %v1610_v40  ;;  %v2148_v62 = vpop.f32.mrf.mxu1  ;;  %5110 = vmatmul.mubr.msk.bf16.gmra.mxu1 %vm333_vm2, %v2773_v19  ;;  %5195 = vmatprep.mubr.msk.bf16.mxu0 %vm5292_vm1, %v5291_v1  ;;  %v3506_v40 = vld [vmem:[%s7025_s2 + $0x118] sm:$0xff]  ;;  %v3508_v19 = vld [vmem:[%s7025_s2 + $0x128] sm:$0xff] }
 0x276   : > { %v2314_v4 = vadd.f32 %v2148_v62, %v6182_v60  ;;  %v4921_v51 = vpop.f32.mrf.mxu0  ;;  %5113 = vmatprep.mubr.msk.bf16.mxu1 %vm5292_vm1, %v5291_v1  ;;  %3689 = vperm.xlu1 %5282, %v3506_v40   ;;  %v3108_v50 = vld [vmem:[%s5351_s26 + $0x73] sm:$0xff] }
 0x277   : > { %v4927_v41 = vpop.f32.mrf.mxu1  ;;  %v2738_v51 = vld [vmem:[%s5351_s26 + $0x82] sm:$0xff]  ;;  %3714 = vperm.xlu0 %5281, %v3511_v63  }
 0x278   : > { %v1939_v46 = vpop.f32.mrf.mxu0 }
 0x279   : > { %v2151_v60 = vpop.f32.mrf.mxu1 }
 0x27a   : > { %v2315_v6 = vadd.f32 %v2151_v60, %v6192_v11  ;;  %v4922_v39 = vpop.f32.mrf.mxu0  ;;  %3699 = vperm.xlu1 %5282, %v3508_v19   ;;  %v3107_v11 = vld [vmem:[%s5351_s26 + $0x6b] sm:$0xff]  ;;  %v3110_v19 = vld [vmem:[%s5351_s26 + $0x83] sm:$0xff] }
 0x27b   : > { %v4928_v3 = vpop.f32.mrf.mxu1  ;;  %v3146_v41 = vpack.c.bf16 %v3108_v50, %v3107_v11 }
 0x27c   : > { %v2520_v48 = vpop.f32.mrf.mxu0  ;;  %5196 = vmatmul.mubr.msk.bf16.gmra.mxu0 %vm333_vm2, %v3145_v9 }
 0x27d   : > { %v2156_v42 = vpop.f32.mrf.mxu1  ;;  %v6603_v16 = vadd.f32 %v2520_v48, %v2314_v4  ;;  %5114 = vmatmul.mubr.msk.bf16.gmra.mxu1 %vm333_vm2, %v2774_v59  ;;  %5199 = vmatprep.mubr.msk.bf16.mxu0 %vm5292_vm1, %v5291_v1  ;;  %v3510_v4 = vld [vmem:[%s7025_s2 + $0x138] sm:$0xff] }
 0x27e   : > { %v2316_v62 = vadd.f32 %v2156_v42, %v6196_v58  ;;  %v5013_v28 = vpop.f32.mrf.mxu0  ;;  %5117 = vmatprep.mubr.msk.bf16.mxu1 %vm5292_vm1, %v5291_v1  ;;  %3709 = vperm.xlu1 %5282, %v3510_v4   ;;  %v2775_v58 = vpack.c.bf16 %v2738_v51, %v2737_v5  ;;  %v2740_v42 = vld [vmem:[%s5351_s26 + $0x92] sm:$0xff] }
 0x27f   : > { %v4931_v37 = vpop.f32.mrf.mxu1 }
 0x280   : > { %v2523_v56 = vpop.f32.mrf.mxu0 }
 0x281   : > { %v2159_v40 = vpop.f32.mrf.mxu1  ;;  %v6618_v31 = vadd.f32 %v2523_v56, %v2315_v6  ;;  %v3109_v6 = vld [vmem:[%s5351_s26 + $0x7b] sm:$0xff] }
 0x282   : > { %v2317_v46 = vadd.f32 %v2159_v40, %v6206_v18  ;;  %v5014_v9 = vpop.f32.mrf.mxu0  ;;  %v2739_v18 = vld [vmem:[%s5351_s26 + $0x8a] sm:$0xff] }
 0x283   : > { %v4932_v60 = vpop.f32.mrf.mxu1  ;;  %v2776_v51 = vpack.c.bf16 %v2740_v42, %v2739_v18 }
 0x284   : > { %v2528_v59 = vpop.f32.mrf.mxu0  ;;  %5200 = vmatmul.mubr.msk.bf16.gmra.mxu0 %vm333_vm2, %v3146_v41 }
 0x285   : > { %v2164_v39 = vpop.f32.mrf.mxu1  ;;  %v6622_v3 = vadd.f32 %v2528_v59, %v2316_v62  ;;  %5118 = vmatmul.mubr.msk.bf16.gmra.mxu1 %vm333_vm2, %v2775_v58  ;;  %5203 = vmatprep.mubr.msk.bf16.mxu0 %vm5292_vm1, %v5291_v1  ;;  %v3147_v62 = vpack.c.bf16 %v3110_v19, %v3109_v6  ;;  %v3111_v58 = vld [vmem:[%s5351_s26 + $0x8b] sm:$0xff]  ;;  %v2742_v59 = vld [vmem:[%s5351_s26 + $0xa2] sm:$0xff] }
 0x286   : > { %v2318_v63 = vadd.f32 %v2164_v39, %v6210_v2  ;;  %v5017_v48 = vpop.f32.mrf.mxu0  ;;  %5121 = vmatprep.mubr.msk.bf16.mxu1 %vm5292_vm1, %v5291_v1 }
 0x287   : > { %v4935_v11 = vpop.f32.mrf.mxu1 }
 0x288   : > { %v2531_v50 = vpop.f32.mrf.mxu0 }
 0x289   : > { %v2167_v28 = vpop.f32.mrf.mxu1  ;;  %v6634_v5 = vadd.f32 %v2531_v50, %v2317_v46  ;;  %v3112_v46 = vld [vmem:[%s5351_s26 + $0x93] sm:$0xff] }
 0x28a   : > { %v2319_v37 = vadd.f32 %v2167_v28, %v6220_v55  ;;  %v5018_v2 = vpop.f32.mrf.mxu0  ;;  %v2741_v55 = vld [vmem:[%s5351_s26 + $0x9a] sm:$0xff]  ;;  %v3148_v19 = vpack.c.bf16 %v3112_v46, %v3111_v58 }
 0x28b   : > { %v4936_v4 = vpop.f32.mrf.mxu1  ;;  %v2777_v18 = vpack.c.bf16 %v2742_v59, %v2741_v55 }
 0x28c   : > { %v2536_v56 = vpop.f32.mrf.mxu0  ;;  %5204 = vmatmul.mubr.msk.bf16.gmra.mxu0 %vm333_vm2, %v3147_v62 }
 0x28d   : > { %v2172_v41 = vpop.f32.mrf.mxu1  ;;  %v6638_v40 = vadd.f32 %v2536_v56, %v2318_v63  ;;  %5122 = vmatmul.mubr.msk.bf16.gmra.mxu1 %vm333_vm2, %v2776_v51  ;;  %5207 = vmatprep.mubr.msk.bf16.mxu0 %vm5292_vm1, %v5291_v1  ;;  %v3113_v51 = vld [vmem:[%s5351_s26 + $0x9b] sm:$0xff]  ;;  %v2744_v56 = vld [vmem:[%s5351_s26 + $0xb2] sm:$0xff] }
 0x28e   : > { %v2320_v9 = vadd.f32 %v2172_v41, %v6224_v24  ;;  %v5021_v60 = vpop.f32.mrf.mxu0  ;;  %5125 = vmatprep.mubr.msk.bf16.mxu1 %vm5292_vm1, %v5291_v1 }
 0x28f   : > { %v4939_v39 = vpop.f32.mrf.mxu1 }
 0x290   : > { %v2539_v6 = vpop.f32.mrf.mxu0 }
 0x291   : > { %v2175_v63 = vpop.f32.mrf.mxu1  ;;  %v6650_v48 = vadd.f32 %v2539_v6, %v2319_v37  ;;  %v3114_v37 = vld [vmem:[%s5351_s26 + $0xa3] sm:$0xff] }
 0x292   : > { %v2321_v42 = vadd.f32 %v2175_v63, %v6234_v45  ;;  %v5022_v24 = vpop.f32.mrf.mxu0  ;;  %v2743_v45 = vld [vmem:[%s5351_s26 + $0xaa] sm:$0xff]  ;;  %v3149_v46 = vpack.c.bf16 %v3114_v37, %v3113_v51 }
 0x293   : > { %v4940_v11 = vpop.f32.mrf.mxu1  ;;  %v2778_v55 = vpack.c.bf16 %v2744_v56, %v2743_v45 }
 0x294   : > { %v2544_v50 = vpop.f32.mrf.mxu0  ;;  %5208 = vmatmul.mubr.msk.bf16.gmra.mxu0 %vm333_vm2, %v3148_v19 }
 0x295   : > { %v2180_v62 = vpop.f32.mrf.mxu1  ;;  %v6654_v28 = vadd.f32 %v2544_v50, %v2320_v9  ;;  %5126 = vmatmul.mubr.msk.bf16.gmra.mxu1 %vm333_vm2, %v2777_v18  ;;  %5211 = vmatprep.mubr.msk.bf16.mxu0 %vm5292_vm1, %v5291_v1  ;;  %v3115_v18 = vld [vmem:[%s5351_s26 + $0xab] sm:$0xff]  ;;  %v2746_v50 = vld [vmem:[%s5351_s26 + $0xc2] sm:$0xff] }
 0x296   : > { %v2322_v2 = vadd.f32 %v2180_v62, %v6238_v47  ;;  %v5025_v4 = vpop.f32.mrf.mxu0  ;;  %5129 = vmatprep.mubr.msk.bf16.mxu1 %vm5292_vm1, %v5291_v1 }
 0x297   : > { %v4943_v41 = vpop.f32.mrf.mxu1 }
 0x298   : > { %v2547_v58 = vpop.f32.mrf.mxu0 }
 0x299   : > { %v2183_v9 = vpop.f32.mrf.mxu1  ;;  %v6666_v60 = vadd.f32 %v2547_v58, %v2321_v42  ;;  %v3116_v42 = vld [vmem:[%s5351_s26 + $0xb3] sm:$0xff] }
 0x29a   : > { %v2323_v59 = vadd.f32 %v2183_v9, %v6248_v13  ;;  %v5026_v47 = vpop.f32.mrf.mxu0  ;;  %v2745_v13 = vld [vmem:[%s5351_s26 + $0xba] sm:$0xff]  ;;  %v3150_v37 = vpack.c.bf16 %v3116_v42, %v3115_v18 }
 0x29b   : > { %v4944_v39 = vpop.f32.mrf.mxu1  ;;  %v2779_v45 = vpack.c.bf16 %v2746_v50, %v2745_v13 }
 0x29c   : > { %v2552_v6 = vpop.f32.mrf.mxu0  ;;  %5212 = vmatmul.mubr.msk.bf16.gmra.mxu0 %vm333_vm2, %v3149_v46 }
 0x29d   : > { %v2188_v19 = vpop.f32.mrf.mxu1  ;;  %v6670_v63 = vadd.f32 %v2552_v6, %v2322_v2  ;;  %5130 = vmatmul.mubr.msk.bf16.gmra.mxu1 %vm333_vm2, %v2778_v55  ;;  %5215 = vmatprep.mubr.msk.bf16.mxu0 %vm5292_vm1, %v5291_v1  ;;  %v3117_v55 = vld [vmem:[%s5351_s26 + $0xbb] sm:$0xff]  ;;  %v2748_v6 = vld [vmem:[%s5351_s26 + $0xd2] sm:$0xff] }
 0x29e   : > { %v2324_v24 = vadd.f32 %v2188_v19, %v6252_v15  ;;  %v5029_v11 = vpop.f32.mrf.mxu0  ;;  %5133 = vmatprep.mubr.msk.bf16.mxu1 %vm5292_vm1, %v5291_v1 }
 0x29f   : > { %v4947_v62 = vpop.f32.mrf.mxu1 }
 0x2a0   : > { %v2555_v51 = vpop.f32.mrf.mxu0 }
 0x2a1   : > { %v2191_v2 = vpop.f32.mrf.mxu1  ;;  %v6682_v4 = vadd.f32 %v2555_v51, %v2323_v59  ;;  %v3118_v59 = vld [vmem:[%s5351_s26 + $0xc3] sm:$0xff] }
 0x2a2   : > { %v2325_v56 = vadd.f32 %v2191_v2, %v6262_v44  ;;  %v5030_v15 = vpop.f32.mrf.mxu0  ;;  %v2747_v44 = vld [vmem:[%s5351_s26 + $0xca] sm:$0xff]  ;;  %v3151_v42 = vpack.c.bf16 %v3118_v59, %v3117_v55 }
 0x2a3   : > { %v4948_v41 = vpop.f32.mrf.mxu1  ;;  %v2780_v13 = vpack.c.bf16 %v2748_v6, %v2747_v44 }
 0x2a4   : > { %v2560_v58 = vpop.f32.mrf.mxu0  ;;  %5216 = vmatmul.mubr.msk.bf16.gmra.mxu0 %vm333_vm2, %v3150_v37 }
 0x2a5   : > { %v2196_v46 = vpop.f32.mrf.mxu1  ;;  %v6686_v9 = vadd.f32 %v2560_v58, %v2324_v24  ;;  %5134 = vmatmul.mubr.msk.bf16.gmra.mxu1 %vm333_vm2, %v2779_v45  ;;  %5219 = vmatprep.mubr.msk.bf16.mxu0 %vm5292_vm1, %v5291_v1  ;;  %v3119_v45 = vld [vmem:[%s5351_s26 + $0xcb] sm:$0xff]  ;;  %v2750_v58 = vld [vmem:[%s5351_s26 + $0xe2] sm:$0xff] }
 0x2a6   : > { %v2326_v47 = vadd.f32 %v2196_v46, %v6266_v43  ;;  %v5033_v39 = vpop.f32.mrf.mxu0  ;;  %5137 = vmatprep.mubr.msk.bf16.mxu1 %vm5292_vm1, %v5291_v1 }
 0x2a7   : > { %v4951_v19 = vpop.f32.mrf.mxu1 }
 0x2a8   : > { %v2563_v18 = vpop.f32.mrf.mxu0 }
 0x2a9   : > { %v2199_v24 = vpop.f32.mrf.mxu1  ;;  %v6698_v11 = vadd.f32 %v2563_v18, %v2325_v56  ;;  %v3120_v56 = vld [vmem:[%s5351_s26 + $0xd3] sm:$0xff] }
 0x2aa   : > { %v2327_v50 = vadd.f32 %v2199_v24, %v6276_v61  ;;  %v5034_v43 = vpop.f32.mrf.mxu0  ;;  %v2749_v61 = vld [vmem:[%s5351_s26 + $0xda] sm:$0xff]  ;;  %v3152_v59 = vpack.c.bf16 %v3120_v56, %v3119_v45 }
 0x2ab   : > { %v4952_v62 = vpop.f32.mrf.mxu1  ;;  %v2781_v44 = vpack.c.bf16 %v2750_v58, %v2749_v61 }
 0x2ac   : > { %v2568_v51 = vpop.f32.mrf.mxu0  ;;  %5220 = vmatmul.mubr.msk.bf16.gmra.mxu0 %vm333_vm2, %v3151_v42 }
 0x2ad   : > { %v2204_v37 = vpop.f32.mrf.mxu1  ;;  %v6702_v2 = vadd.f32 %v2568_v51, %v2326_v47  ;;  %5138 = vmatmul.mubr.msk.bf16.gmra.mxu1 %vm333_vm2, %v2780_v13  ;;  %5223 = vmatprep.mubr.msk.bf16.mxu0 %vm5292_vm1, %v5291_v1  ;;  %v3121_v13 = vld [vmem:[%s5351_s26 + $0xdb] sm:$0xff]  ;;  %v2752_v51 = vld [vmem:[%s5351_s26 + $0xf2] sm:$0xff] }
 0x2ae   : > { %v2328_v15 = vadd.f32 %v2204_v37, %v6280_v25  ;;  %v5037_v41 = vpop.f32.mrf.mxu0  ;;  %5141 = vmatprep.mubr.msk.bf16.mxu1 %vm5292_vm1, %v5291_v1 }
 0x2af   : > { %v4955_v46 = vpop.f32.mrf.mxu1 }
 0x2b0   : > { %v2571_v55 = vpop.f32.mrf.mxu0 }
 0x2b1   : > { %v2207_v47 = vpop.f32.mrf.mxu1  ;;  %v6714_v39 = vadd.f32 %v2571_v55, %v2327_v50  ;;  %v3122_v50 = vld [vmem:[%s5351_s26 + $0xe3] sm:$0xff] }
 0x2b2   : > { %v2329_v6 = vadd.f32 %v2207_v47, %v6290_v14  ;;  %v5038_v25 = vpop.f32.mrf.mxu0  ;;  %v2751_v14 = vld [vmem:[%s5351_s26 + $0xea] sm:$0xff]  ;;  %v3153_v56 = vpack.c.bf16 %v3122_v50, %v3121_v13 }
 0x2b3   : > { %v4956_v19 = vpop.f32.mrf.mxu1  ;;  %v2782_v61 = vpack.c.bf16 %v2752_v51, %v2751_v14 }
 0x2b4   : > { %v2576_v18 = vpop.f32.mrf.mxu0  ;;  %5224 = vmatmul.mubr.msk.bf16.gmra.mxu0 %vm333_vm2, %v3152_v59 }
 0x2b5   : > { %v2212_v42 = vpop.f32.mrf.mxu1  ;;  %v6718_v24 = vadd.f32 %v2576_v18, %v2328_v15  ;;  %5142 = vmatmul.mubr.msk.bf16.gmra.mxu1 %vm333_vm2, %v2781_v44  ;;  %5227 = vmatprep.mubr.msk.bf16.mxu0 %vm5292_vm1, %v5291_v1  ;;  %v3123_v44 = vld [vmem:[%s5351_s26 + $0xeb] sm:$0xff]  ;;  %v2754_v18 = vld [vmem:[%s5351_s26 + $0x102] sm:$0xff] }
 0x2b6   : > { %v2330_v43 = vadd.f32 %v2212_v42, %v6294_v23  ;;  %v5041_v62 = vpop.f32.mrf.mxu0  ;;  %5145 = vmatprep.mubr.msk.bf16.mxu1 %vm5292_vm1, %v5291_v1 }
 0x2b7   : > { %v4959_v37 = vpop.f32.mrf.mxu1 }
 0x2b8   : > { %v2579_v45 = vpop.f32.mrf.mxu0 }
 0x2b9   : > { %v2215_v15 = vpop.f32.mrf.mxu1  ;;  %v6730_v41 = vadd.f32 %v2579_v45, %v2329_v6  ;;  %v3124_v6 = vld [vmem:[%s5351_s26 + $0xf3] sm:$0xff] }
 0x2ba   : > { %v2331_v58 = vadd.f32 %v2215_v15, %v6304_v49  ;;  %v5042_v23 = vpop.f32.mrf.mxu0  ;;  %v2753_v49 = vld [vmem:[%s5351_s26 + $0xfa] sm:$0xff]  ;;  %v3154_v50 = vpack.c.bf16 %v3124_v6, %v3123_v44 }
 0x2bb   : > { %v4960_v46 = vpop.f32.mrf.mxu1  ;;  %v2783_v14 = vpack.c.bf16 %v2754_v18, %v2753_v49 }
 0x2bc   : > { %v2584_v55 = vpop.f32.mrf.mxu0  ;;  %5228 = vmatmul.mubr.msk.bf16.gmra.mxu0 %vm333_vm2, %v3153_v56 }
 0x2bd   : > { %v2220_v59 = vpop.f32.mrf.mxu1  ;;  %v6734_v47 = vadd.f32 %v2584_v55, %v2330_v43  ;;  %5146 = vmatmul.mubr.msk.bf16.gmra.mxu1 %vm333_vm2, %v2782_v61  ;;  %5231 = vmatprep.mubr.msk.bf16.mxu0 %vm5292_vm1, %v5291_v1  ;;  %v3125_v61 = vld [vmem:[%s5351_s26 + $0xfb] sm:$0xff]  ;;  %v2756_v55 = vld [vmem:[%s5351_s26 + $0x112] sm:$0xff] }
 0x2be   : > { %v2332_v25 = vadd.f32 %v2220_v59, %v6308_v0  ;;  %v5045_v19 = vpop.f32.mrf.mxu0  ;;  %5149 = vmatprep.mubr.msk.bf16.mxu1 %vm5292_vm1, %v5291_v1 }
 0x2bf   : > { %v4963_v42 = vpop.f32.mrf.mxu1 }
 0x2c0   : > { %v2587_v13 = vpop.f32.mrf.mxu0 }
 0x2c1   : > { %v2223_v43 = vpop.f32.mrf.mxu1  ;;  %v6746_v62 = vadd.f32 %v2587_v13, %v2331_v58  ;;  %v3126_v58 = vld [vmem:[%s5351_s26 + $0x103] sm:$0xff] }
 0x2c2   : > { %v2333_v51 = vadd.f32 %v2223_v43, %v6318_v33  ;;  %v5046_v0 = vpop.f32.mrf.mxu0  ;;  %v2755_v33 = vld [vmem:[%s5351_s26 + $0x10a] sm:$0xff]  ;;  %v3155_v6 = vpack.c.bf16 %v3126_v58, %v3125_v61 }
 0x2c3   : > { %v4964_v37 = vpop.f32.mrf.mxu1  ;;  %v2784_v49 = vpack.c.bf16 %v2756_v55, %v2755_v33 }
 0x2c4   : > { %v2592_v45 = vpop.f32.mrf.mxu0  ;;  %5232 = vmatmul.mubr.msk.bf16.gmra.mxu0 %vm333_vm2, %v3154_v50 }
 0x2c5   : > { %v2228_v56 = vpop.f32.mrf.mxu1  ;;  %v6750_v15 = vadd.f32 %v2592_v45, %v2332_v25  ;;  %5150 = vmatmul.mubr.msk.bf16.gmra.mxu1 %vm333_vm2, %v2783_v14  ;;  %5235 = vmatprep.mubr.msk.bf16.mxu0 %vm5292_vm1, %v5291_v1  ;;  %v3127_v14 = vld [vmem:[%s5351_s26 + $0x10b] sm:$0xff]  ;;  %v2758_v45 = vld [vmem:[%s5351_s26 + $0x122] sm:$0xff] }
 0x2c6   : > { %v2334_v23 = vadd.f32 %v2228_v56, %v6322_v10  ;;  %v5049_v46 = vpop.f32.mrf.mxu0  ;;  %5153 = vmatprep.mubr.msk.bf16.mxu1 %vm5292_vm1, %v5291_v1 }
 0x2c7   : > { %v4967_v59 = vpop.f32.mrf.mxu1 }
 0x2c8   : > { %v2595_v44 = vpop.f32.mrf.mxu0 }
 0x2c9   : > { %v2231_v25 = vpop.f32.mrf.mxu1  ;;  %v6762_v19 = vadd.f32 %v2595_v44, %v2333_v51  ;;  %v3128_v51 = vld [vmem:[%s5351_s26 + $0x113] sm:$0xff] }
 0x2ca   : > { %v2335_v18 = vadd.f32 %v2231_v25, %v6332_v34  ;;  %v5050_v10 = vpop.f32.mrf.mxu0  ;;  %v2757_v34 = vld [vmem:[%s5351_s26 + $0x11a] sm:$0xff]  ;;  %v3156_v58 = vpack.c.bf16 %v3128_v51, %v3127_v14 }
 0x2cb   : > { %v4968_v42 = vpop.f32.mrf.mxu1  ;;  %v2785_v33 = vpack.c.bf16 %v2758_v45, %v2757_v34 }
 0x2cc   : > { %v2600_v13 = vpop.f32.mrf.mxu0  ;;  %5236 = vmatmul.mubr.msk.bf16.gmra.mxu0 %vm333_vm2, %v3155_v6 }
 0x2cd   : > { %v2236_v50 = vpop.f32.mrf.mxu1  ;;  %v6766_v43 = vadd.f32 %v2600_v13, %v2334_v23  ;;  %5154 = vmatmul.mubr.msk.bf16.gmra.mxu1 %vm333_vm2, %v2784_v49  ;;  %5239 = vmatprep.mubr.msk.bf16.mxu0 %vm5292_vm1, %v5291_v1  ;;  %v3129_v49 = vld [vmem:[%s5351_s26 + $0x11b] sm:$0xff]  ;;  %v2760_v13 = vld [vmem:[%s5351_s26 + $0x132] sm:$0xff] }
 0x2ce   : > { %v2336_v0 = vadd.f32 %v2236_v50, %v6339_v22  ;;  %v5053_v37 = vpop.f32.mrf.mxu0  ;;  %5157 = vmatprep.mubr.msk.bf16.mxu1 %vm5292_vm1, %v5291_v1 }
 0x2cf   : > { %v4971_v56 = vpop.f32.mrf.mxu1 }
 0x2d0   : > { %v2603_v61 = vpop.f32.mrf.mxu0 }
 0x2d1   : > { %v2239_v23 = vpop.f32.mrf.mxu1  ;;  %v6778_v46 = vadd.f32 %v2603_v61, %v2335_v18  ;;  %v3130_v18 = vld [vmem:[%s5351_s26 + $0x123] sm:$0xff] }
 0x2d2   : > { %v2337_v55 = vadd.f32 %v2239_v23, %v6352_v7  ;;  %v5054_v22 = vpop.f32.mrf.mxu0  ;;  %v2759_v7 = vld [vmem:[%s5351_s26 + $0x12a] sm:$0xff]  ;;  %v3157_v51 = vpack.c.bf16 %v3130_v18, %v3129_v49 }
 0x2d3   : > { %v4972_v59 = vpop.f32.mrf.mxu1  ;;  %v2786_v34 = vpack.c.bf16 %v2760_v13, %v2759_v7 }
 0x2d4   : > { %v2608_v44 = vpop.f32.mrf.mxu0  ;;  %5240 = vmatmul.mubr.msk.bf16.gmra.mxu0 %vm333_vm2, %v3156_v58 }
 0x2d5   : > { %v2244_v6 = vpop.f32.mrf.mxu1  ;;  %v6782_v25 = vadd.f32 %v2608_v44, %v2336_v0  ;;  %5158 = vmatmul.mubr.msk.bf16.gmra.mxu1 %vm333_vm2, %v2785_v33  ;;  %5243 = vmatprep.mubr.msk.bf16.mxu0 %vm5292_vm1, %v5291_v1  ;;  %v3131_v33 = vld [vmem:[%s5351_s26 + $0x12b] sm:$0xff]  ;;  %v2762_v44 = vld [vmem:[%s5351_s26 + $0x142] sm:$0xff] }
 0x2d6   : > { %v2338_v10 = vadd.f32 %v2244_v6, %v6362_v21  ;;  %v5057_v42 = vpop.f32.mrf.mxu0  ;;  %5161 = vmatprep.mubr.msk.bf16.mxu1 %vm5292_vm1, %v5291_v1 }
 0x2d7   : > { %v4975_v50 = vpop.f32.mrf.mxu1 }
 0x2d8   : > { %v2611_v14 = vpop.f32.mrf.mxu0 }
 0x2d9   : > { %v2247_v0 = vpop.f32.mrf.mxu1  ;;  %v6794_v37 = vadd.f32 %v2611_v14, %v2337_v55  ;;  %v3132_v55 = vld [vmem:[%s5351_s26 + $0x133] sm:$0xff] }
 0x2da   : > { %v2339_v45 = vadd.f32 %v2247_v0, %v6378_v38  ;;  %v5058_v21 = vpop.f32.mrf.mxu0  ;;  %v2761_v38 = vld [vmem:[%s5351_s26 + $0x13a] sm:$0xff]  ;;  %v3158_v18 = vpack.c.bf16 %v3132_v55, %v3131_v33 }
 0x2db   : > { %v4976_v56 = vpop.f32.mrf.mxu1  ;;  %v2787_v7 = vpack.c.bf16 %v2762_v44, %v2761_v38 }
 0x2dc   : > { %v2616_v61 = vpop.f32.mrf.mxu0  ;;  %5244 = vmatmul.mubr.msk.bf16.gmra.mxu0 %vm333_vm2, %v3157_v51 }
 0x2dd   : > { %v2252_v58 = vpop.f32.mrf.mxu1  ;;  %v6798_v23 = vadd.f32 %v2616_v61, %v2338_v10  ;;  %5162 = vmatmul.mubr.msk.bf16.gmra.mxu1 %vm333_vm2, %v2786_v34  ;;  %5247 = vmatprep.mubr.msk.bf16.mxu0 %vm5292_vm1, %v5291_v1  ;;  %v3133_v34 = vld [vmem:[%s5351_s26 + $0x13b] sm:$0xff]  ;;  %v2764_v61 = vld [vmem:[%s5351_s26 + $0x152] sm:$0xff] }
 0x2de   : > { %v2340_v22 = vadd.f32 %v2252_v58, %v6388_v12  ;;  %v5061_v59 = vpop.f32.mrf.mxu0  ;;  %5165 = vmatprep.mubr.msk.bf16.mxu1 %vm5292_vm1, %v5291_v1 }
 0x2df   : > { %v4979_v6 = vpop.f32.mrf.mxu1 }
 0x2e0   : > { %v2619_v49 = vpop.f32.mrf.mxu0 }
 0x2e1   : > { %v2255_v10 = vpop.f32.mrf.mxu1  ;;  %v6810_v42 = vadd.f32 %v2619_v49, %v2339_v45  ;;  %v3134_v45 = vld [vmem:[%s5351_s26 + $0x143] sm:$0xff] }
 0x2e2   : > { %v2341_v13 = vadd.f32 %v2255_v10, %v6404_v57  ;;  %v5062_v12 = vpop.f32.mrf.mxu0  ;;  %v2763_v57 = vld [vmem:[%s5351_s26 + $0x14a] sm:$0xff]  ;;  %v3159_v55 = vpack.c.bf16 %v3134_v45, %v3133_v34 }
 0x2e3   : > { %v4980_v50 = vpop.f32.mrf.mxu1  ;;  %v2788_v38 = vpack.c.bf16 %v2764_v61, %v2763_v57 }
 0x2e4   : > { %v2624_v14 = vpop.f32.mrf.mxu0  ;;  %5248 = vmatmul.mubr.msk.bf16.gmra.mxu0 %vm333_vm2, %v3158_v18 }
 0x2e5   : > { %v2260_v51 = vpop.f32.mrf.mxu1  ;;  %v6814_v0 = vadd.f32 %v2624_v14, %v2340_v22  ;;  %5166 = vmatmul.mubr.msk.bf16.gmra.mxu1 %vm333_vm2, %v2787_v7  ;;  %5251 = vmatprep.mubr.msk.bf16.mxu0 %vm5292_vm1, %v5291_v1  ;;  %v3135_v7 = vld [vmem:[%s5351_s26 + $0x14b] sm:$0xff]  ;;  %v2766_v14 = vld [vmem:[%s5351_s26 + $0x162] sm:$0xff] }
 0x2e6   : > { %v2342_v21 = vadd.f32 %v2260_v51, %v6414_v30  ;;  %v5065_v56 = vpop.f32.mrf.mxu0  ;;  %5169 = vmatprep.mubr.msk.bf16.mxu1 %vm5292_vm1, %v5291_v1 }
 0x2e7   : > { %v4983_v58 = vpop.f32.mrf.mxu1 }
 0x2e8   : > { %v2627_v33 = vpop.f32.mrf.mxu0 }
 0x2e9   : > { %v2263_v22 = vpop.f32.mrf.mxu1  ;;  %v6826_v59 = vadd.f32 %v2627_v33, %v2341_v13  ;;  %v3136_v13 = vld [vmem:[%s5351_s26 + $0x153] sm:$0xff] }
 0x2ea   : > { %v2343_v44 = vadd.f32 %v2263_v22, %v6430_v8  ;;  %v5066_v30 = vpop.f32.mrf.mxu0  ;;  %v2765_v8 = vld [vmem:[%s5351_s26 + $0x15a] sm:$0xff]  ;;  %v3160_v45 = vpack.c.bf16 %v3136_v13, %v3135_v7 }
 0x2eb   : > { %v4984_v6 = vpop.f32.mrf.mxu1  ;;  %v2789_v57 = vpack.c.bf16 %v2766_v14, %v2765_v8 }
 0x2ec   : > { %v2632_v49 = vpop.f32.mrf.mxu0  ;;  %5252 = vmatmul.mubr.msk.bf16.gmra.mxu0 %vm333_vm2, %v3159_v55 }
 0x2ed   : > { %v2268_v18 = vpop.f32.mrf.mxu1  ;;  %v6830_v10 = vadd.f32 %v2632_v49, %v2342_v21  ;;  %5170 = vmatmul.mubr.msk.bf16.gmra.mxu1 %vm333_vm2, %v2788_v38  ;;  %5255 = vmatprep.mubr.msk.bf16.mxu0 %vm5292_vm1, %v5291_v1  ;;  %v3137_v38 = vld [vmem:[%s5351_s26 + $0x15b] sm:$0xff] }
 0x2ee   : > { %v2344_v12 = vadd.f32 %v2268_v18, %v6440_v36  ;;  %v5069_v50 = vpop.f32.mrf.mxu0  ;;  %5173 = vmatprep.mubr.msk.bf16.mxu1 %vm5292_vm1, %v5291_v1 }
 0x2ef   : > { %v4987_v51 = vpop.f32.mrf.mxu1 }
 0x2f0   : > { %v2635_v34 = vpop.f32.mrf.mxu0 }
 0x2f1   : > { %v2271_v21 = vpop.f32.mrf.mxu1  ;;  %v6842_v56 = vadd.f32 %v2635_v34, %v2343_v44  ;;  %v3138_v44 = vld [vmem:[%s5351_s26 + $0x163] sm:$0xff] }
 0x2f2   : > { %v2345_v61 = vadd.f32 %v2271_v21, %v6457_v54  ;;  %v5070_v58 = vpop.f32.mrf.mxu0  ;;  %v2767_v54 = vld [vmem:[%s5351_s26 + $0x16a] sm:$0xf]  ;;  %v3161_v7 = vpack.c.bf16 %v3138_v44, %v3137_v38 }
 0x2f3   : > { %v4988_v36 = vpop.f32.mrf.mxu1  ;;  %v2790_v50 = vpack.c.bf16 %v2767_v54, %v2767_v54  ;;  %v3139_v21 = vld [vmem:[%s5351_s26 + $0x16b] sm:$0xf] }
 0x2f4   : > { %v2640_v33 = vpop.f32.mrf.mxu0  ;;  %5256 = vmatmul.mubr.msk.bf16.gmra.mxu0 %vm333_vm2, %v3160_v45 }
 0x2f5   : > { %v2276_v55 = vpop.f32.mrf.mxu1  ;;  %v6846_v22 = vadd.f32 %v2640_v33, %v2344_v12  ;;  %5174 = vmatmul.mubr.msk.bf16.gmra.mxu1 %vm333_vm2, %v2789_v57  ;;  %5259 = vmatprep.mubr.msk.bf16.mxu0 %vm5292_vm1, %v5291_v1 }
 0x2f6   : > { %v2346_v30 = vadd.f32 %v2276_v55, %v6467_v26  ;;  %v5073_v6 = vpop.f32.mrf.mxu0  ;;  %5177 = vmatprep.mubr.msk.bf16.mxu1 %vm5292_vm1, %v5291_v1 }
 0x2f7   : > { %v4991_v49 = vpop.f32.mrf.mxu1 }
 0x2f8   : > { %v2643_v18 = vpop.f32.mrf.mxu0 }
 0x2f9   : > { %v2279_v13 = vpop.f32.mrf.mxu1  ;;  %v6857_v12 = vadd.f32 %v2643_v18, %v2345_v61 }
 0x2fa   : > { %v2347_v8 = vadd.f32 %v2279_v13, %v6484_v35  ;;  %v5074_v14 = vpop.f32.mrf.mxu0  ;;  %v3162_v35 = vpack.c.bf16 %v3139_v21, %v3139_v21 }
 0x2fb   : > { %v4992_v51 = vpop.f32.mrf.mxu1 }
 0x2fc   : > { %v2648_v34 = vpop.f32.mrf.mxu0  ;;  %5260 = vmatmul.mubr.msk.bf16.gmra.mxu0 %vm333_vm2, %v3161_v7 }
 0x2fd   : > { %v2284_v26 = vpop.f32.mrf.mxu1  ;;  %v6861_v45 = vadd.f32 %v2648_v34, %v2346_v30  ;;  %5178 = vmatmul.mubr.msk.bf16.gmra.mxu1 %vm333_vm2, %v2790_v50  ;;  %5263 = vmatprep.mubr.msk.bf16.mxu0 %vm5292_vm1, %v5291_v1 }
 0x2fe   : > { %v2348_v57 = vadd.f32 %v2284_v26, %v6494_v29  ;;  %v5077_v61 = vpop.f32.mrf.mxu0 }
 0x2ff   : > { %v4995_v58 = vpop.f32.mrf.mxu1 }
 0x300   : > { %v2651_v36 = vpop.f32.mrf.mxu0 }
 0x301   : > { %v2287_v33 = vpop.f32.mrf.mxu1  ;;  %v6868_v55 = vadd.f32 %v2651_v36, %v2347_v8 }
 0x302   : > { %v2349_v38 = vadd.f32 %v2287_v33, %v6512_v52  ;;  %v5078_v44 = vpop.f32.mrf.mxu0 }
 0x303   : > { %v4996_v30 = vpop.f32.mrf.mxu1 }
 0x304   : > { %v2656_v6 = vpop.f32.mrf.mxu0  ;;  %5264 = vmatmul.mubr.msk.bf16.gmra.mxu0 %vm333_vm2, %v3162_v35 }
 0x305   : > { %v2292_v54 = vpop.f32.mrf.mxu1  ;;  %v6872_v49 = vadd.f32 %v2656_v6, %v2348_v57 }
 0x306   : > { %v2350_v1 = vadd.f32 %v2292_v54, %v6522_v20  ;;  %v5081_v29 = vpop.f32.mrf.mxu0 }
 0x307   : > { %v4999_v18 = vpop.f32.mrf.mxu1 }
 0x308   : > { %v2659_v7 = vpop.f32.mrf.mxu0 }
 0x309   : > { %v2295_v13 = vpop.f32.mrf.mxu1  ;;  %v6875_v50 = vadd.f32 %v2659_v7, %v2349_v38 }
 0x30a   : > { %v2351_v8 = vadd.f32 %v2295_v13, %v6540_v32  ;;  %v5082_v14 = vpop.f32.mrf.mxu0 }
 0x30b   : > { %v5000_v52 = vpop.f32.mrf.mxu1 }
 0x30c   : > { %v2664_v51 = vpop.f32.mrf.mxu0 }
 0x30d   : > { %v2300_v34 = vpop.f32.mrf.mxu1  ;;  %v6878_v26 = vadd.f32 %v2664_v51, %v2350_v1 }
 0x30e   : > { %v2352_v21 = vadd.f32 %v2300_v34, %v6550_v17  ;;  %v5085_v57 = vpop.f32.mrf.mxu0 }
 0x30f   : > { %v5003_v61 = vpop.f32.mrf.mxu1 }
 0x310   : > { %v2667_v58 = vpop.f32.mrf.mxu0 }
 0x311   : > { %v2303_v20 = vpop.f32.mrf.mxu1  ;;  %v6881_v36 = vadd.f32 %v2667_v58, %v2351_v8  ;;  %v3515_v58 = vpop.permute.xlu0 %3514 }
 0x312   : > { %v2353_v35 = vadd.f32 %v2303_v20, %v6568_v27  ;;  %v5086_v33 = vpop.f32.mrf.mxu0 }
 0x313   : > { %v5004_v38 = vpop.f32.mrf.mxu1 }
 0x314   : > { %v2672_v44 = vpop.f32.mrf.mxu0 }
 0x315   : > { %v2308_v32 = vpop.f32.mrf.mxu1  ;;  %v6884_v30 = vadd.f32 %v2672_v44, %v2352_v21 }
 0x316   : > { %v2354_v6 = vadd.f32 %v2308_v32, %v6577_v53  ;;  %v5089_v54 = vpop.f32.mrf.mxu0 }
 0x317   : > { %v5007_v1 = vpop.f32.mrf.mxu1 }
 0x318   : > { %v2675_v29 = vpop.f32.mrf.mxu0 }
 0x319   : > { %v2311_v17 = vpop.f32.mrf.mxu1  ;;  %v6887_v18 = vadd.f32 %v2675_v29, %v2353_v35  ;;  %v3520_v29 = vpop.permute.xlu0 %3519 }
 0x31a   : > { %v5090_v7 = vpop.f32.mrf.mxu0 }
 0x31b   : > { %v5008_v13 = vpop.f32.mrf.mxu1 }
 0x31c   : > { %v2680_v8 = vpop.f32.mrf.mxu0 }
 0x31d   : > { %v6889_v14 = vadd.f32 %v2680_v8, %v2354_v6  ;;  %v2892_v27 = vpop.f32.mrf.mxu1 }
 0x31e   : > { %v3058_v52 = vadd.f32 %v2892_v27, %v6603_v16  ;;  %v5093_v51 = vpop.f32.mrf.mxu0 }
 0x31f   : > { %v5099_v34 = vpop.f32.mrf.mxu1 }
 0x320   : > { %v2683_v21 = vpop.f32.mrf.mxu0 }
 0x321   : > { %v2895_v57 = vpop.f32.mrf.mxu1 }
 0x322   : > { %v3059_v53 = vadd.f32 %v2895_v57, %v6618_v31  ;;  %v5094_v61 = vpop.f32.mrf.mxu0  ;;  %v3525_v31 = vpop.permute.xlu1 %3524 }
 0x323   : > { %v5100_v20 = vpop.f32.mrf.mxu1 }
 0x324   : > { %v3264_v33 = vpop.f32.mrf.mxu0 }
 0x325   : > { %v2900_v35 = vpop.f32.mrf.mxu1  ;;  %v3430_v38 = vadd.f32 %v3264_v33, %v3058_v52 }
 0x326   : > { %v3060_v44 = vadd.f32 %v2900_v35, %v6622_v3  ;;  %v5185_v32 = vpop.f32.mrf.mxu0 }
 0x327   : > { %v3848_v6 = vmul.f32 %v3430_v38, %v3430_v38  ;;  %v5103_v54 = vpop.f32.mrf.mxu1  ;;  %v3717_v16 = vmul.f32 %v3515_v58, %v3430_v38 }
 0x328   : > { %v3267_v1 = vpop.f32.mrf.mxu0 }
 0x329   : > { %v2903_v17 = vpop.f32.mrf.mxu1  ;;  %v3431_v7 = vadd.f32 %v3267_v1, %v3059_v53  ;;  %v3889_v27 = vmul.f32 %v3848_v6, %v3515_v58  ;;  %v3758_v52 = vsel %vm333_vm2, %v3717_v16, 0.0 }
 0x32a   : > { %v3061_v13 = vadd.f32 %v2903_v17, %v6634_v5  ;;  %v5186_v8 = vpop.f32.mrf.mxu0 }
 0x32b   : > { %v3849_v51 = vmul.f32 %v3431_v7, %v3431_v7  ;;  %v3718_v34 = vmul.f32 %v3520_v29, %v3431_v7  ;;  %v5104_v21 = vpop.f32.mrf.mxu1  ;;  %v3930_v5 = vsel %vm333_vm2, %v3889_v27, 0.0  ;;  %v3530_v7 = vpop.permute.xlu1 %3529 }
 0x32c   : > { %v3272_v57 = vpop.f32.mrf.mxu0 }
 0x32d   : > { %v3759_v3 = vsel %vm333_vm2, %v3718_v34, 0.0  ;;  %v3890_v61 = vmul.f32 %v3849_v51, %v3520_v29  ;;  %v2908_v20 = vpop.f32.mrf.mxu1  ;;  %v3432_v33 = vadd.f32 %v3272_v57, %v3060_v44 }
 0x32e   : > { %v3760_v35 = vadd.f32 %v3759_v3, %v3758_v52  ;;  %v3062_v38 = vadd.f32 %v2908_v20, %v6638_v40  ;;  %v5189_v53 = vpop.f32.mrf.mxu0 }
 0x32f   : > { %v3931_v32 = vsel %vm333_vm2, %v3890_v61, 0.0  ;;  %v3850_v58 = vmul.f32 %v3432_v33, %v3432_v33  ;;  %v3719_v6 = vmul.f32 %v3525_v31, %v3432_v33  ;;  %v5107_v54 = vpop.f32.mrf.mxu1 }
 0x330   : > { %v3932_v1 = vadd.f32 %v3931_v32, %v3930_v5  ;;  %v3275_v17 = vpop.f32.mrf.mxu0  ;;  %v3535_v32 = vpop.permute.xlu0 %3534 }
 0x331   : > { %v3761_v16 = vsel %vm333_vm2, %v3719_v6, 0.0  ;;  %v3891_v8 = vmul.f32 %v3850_v58, %v3525_v31  ;;  %v2911_v29 = vpop.f32.mrf.mxu1  ;;  %v3433_v51 = vadd.f32 %v3275_v17, %v3061_v13 }
 0x332   : > { %v3762_v44 = vadd.f32 %v3761_v16, %v3760_v35  ;;  %v3063_v34 = vadd.f32 %v2911_v29, %v6650_v48  ;;  %v5190_v40 = vpop.f32.mrf.mxu0 }
 0x333   : > { %v3933_v21 = vsel %vm333_vm2, %v3891_v8, 0.0  ;;  %v3851_v27 = vmul.f32 %v3433_v51, %v3433_v51  ;;  %v3720_v57 = vmul.f32 %v3530_v7, %v3433_v51  ;;  %v5108_v52 = vpop.f32.mrf.mxu1  ;;  %v3540_v40 = vpop.permute.xlu1 %3539 }
 0x334   : > { %v3934_v3 = vadd.f32 %v3933_v21, %v3932_v1  ;;  %v3280_v61 = vpop.f32.mrf.mxu0 }
 0x335   : > { %v3763_v20 = vsel %vm333_vm2, %v3720_v57, 0.0  ;;  %v3892_v33 = vmul.f32 %v3851_v27, %v3530_v7  ;;  %v2916_v53 = vpop.f32.mrf.mxu1  ;;  %v3434_v5 = vadd.f32 %v3280_v61, %v3062_v38 }
 0x336   : > { %v3764_v31 = vadd.f32 %v3763_v20, %v3762_v44  ;;  %v3064_v13 = vadd.f32 %v2916_v53, %v6654_v28  ;;  %v5193_v35 = vpop.f32.mrf.mxu0 }
 0x337   : > { %v3935_v48 = vsel %vm333_vm2, %v3892_v33, 0.0  ;;  %v3721_v58 = vmul.f32 %v3535_v32, %v3434_v5  ;;  %v3852_v6 = vmul.f32 %v3434_v5, %v3434_v5  ;;  %v5111_v54 = vpop.f32.mrf.mxu1  ;;  %v3545_v5 = vpop.permute.xlu0 %3544 }
 0x338   : > { %v3936_v17 = vadd.f32 %v3935_v48, %v3934_v3  ;;  %v3283_v16 = vpop.f32.mrf.mxu0 }
 0x339   : > { %v3765_v1 = vsel %vm333_vm2, %v3721_v58, 0.0  ;;  %v3893_v8 = vmul.f32 %v3852_v6, %v3535_v32  ;;  %v2919_v29 = vpop.f32.mrf.mxu1  ;;  %v3435_v51 = vadd.f32 %v3283_v16, %v3063_v34 }
 0x33a   : > { %v3766_v7 = vadd.f32 %v3765_v1, %v3764_v31  ;;  %v3065_v38 = vadd.f32 %v2919_v29, %v6666_v60  ;;  %v5194_v44 = vpop.f32.mrf.mxu0  ;;  %v3550_v29 = vpop.permute.xlu1 %3549 }
 0x33b   : > { %v3937_v28 = vsel %vm333_vm2, %v3893_v8, 0.0  ;;  %v3722_v21 = vmul.f32 %v3540_v40, %v3435_v51  ;;  %v3853_v27 = vmul.f32 %v3435_v51, %v3435_v51  ;;  %v5112_v57 = vpop.f32.mrf.mxu1 }
 0x33c   : > { %v3938_v52 = vadd.f32 %v3937_v28, %v3936_v17  ;;  %v3288_v61 = vpop.f32.mrf.mxu0 }
 0x33d   : > { %v3767_v3 = vsel %vm333_vm2, %v3722_v21, 0.0  ;;  %v3894_v20 = vmul.f32 %v3853_v27, %v3540_v40  ;;  %v2924_v33 = vpop.f32.mrf.mxu1  ;;  %v3436_v53 = vadd.f32 %v3288_v61, %v3064_v13 }
 0x33e   : > { %v3768_v32 = vadd.f32 %v3767_v3, %v3766_v7  ;;  %v3066_v34 = vadd.f32 %v2924_v33, %v6670_v63  ;;  %v5197_v31 = vpop.f32.mrf.mxu0 }
 0x33f   : > { %v3939_v60 = vsel %vm333_vm2, %v3894_v20, 0.0  ;;  %v3723_v35 = vmul.f32 %v3545_v5, %v3436_v53  ;;  %v3854_v48 = vmul.f32 %v3436_v53, %v3436_v53  ;;  %v5115_v58 = vpop.f32.mrf.mxu1  ;;  %v3555_v20 = vpop.permute.xlu0 %3554 }
 0x340   : > { %v3940_v6 = vadd.f32 %v3939_v60, %v3938_v52  ;;  %v3291_v54 = vpop.f32.mrf.mxu0 }
 0x341   : > { %v3769_v17 = vsel %vm333_vm2, %v3723_v35, 0.0  ;;  %v3895_v16 = vmul.f32 %v3854_v48, %v3545_v5  ;;  %v2927_v1 = vpop.f32.mrf.mxu1  ;;  %v3437_v8 = vadd.f32 %v3291_v54, %v3065_v38 }
 0x342   : > { %v3770_v51 = vadd.f32 %v3769_v17, %v3768_v32  ;;  %v3067_v13 = vadd.f32 %v2927_v1, %v6682_v4  ;;  %v5198_v7 = vpop.f32.mrf.mxu0  ;;  %v3560_v17 = vpop.permute.xlu1 %3559 }
 0x343   : > { %v3941_v63 = vsel %vm333_vm2, %v3895_v16, 0.0  ;;  %v3724_v40 = vmul.f32 %v3550_v29, %v3437_v8  ;;  %v3855_v44 = vmul.f32 %v3437_v8, %v3437_v8  ;;  %v5116_v28 = vpop.f32.mrf.mxu1 }
 0x344   : > { %v3942_v21 = vadd.f32 %v3941_v63, %v3940_v6  ;;  %v3296_v27 = vpop.f32.mrf.mxu0 }
 0x345   : > { %v3771_v57 = vsel %vm333_vm2, %v3724_v40, 0.0  ;;  %v3896_v52 = vmul.f32 %v3855_v44, %v3550_v29  ;;  %v2932_v61 = vpop.f32.mrf.mxu1  ;;  %v3438_v3 = vadd.f32 %v3296_v27, %v3066_v34 }
 0x346   : > { %v3772_v33 = vadd.f32 %v3771_v57, %v3770_v51  ;;  %v3068_v38 = vadd.f32 %v2932_v61, %v6686_v9  ;;  %v5201_v53 = vpop.f32.mrf.mxu0 }
 0x347   : > { %v3943_v4 = vsel %vm333_vm2, %v3896_v52, 0.0  ;;  %v3725_v5 = vmul.f32 %v3555_v20, %v3438_v3  ;;  %v3856_v32 = vmul.f32 %v3438_v3, %v3438_v3  ;;  %v5119_v31 = vpop.f32.mrf.mxu1 }
 0x348   : > { %v3944_v60 = vadd.f32 %v3943_v4, %v3942_v21  ;;  %v3299_v35 = vpop.f32.mrf.mxu0  ;;  %v3565_v21 = vpop.permute.xlu0 %3564 }
 0x349   : > { %v3773_v48 = vsel %vm333_vm2, %v3725_v5, 0.0  ;;  %v3897_v58 = vmul.f32 %v3856_v32, %v3555_v20  ;;  %v2935_v6 = vpop.f32.mrf.mxu1  ;;  %v3439_v54 = vadd.f32 %v3299_v35, %v3067_v13 }
 0x34a   : > { %v3774_v16 = vadd.f32 %v3773_v48, %v3772_v33  ;;  %v5202_v34 = vpop.f32.mrf.mxu0  ;;  %v3069_v13 = vadd.f32 %v2935_v6, %v6698_v11 }
 0x34b   : > { %v3945_v1 = vsel %vm333_vm2, %v3897_v58, 0.0  ;;  %v3726_v8 = vmul.f32 %v3560_v17, %v3439_v54  ;;  %v3857_v9 = vmul.f32 %v3439_v54, %v3439_v54  ;;  %v5120_v29 = vpop.f32.mrf.mxu1 }
 0x34c   : > { %v3946_v51 = vadd.f32 %v3945_v1, %v3944_v60  ;;  %v3304_v7 = vpop.f32.mrf.mxu0  ;;  %v3570_v60 = vpop.permute.xlu1 %3569 }
 0x34d   : > { %v3775_v63 = vsel %vm333_vm2, %v3726_v8, 0.0  ;;  %v3898_v40 = vmul.f32 %v3857_v9, %v3560_v17  ;;  %v2940_v44 = vpop.f32.mrf.mxu1  ;;  %v3440_v28 = vadd.f32 %v3304_v7, %v3068_v38  ;;  %v3575_v29 = vpop.permute.xlu0 %3574 }
 0x34e   : > { %v3776_v27 = vadd.f32 %v3775_v63, %v3774_v16  ;;  %v5205_v57 = vpop.f32.mrf.mxu0  ;;  %v3070_v48 = vadd.f32 %v2940_v44, %v6702_v2 }
 0x34f   : > { %v3947_v52 = vsel %vm333_vm2, %v3898_v40, 0.0  ;;  %v3727_v61 = vmul.f32 %v3565_v21, %v3440_v28  ;;  %v3858_v3 = vmul.f32 %v3440_v28, %v3440_v28  ;;  %v5123_v20 = vpop.f32.mrf.mxu1 }
 0x350   : > { %v3948_v33 = vadd.f32 %v3947_v52, %v3946_v51  ;;  %v3307_v53 = vpop.f32.mrf.mxu0 }
 0x351   : > { %v3777_v4 = vsel %vm333_vm2, %v3727_v61, 0.0  ;;  %v3899_v5 = vmul.f32 %v3858_v3, %v3565_v21  ;;  %v2943_v32 = vpop.f32.mrf.mxu1  ;;  %v3441_v31 = vadd.f32 %v3307_v53, %v3069_v13  ;;  %v3580_v3 = vpop.permute.xlu1 %3579 }
 0x352   : > { %v3778_v35 = vadd.f32 %v3777_v4, %v3776_v27  ;;  %v5206_v38 = vpop.f32.mrf.mxu0  ;;  %v3071_v63 = vadd.f32 %v2943_v32, %v6714_v39 }
 0x353   : > { %v3949_v58 = vsel %vm333_vm2, %v3899_v5, 0.0  ;;  %v3728_v11 = vmul.f32 %v3570_v60, %v3441_v31  ;;  %v3859_v6 = vmul.f32 %v3441_v31, %v3441_v31  ;;  %v5124_v54 = vpop.f32.mrf.mxu1 }
 0x354   : > { %v3950_v17 = vadd.f32 %v3949_v58, %v3948_v33  ;;  %v3312_v16 = vpop.f32.mrf.mxu0 }
 0x355   : > { %v3779_v34 = vsel %vm333_vm2, %v3728_v11, 0.0  ;;  %v3900_v1 = vmul.f32 %v3859_v6, %v3570_v60  ;;  %v2948_v8 = vpop.f32.mrf.mxu1  ;;  %v3442_v9 = vadd.f32 %v3312_v16, %v3070_v48  ;;  %v3585_v11 = vpop.permute.xlu0 %3584 }
 0x356   : > { %v3780_v51 = vadd.f32 %v3779_v34, %v3778_v35  ;;  %v5209_v7 = vpop.f32.mrf.mxu0  ;;  %v3072_v53 = vadd.f32 %v2948_v8, %v6718_v24 }
 0x357   : > { %v3951_v40 = vsel %vm333_vm2, %v3900_v1, 0.0  ;;  %v3729_v2 = vmul.f32 %v3575_v29, %v3442_v9  ;;  %v3860_v44 = vmul.f32 %v3442_v9, %v3442_v9  ;;  %v5127_v28 = vpop.f32.mrf.mxu1 }
 0x358   : > { %v3952_v21 = vadd.f32 %v3951_v40, %v3950_v17  ;;  %v3315_v27 = vpop.f32.mrf.mxu0  ;;  %v3590_v40 = vpop.permute.xlu1 %3589 }
 0x359   : > { %v3781_v57 = vsel %vm333_vm2, %v3729_v2, 0.0  ;;  %v3901_v13 = vmul.f32 %v3860_v44, %v3575_v29  ;;  %v2951_v52 = vpop.f32.mrf.mxu1  ;;  %v3443_v61 = vadd.f32 %v3315_v27, %v3071_v63 }
 0x35a   : > { %v3782_v20 = vadd.f32 %v3781_v57, %v3780_v51  ;;  %v5210_v33 = vpop.f32.mrf.mxu0  ;;  %v3073_v17 = vadd.f32 %v2951_v52, %v6730_v41 }
 0x35b   : > { %v3953_v4 = vsel %vm333_vm2, %v3901_v13, 0.0  ;;  %v3730_v39 = vmul.f32 %v3580_v3, %v3443_v61  ;;  %v3861_v5 = vmul.f32 %v3443_v61, %v3443_v61  ;;  %v5128_v32 = vpop.f32.mrf.mxu1 }
 0x35c   : > { %v3954_v31 = vadd.f32 %v3953_v4, %v3952_v21  ;;  %v3320_v60 = vpop.f32.mrf.mxu0 }
 0x35d   : > { %v3783_v35 = vsel %vm333_vm2, %v3730_v39, 0.0  ;;  %v3902_v38 = vmul.f32 %v3861_v5, %v3580_v3  ;;  %v2956_v48 = vpop.f32.mrf.mxu1  ;;  %v3444_v58 = vadd.f32 %v3320_v60, %v3072_v53  ;;  %v3595_v53 = vpop.permute.xlu0 %3594 }
 0x35e   : > { %v3784_v6 = vadd.f32 %v3783_v35, %v3782_v20  ;;  %v5213_v54 = vpop.f32.mrf.mxu0  ;;  %v3074_v28 = vadd.f32 %v2956_v48, %v6734_v47 }
 0x35f   : > { %v3955_v16 = vsel %vm333_vm2, %v3902_v38, 0.0  ;;  %v3731_v24 = vmul.f32 %v3585_v11, %v3444_v58  ;;  %v3862_v34 = vmul.f32 %v3444_v58, %v3444_v58  ;;  %v5131_v1 = vpop.f32.mrf.mxu1  ;;  %v3600_v54 = vpop.permute.xlu1 %3599 }
 0x360   : > { %v3956_v8 = vadd.f32 %v3955_v16, %v3954_v31  ;;  %v3323_v9 = vpop.f32.mrf.mxu0 }
 0x361   : > { %v3785_v29 = vsel %vm333_vm2, %v3731_v24, 0.0  ;;  %v3903_v51 = vmul.f32 %v3862_v34, %v3585_v11  ;;  %v2959_v7 = vpop.f32.mrf.mxu1  ;;  %v3445_v63 = vadd.f32 %v3323_v9, %v3073_v17 }
 0x362   : > { %v3786_v2 = vadd.f32 %v3785_v29, %v3784_v6  ;;  %v5214_v44 = vpop.f32.mrf.mxu0  ;;  %v3075_v5 = vadd.f32 %v2959_v7, %v6746_v62 }
 0x363   : > { %v3957_v21 = vsel %vm333_vm2, %v3903_v51, 0.0  ;;  %v3732_v41 = vmul.f32 %v3590_v40, %v3445_v63  ;;  %v3863_v27 = vmul.f32 %v3445_v63, %v3445_v63  ;;  %v5132_v57 = vpop.f32.mrf.mxu1 }
 0x364   : > { %v3958_v13 = vadd.f32 %v3957_v21, %v3956_v8  ;;  %v3328_v52 = vpop.f32.mrf.mxu0 }
 0x365   : > { %v3787_v61 = vsel %vm333_vm2, %v3732_v41, 0.0  ;;  %v3904_v3 = vmul.f32 %v3863_v27, %v3590_v40  ;;  %v2964_v20 = vpop.f32.mrf.mxu1  ;;  %v3446_v33 = vadd.f32 %v3328_v52, %v3074_v28 }
 0x366   : > { %v3788_v4 = vadd.f32 %v3787_v61, %v3786_v2  ;;  %v5217_v39 = vpop.f32.mrf.mxu0  ;;  %v3076_v24 = vadd.f32 %v2964_v20, %v6750_v15  ;;  %v3605_v2 = vpop.permute.xlu0 %3604 }
 0x367   : > { %v3959_v32 = vsel %vm333_vm2, %v3904_v3, 0.0  ;;  %v3733_v47 = vmul.f32 %v3595_v53, %v3446_v33  ;;  %v3864_v31 = vmul.f32 %v3446_v33, %v3446_v33  ;;  %v5135_v60 = vpop.f32.mrf.mxu1 }
 0x368   : > { %v3960_v35 = vadd.f32 %v3959_v32, %v3958_v13  ;;  %v3331_v38 = vpop.f32.mrf.mxu0 }
 0x369   : > { %v3789_v48 = vsel %vm333_vm2, %v3733_v47, 0.0  ;;  %v3905_v58 = vmul.f32 %v3864_v31, %v3595_v53  ;;  %v2967_v11 = vpop.f32.mrf.mxu1  ;;  %v3447_v6 = vadd.f32 %v3331_v38, %v3075_v5  ;;  %v3610_v53 = vpop.permute.xlu1 %3609 }
 0x36a   : > { %v3790_v17 = vadd.f32 %v3789_v48, %v3788_v4  ;;  %v5218_v16 = vpop.f32.mrf.mxu0  ;;  %v3077_v21 = vadd.f32 %v2967_v11, %v6762_v19 }
 0x36b   : > { %v3961_v34 = vsel %vm333_vm2, %v3905_v58, 0.0  ;;  %v3734_v62 = vmul.f32 %v3600_v54, %v3447_v6  ;;  %v3865_v1 = vmul.f32 %v3447_v6, %v3447_v6  ;;  %v5136_v8 = vpop.f32.mrf.mxu1  ;;  %v3615_v6 = vpop.permute.xlu0 %3614 }
 0x36c   : > { %v3962_v9 = vadd.f32 %v3961_v34, %v3960_v35  ;;  %v3336_v29 = vpop.f32.mrf.mxu0 }
 0x36d   : > { %v3791_v51 = vsel %vm333_vm2, %v3734_v62, 0.0  ;;  %v3906_v7 = vmul.f32 %v3865_v1, %v3600_v54  ;;  %v2972_v63 = vpop.f32.mrf.mxu1  ;;  %v3448_v40 = vadd.f32 %v3336_v29, %v3076_v24 }
 0x36e   : > { %v3792_v44 = vadd.f32 %v3791_v51, %v3790_v17  ;;  %v5221_v28 = vpop.f32.mrf.mxu0  ;;  %v3078_v5 = vadd.f32 %v2972_v63, %v6766_v43  ;;  %v3620_v63 = vpop.permute.xlu1 %3619 }
 0x36f   : > { %v3963_v41 = vsel %vm333_vm2, %v3906_v7, 0.0  ;;  %v3735_v15 = vmul.f32 %v3605_v2, %v3448_v40  ;;  %v3866_v27 = vmul.f32 %v3448_v40, %v3448_v40  ;;  %v5139_v57 = vpop.f32.mrf.mxu1 }
 0x370   : > { %v3964_v13 = vadd.f32 %v3963_v41, %v3962_v9  ;;  %v3339_v52 = vpop.f32.mrf.mxu0 }
 0x371   : > { %v3793_v61 = vsel %vm333_vm2, %v3735_v15, 0.0  ;;  %v3907_v3 = vmul.f32 %v3866_v27, %v3605_v2  ;;  %v2975_v20 = vpop.f32.mrf.mxu1  ;;  %v3449_v33 = vadd.f32 %v3339_v52, %v3077_v21 }
 0x372   : > { %v3794_v4 = vadd.f32 %v3793_v61, %v3792_v44  ;;  %v5222_v39 = vpop.f32.mrf.mxu0  ;;  %v3079_v16 = vadd.f32 %v2975_v20, %v6778_v46 }
 0x373   : > { %v3965_v32 = vsel %vm333_vm2, %v3907_v3, 0.0  ;;  %v3736_v19 = vmul.f32 %v3610_v53, %v3449_v33  ;;  %v3867_v47 = vmul.f32 %v3449_v33, %v3449_v33  ;;  %v5140_v31 = vpop.f32.mrf.mxu1  ;;  %v3625_v3 = vpop.permute.xlu0 %3624 }
 0x374   : > { %v3966_v60 = vadd.f32 %v3965_v32, %v3964_v13  ;;  %v3344_v35 = vpop.f32.mrf.mxu0 }
 0x375   : > { %v3795_v38 = vsel %vm333_vm2, %v3736_v19, 0.0  ;;  %v3908_v48 = vmul.f32 %v3867_v47, %v3610_v53  ;;  %v2980_v58 = vpop.f32.mrf.mxu1  ;;  %v3450_v11 = vadd.f32 %v3344_v35, %v3078_v5 }
 0x376   : > { %v3796_v54 = vadd.f32 %v3795_v38, %v3794_v4  ;;  %v5225_v17 = vpop.f32.mrf.mxu0  ;;  %v3080_v44 = vadd.f32 %v2980_v58, %v6782_v25  ;;  %v3630_v38 = vpop.permute.xlu1 %3629 }
 0x377   : > { %v3967_v24 = vsel %vm333_vm2, %v3908_v48, 0.0  ;;  %v3737_v43 = vmul.f32 %v3615_v6, %v3450_v11  ;;  %v3868_v34 = vmul.f32 %v3450_v11, %v3450_v11  ;;  %v5143_v62 = vpop.f32.mrf.mxu1 }
 0x378   : > { %v3968_v1 = vadd.f32 %v3967_v24, %v3966_v60  ;;  %v3347_v8 = vpop.f32.mrf.mxu0 }
 0x379   : > { %v3797_v9 = vsel %vm333_vm2, %v3737_v43, 0.0  ;;  %v3909_v29 = vmul.f32 %v3868_v34, %v3615_v6  ;;  %v2983_v51 = vpop.f32.mrf.mxu1  ;;  %v3451_v7 = vadd.f32 %v3347_v8, %v3079_v16  ;;  %v3635_v8 = vpop.permute.xlu0 %3634 }
 0x37a   : > { %v3798_v40 = vadd.f32 %v3797_v9, %v3796_v54  ;;  %v5226_v2 = vpop.f32.mrf.mxu0  ;;  %v3081_v53 = vadd.f32 %v2983_v51, %v6794_v37 }
 0x37b   : > { %v3969_v28 = vsel %vm333_vm2, %v3909_v29, 0.0  ;;  %v3738_v46 = vmul.f32 %v3620_v63, %v3451_v7  ;;  %v3869_v21 = vmul.f32 %v3451_v7, %v3451_v7  ;;  %v5144_v41 = vpop.f32.mrf.mxu1 }
 0x37c   : > { %v3970_v15 = vadd.f32 %v3969_v28, %v3968_v1  ;;  %v3352_v27 = vpop.f32.mrf.mxu0 }
 0x37d   : > { %v3799_v57 = vsel %vm333_vm2, %v3738_v46, 0.0  ;;  %v3910_v13 = vmul.f32 %v3869_v21, %v3620_v63  ;;  %v2988_v52 = vpop.f32.mrf.mxu1  ;;  %v3452_v61 = vadd.f32 %v3352_v27, %v3080_v44 }
 0x37e   : > { %v3800_v20 = vadd.f32 %v3799_v57, %v3798_v40  ;;  %v5229_v33 = vpop.f32.mrf.mxu0  ;;  %v3082_v11 = vadd.f32 %v2988_v52, %v6798_v23 }
 0x37f   : > { %v3971_v4 = vsel %vm333_vm2, %v3910_v13, 0.0  ;;  %v3739_v25 = vmul.f32 %v3625_v3, %v3452_v61  ;;  %v3870_v39 = vmul.f32 %v3452_v61, %v3452_v61  ;;  %v5147_v5 = vpop.f32.mrf.mxu1 }
 0x380   : > { %v3972_v32 = vadd.f32 %v3971_v4, %v3970_v15  ;;  %v3355_v19 = vpop.f32.mrf.mxu0  ;;  %v3640_v15 = vpop.permute.xlu1 %3639 }
 0x381   : > { %v3801_v47 = vsel %vm333_vm2, %v3739_v25, 0.0  ;;  %v3911_v31 = vmul.f32 %v3870_v39, %v3625_v3  ;;  %v2991_v60 = vpop.f32.mrf.mxu1  ;;  %v3453_v35 = vadd.f32 %v3355_v19, %v3081_v53  ;;  %v3645_v5 = vpop.permute.xlu0 %3644 }
 0x382   : > { %v3802_v48 = vadd.f32 %v3801_v47, %v3800_v20  ;;  %v5230_v58 = vpop.f32.mrf.mxu0  ;;  %v3083_v51 = vadd.f32 %v2991_v60, %v6810_v42 }
 0x383   : > { %v3973_v6 = vsel %vm333_vm2, %v3911_v31, 0.0  ;;  %v3740_v37 = vmul.f32 %v3630_v38, %v3453_v35  ;;  %v3871_v54 = vmul.f32 %v3453_v35, %v3453_v35  ;;  %v5148_v17 = vpop.f32.mrf.mxu1 }
 0x384   : > { %v3974_v16 = vadd.f32 %v3973_v6, %v3972_v32  ;;  %v3360_v24 = vpop.f32.mrf.mxu0 }
 0x385   : > { %v3803_v43 = vsel %vm333_vm2, %v3740_v37, 0.0  ;;  %v3912_v34 = vmul.f32 %v3871_v54, %v3630_v38  ;;  %v2996_v62 = vpop.f32.mrf.mxu1  ;;  %v3454_v1 = vadd.f32 %v3360_v24, %v3082_v11  ;;  %v3650_v54 = vpop.permute.xlu1 %3649 }
 0x386   : > { %v3804_v9 = vadd.f32 %v3803_v43, %v3802_v48  ;;  %v5233_v29 = vpop.f32.mrf.mxu0  ;;  %v3084_v13 = vadd.f32 %v2996_v62, %v6814_v0 }
 0x387   : > { %v3975_v7 = vsel %vm333_vm2, %v3912_v34, 0.0  ;;  %v3741_v23 = vmul.f32 %v3635_v8, %v3454_v1  ;;  %v3872_v63 = vmul.f32 %v3454_v1, %v3454_v1  ;;  %v5151_v40 = vpop.f32.mrf.mxu1 }
 0x388   : > { %v3976_v2 = vadd.f32 %v3975_v7, %v3974_v16  ;;  %v3363_v44 = vpop.f32.mrf.mxu0 }
 0x389   : > { %v3805_v28 = vsel %vm333_vm2, %v3741_v23, 0.0  ;;  %v3913_v46 = vmul.f32 %v3872_v63, %v3635_v8  ;;  %v2999_v21 = vpop.f32.mrf.mxu1  ;;  %v3455_v41 = vadd.f32 %v3363_v44, %v3083_v51  ;;  %v3655_v23 = vpop.permute.xlu0 %3654 }
 0x38a   : > { %v3806_v27 = vadd.f32 %v3805_v28, %v3804_v9  ;;  %v5234_v57 = vpop.f32.mrf.mxu0  ;;  %v3085_v47 = vadd.f32 %v2999_v21, %v6826_v59 }
 0x38b   : > { %v3977_v52 = vsel %vm333_vm2, %v3913_v46, 0.0  ;;  %v3742_v42 = vmul.f32 %v3640_v15, %v3455_v41  ;;  %v3873_v61 = vmul.f32 %v3455_v41, %v3455_v41  ;;  %v5152_v3 = vpop.f32.mrf.mxu1 }
 0x38c   : > { %v3978_v20 = vadd.f32 %v3977_v52, %v3976_v2  ;;  %v3368_v33 = vpop.f32.mrf.mxu0  ;;  %v3660_v52 = vpop.permute.xlu1 %3659 }
 0x38d   : > { %v3807_v53 = vsel %vm333_vm2, %v3742_v42, 0.0  ;;  %v3914_v4 = vmul.f32 %v3873_v61, %v3640_v15  ;;  %v3004_v25 = vpop.f32.mrf.mxu1  ;;  %v3456_v39 = vadd.f32 %v3368_v33, %v3084_v13 }
 0x38e   : > { %v3808_v32 = vadd.f32 %v3807_v53, %v3806_v27  ;;  %v5237_v19 = vpop.f32.mrf.mxu0  ;;  %v3086_v24 = vadd.f32 %v3004_v25, %v6830_v10 }
 0x38f   : > { %v3979_v31 = vsel %vm333_vm2, %v3914_v4, 0.0  ;;  %v3743_v0 = vmul.f32 %v3645_v5, %v3456_v39  ;;  %v3874_v60 = vmul.f32 %v3456_v39, %v3456_v39  ;;  %v5155_v35 = vpop.f32.mrf.mxu1 }
 0x390   : > { %v3980_v38 = vadd.f32 %v3979_v31, %v3978_v20  ;;  %v3371_v48 = vpop.f32.mrf.mxu0 }
 0x391   : > { %v3809_v58 = vsel %vm333_vm2, %v3743_v0, 0.0  ;;  %v3915_v11 = vmul.f32 %v3874_v60, %v3645_v5  ;;  %v3007_v6 = vpop.f32.mrf.mxu1  ;;  %v3457_v37 = vadd.f32 %v3371_v48, %v3085_v47  ;;  %v3665_v47 = vpop.permute.xlu0 %3664 }
 0x392   : > { %v3810_v17 = vadd.f32 %v3809_v58, %v3808_v32  ;;  %v5238_v16 = vpop.f32.mrf.mxu0  ;;  %v3087_v2 = vadd.f32 %v3007_v6, %v6842_v56 }
 0x393   : > { %v3981_v43 = vsel %vm333_vm2, %v3915_v11, 0.0  ;;  %v3744_v59 = vmul.f32 %v3650_v54, %v3457_v37  ;;  %v3875_v34 = vmul.f32 %v3457_v37, %v3457_v37  ;;  %v5156_v62 = vpop.f32.mrf.mxu1  ;;  %v3670_v16 = vpop.permute.xlu1 %3669 }
 0x394   : > { %v3982_v1 = vadd.f32 %v3981_v43, %v3980_v38  ;;  %v3376_v8 = vpop.f32.mrf.mxu0 }
 0x395   : > { %v3811_v9 = vsel %vm333_vm2, %v3744_v59, 0.0  ;;  %v3916_v29 = vmul.f32 %v3875_v34, %v3650_v54  ;;  %v3012_v51 = vpop.f32.mrf.mxu1  ;;  %v3458_v7 = vadd.f32 %v3376_v8, %v3086_v24 }
 0x396   : > { %v3812_v63 = vadd.f32 %v3811_v9, %v3810_v17  ;;  %v5241_v40 = vpop.f32.mrf.mxu0  ;;  %v3088_v3 = vadd.f32 %v3012_v51, %v6846_v22 }
 0x397   : > { %v3983_v44 = vsel %vm333_vm2, %v3916_v29, 0.0  ;;  %v3745_v10 = vmul.f32 %v3655_v23, %v3458_v7  ;;  %v3876_v28 = vmul.f32 %v3458_v7, %v3458_v7  ;;  %v5159_v46 = vpop.f32.mrf.mxu1 }
 0x398   : > { %v3984_v21 = vadd.f32 %v3983_v44, %v3982_v1  ;;  %v3379_v41 = vpop.f32.mrf.mxu0 }
 0x399   : > { %v3813_v15 = vsel %vm333_vm2, %v3745_v10, 0.0  ;;  %v3917_v27 = vmul.f32 %v3876_v28, %v3655_v23  ;;  %v3015_v57 = vpop.f32.mrf.mxu1  ;;  %v3459_v13 = vadd.f32 %v3379_v41, %v3087_v2 }
 0x39a   : > { %v3814_v42 = vadd.f32 %v3813_v15, %v3812_v63  ;;  %v5242_v61 = vpop.f32.mrf.mxu0  ;;  %v3089_v60 = vadd.f32 %v3015_v57, %v6857_v12  ;;  %v3675_v63 = vpop.permute.xlu0 %3674 }
 0x39b   : > { %v3985_v20 = vsel %vm333_vm2, %v3917_v27, 0.0  ;;  %v3746_v56 = vmul.f32 %v3660_v52, %v3459_v13  ;;  %v3877_v33 = vmul.f32 %v3459_v13, %v3459_v13  ;;  %v5160_v53 = vpop.f32.mrf.mxu1 }
 0x39c   : > { %v3986_v4 = vadd.f32 %v3985_v20, %v3984_v21  ;;  %v3384_v25 = vpop.f32.mrf.mxu0 }
 0x39d   : > { %v3815_v39 = vsel %vm333_vm2, %v3746_v56, 0.0  ;;  %v3918_v5 = vmul.f32 %v3877_v33, %v3660_v52  ;;  %v3020_v32 = vpop.f32.mrf.mxu1  ;;  %v3460_v19 = vadd.f32 %v3384_v25, %v3088_v3  ;;  %v3680_v52 = vpop.permute.xlu1 %3679 }
 0x39e   : > { %v3816_v31 = vadd.f32 %v3815_v39, %v3814_v42  ;;  %v5245_v0 = vpop.f32.mrf.mxu0  ;;  %v3090_v59 = vadd.f32 %v3020_v32, %v6861_v45 }
 0x39f   : > { %v3987_v35 = vsel %vm333_vm2, %v3918_v5, 0.0  ;;  %v3747_v22 = vmul.f32 %v3665_v47, %v3460_v19  ;;  %v3878_v38 = vmul.f32 %v3460_v19, %v3460_v19  ;;  %v5163_v48 = vpop.f32.mrf.mxu1  ;;  %v3685_v19 = vpop.permute.xlu0 %3684 }
 0x3a0   : > { %v3988_v58 = vadd.f32 %v3987_v35, %v3986_v4  ;;  %v3387_v11 = vpop.f32.mrf.mxu0 }
 0x3a1   : > { %v3817_v6 = vsel %vm333_vm2, %v3747_v22, 0.0  ;;  %v3919_v37 = vmul.f32 %v3878_v38, %v3665_v47  ;;  %v3023_v54 = vpop.f32.mrf.mxu1  ;;  %v3461_v17 = vadd.f32 %v3387_v11, %v3089_v60 }
 0x3a2   : > { %v3818_v24 = vadd.f32 %v3817_v6, %v3816_v31  ;;  %v5246_v43 = vpop.f32.mrf.mxu0  ;;  %v3091_v44 = vadd.f32 %v3023_v54, %v6868_v55  ;;  %v3690_v54 = vpop.permute.xlu1 %3689 }
 0x3a3   : > { %v3989_v34 = vsel %vm333_vm2, %v3919_v37, 0.0  ;;  %v3748_v12 = vmul.f32 %v3670_v16, %v3461_v17  ;;  %v3879_v62 = vmul.f32 %v3461_v17, %v3461_v17  ;;  %v5164_v1 = vpop.f32.mrf.mxu1 }
 0x3a4   : > { %v3990_v8 = vadd.f32 %v3989_v34, %v3988_v58  ;;  %v3392_v9 = vpop.f32.mrf.mxu0 }
 0x3a5   : > { %v3819_v29 = vsel %vm333_vm2, %v3748_v12, 0.0  ;;  %v3920_v51 = vmul.f32 %v3879_v62, %v3670_v16  ;;  %v3028_v7 = vpop.f32.mrf.mxu1  ;;  %v3462_v23 = vadd.f32 %v3392_v9, %v3090_v59 }
 0x3a6   : > { %v3820_v40 = vadd.f32 %v3819_v29, %v3818_v24  ;;  %v5249_v2 = vpop.f32.mrf.mxu0  ;;  %v3092_v3 = vadd.f32 %v3028_v7, %v6872_v49 }
 0x3a7   : > { %v3991_v10 = vsel %vm333_vm2, %v3920_v51, 0.0  ;;  %v3749_v45 = vmul.f32 %v3675_v63, %v3462_v23  ;;  %v3880_v28 = vmul.f32 %v3462_v23, %v3462_v23  ;;  %v5167_v46 = vpop.f32.mrf.mxu1  ;;  %v3695_v51 = vpop.permute.xlu0 %3694 }
 0x3a8   : > { %v3992_v21 = vadd.f32 %v3991_v10, %v3990_v8  ;;  %v3395_v41 = vpop.f32.mrf.mxu0 }
 0x3a9   : > { %v3821_v15 = vsel %vm333_vm2, %v3749_v45, 0.0  ;;  %v3921_v27 = vmul.f32 %v3880_v28, %v3675_v63  ;;  %v3031_v57 = vpop.f32.mrf.mxu1  ;;  %v3463_v13 = vadd.f32 %v3395_v41, %v3091_v44 }
 0x3aa   : > { %v3822_v42 = vadd.f32 %v3821_v15, %v3820_v40  ;;  %v5250_v61 = vpop.f32.mrf.mxu0  ;;  %v3093_v0 = vadd.f32 %v3031_v57, %v6875_v50  ;;  %v3700_v15 = vpop.permute.xlu1 %3699 }
 0x3ab   : > { %v3993_v20 = vsel %vm333_vm2, %v3921_v27, 0.0  ;;  %v3750_v55 = vmul.f32 %v3680_v52, %v3463_v13  ;;  %v3881_v56 = vmul.f32 %v3463_v13, %v3463_v13  ;;  %v5168_v33 = vpop.f32.mrf.mxu1 }
 0x3ac   : > { %v3994_v53 = vadd.f32 %v3993_v20, %v3992_v21  ;;  %v3400_v4 = vpop.f32.mrf.mxu0 }
 0x3ad   : > { %v3823_v25 = vsel %vm333_vm2, %v3750_v55, 0.0  ;;  %v3922_v39 = vmul.f32 %v3881_v56, %v3680_v52  ;;  %v3036_v5 = vpop.f32.mrf.mxu1  ;;  %v3464_v32 = vadd.f32 %v3400_v4, %v3092_v3  ;;  %v3705_v4 = vpop.permute.xlu0 %3704 }
 0x3ae   : > { %v3824_v47 = vadd.f32 %v3823_v25, %v3822_v42  ;;  %v5253_v31 = vpop.f32.mrf.mxu0  ;;  %v3094_v24 = vadd.f32 %v3036_v5, %v6878_v26 }
 0x3af   : > { %v3995_v60 = vsel %vm333_vm2, %v3922_v39, 0.0  ;;  %v3751_v49 = vmul.f32 %v3685_v19, %v3464_v32  ;;  %v3882_v35 = vmul.f32 %v3464_v32, %v3464_v32  ;;  %v5171_v22 = vpop.f32.mrf.mxu1 }
 0x3b0   : > { %v3996_v38 = vadd.f32 %v3995_v60, %v3994_v53  ;;  %v3403_v48 = vpop.f32.mrf.mxu0 }
 0x3b1   : > { %v3825_v58 = vsel %vm333_vm2, %v3751_v49, 0.0  ;;  %v3923_v11 = vmul.f32 %v3882_v35, %v3685_v19  ;;  %v3039_v6 = vpop.f32.mrf.mxu1  ;;  %v3465_v37 = vadd.f32 %v3403_v48, %v3093_v0 }
 0x3b2   : > { %v3826_v17 = vadd.f32 %v3825_v58, %v3824_v47  ;;  %v5254_v16 = vpop.f32.mrf.mxu0  ;;  %v3095_v63 = vadd.f32 %v3039_v6, %v6881_v36 }
 0x3b3   : > { %v3997_v43 = vsel %vm333_vm2, %v3923_v11, 0.0  ;;  %v3752_v50 = vmul.f32 %v3690_v54, %v3465_v37  ;;  %v3883_v59 = vmul.f32 %v3465_v37, %v3465_v37  ;;  %v5172_v34 = vpop.f32.mrf.mxu1 }
 0x3b4   : > { %v3998_v12 = vadd.f32 %v3997_v43, %v3996_v38  ;;  %v3408_v62 = vpop.f32.mrf.mxu0  ;;  %v3710_v38 = vpop.permute.xlu1 %3709 }
 0x3b5   : > { %v3827_v1 = vsel %vm333_vm2, %v3752_v50, 0.0  ;;  %v3924_v8 = vmul.f32 %v3883_v59, %v3690_v54  ;;  %v3044_v9 = vpop.f32.mrf.mxu1  ;;  %v3466_v29 = vadd.f32 %v3408_v62, %v3094_v24  ;;  %v3715_v59 = vpop.permute.xlu0 %3714 }
 0x3b6   : > { %v3828_v7 = vadd.f32 %v3827_v1, %v3826_v17  ;;  %v5257_v23 = vpop.f32.mrf.mxu0  ;;  %v3096_v13 = vadd.f32 %v3044_v9, %v6884_v30 }
 0x3b7   : > { %v3999_v40 = vsel %vm333_vm2, %v3924_v8, 0.0  ;;  %v3753_v26 = vmul.f32 %v3695_v51, %v3466_v29  ;;  %v3884_v2 = vmul.f32 %v3466_v29, %v3466_v29  ;;  %v5175_v44 = vpop.f32.mrf.mxu1 }
 0x3b8   : > { %v4000_v10 = vadd.f32 %v3999_v40, %v3998_v12  ;;  %v3411_v45 = vpop.f32.mrf.mxu0 }
 0x3b9   : > { %v3829_v28 = vsel %vm333_vm2, %v3753_v26, 0.0  ;;  %v3925_v46 = vmul.f32 %v3884_v2, %v3695_v51  ;;  %v3047_v21 = vpop.f32.mrf.mxu1  ;;  %v3467_v41 = vadd.f32 %v3411_v45, %v3095_v63 }
 0x3ba   : > { %v3830_v27 = vadd.f32 %v3829_v28, %v3828_v7  ;;  %v5258_v57 = vpop.f32.mrf.mxu0  ;;  %v3097_v5 = vadd.f32 %v3047_v21, %v6887_v18 }
 0x3bb   : > { %v4001_v52 = vsel %vm333_vm2, %v3925_v46, 0.0  ;;  %v3754_v36 = vmul.f32 %v3700_v15, %v3467_v41  ;;  %v3885_v42 = vmul.f32 %v3467_v41, %v3467_v41  ;;  %v5176_v61 = vpop.f32.mrf.mxu1 }
 0x3bc   : > { %v4002_v3 = vadd.f32 %v4001_v52, %v4000_v10  ;;  %v3416_v20 = vpop.f32.mrf.mxu0 }
 0x3bd   : > { %v3831_v55 = vsel %vm333_vm2, %v3754_v36, 0.0  ;;  %v3926_v56 = vmul.f32 %v3885_v42, %v3700_v15  ;;  %v3052_v33 = vpop.f32.mrf.mxu1  ;;  %v3468_v53 = vadd.f32 %v3416_v20, %v3096_v13 }
 0x3be   : > { %v3832_v25 = vadd.f32 %v3831_v55, %v3830_v27  ;;  %v5261_v39 = vpop.f32.mrf.mxu0  ;;  %v3098_v11 = vadd.f32 %v3052_v33, %v6889_v14 }
 0x3bf   : > { %v4003_v32 = vsel %vm333_vm2, %v3926_v56, 0.0  ;;  %v3755_v30 = vmul.f32 %v3705_v4, %v3468_v53  ;;  %v3886_v19 = vmul.f32 %v3468_v53, %v3468_v53  ;;  %v5179_v47 = vpop.f32.mrf.mxu1 }
 0x3c0   : > { %v4004_v31 = vadd.f32 %v4003_v32, %v4002_v3  ;;  %v3419_v0 = vpop.f32.mrf.mxu0 }
 0x3c1   : > { %v3833_v60 = vsel %vm333_vm2, %v3755_v30, 0.0  ;;  %v3927_v49 = vmul.f32 %v3886_v19, %v3705_v4  ;;  %v3055_v35 = vpop.f32.mrf.mxu1  ;;  %v3469_v22 = vadd.f32 %v3419_v0, %v3097_v5 }
 0x3c2   : > { %v3834_v48 = vadd.f32 %v3833_v60, %v3832_v25  ;;  %v5262_v58 = vpop.f32.mrf.mxu0 }
 0x3c3   : > { %v4005_v6 = vsel %vm333_vm2, %v3927_v49, 0.0  ;;  %v3756_v18 = vmul.f32 %v3710_v38, %v3469_v22  ;;  %v3887_v37 = vmul.f32 %v3469_v22, %v3469_v22  ;;  %v5180_v54 = vpop.f32.mrf.mxu1 }
 0x3c4   : > { %v4006_v17 = vadd.f32 %v4005_v6, %v4004_v31  ;;  %v3424_v16 = vpop.f32.mrf.mxu0 }
 0x3c5   : > { %v3835_v24 = vsel %vm333_vm2, %v3756_v18, 0.0  ;;  %v3928_v43 = vmul.f32 %v3887_v37, %v3710_v38  ;;  %v3470_v50 = vadd.f32 %v3424_v16, %v3098_v11 }
 0x3c6   : > { %v3836_v34 = vadd.f32 %v3835_v24, %v3834_v48  ;;  %v5265_v12 = vpop.f32.mrf.mxu0 }
 0x3c7   : > { %v4007_v62 = vsel %vm333_vm2, %v3928_v43, 0.0  ;;  %v3757_v1 = vmul.f32 %v3715_v59, %v3470_v50  ;;  %v3888_v8 = vmul.f32 %v3470_v50, %v3470_v50 }
 0x3c8   : > { %v4008_v14 = vadd.f32 %v4007_v62, %v4006_v17  ;;  %v3427_v9 = vpop.f32.mrf.mxu0 }
 0x3c9   : > { %v3838_v29 = vsel %vm3837_vm3, %v3757_v1, 0.0  ;;  %v3929_v51 = vmul.f32 %v3888_v8, %v3715_v59 }
 0x3ca   : > { %v3839_v7 = vadd.f32 %v3838_v29, %v3836_v34  ;;  %v5266_v23 = vpop.f32.mrf.mxu0 }
 0x3cb   : > { %v4009_v63 = vsel %vm3837_vm3, %v3929_v51, 0.0 }
 0x3cc   : > { %v3840_v40 = vrot.slane %v3839_v7, 4  ;;  %v4010_v26 = vadd.f32 %v4009_v63, %v4008_v14 }
 0x3ce   : > { %v3841_v2 = vadd.f32 %v3840_v40, %v3839_v7  ;;  %v4011_v44 = vrot.slane %v4010_v26, 4 }
 0x3d0   : > { %v3842_v10 = vrot.slane %v3841_v2, 2  ;;  %v4012_v45 = vadd.f32 %v4011_v44, %v4010_v26 }
 0x3d2   : > { %v3843_v28 = vadd.f32 %v3842_v10, %v3841_v2  ;;  %v4013_v46 = vrot.slane %v4012_v45, 2 }
 0x3d4   : > { %v3844_v21 = vrot.slane %v3843_v28, 1  ;;  %v4014_v41 = vadd.f32 %v4013_v46, %v4012_v45 }
 0x3d6   : > { %v3845_v15 = vadd.f32 %v3844_v21, %v3843_v28  ;;  %v4015_v27 = vrot.slane %v4014_v41, 1 }
 0x3d8   : > { %3847 = vst.msk [vmem:[%s199_s30] sm:$0x1] %vm3846_vm4, %v3845_v15  ;;  %v4016_v57 = vadd.f32 %v4015_v27, %v4014_v41 }
 0x3da   : > { %4017 = vst.msk [vmem:[%s202_s7] sm:$0x1] %vm3846_vm4, %v4016_v57 }
 0x3db PF: > { %s15_s15 = sadd.s32 1, %s5289_s15  }
 0x3dc   : > { %p12_p4 = scmp.ge.s32.totalorder %s15_s15, 4  }
 0x3de   :  { %14 = sbr.rel (!%p12_p4) target bundleno = 1 (0x1), region = 82 }

// kernel: residual_block_forward.5
= control target key start
LH: loop header
LB: loop body
LE: loop exit
PB: predicated region body
PF: predicated region fallthrough
CT: control target
= control target key end

     0   :  { %s5257_s18 = smov 0   ;;  %s7073_s0 = inlined_call_operand.vmem [shape: f32[2,372,4], index: 0, kind: input, shape index: {}]   ;;  %s7074_s1 = inlined_call_operand.vmem [shape: f32[9,4,4], index: 1, kind: input, shape index: {}]   ;;  %s7075_s2 = inlined_call_operand.vmem [shape: f32[324,1], index: 2, kind: input, shape index: {}]   ;;  %s7076_s3 = inlined_call_operand.vmem [shape: f32[1,4], index: 3, kind: input, shape index: {}]   ;;  %s7077_s4 = inlined_call_operand.vmem [shape: f32[1,4], index: 4, kind: input, shape index: {}]   ;;  %s7078_s5 = inlined_call_operand.vmem [shape: f32[2,372,4], index: 5, kind: output, shape index: {}]  }
   0x1 LB: > { %s4020_s19 = sadd.s32 4294967295, %s5222_s18   ;;  %p4024_p0 = scmp.ge.s32.totalorder %s5222_s18, 1  ;;  %s5222_s18 = sphi %s5257_s18, %s15_s18  }
   0x2   : > { %p187_p1 = scmp.lt.s32.totalorder %s5222_s18, 3 }
   0x4   : > { %p188_p2 = pnand %p4024_p0, %p187_p1 }
   0x6   : > { %191 = sbr.rel (%p188_p2) target bundleno = 976 (0x3d0), region = 40 }
   0xb   : > { %v4027_v0 = vld [vmem:[%s7074_s1 + $0x4] sm:$0xf]  ;;  %vm419_vm0 = vcmask 1041408   ;;  %p215_p3 = scmp.lt.s32.totalorder %s4020_s19, 1  ;;  %v5224_v1 = vmov 0.0   ;;  %vm5225_vm1 = vmmov 0  }
   0xc   : > { %4426 = vmatprep.subr.bf16.mxu0 %v5224_v1  ;;  %5200 = vmatprep.subr.bf16.mxu1 %v5224_v1  ;;  %v354_v2 = vpack.c.bf16 %v4027_v0, %v4027_v0  ;;  %v4070_v3 = vld [vmem:[%s7074_s1 + $0x8] sm:$0xf]  ;;  %v267_v4 = vld [vmem:[%s7074_s1] sm:$0xf]  ;;  %vm355_vm2 = vcmask 31744   ;;  %vm3960_vm3 = vcmask 27648  }
   0xd   : > { %4428 = vmatprep.mubr.msk.bf16.mxu0 %vm5225_vm1, %v5224_v1  ;;  %4472 = vmatprep.mubr.msk.bf16.mxu1 %vm5225_vm1, %v5224_v1  ;;  %s7096_s19 = smov (!%p215_p3, %s4020_s19), 1  ;;  %v953_v6 = vpack.c.bf16 %v4070_v3, %v4070_v3  ;;  %v289_v7 = vpack.c.bf16 %v267_v4, %v267_v4 }
   0xe   : > { %v421_v5 = vsel %vm419_vm0, %v354_v2, 0  ;;  %s5202_s26 = smul.u32 376, %s7096_s19 }
   0xf   : > { %4427 = vmatpush3.bf16.msra.mxu0 %v421_v5  ;;  %5201 = vmatpush3.bf16.msra.mxu1 %v421_v5  ;;  %v1018_v13 = vsel %vm419_vm0, %v953_v6, 0  ;;  %v687_v15 = vsel %vm419_vm0, %v289_v7, 0  ;;  %v4092_v6 = vld [vmem:[%s7074_s1 + $0xc] sm:$0xf] }
  0x10   : > { %4598 = vmatprep.subr.bf16.mxu0 %v5224_v1  ;;  %4512 = vmatprep.subr.bf16.mxu1 %v5224_v1  ;;  %s5291_s29 = scalar_lea.vmem %s7073_s0, %s5202_s26  ;;  %s6646_s17 = scalar_lea.vmem %s7078_s5, %s5202_s26 }
  0x11   : > { %v290_v8 = vld [vmem:[%s5291_s29 + $0x6] sm:$0xff]  ;;  %v291_v9 = vld [vmem:[%s5291_s29 + $0xe] sm:$0xff]  ;;  %v312_v10 = vld [vmem:[%s5291_s29 + $0xb6] sm:$0xff]  ;;  %3917 = vst.msk [vmem:[%s6646_s17] sm:$0xff] %vm355_vm2, %v5224_v1 }
  0x12   : > { %v333_v11 = vpack.c.bf16 %v291_v9, %v290_v8  ;;  %v313_v12 = vld [vmem:[%s5291_s29 + $0xbe] sm:$0xff]  ;;  %v292_v16 = vld [vmem:[%s5291_s29 + $0x16] sm:$0xff]  ;;  %v314_v18 = vld [vmem:[%s5291_s29 + $0xc6] sm:$0xff]  ;;  %3918 = vst.msk [vmem:[%s6646_s17 + $0x8] sm:$0xff] %vm355_vm2, %v5224_v1 }
  0x13   : > { %v344_v14 = vpack.c.bf16 %v313_v12, %v312_v10  ;;  %v293_v17 = vld [vmem:[%s5291_s29 + $0x1e] sm:$0xff]  ;;  %v315_v19 = vld [vmem:[%s5291_s29 + $0xce] sm:$0xff]  ;;  %v294_v22 = vld [vmem:[%s5291_s29 + $0x26] sm:$0xff]  ;;  %3919 = vst.msk [vmem:[%s6646_s17 + $0x10] sm:$0xff] %vm355_vm2, %v5224_v1 }
  0x14   : > { %4429 = vmatmul.mubr.msk.bf16.vlgmr.msra.gmra.mxu0 %vm355_vm2, %v333_v11  ;;  %v334_v20 = vpack.c.bf16 %v293_v17, %v292_v16  ;;  %v345_v21 = vpack.c.bf16 %v315_v19, %v314_v18  ;;  %v295_v23 = vld [vmem:[%s5291_s29 + $0x2e] sm:$0xff]  ;;  %v316_v24 = vld [vmem:[%s5291_s29 + $0xd6] sm:$0xff]  ;;  %v317_v25 = vld [vmem:[%s5291_s29 + $0xde] sm:$0xff]  ;;  %v1325_v11 = vpack.c.bf16 %v4092_v6, %v4092_v6  ;;  %3962 = vst.msk [vmem:[%s6646_s17 + $0x15c] sm:$0xff] %vm355_vm2, %v5224_v1 }
  0x15   : > { %4473 = vmatmul.mubr.msk.bf16.vlgmr.msra.gmra.mxu1 %vm355_vm2, %v344_v14  ;;  %4599 = vmatpush3.bf16.msra.mxu0 %v1018_v13  ;;  %v335_v26 = vpack.c.bf16 %v295_v23, %v294_v22  ;;  %v346_v27 = vpack.c.bf16 %v317_v25, %v316_v24  ;;  %v296_v28 = vld [vmem:[%s5291_s29 + $0x36] sm:$0xff]  ;;  %v297_v29 = vld [vmem:[%s5291_s29 + $0x3e] sm:$0xff]  ;;  %v318_v30 = vld [vmem:[%s5291_s29 + $0xe6] sm:$0xff]  ;;  %3963 = vst.msk [vmem:[%s6646_s17 + $0x164] sm:$0xff] %vm355_vm2, %v5224_v1 }
  0x16   : > { %4513 = vmatpush3.bf16.msra.mxu1 %v687_v15  ;;  %4432 = vmatprep.mubr.msk.bf16.mxu0 %vm5225_vm1, %v5224_v1  ;;  %v319_v31 = vld [vmem:[%s5291_s29 + $0xee] sm:$0xff]  ;;  %v336_v32 = vpack.c.bf16 %v297_v29, %v296_v28  ;;  %v298_v34 = vld [vmem:[%s5291_s29 + $0x46] sm:$0xff]  ;;  %v320_v36 = vld [vmem:[%s5291_s29 + $0xf6] sm:$0xff]  ;;  %v1390_v14 = vsel %vm419_vm0, %v1325_v11, 0  ;;  %3964 = vst.msk [vmem:[%s6646_s17 + $0x16c] sm:$0xff] %vm355_vm2, %v5224_v1 }
  0x17   : > { %4476 = vmatprep.mubr.msk.bf16.mxu1 %vm5225_vm1, %v5224_v1  ;;  %4684 = vmatprep.subr.bf16.mxu1 %v5224_v1  ;;  %v347_v33 = vpack.c.bf16 %v319_v31, %v318_v30  ;;  %v299_v35 = vld [vmem:[%s5291_s29 + $0x4e] sm:$0xff]  ;;  %v321_v37 = vld [vmem:[%s5291_s29 + $0xfe] sm:$0xff]  ;;  %v300_v40 = vld [vmem:[%s5291_s29 + $0x56] sm:$0xff] }
  0x18   : > { %4770 = vmatprep.subr.bf16.mxu0 %v5224_v1  ;;  %v337_v38 = vpack.c.bf16 %v299_v35, %v298_v34  ;;  %v348_v39 = vpack.c.bf16 %v321_v37, %v320_v36  ;;  %v301_v41 = vld [vmem:[%s5291_s29 + $0x5e] sm:$0xff]  ;;  %v322_v42 = vld [vmem:[%s5291_s29 + $0x106] sm:$0xff]  ;;  %v323_v43 = vld [vmem:[%s5291_s29 + $0x10e] sm:$0xff] }
  0x19   : > { %v338_v44 = vpack.c.bf16 %v301_v41, %v300_v40  ;;  %v349_v45 = vpack.c.bf16 %v323_v43, %v322_v42  ;;  %v302_v46 = vld [vmem:[%s5291_s29 + $0x66] sm:$0xff]  ;;  %v303_v47 = vld [vmem:[%s5291_s29 + $0x6e] sm:$0xff]  ;;  %v324_v48 = vld [vmem:[%s5291_s29 + $0x116] sm:$0xff] }
  0x1a   : > { %v325_v49 = vld [vmem:[%s5291_s29 + $0x11e] sm:$0xff]  ;;  %v339_v50 = vpack.c.bf16 %v303_v47, %v302_v46  ;;  %v304_v52 = vld [vmem:[%s5291_s29 + $0x76] sm:$0xff]  ;;  %v326_v54 = vld [vmem:[%s5291_s29 + $0x126] sm:$0xff] }
  0x1b   : > { %v350_v51 = vpack.c.bf16 %v325_v49, %v324_v48  ;;  %v305_v53 = vld [vmem:[%s5291_s29 + $0x7e] sm:$0xff]  ;;  %v327_v55 = vld [vmem:[%s5291_s29 + $0x12e] sm:$0xff]  ;;  %v306_v58 = vld [vmem:[%s5291_s29 + $0x86] sm:$0xff] }
  0x1c   : > { %4433 = vmatmul.mubr.msk.bf16.gmra.mxu0 %vm355_vm2, %v334_v20  ;;  %v340_v56 = vpack.c.bf16 %v305_v53, %v304_v52  ;;  %v351_v57 = vpack.c.bf16 %v327_v55, %v326_v54  ;;  %v307_v59 = vld [vmem:[%s5291_s29 + $0x8e] sm:$0xff]  ;;  %v328_v60 = vld [vmem:[%s5291_s29 + $0x136] sm:$0xff]  ;;  %v329_v61 = vld [vmem:[%s5291_s29 + $0x13e] sm:$0xff] }
  0x1d   : > { %4477 = vmatmul.mubr.msk.bf16.gmra.mxu1 %vm355_vm2, %v345_v21  ;;  %4436 = vmatprep.mubr.msk.bf16.mxu0 %vm5225_vm1, %v5224_v1  ;;  %v341_v62 = vpack.c.bf16 %v307_v59, %v306_v58  ;;  %v352_v63 = vpack.c.bf16 %v329_v61, %v328_v60  ;;  %v308_v0 = vld [vmem:[%s5291_s29 + $0x96] sm:$0xff]  ;;  %v309_v2 = vld [vmem:[%s5291_s29 + $0x9e] sm:$0xff]  ;;  %v330_v3 = vld [vmem:[%s5291_s29 + $0x146] sm:$0xf] }
  0x1e   : > { %4480 = vmatprep.mubr.msk.bf16.mxu1 %vm5225_vm1, %v5224_v1  ;;  %v342_v4 = vpack.c.bf16 %v309_v2, %v308_v0  ;;  %v353_v5 = vpack.c.bf16 %v330_v3, %v330_v3  ;;  %v310_v7 = vld [vmem:[%s5291_s29 + $0xa6] sm:$0xff]  ;;  %v311_v8 = vld [vmem:[%s5291_s29 + $0xae] sm:$0xff]  ;;  %v229_v19 = vld [vmem:[%s5291_s29 + $0x1d] sm:$0xff] }
  0x1f   : > { %v226_v9 = vld [vmem:[%s5291_s29 + $0x5] sm:$0xff]  ;;  %v227_v10 = vld [vmem:[%s5291_s29 + $0xd] sm:$0xff]  ;;  %v343_v12 = vpack.c.bf16 %v311_v8, %v310_v7  ;;  %v228_v18 = vld [vmem:[%s5291_s29 + $0x15] sm:$0xff] }
  0x20   : > { %v268_v13 = vpack.c.bf16 %v227_v10, %v226_v9  ;;  %v4114_v15 = vld [vmem:[%s7074_s1 + $0x10] sm:$0xf]  ;;  %v889_v16 = vld [vmem:[%s5291_s29 + $0x7] sm:$0xff]  ;;  %v269_v22 = vpack.c.bf16 %v229_v19, %v228_v18  ;;  %v891_v24 = vld [vmem:[%s5291_s29 + $0x17] sm:$0xff] }
  0x21   : > { %v890_v17 = vld [vmem:[%s5291_s29 + $0xf] sm:$0xff]  ;;  %v1697_v20 = vpack.c.bf16 %v4114_v15, %v4114_v15  ;;  %v892_v25 = vld [vmem:[%s5291_s29 + $0x1f] sm:$0xff]  ;;  %v893_v30 = vld [vmem:[%s5291_s29 + $0x27] sm:$0xff] }
  0x22   : > { %v932_v21 = vpack.c.bf16 %v890_v17, %v889_v16  ;;  %v5430_v28 = vpack.c.bf16 %v892_v25, %v891_v24  ;;  %v894_v31 = vld [vmem:[%s5291_s29 + $0x2f] sm:$0xff]  ;;  %v895_v36 = vld [vmem:[%s5291_s29 + $0x37] sm:$0xff]  ;;  %v896_v37 = vld [vmem:[%s5291_s29 + $0x3f] sm:$0xff] }
  0x23   : > { %v1762_v23 = vsel %vm419_vm0, %v1697_v20, 0  ;;  %v5443_v34 = vpack.c.bf16 %v894_v31, %v893_v30  ;;  %v5456_v40 = vpack.c.bf16 %v896_v37, %v895_v36  ;;  %v897_v42 = vld [vmem:[%s5291_s29 + $0x47] sm:$0xff]  ;;  %v898_v43 = vld [vmem:[%s5291_s29 + $0x4f] sm:$0xff]  ;;  %v899_v48 = vld [vmem:[%s5291_s29 + $0x57] sm:$0xff] }
  0x24   : > { %4437 = vmatmul.mubr.msk.bf16.gmra.mxu0 %vm355_vm2, %v335_v26  ;;  %v230_v26 = vld [vmem:[%s5291_s29 + $0x25] sm:$0xff]  ;;  %v5469_v46 = vpack.c.bf16 %v898_v43, %v897_v42  ;;  %v902_v55 = vld [vmem:[%s5291_s29 + $0x6f] sm:$0xff]  ;;  %v903_v60 = vld [vmem:[%s5291_s29 + $0x77] sm:$0xff] }
  0x25   : > { %4481 = vmatmul.mubr.msk.bf16.gmra.mxu1 %vm355_vm2, %v346_v27  ;;  %4440 = vmatprep.mubr.msk.bf16.mxu0 %vm5225_vm1, %v5224_v1  ;;  %v231_v27 = vld [vmem:[%s5291_s29 + $0x2d] sm:$0xff]  ;;  %v900_v49 = vld [vmem:[%s5291_s29 + $0x5f] sm:$0xff]  ;;  %v907_v9 = vld [vmem:[%s5291_s29 + $0x97] sm:$0xff] }
  0x26   : > { %4484 = vmatprep.mubr.msk.bf16.mxu1 %vm5225_vm1, %v5224_v1  ;;  %v270_v29 = vpack.c.bf16 %v231_v27, %v230_v26  ;;  %v5482_v52 = vpack.c.bf16 %v900_v49, %v899_v48  ;;  %v901_v54 = vld [vmem:[%s5291_s29 + $0x67] sm:$0xff]  ;;  %v904_v61 = vld [vmem:[%s5291_s29 + $0x7f] sm:$0xff]  ;;  %v910_v16 = vld [vmem:[%s5291_s29 + $0xaf] sm:$0xff] }
  0x27   : > { %v5495_v58 = vpack.c.bf16 %v902_v55, %v901_v54  ;;  %v5508_v0 = vpack.c.bf16 %v904_v61, %v903_v60  ;;  %v905_v3 = vld [vmem:[%s5291_s29 + $0x87] sm:$0xff]  ;;  %v245_v6 = vld [vmem:[%s5291_s29 + $0x9d] sm:$0xff]  ;;  %v248_v17 = vld [vmem:[%s5291_s29 + $0xb5] sm:$0xff] }
  0x28   : > { %v908_v10 = vld [vmem:[%s5291_s29 + $0x9f] sm:$0xff]  ;;  %v909_v15 = vld [vmem:[%s5291_s29 + $0xa7] sm:$0xff]  ;;  %v252_v30 = vld [vmem:[%s5291_s29 + $0xd5] sm:$0xff] }
  0x29   : > { %v246_v11 = vld [vmem:[%s5291_s29 + $0xa5] sm:$0xff]  ;;  %v249_v18 = vld [vmem:[%s5291_s29 + $0xbd] sm:$0xff]  ;;  %v5547_v19 = vpack.c.bf16 %v910_v16, %v909_v15  ;;  %v251_v24 = vld [vmem:[%s5291_s29 + $0xcd] sm:$0xff] }
  0x2a   : > { %v279_v20 = vpack.c.bf16 %v249_v18, %v248_v17  ;;  %v913_v27 = vld [vmem:[%s5291_s29 + $0xc7] sm:$0xff]  ;;  %v253_v31 = vld [vmem:[%s5291_s29 + $0xdd] sm:$0xff]  ;;  %v256_v48 = vld [vmem:[%s5291_s29 + $0xf5] sm:$0xff] }
  0x2b   : > { %v916_v36 = vld [vmem:[%s5291_s29 + $0xdf] sm:$0xff]  ;;  %v919_v61 = vld [vmem:[%s5291_s29 + $0xf7] sm:$0xff]  ;;  %v921_v15 = vld [vmem:[%s5291_s29 + $0x107] sm:$0xff] }
  0x2c   : > { %4441 = vmatmul.mubr.msk.bf16.gmra.mxu0 %vm355_vm2, %v336_v32  ;;  %v232_v32 = vld [vmem:[%s5291_s29 + $0x35] sm:$0xff]  ;;  %v254_v37 = vld [vmem:[%s5291_s29 + $0xe5] sm:$0xff]  ;;  %v257_v49 = vld [vmem:[%s5291_s29 + $0xfd] sm:$0xff] }
  0x2d   : > { %4485 = vmatmul.mubr.msk.bf16.gmra.mxu1 %vm355_vm2, %v347_v33  ;;  %4444 = vmatprep.mubr.msk.bf16.mxu0 %vm5225_vm1, %v5224_v1  ;;  %v233_v33 = vld [vmem:[%s5291_s29 + $0x3d] sm:$0xff]  ;;  %v283_v55 = vpack.c.bf16 %v257_v49, %v256_v48  ;;  %v922_v16 = vld [vmem:[%s5291_s29 + $0x10f] sm:$0xff] }
  0x2e   : > { %4488 = vmatprep.mubr.msk.bf16.mxu1 %vm5225_vm1, %v5224_v1  ;;  %v271_v35 = vpack.c.bf16 %v233_v33, %v232_v32  ;;  %v281_v33 = vpack.c.bf16 %v253_v31, %v252_v30  ;;  %v260_v18 = vld [vmem:[%s5291_s29 + $0x115] sm:$0xff] }
  0x34   : > { %4445 = vmatmul.mubr.msk.bf16.gmra.mxu0 %vm355_vm2, %v337_v38  ;;  %v234_v38 = vld [vmem:[%s5291_s29 + $0x45] sm:$0xff] }
  0x35   : > { %4489 = vmatmul.mubr.msk.bf16.gmra.mxu1 %vm355_vm2, %v348_v39  ;;  %4448 = vmatprep.mubr.msk.bf16.mxu0 %vm5225_vm1, %v5224_v1  ;;  %v235_v39 = vld [vmem:[%s5291_s29 + $0x4d] sm:$0xff] }
  0x36   : > { %4492 = vmatprep.mubr.msk.bf16.mxu1 %vm5225_vm1, %v5224_v1  ;;  %v272_v41 = vpack.c.bf16 %v235_v39, %v234_v38  ;;  %v255_v38 = vld [vmem:[%s5291_s29 + $0xed] sm:$0xff] }
  0x3c   : > { %4449 = vmatmul.mubr.msk.bf16.gmra.mxu0 %vm355_vm2, %v338_v44  ;;  %v236_v44 = vld [vmem:[%s5291_s29 + $0x55] sm:$0xff] }
  0x3d   : > { %4493 = vmatmul.mubr.msk.bf16.gmra.mxu1 %vm355_vm2, %v349_v45  ;;  %4452 = vmatprep.mubr.msk.bf16.mxu0 %vm5225_vm1, %v5224_v1  ;;  %v237_v45 = vld [vmem:[%s5291_s29 + $0x5d] sm:$0xff] }
  0x3e   : > { %4496 = vmatprep.mubr.msk.bf16.mxu1 %vm5225_vm1, %v5224_v1  ;;  %v273_v47 = vpack.c.bf16 %v237_v45, %v236_v44  ;;  %v917_v44 = vld [vmem:[%s5291_s29 + $0xe7] sm:$0xff]  ;;  %v918_v45 = vld [vmem:[%s5291_s29 + $0xef] sm:$0xff] }
  0x44   : > { %4453 = vmatmul.mubr.msk.bf16.gmra.mxu0 %vm355_vm2, %v339_v50  ;;  %v238_v50 = vld [vmem:[%s5291_s29 + $0x65] sm:$0xff] }
  0x45   : > { %4497 = vmatmul.mubr.msk.bf16.gmra.mxu1 %vm355_vm2, %v350_v51  ;;  %4456 = vmatprep.mubr.msk.bf16.mxu0 %vm5225_vm1, %v5224_v1  ;;  %v239_v51 = vld [vmem:[%s5291_s29 + $0x6d] sm:$0xff] }
  0x46   : > { %4500 = vmatprep.mubr.msk.bf16.mxu1 %vm5225_vm1, %v5224_v1  ;;  %v274_v53 = vpack.c.bf16 %v239_v51, %v238_v50 }
  0x4c   : > { %4457 = vmatmul.mubr.msk.bf16.gmra.mxu0 %vm355_vm2, %v340_v56  ;;  %v240_v56 = vld [vmem:[%s5291_s29 + $0x75] sm:$0xff] }
  0x4d   : > { %4501 = vmatmul.mubr.msk.bf16.gmra.mxu1 %vm355_vm2, %v351_v57  ;;  %4460 = vmatprep.mubr.msk.bf16.mxu0 %vm5225_vm1, %v5224_v1  ;;  %v241_v57 = vld [vmem:[%s5291_s29 + $0x7d] sm:$0xff] }
  0x4e   : > { %4504 = vmatprep.mubr.msk.bf16.mxu1 %vm5225_vm1, %v5224_v1  ;;  %v275_v59 = vpack.c.bf16 %v241_v57, %v240_v56 }
  0x54   : > { %4461 = vmatmul.mubr.msk.bf16.gmra.mxu0 %vm355_vm2, %v341_v62  ;;  %v242_v62 = vld [vmem:[%s5291_s29 + $0x85] sm:$0xff] }
  0x55   : > { %4505 = vmatmul.mubr.msk.bf16.gmra.mxu1 %vm355_vm2, %v352_v63  ;;  %4464 = vmatprep.mubr.msk.bf16.mxu0 %vm5225_vm1, %v5224_v1  ;;  %v243_v63 = vld [vmem:[%s5291_s29 + $0x8d] sm:$0xff] }
  0x56   : > { %4508 = vmatprep.mubr.msk.bf16.mxu1 %vm5225_vm1, %v5224_v1  ;;  %v276_v2 = vpack.c.bf16 %v243_v63, %v242_v62  ;;  %v920_v62 = vld [vmem:[%s5291_s29 + $0xff] sm:$0xff] }
  0x5c   : > { %4465 = vmatmul.mubr.msk.bf16.gmra.mxu0 %vm355_vm2, %v342_v4  ;;  %v906_v4 = vld [vmem:[%s5291_s29 + $0x8f] sm:$0xff] }
  0x5d   : > { %4509 = vmatmul.mubr.msk.bf16.gmra.mxu1 %vm355_vm2, %v353_v5  ;;  %4468 = vmatprep.mubr.msk.bf16.mxu0 %vm5225_vm1, %v5224_v1  ;;  %v244_v5 = vld [vmem:[%s5291_s29 + $0x95] sm:$0xff]  ;;  %v5521_v7 = vpack.c.bf16 %v906_v4, %v905_v3  ;;  %v259_v3 = vld [vmem:[%s5291_s29 + $0x10d] sm:$0xff] }
  0x5e   : > { %4514 = vmatprep.mubr.msk.bf16.mxu1 %vm5225_vm1, %v5224_v1  ;;  %v277_v8 = vpack.c.bf16 %v245_v6, %v244_v5  ;;  %v5626_v6 = vpack.c.bf16 %v920_v62, %v919_v61  ;;  %v926_v61 = vld [vmem:[%s5291_s29 + $0x12f] sm:$0xff] }
  0x64   : > { %4469 = vmatmul.mubr.msk.bf16.gmra.mxu0 %vm355_vm2, %v343_v12  ;;  %v247_v12 = vld [vmem:[%s5291_s29 + $0xad] sm:$0xff] }
  0x65   : > { %4515 = vmatmul.mubr.msk.bf16.vlgmr.msra.gmra.mxu1 %vm355_vm2, %v268_v13  ;;  %4600 = vmatprep.mubr.msk.bf16.mxu0 %vm5225_vm1, %v5224_v1  ;;  %v5534_v13 = vpack.c.bf16 %v908_v10, %v907_v9 }
  0x66   : > { %4685 = vmatpush3.bf16.msra.mxu1 %v1390_v14  ;;  %4518 = vmatprep.mubr.msk.bf16.mxu1 %vm5225_vm1, %v5224_v1  ;;  %v278_v14 = vpack.c.bf16 %v247_v12, %v246_v11 }
  0x67   : > { %4856 = vmatprep.subr.bf16.mxu1 %v5224_v1 }
  0x6c   : > { %4601 = vmatmul.mubr.msk.bf16.vlgmr.msra.gmra.mxu0 %vm355_vm2, %v932_v21  ;;  %v911_v21 = vld [vmem:[%s5291_s29 + $0xb7] sm:$0xff] }
  0x6d   : > { %4519 = vmatmul.mubr.msk.bf16.gmra.mxu1 %vm355_vm2, %v269_v22  ;;  %4771 = vmatpush3.bf16.msra.mxu0 %v1762_v23  ;;  %v912_v22 = vld [vmem:[%s5291_s29 + $0xbf] sm:$0xff] }
  0x6e   : > { %4522 = vmatprep.mubr.msk.bf16.mxu1 %vm5225_vm1, %v5224_v1  ;;  %4604 = vmatprep.mubr.msk.bf16.mxu0 %vm5225_vm1, %v5224_v1  ;;  %v250_v23 = vld [vmem:[%s5291_s29 + $0xc5] sm:$0xff]  ;;  %v5560_v25 = vpack.c.bf16 %v912_v22, %v911_v21 }
  0x6f   : > { %4942 = vmatprep.subr.bf16.mxu0 %v5224_v1  ;;  %v280_v26 = vpack.c.bf16 %v251_v24, %v250_v23  ;;  %v5647_v23 = vpack.c.bf16 %v922_v16, %v921_v15 }
  0x74   : > { %4605 = vmatmul.mubr.msk.bf16.gmra.mxu0 %vm355_vm2, %v5430_v28 }
  0x75   : > { %4523 = vmatmul.mubr.msk.bf16.gmra.mxu1 %vm355_vm2, %v270_v29  ;;  %4608 = vmatprep.mubr.msk.bf16.mxu0 %vm5225_vm1, %v5224_v1  ;;  %v914_v29 = vld [vmem:[%s5291_s29 + $0xcf] sm:$0xff] }
  0x76   : > { %4526 = vmatprep.mubr.msk.bf16.mxu1 %vm5225_vm1, %v5224_v1  ;;  %v5573_v32 = vpack.c.bf16 %v914_v29, %v913_v27 }
  0x7c   : > { %4609 = vmatmul.mubr.msk.bf16.gmra.mxu0 %vm355_vm2, %v5443_v34 }
  0x7d   : > { %4527 = vmatmul.mubr.msk.bf16.gmra.mxu1 %vm355_vm2, %v271_v35  ;;  %4612 = vmatprep.mubr.msk.bf16.mxu0 %vm5225_vm1, %v5224_v1  ;;  %v915_v35 = vld [vmem:[%s5291_s29 + $0xd7] sm:$0xff] }
  0x7e   : > { %4530 = vmatprep.mubr.msk.bf16.mxu1 %vm5225_vm1, %v5224_v1  ;;  %v5586_v39 = vpack.c.bf16 %v916_v36, %v915_v35  ;;  %v924_v35 = vld [vmem:[%s5291_s29 + $0x11f] sm:$0xff] }
  0x84   : > { %4613 = vmatmul.mubr.msk.bf16.gmra.mxu0 %vm355_vm2, %v5456_v40 }
  0x85   : > { %4531 = vmatmul.mubr.msk.bf16.gmra.mxu1 %vm355_vm2, %v272_v41  ;;  %4616 = vmatprep.mubr.msk.bf16.mxu0 %vm5225_vm1, %v5224_v1  ;;  %v282_v41 = vpack.c.bf16 %v255_v38, %v254_v37  ;;  %v262_v37 = vld [vmem:[%s5291_s29 + $0x125] sm:$0xff]  ;;  %v263_v38 = vld [vmem:[%s5291_s29 + $0x12d] sm:$0xff] }
  0x86   : > { %4534 = vmatprep.mubr.msk.bf16.mxu1 %vm5225_vm1, %v5224_v1  ;;  %v286_v48 = vpack.c.bf16 %v263_v38, %v262_v37 }
  0x8c   : > { %4617 = vmatmul.mubr.msk.bf16.gmra.mxu0 %vm355_vm2, %v5469_v46 }
  0x8d   : > { %4535 = vmatmul.mubr.msk.bf16.gmra.mxu1 %vm355_vm2, %v273_v47  ;;  %4620 = vmatprep.mubr.msk.bf16.mxu0 %vm5225_vm1, %v5224_v1 }
  0x8e   : > { %4538 = vmatprep.mubr.msk.bf16.mxu1 %vm5225_vm1, %v5224_v1 }
  0x94   : > { %4621 = vmatmul.mubr.msk.bf16.gmra.mxu0 %vm355_vm2, %v5482_v52 }
  0x95   : > { %4539 = vmatmul.mubr.msk.bf16.gmra.mxu1 %vm355_vm2, %v274_v53  ;;  %4624 = vmatprep.mubr.msk.bf16.mxu0 %vm5225_vm1, %v5224_v1  ;;  %v5605_v53 = vpack.c.bf16 %v918_v45, %v917_v44 }
  0x96   : > { %4542 = vmatprep.mubr.msk.bf16.mxu1 %vm5225_vm1, %v5224_v1 }
  0x9c   : > { %4625 = vmatmul.mubr.msk.bf16.gmra.mxu0 %vm355_vm2, %v5495_v58 }
  0x9d   : > { %4543 = vmatmul.mubr.msk.bf16.gmra.mxu1 %vm355_vm2, %v275_v59  ;;  %4628 = vmatprep.mubr.msk.bf16.mxu0 %vm5225_vm1, %v5224_v1 }
  0x9e   : > { %4546 = vmatprep.mubr.msk.bf16.mxu1 %vm5225_vm1, %v5224_v1 }
  0xa4   : > { %4629 = vmatmul.mubr.msk.bf16.gmra.mxu0 %vm355_vm2, %v5508_v0 }
  0xa5   : > { %4547 = vmatmul.mubr.msk.bf16.gmra.mxu1 %vm355_vm2, %v276_v2  ;;  %4632 = vmatprep.mubr.msk.bf16.mxu0 %vm5225_vm1, %v5224_v1  ;;  %v258_v2 = vld [vmem:[%s5291_s29 + $0x105] sm:$0xff] }
  0xa6   : > { %4550 = vmatprep.mubr.msk.bf16.mxu1 %vm5225_vm1, %v5224_v1  ;;  %v284_v9 = vpack.c.bf16 %v259_v3, %v258_v2  ;;  %v265_v2 = vld [vmem:[%s5291_s29 + $0x13d] sm:$0xff] }
  0xac   : > { %4633 = vmatmul.mubr.msk.bf16.gmra.mxu0 %vm355_vm2, %v5521_v7 }
  0xad   : > { %4551 = vmatmul.mubr.msk.bf16.gmra.mxu1 %vm355_vm2, %v277_v8  ;;  %4636 = vmatprep.mubr.msk.bf16.mxu0 %vm5225_vm1, %v5224_v1 }
  0xae   : > { %4554 = vmatprep.mubr.msk.bf16.mxu1 %vm5225_vm1, %v5224_v1 }
  0xb4   : > { %4637 = vmatmul.mubr.msk.bf16.gmra.mxu0 %vm355_vm2, %v5534_v13 }
  0xb5   : > { %4555 = vmatmul.mubr.msk.bf16.gmra.mxu1 %vm355_vm2, %v278_v14  ;;  %4640 = vmatprep.mubr.msk.bf16.mxu0 %vm5225_vm1, %v5224_v1 }
  0xb6   : > { %4558 = vmatprep.mubr.msk.bf16.mxu1 %vm5225_vm1, %v5224_v1 }
  0xbc   : > { %4641 = vmatmul.mubr.msk.bf16.gmra.mxu0 %vm355_vm2, %v5547_v19 }
  0xbd   : > { %4559 = vmatmul.mubr.msk.bf16.gmra.mxu1 %vm355_vm2, %v279_v20  ;;  %4644 = vmatprep.mubr.msk.bf16.mxu0 %vm5225_vm1, %v5224_v1  ;;  %v261_v20 = vld [vmem:[%s5291_s29 + $0x11d] sm:$0xff] }
  0xbe   : > { %4562 = vmatprep.mubr.msk.bf16.mxu1 %vm5225_vm1, %v5224_v1 }
  0xc4   : > { %4645 = vmatmul.mubr.msk.bf16.gmra.mxu0 %vm355_vm2, %v5560_v25 }
  0xc5   : > { %4563 = vmatmul.mubr.msk.bf16.gmra.mxu1 %vm355_vm2, %v280_v26  ;;  %4648 = vmatprep.mubr.msk.bf16.mxu0 %vm5225_vm1, %v5224_v1  ;;  %v285_v26 = vpack.c.bf16 %v261_v20, %v260_v18  ;;  %v927_v20 = vld [vmem:[%s5291_s29 + $0x137] sm:$0xff] }
  0xc6   : > { %4566 = vmatprep.mubr.msk.bf16.mxu1 %vm5225_vm1, %v5224_v1 }
  0xcc   : > { %4649 = vmatmul.mubr.msk.bf16.gmra.mxu0 %vm355_vm2, %v5573_v32 }
  0xcd   : > { %4567 = vmatmul.mubr.msk.bf16.gmra.mxu1 %vm355_vm2, %v281_v33  ;;  %4652 = vmatprep.mubr.msk.bf16.mxu0 %vm5225_vm1, %v5224_v1  ;;  %v923_v33 = vld [vmem:[%s5291_s29 + $0x117] sm:$0xff] }
  0xce   : > { %4570 = vmatprep.mubr.msk.bf16.mxu1 %vm5225_vm1, %v5224_v1  ;;  %v5668_v45 = vpack.c.bf16 %v924_v35, %v923_v33 }
  0xd4   : > { %v5588_v42 = vpop.f32.mrf.mxu0  ;;  %4653 = vmatmul.mubr.msk.bf16.gmra.mxu0 %vm355_vm2, %v5586_v39 }
  0xd5   : > { %v5592_v43 = vpop.f32.mrf.mxu1  ;;  %4571 = vmatmul.mubr.msk.bf16.gmra.mxu1 %vm355_vm2, %v282_v41  ;;  %4656 = vmatprep.mubr.msk.bf16.mxu0 %vm5225_vm1, %v5224_v1 }
  0xd6   : > { %v4430_v47 = vpop.f32.mrf.mxu0  ;;  %4574 = vmatprep.mubr.msk.bf16.mxu1 %vm5225_vm1, %v5224_v1 }
  0xd7   : > { %v4474_v50 = vpop.f32.mrf.mxu1 }
  0xd8   : > { %v5603_v51 = vpop.f32.mrf.mxu0 }
  0xd9   : > { %v5607_v54 = vpop.f32.mrf.mxu1 }
  0xda   : > { %v4431_v56 = vpop.f32.mrf.mxu0 }
  0xdb   : > { %v4475_v57 = vpop.f32.mrf.mxu1 }
  0xdc   : > { %v5609_v59 = vpop.f32.mrf.mxu0  ;;  %4657 = vmatmul.mubr.msk.bf16.gmra.mxu0 %vm355_vm2, %v5605_v53  ;;  %v925_v57 = vld [vmem:[%s5291_s29 + $0x127] sm:$0xff] }
  0xdd   : > { %v5613_v60 = vpop.f32.mrf.mxu1  ;;  %4575 = vmatmul.mubr.msk.bf16.gmra.mxu1 %vm355_vm2, %v283_v55  ;;  %4660 = vmatprep.mubr.msk.bf16.mxu0 %vm5225_vm1, %v5224_v1 }
  0xde   : > { %v4434_v63 = vpop.f32.mrf.mxu0  ;;  %4578 = vmatprep.mubr.msk.bf16.mxu1 %vm5225_vm1, %v5224_v1 }
  0xdf   : > { %v4478_v4 = vpop.f32.mrf.mxu1  ;;  %v264_v63 = vld [vmem:[%s5291_s29 + $0x135] sm:$0xff] }
  0xe0   : > { %v5624_v5 = vpop.f32.mrf.mxu0 }
  0xe1   : > { %v5628_v8 = vpop.f32.mrf.mxu1 }
  0xe2   : > { %v4435_v10 = vpop.f32.mrf.mxu0 }
  0xe3   : > { %v4479_v11 = vpop.f32.mrf.mxu1 }
  0xe4   : > { %v5630_v12 = vpop.f32.mrf.mxu0  ;;  %4661 = vmatmul.mubr.msk.bf16.gmra.mxu0 %vm355_vm2, %v5626_v6  ;;  %v287_v11 = vpack.c.bf16 %v265_v2, %v264_v63 }
  0xe5   : > { %v5634_v14 = vpop.f32.mrf.mxu1  ;;  %4579 = vmatmul.mubr.msk.bf16.gmra.mxu1 %vm355_vm2, %v284_v9  ;;  %4664 = vmatprep.mubr.msk.bf16.mxu0 %vm5225_vm1, %v5224_v1  ;;  %v5689_v9 = vpack.c.bf16 %v926_v61, %v925_v57  ;;  %v929_v57 = vld [vmem:[%s5291_s29 + $0x147] sm:$0xf] }
  0xe6   : > { %v4438_v17 = vpop.f32.mrf.mxu0  ;;  %4582 = vmatprep.mubr.msk.bf16.mxu1 %vm5225_vm1, %v5224_v1 }
  0xe7   : > { %v4482_v21 = vpop.f32.mrf.mxu1 }
  0xe8   : > { %v5645_v22 = vpop.f32.mrf.mxu0  ;;  %v928_v21 = vld [vmem:[%s5291_s29 + $0x13f] sm:$0xff] }
  0xe9   : > { %v5649_v24 = vpop.f32.mrf.mxu1  ;;  %v5709_v35 = vpack.c.bf16 %v928_v21, %v927_v20  ;;  %v4158_v21 = vld [vmem:[%s7074_s1 + $0x18] sm:$0xf] }
  0xea   : > { %v4439_v27 = vpop.f32.mrf.mxu0 }
  0xeb   : > { %v4483_v29 = vpop.f32.mrf.mxu1  ;;  %v266_v27 = vld [vmem:[%s5291_s29 + $0x145] sm:$0xf] }
  0xec   : > { %v5651_v30 = vpop.f32.mrf.mxu0  ;;  %4665 = vmatmul.mubr.msk.bf16.gmra.mxu0 %vm355_vm2, %v5647_v23  ;;  %v288_v37 = vpack.c.bf16 %v266_v27, %v266_v27 }
  0xed   : > { %v5655_v31 = vpop.f32.mrf.mxu1  ;;  %4583 = vmatmul.mubr.msk.bf16.gmra.mxu1 %vm355_vm2, %v285_v26  ;;  %4668 = vmatprep.mubr.msk.bf16.mxu0 %vm5225_vm1, %v5224_v1 }
  0xee   : > { %v4442_v36 = vpop.f32.mrf.mxu0  ;;  %4586 = vmatprep.mubr.msk.bf16.mxu1 %vm5225_vm1, %v5224_v1 }
  0xef   : > { %v4486_v41 = vpop.f32.mrf.mxu1 }
  0xf0   : > { %v5666_v44 = vpop.f32.mrf.mxu0 }
  0xf1   : > { %v5670_v47 = vpop.f32.mrf.mxu1 }
  0xf2   : > { %v4443_v49 = vpop.f32.mrf.mxu0 }
  0xf3   : > { %v4487_v50 = vpop.f32.mrf.mxu1  ;;  %v4136_v49 = vld [vmem:[%s7074_s1 + $0x14] sm:$0xf] }
  0xf4   : > { %v5672_v55 = vpop.f32.mrf.mxu0  ;;  %4669 = vmatmul.mubr.msk.bf16.gmra.mxu0 %vm355_vm2, %v5668_v45  ;;  %v2069_v63 = vpack.c.bf16 %v4136_v49, %v4136_v49 }
  0xf5   : > { %v5676_v56 = vpop.f32.mrf.mxu1  ;;  %4587 = vmatmul.mubr.msk.bf16.gmra.mxu1 %vm355_vm2, %v286_v48  ;;  %4672 = vmatprep.mubr.msk.bf16.mxu0 %vm5225_vm1, %v5224_v1 }
  0xf6   : > { %v4446_v62 = vpop.f32.mrf.mxu0  ;;  %4590 = vmatprep.mubr.msk.bf16.mxu1 %vm5225_vm1, %v5224_v1  ;;  %v2134_v20 = vsel %vm419_vm0, %v2069_v63, 0 }
  0xf7   : > { %v4490_v3 = vpop.f32.mrf.mxu1 }
  0xf8   : > { %v5687_v4 = vpop.f32.mrf.mxu0  ;;  %v952_v3 = vpack.c.bf16 %v929_v57, %v929_v57 }
  0xf9   : > { %v5691_v10 = vpop.f32.mrf.mxu1 }
  0xfa   : > { %v4447_v15 = vpop.f32.mrf.mxu0 }
  0xfb   : > { %v4491_v16 = vpop.f32.mrf.mxu1 }
  0xfc   : > { %v5693_v17 = vpop.f32.mrf.mxu0  ;;  %4673 = vmatmul.mubr.msk.bf16.gmra.mxu0 %vm355_vm2, %v5689_v9 }
  0xfd   : > { %v5697_v18 = vpop.f32.mrf.mxu1  ;;  %4591 = vmatmul.mubr.msk.bf16.gmra.mxu1 %vm355_vm2, %v287_v11  ;;  %4676 = vmatprep.mubr.msk.bf16.mxu0 %vm5225_vm1, %v5224_v1 }
  0xfe   : > { %v4450_v26 = vpop.f32.mrf.mxu0  ;;  %4594 = vmatprep.mubr.msk.bf16.mxu1 %vm5225_vm1, %v5224_v1 }
  0xff   : > { %v4494_v29 = vpop.f32.mrf.mxu1 }
 0x100   : > { %v5707_v33 = vpop.f32.mrf.mxu0  ;;  %v1633_v29 = vld [vmem:[%s5291_s29 + $0x18] sm:$0xff] }
 0x101   : > { %v5711_v36 = vpop.f32.mrf.mxu1 }
 0x102   : > { %v4451_v38 = vpop.f32.mrf.mxu0 }
 0x103   : > { %v4495_v41 = vpop.f32.mrf.mxu1 }
 0x104   : > { %v5713_v48 = vpop.f32.mrf.mxu0  ;;  %4677 = vmatmul.mubr.msk.bf16.gmra.mxu0 %vm355_vm2, %v5709_v35  ;;  %v2441_v41 = vpack.c.bf16 %v4158_v21, %v4158_v21  ;;  %v1636_v21 = vld [vmem:[%s5291_s29 + $0x30] sm:$0xff] }
 0x105   : > { %v5720_v50 = vpop.f32.mrf.mxu1  ;;  %4595 = vmatmul.mubr.msk.bf16.gmra.mxu1 %vm355_vm2, %v288_v37  ;;  %4680 = vmatprep.mubr.msk.bf16.mxu0 %vm5225_vm1, %v5224_v1  ;;  %v1634_v37 = vld [vmem:[%s5291_s29 + $0x20] sm:$0xff] }
 0x106   : > { %7079 = vst [vmem:[#allocation2_spill] sm:$0xff] %v5720_v50  ;;  %v4454_v61 = vpop.f32.mrf.mxu0  ;;  %4686 = vmatprep.mubr.msk.bf16.mxu1 %vm5225_vm1, %v5224_v1  ;;  %v2506_v63 = vsel %vm419_vm0, %v2441_v41, 0 }
 0x107   : > { %v4498_v62 = vpop.f32.mrf.mxu1  ;;  %v1676_v61 = vpack.c.bf16 %v1634_v37, %v1633_v29 }
 0x108   : > { %v5728_v2 = vpop.f32.mrf.mxu0 }
 0x109   : > { %v5730_v11 = vpop.f32.mrf.mxu1 }
 0x10a   : > { %7080 = vst [vmem:[#allocation3_spill] sm:$0xff] %v5730_v11  ;;  %v4455_v15 = vpop.f32.mrf.mxu0 }
 0x10b   : > { %v4499_v16 = vpop.f32.mrf.mxu1 }
 0x10c   : > { %v5736_v26 = vpop.f32.mrf.mxu0  ;;  %4681 = vmatmul.mubr.msk.bf16.gmra.mxu0 %vm355_vm2, %v952_v3 }
 0x10d   : > { %v5739_v27 = vpop.f32.mrf.mxu1  ;;  %4687 = vmatmul.mubr.msk.bf16.vlgmr.msra.gmra.mxu1 %vm355_vm2, %v5430_v28  ;;  %4772 = vmatprep.mubr.msk.bf16.mxu0 %vm5225_vm1, %v5224_v1 }
 0x10e   : > { %7081 = vst [vmem:[#allocation4_spill] sm:$0xff] %v5739_v27  ;;  %v4458_v38 = vpop.f32.mrf.mxu0  ;;  %4857 = vmatpush3.bf16.msra.mxu1 %v2134_v20  ;;  %4690 = vmatprep.mubr.msk.bf16.mxu1 %vm5225_vm1, %v5224_v1  ;;  %v1635_v20 = vld [vmem:[%s5291_s29 + $0x28] sm:$0xff] }
 0x10f   : > { %v4502_v49 = vpop.f32.mrf.mxu1  ;;  %5028 = vmatprep.subr.bf16.mxu1 %v5224_v1  ;;  %v1677_v41 = vpack.c.bf16 %v1636_v21, %v1635_v20  ;;  %v1638_v20 = vld [vmem:[%s5291_s29 + $0x40] sm:$0xff] }
 0x110   : > { %v5750_v57 = vpop.f32.mrf.mxu0 }
 0x111   : > { %v5752_v28 = vpop.f32.mrf.mxu1 }
 0x112   : > { %7082 = vst [vmem:[#allocation5_spill] sm:$0xff] %v5752_v28  ;;  %v4459_v62 = vpop.f32.mrf.mxu0 }
 0x113   : > { %v4503_v3 = vpop.f32.mrf.mxu1 }
 0x114   : > { %v5755_v15 = vpop.f32.mrf.mxu0  ;;  %4773 = vmatmul.mubr.msk.bf16.vlgmr.msra.gmra.mxu0 %vm355_vm2, %v1676_v61  ;;  %v1637_v3 = vld [vmem:[%s5291_s29 + $0x38] sm:$0xff] }
 0x115   : > { %v5758_v16 = vpop.f32.mrf.mxu1  ;;  %4691 = vmatmul.mubr.msk.bf16.gmra.mxu1 %vm355_vm2, %v5443_v34  ;;  %4943 = vmatpush3.bf16.msra.mxu0 %v2506_v63 }
 0x116   : > { %7083 = vst [vmem:[#allocation6_spill] sm:$0xff] %v5758_v16  ;;  %v4462_v29 = vpop.f32.mrf.mxu0  ;;  %4694 = vmatprep.mubr.msk.bf16.mxu1 %vm5225_vm1, %v5224_v1  ;;  %4776 = vmatprep.mubr.msk.bf16.mxu0 %vm5225_vm1, %v5224_v1  ;;  %v1640_v16 = vld [vmem:[%s5291_s29 + $0x50] sm:$0xff] }
 0x117   : > { %v4506_v37 = vpop.f32.mrf.mxu1  ;;  %5114 = vmatprep.subr.bf16.mxu0 %v5224_v1 }
 0x118   : > { %v5769_v38 = vpop.f32.mrf.mxu0 }
 0x119   : > { %v5771_v49 = vpop.f32.mrf.mxu1 }
 0x11a   : > { %7084 = vst [vmem:[#allocation7_spill] sm:$0xff] %v5771_v49  ;;  %v4463_v34 = vpop.f32.mrf.mxu0 }
 0x11b   : > { %v4507_v61 = vpop.f32.mrf.mxu1 }
 0x11c   : > { %v5773_v62 = vpop.f32.mrf.mxu0  ;;  %4777 = vmatmul.mubr.msk.bf16.gmra.mxu0 %vm355_vm2, %v1677_v41  ;;  %v1678_v41 = vpack.c.bf16 %v1638_v20, %v1637_v3 }
 0x11d   : > { %v5776_v63 = vpop.f32.mrf.mxu1  ;;  %4695 = vmatmul.mubr.msk.bf16.gmra.mxu1 %vm355_vm2, %v5456_v40  ;;  %4780 = vmatprep.mubr.msk.bf16.mxu0 %vm5225_vm1, %v5224_v1 }
 0x11e   : > { %7085 = vst [vmem:[#allocation8_spill] sm:$0xff] %v5776_v63  ;;  %v4466_v21 = vpop.f32.mrf.mxu0  ;;  %4698 = vmatprep.mubr.msk.bf16.mxu1 %vm5225_vm1, %v5224_v1 }
 0x11f   : > { %v4510_v29 = vpop.f32.mrf.mxu1  ;;  %v1639_v21 = vld [vmem:[%s5291_s29 + $0x48] sm:$0xff] }
 0x120   : > { %v5786_v37 = vpop.f32.mrf.mxu0  ;;  %v1679_v20 = vpack.c.bf16 %v1640_v16, %v1639_v21 }
 0x121   : > { %v620_v34 = vpop.f32.mrf.mxu1 }
 0x122   : > { %v4467_v61 = vpop.f32.mrf.mxu0 }
 0x123   : > { %v4511_v63 = vpop.f32.mrf.mxu1 }
 0x124   : > { %v5788_v49 = vpop.f32.mrf.mxu0  ;;  %4781 = vmatmul.mubr.msk.bf16.gmra.mxu0 %vm355_vm2, %v1678_v41 }
 0x125   : > { %v723_v40 = vpop.f32.mrf.mxu1  ;;  %4699 = vmatmul.mubr.msk.bf16.gmra.mxu1 %vm355_vm2, %v5469_v46  ;;  %4784 = vmatprep.mubr.msk.bf16.mxu0 %vm5225_vm1, %v5224_v1 }
 0x126   : > { %v4470_v29 = vpop.f32.mrf.mxu0  ;;  %4702 = vmatprep.mubr.msk.bf16.mxu1 %vm5225_vm1, %v5224_v1  ;;  %v724_v61 = vadd.f32 %v723_v40, %v5588_v42 }
 0x127   : > { %v4516_v63 = vpop.f32.mrf.mxu1  ;;  %v1641_v29 = vld [vmem:[%s5291_s29 + $0x58] sm:$0xff] }
 0x128   : > { %v5799_v3 = vpop.f32.mrf.mxu0  ;;  %v1642_v63 = vld [vmem:[%s5291_s29 + $0x60] sm:$0xff] }
 0x129   : > { %v726_v41 = vpop.f32.mrf.mxu1 }
 0x12a   : > { %v4471_v34 = vpop.f32.mrf.mxu0  ;;  %v727_v42 = vadd.f32 %v726_v41, %v5603_v51  ;;  %v1643_v51 = vld [vmem:[%s5291_s29 + $0x68] sm:$0xff]  ;;  %v1644_v41 = vld [vmem:[%s5291_s29 + $0x70] sm:$0xff] }
 0x12b   : > { %v4517_v46 = vpop.f32.mrf.mxu1 }
 0x12c   : > { %v1054_v28 = vpop.f32.mrf.mxu0  ;;  %4785 = vmatmul.mubr.msk.bf16.gmra.mxu0 %vm355_vm2, %v1679_v20 }
 0x12d   : > { %v731_v27 = vpop.f32.mrf.mxu1  ;;  %v5803_v11 = vadd.f32 %v1054_v28, %v724_v61  ;;  %4703 = vmatmul.mubr.msk.bf16.gmra.mxu1 %vm355_vm2, %v5482_v52  ;;  %4788 = vmatprep.mubr.msk.bf16.mxu0 %vm5225_vm1, %v5224_v1  ;;  %v1680_v28 = vpack.c.bf16 %v1642_v63, %v1641_v29 }
 0x12e   : > { %v4602_v16 = vpop.f32.mrf.mxu0  ;;  %4706 = vmatprep.mubr.msk.bf16.mxu1 %vm5225_vm1, %v5224_v1  ;;  %v732_v61 = vadd.f32 %v731_v27, %v5609_v59 }
 0x12f   : > { %7086 = vst [vmem:[#allocation9_spill] sm:$0xff] %v5803_v11  ;;  %v4520_v40 = vpop.f32.mrf.mxu1 }
 0x130   : > { %v1057_v21 = vpop.f32.mrf.mxu0 }
 0x131   : > { %v734_v20 = vpop.f32.mrf.mxu1  ;;  %v5814_v34 = vadd.f32 %v1057_v21, %v727_v42 }
 0x132   : > { %v4603_v52 = vpop.f32.mrf.mxu0  ;;  %v735_v59 = vadd.f32 %v734_v20, %v5624_v5  ;;  %v1645_v5 = vld [vmem:[%s5291_s29 + $0x78] sm:$0xff]  ;;  %v1646_v20 = vld [vmem:[%s5291_s29 + $0x80] sm:$0xff] }
 0x133   : > { %v4521_v46 = vpop.f32.mrf.mxu1 }
 0x134   : > { %v1062_v11 = vpop.f32.mrf.mxu0  ;;  %4789 = vmatmul.mubr.msk.bf16.gmra.mxu0 %vm355_vm2, %v1680_v28 }
 0x135   : > { %v739_v16 = vpop.f32.mrf.mxu1  ;;  %v5818_v50 = vadd.f32 %v1062_v11, %v732_v61  ;;  %4707 = vmatmul.mubr.msk.bf16.gmra.mxu1 %vm355_vm2, %v5495_v58  ;;  %4792 = vmatprep.mubr.msk.bf16.mxu0 %vm5225_vm1, %v5224_v1  ;;  %v1681_v11 = vpack.c.bf16 %v1644_v41, %v1643_v51 }
 0x136   : > { %v4606_v29 = vpop.f32.mrf.mxu0  ;;  %4710 = vmatprep.mubr.msk.bf16.mxu1 %vm5225_vm1, %v5224_v1  ;;  %v740_v21 = vadd.f32 %v739_v16, %v5630_v12 }
 0x137   : > { %v4524_v27 = vpop.f32.mrf.mxu1  ;;  %v1682_v29 = vpack.c.bf16 %v1646_v20, %v1645_v5 }
 0x138   : > { %v1065_v63 = vpop.f32.mrf.mxu0 }
 0x139   : > { %v742_v42 = vpop.f32.mrf.mxu1  ;;  %v5829_v40 = vadd.f32 %v1065_v63, %v735_v59 }
 0x13a   : > { %v4607_v58 = vpop.f32.mrf.mxu0  ;;  %v743_v12 = vadd.f32 %v742_v42, %v5645_v22  ;;  %v1647_v22 = vld [vmem:[%s5291_s29 + $0x88] sm:$0xff]  ;;  %v1648_v42 = vld [vmem:[%s5291_s29 + $0x90] sm:$0xff] }
 0x13b   : > { %v4525_v28 = vpop.f32.mrf.mxu1  ;;  %v1683_v20 = vpack.c.bf16 %v1648_v42, %v1647_v22 }
 0x13c   : > { %v1070_v52 = vpop.f32.mrf.mxu0  ;;  %4793 = vmatmul.mubr.msk.bf16.gmra.mxu0 %vm355_vm2, %v1681_v11 }
 0x13d   : > { %v747_v61 = vpop.f32.mrf.mxu1  ;;  %v5833_v46 = vadd.f32 %v1070_v52, %v740_v21  ;;  %4711 = vmatmul.mubr.msk.bf16.gmra.mxu1 %vm355_vm2, %v5508_v0  ;;  %4796 = vmatprep.mubr.msk.bf16.mxu0 %vm5225_vm1, %v5224_v1 }
 0x13e   : > { %v4610_v51 = vpop.f32.mrf.mxu0  ;;  %4714 = vmatprep.mubr.msk.bf16.mxu1 %vm5225_vm1, %v5224_v1  ;;  %v748_v63 = vadd.f32 %v747_v61, %v5651_v30 }
 0x13f   : > { %v4528_v16 = vpop.f32.mrf.mxu1 }
 0x140   : > { %v1073_v41 = vpop.f32.mrf.mxu0 }
 0x141   : > { %v750_v59 = vpop.f32.mrf.mxu1  ;;  %v5844_v27 = vadd.f32 %v1073_v41, %v743_v12 }
 0x142   : > { %v4611_v0 = vpop.f32.mrf.mxu0  ;;  %v751_v30 = vadd.f32 %v750_v59, %v5666_v44  ;;  %v1649_v44 = vld [vmem:[%s5291_s29 + $0x98] sm:$0xff]  ;;  %v1650_v59 = vld [vmem:[%s5291_s29 + $0xa0] sm:$0xff] }
 0x143   : > { %v4529_v11 = vpop.f32.mrf.mxu1  ;;  %v1684_v22 = vpack.c.bf16 %v1650_v59, %v1649_v44 }
 0x144   : > { %v1078_v58 = vpop.f32.mrf.mxu0  ;;  %4797 = vmatmul.mubr.msk.bf16.gmra.mxu0 %vm355_vm2, %v1682_v29 }
 0x145   : > { %v755_v21 = vpop.f32.mrf.mxu1  ;;  %v5848_v28 = vadd.f32 %v1078_v58, %v748_v63  ;;  %4715 = vmatmul.mubr.msk.bf16.gmra.mxu1 %vm355_vm2, %v5521_v7  ;;  %4800 = vmatprep.mubr.msk.bf16.mxu0 %vm5225_vm1, %v5224_v1 }
 0x146   : > { %v4614_v52 = vpop.f32.mrf.mxu0  ;;  %4718 = vmatprep.mubr.msk.bf16.mxu1 %vm5225_vm1, %v5224_v1  ;;  %v756_v16 = vadd.f32 %v755_v21, %v5672_v55 }
 0x147   : > { %v4532_v61 = vpop.f32.mrf.mxu1 }
 0x148   : > { %v1081_v5 = vpop.f32.mrf.mxu0 }
 0x149   : > { %v758_v51 = vpop.f32.mrf.mxu1  ;;  %v5859_v12 = vadd.f32 %v1081_v5, %v751_v30 }
 0x14a   : > { %v4615_v7 = vpop.f32.mrf.mxu0  ;;  %v759_v55 = vadd.f32 %v758_v51, %v5687_v4  ;;  %v1651_v4 = vld [vmem:[%s5291_s29 + $0xa8] sm:$0xff]  ;;  %v1652_v51 = vld [vmem:[%s5291_s29 + $0xb0] sm:$0xff] }
 0x14b   : > { %v4533_v41 = vpop.f32.mrf.mxu1 }
 0x14c   : > { %v1086_v29 = vpop.f32.mrf.mxu0  ;;  %4801 = vmatmul.mubr.msk.bf16.gmra.mxu0 %vm355_vm2, %v1683_v20 }
 0x14d   : > { %v763_v0 = vpop.f32.mrf.mxu1  ;;  %v5863_v63 = vadd.f32 %v1086_v29, %v756_v16  ;;  %4719 = vmatmul.mubr.msk.bf16.gmra.mxu1 %vm355_vm2, %v5534_v13  ;;  %4804 = vmatprep.mubr.msk.bf16.mxu0 %vm5225_vm1, %v5224_v1 }
 0x14e   : > { %v4618_v11 = vpop.f32.mrf.mxu0  ;;  %4722 = vmatprep.mubr.msk.bf16.mxu1 %vm5225_vm1, %v5224_v1  ;;  %v764_v30 = vadd.f32 %v763_v0, %v5693_v17  ;;  %v1685_v0 = vpack.c.bf16 %v1652_v51, %v1651_v4 }
 0x14f   : > { %v4536_v58 = vpop.f32.mrf.mxu1 }
 0x150   : > { %v1089_v21 = vpop.f32.mrf.mxu0 }
 0x151   : > { %v766_v42 = vpop.f32.mrf.mxu1  ;;  %v5874_v52 = vadd.f32 %v1089_v21, %v759_v55 }
 0x152   : > { %v4619_v13 = vpop.f32.mrf.mxu0  ;;  %v767_v17 = vadd.f32 %v766_v42, %v5707_v33  ;;  %v1653_v33 = vld [vmem:[%s5291_s29 + $0xb8] sm:$0xff]  ;;  %v1654_v42 = vld [vmem:[%s5291_s29 + $0xc0] sm:$0xff] }
 0x153   : > { %v4537_v61 = vpop.f32.mrf.mxu1 }
 0x154   : > { %v1094_v5 = vpop.f32.mrf.mxu0  ;;  %4805 = vmatmul.mubr.msk.bf16.gmra.mxu0 %vm355_vm2, %v1684_v22 }
 0x155   : > { %v771_v20 = vpop.f32.mrf.mxu1  ;;  %v5878_v7 = vadd.f32 %v1094_v5, %v764_v30  ;;  %4723 = vmatmul.mubr.msk.bf16.gmra.mxu1 %vm355_vm2, %v5547_v19  ;;  %4808 = vmatprep.mubr.msk.bf16.mxu0 %vm5225_vm1, %v5224_v1  ;;  %v1686_v5 = vpack.c.bf16 %v1654_v42, %v1653_v33 }
 0x156   : > { %v4622_v16 = vpop.f32.mrf.mxu0  ;;  %4726 = vmatprep.mubr.msk.bf16.mxu1 %vm5225_vm1, %v5224_v1  ;;  %v772_v11 = vadd.f32 %v771_v20, %v5713_v48 }
 0x157   : > { %v4540_v41 = vpop.f32.mrf.mxu1 }
 0x158   : > { %v1097_v29 = vpop.f32.mrf.mxu0 }
 0x159   : > { %v774_v44 = vpop.f32.mrf.mxu1  ;;  %v5889_v59 = vadd.f32 %v1097_v29, %v767_v17 }
 0x15a   : > { %v4623_v19 = vpop.f32.mrf.mxu0  ;;  %v775_v48 = vadd.f32 %v774_v44, %v5728_v2  ;;  %v1655_v2 = vld [vmem:[%s5291_s29 + $0xc8] sm:$0xff] }
 0x15b   : > { %v4541_v55 = vpop.f32.mrf.mxu1 }
 0x15c   : > { %v1102_v58 = vpop.f32.mrf.mxu0  ;;  %4809 = vmatmul.mubr.msk.bf16.gmra.mxu0 %vm355_vm2, %v1685_v0  ;;  %v1656_v0 = vld [vmem:[%s5291_s29 + $0xd0] sm:$0xff] }
 0x15d   : > { %v779_v21 = vpop.f32.mrf.mxu1  ;;  %v5893_v22 = vadd.f32 %v1102_v58, %v772_v11  ;;  %4727 = vmatmul.mubr.msk.bf16.gmra.mxu1 %vm355_vm2, %v5560_v25  ;;  %4812 = vmatprep.mubr.msk.bf16.mxu0 %vm5225_vm1, %v5224_v1  ;;  %v1687_v55 = vpack.c.bf16 %v1656_v0, %v1655_v2 }
 0x15e   : > { %v4626_v13 = vpop.f32.mrf.mxu0  ;;  %4730 = vmatprep.mubr.msk.bf16.mxu1 %vm5225_vm1, %v5224_v1  ;;  %v780_v51 = vadd.f32 %v779_v21, %v5736_v26 }
 0x15f   : > { %v4544_v30 = vpop.f32.mrf.mxu1 }
 0x160   : > { %v1105_v61 = vpop.f32.mrf.mxu0 }
 0x161   : > { %v782_v20 = vpop.f32.mrf.mxu1  ;;  %v5904_v4 = vadd.f32 %v1105_v61, %v775_v48  ;;  %v1658_v61 = vld [vmem:[%s5291_s29 + $0xe0] sm:$0xff] }
 0x162   : > { %v4627_v25 = vpop.f32.mrf.mxu0  ;;  %v783_v26 = vadd.f32 %v782_v20, %v5750_v57  ;;  %v1657_v57 = vld [vmem:[%s5291_s29 + $0xd8] sm:$0xff] }
 0x163   : > { %v4545_v16 = vpop.f32.mrf.mxu1 }
 0x164   : > { %v1110_v17 = vpop.f32.mrf.mxu0  ;;  %4813 = vmatmul.mubr.msk.bf16.gmra.mxu0 %vm355_vm2, %v1686_v5 }
 0x165   : > { %v787_v41 = vpop.f32.mrf.mxu1  ;;  %v5908_v29 = vadd.f32 %v1110_v17, %v780_v51  ;;  %4731 = vmatmul.mubr.msk.bf16.gmra.mxu1 %vm355_vm2, %v5573_v32  ;;  %4816 = vmatprep.mubr.msk.bf16.mxu0 %vm5225_vm1, %v5224_v1  ;;  %v1688_v51 = vpack.c.bf16 %v1658_v61, %v1657_v57 }
 0x166   : > { %v4630_v44 = vpop.f32.mrf.mxu0  ;;  %4734 = vmatprep.mubr.msk.bf16.mxu1 %vm5225_vm1, %v5224_v1  ;;  %v788_v33 = vadd.f32 %v787_v41, %v5755_v15 }
 0x167   : > { %v4548_v19 = vpop.f32.mrf.mxu1 }
 0x168   : > { %v1113_v11 = vpop.f32.mrf.mxu0  ;;  %v1660_v19 = vld [vmem:[%s5291_s29 + $0xf0] sm:$0xff] }
 0x169   : > { %v790_v58 = vpop.f32.mrf.mxu1  ;;  %v5919_v21 = vadd.f32 %v1113_v11, %v783_v26 }
 0x16a   : > { %v4631_v32 = vpop.f32.mrf.mxu0  ;;  %v791_v15 = vadd.f32 %v790_v58, %v5769_v38  ;;  %v1659_v38 = vld [vmem:[%s5291_s29 + $0xe8] sm:$0xff] }
 0x16b   : > { %v4549_v42 = vpop.f32.mrf.mxu1  ;;  %v1689_v32 = vpack.c.bf16 %v1660_v19, %v1659_v38 }
 0x16c   : > { %v1118_v13 = vpop.f32.mrf.mxu0  ;;  %4817 = vmatmul.mubr.msk.bf16.gmra.mxu0 %vm355_vm2, %v1687_v55 }
 0x16d   : > { %v795_v48 = vpop.f32.mrf.mxu1  ;;  %v5923_v30 = vadd.f32 %v1118_v13, %v788_v33  ;;  %4735 = vmatmul.mubr.msk.bf16.gmra.mxu1 %vm355_vm2, %v5586_v39  ;;  %4820 = vmatprep.mubr.msk.bf16.mxu0 %vm5225_vm1, %v5224_v1 }
 0x16e   : > { %v4634_v5 = vpop.f32.mrf.mxu0  ;;  %4738 = vmatprep.mubr.msk.bf16.mxu1 %vm5225_vm1, %v5224_v1  ;;  %v796_v41 = vadd.f32 %v795_v48, %v5773_v62 }
 0x16f   : > { %v4552_v20 = vpop.f32.mrf.mxu1 }
 0x170   : > { %v1121_v25 = vpop.f32.mrf.mxu0 }
 0x171   : > { %v798_v16 = vpop.f32.mrf.mxu1  ;;  %v5934_v17 = vadd.f32 %v1121_v25, %v791_v15  ;;  %v1662_v15 = vld [vmem:[%s5291_s29 + $0x100] sm:$0xff] }
 0x172   : > { %v4635_v39 = vpop.f32.mrf.mxu0  ;;  %v799_v62 = vadd.f32 %v798_v16, %v5786_v37  ;;  %v1661_v37 = vld [vmem:[%s5291_s29 + $0xf8] sm:$0xff] }
 0x173   : > { %v4553_v2 = vpop.f32.mrf.mxu1  ;;  %v1690_v16 = vpack.c.bf16 %v1662_v15, %v1661_v37  ;;  %v1666_v15 = vld [vmem:[%s5291_s29 + $0x120] sm:$0xff] }
 0x174   : > { %v1126_v0 = vpop.f32.mrf.mxu0  ;;  %4821 = vmatmul.mubr.msk.bf16.gmra.mxu0 %vm355_vm2, %v1688_v51 }
 0x175   : > { %v803_v44 = vpop.f32.mrf.mxu1  ;;  %v5938_v26 = vadd.f32 %v1126_v0, %v796_v41  ;;  %4739 = vmatmul.mubr.msk.bf16.gmra.mxu1 %vm355_vm2, %v5605_v53  ;;  %4824 = vmatprep.mubr.msk.bf16.mxu0 %vm5225_vm1, %v5224_v1 }
 0x176   : > { %v4638_v11 = vpop.f32.mrf.mxu0  ;;  %4742 = vmatprep.mubr.msk.bf16.mxu1 %vm5225_vm1, %v5224_v1  ;;  %v804_v13 = vadd.f32 %v803_v44, %v5788_v49 }
 0x177   : > { %v4556_v55 = vpop.f32.mrf.mxu1  ;;  %v1664_v11 = vld [vmem:[%s5291_s29 + $0x110] sm:$0xff] }
 0x178   : > { %v1129_v58 = vpop.f32.mrf.mxu0 }
 0x179   : > { %v806_v33 = vpop.f32.mrf.mxu1  ;;  %v5949_v42 = vadd.f32 %v1129_v58, %v799_v62 }
 0x17a   : > { %v4639_v53 = vpop.f32.mrf.mxu0  ;;  %v807_v49 = vadd.f32 %v806_v33, %v5799_v3  ;;  %v1663_v3 = vld [vmem:[%s5291_s29 + $0x108] sm:$0xff] }
 0x17b   : > { %v4557_v48 = vpop.f32.mrf.mxu1 }
 0x17c   : > { %v1134_v57 = vpop.f32.mrf.mxu0  ;;  %4825 = vmatmul.mubr.msk.bf16.gmra.mxu0 %vm355_vm2, %v1689_v32  ;;  %v1691_v32 = vpack.c.bf16 %v1664_v11, %v1663_v3  ;;  %v1668_v3 = vld [vmem:[%s5291_s29 + $0x130] sm:$0xff] }
 0x17d   : > { %v811_v61 = vpop.f32.mrf.mxu1  ;;  %v5953_v5 = vadd.f32 %v1134_v57, %v804_v13  ;;  %4743 = vmatmul.mubr.msk.bf16.gmra.mxu1 %vm355_vm2, %v5626_v6  ;;  %4828 = vmatprep.mubr.msk.bf16.mxu0 %vm5225_vm1, %v5224_v1 }
 0x17e   : > { %v4642_v20 = vpop.f32.mrf.mxu0  ;;  %4746 = vmatprep.mubr.msk.bf16.mxu1 %vm5225_vm1, %v5224_v1  ;;  %v812_v2 = vadd.f32 %v811_v61, %v5592_v43 }
 0x17f   : > { %v4560_v25 = vpop.f32.mrf.mxu1 }
 0x180   : > { %v1137_v51 = vpop.f32.mrf.mxu0 }
 0x181   : > { %v814_v39 = vpop.f32.mrf.mxu1  ;;  %v5964_v41 = vadd.f32 %v1137_v51, %v807_v49 }
 0x182   : > { %v4643_v6 = vpop.f32.mrf.mxu0  ;;  %v815_v43 = vadd.f32 %v814_v39, %v5607_v54  ;;  %v1665_v54 = vld [vmem:[%s5291_s29 + $0x118] sm:$0xff] }
 0x183   : > { %v4561_v0 = vpop.f32.mrf.mxu1  ;;  %v1692_v51 = vpack.c.bf16 %v1666_v15, %v1665_v54  ;;  %v1300_v15 = vld [vmem:[%s5291_s29 + $0x14f] sm:$0xff] }
 0x184   : > { %v1142_v44 = vpop.f32.mrf.mxu0  ;;  %4829 = vmatmul.mubr.msk.bf16.gmra.mxu0 %vm355_vm2, %v1690_v16 }
 0x185   : > { %v819_v38 = vpop.f32.mrf.mxu1  ;;  %v5968_v19 = vadd.f32 %v1142_v44, %v812_v2  ;;  %4747 = vmatmul.mubr.msk.bf16.gmra.mxu1 %vm355_vm2, %v5647_v23  ;;  %4832 = vmatprep.mubr.msk.bf16.mxu0 %vm5225_vm1, %v5224_v1 }
 0x186   : > { %v4646_v62 = vpop.f32.mrf.mxu0  ;;  %4750 = vmatprep.mubr.msk.bf16.mxu1 %vm5225_vm1, %v5224_v1  ;;  %v820_v13 = vadd.f32 %v819_v38, %v5613_v60 }
 0x187   : > { %v4564_v55 = vpop.f32.mrf.mxu1 }
 0x188   : > { %v1145_v58 = vpop.f32.mrf.mxu0 }
 0x189   : > { %v822_v33 = vpop.f32.mrf.mxu1  ;;  %v5979_v53 = vadd.f32 %v1145_v58, %v815_v43 }
 0x18a   : > { %v4647_v23 = vpop.f32.mrf.mxu0  ;;  %v823_v60 = vadd.f32 %v822_v33, %v5628_v8  ;;  %v1667_v8 = vld [vmem:[%s5291_s29 + $0x128] sm:$0xff] }
 0x18b   : > { %v4565_v48 = vpop.f32.mrf.mxu1  ;;  %v1693_v55 = vpack.c.bf16 %v1668_v3, %v1667_v8  ;;  %v1672_v3 = vld [vmem:[%s5291_s29 + $0x150] sm:$0xff] }
 0x18c   : > { %v1150_v57 = vpop.f32.mrf.mxu0  ;;  %4833 = vmatmul.mubr.msk.bf16.gmra.mxu0 %vm355_vm2, %v1691_v32 }
 0x18d   : > { %v827_v61 = vpop.f32.mrf.mxu1  ;;  %v5983_v37 = vadd.f32 %v1150_v57, %v820_v13  ;;  %4751 = vmatmul.mubr.msk.bf16.gmra.mxu1 %vm355_vm2, %v5668_v45  ;;  %4836 = vmatprep.mubr.msk.bf16.mxu0 %vm5225_vm1, %v5224_v1 }
 0x18e   : > { %v4650_v20 = vpop.f32.mrf.mxu0  ;;  %4754 = vmatprep.mubr.msk.bf16.mxu1 %vm5225_vm1, %v5224_v1  ;;  %v828_v6 = vadd.f32 %v827_v61, %v5634_v14  ;;  %v1670_v61 = vld [vmem:[%s5291_s29 + $0x140] sm:$0xff] }
 0x18f   : > { %v4568_v49 = vpop.f32.mrf.mxu1 }
 0x190   : > { %v1153_v25 = vpop.f32.mrf.mxu0 }
 0x191   : > { %v830_v16 = vpop.f32.mrf.mxu1  ;;  %v5994_v39 = vadd.f32 %v1153_v25, %v823_v60 }
 0x192   : > { %v4651_v45 = vpop.f32.mrf.mxu0  ;;  %v831_v14 = vadd.f32 %v830_v16, %v5649_v24  ;;  %v1669_v24 = vld [vmem:[%s5291_s29 + $0x138] sm:$0xff] }
 0x193   : > { %v4569_v2 = vpop.f32.mrf.mxu1  ;;  %v1694_v25 = vpack.c.bf16 %v1670_v61, %v1669_v24 }
 0x194   : > { %v1158_v0 = vpop.f32.mrf.mxu0  ;;  %4837 = vmatmul.mubr.msk.bf16.gmra.mxu0 %vm355_vm2, %v1692_v51 }
 0x195   : > { %v835_v44 = vpop.f32.mrf.mxu1  ;;  %v5998_v38 = vadd.f32 %v1158_v0, %v828_v6  ;;  %4755 = vmatmul.mubr.msk.bf16.gmra.mxu1 %vm355_vm2, %v5689_v9  ;;  %4840 = vmatprep.mubr.msk.bf16.mxu0 %vm5225_vm1, %v5224_v1 }
 0x196   : > { %v4654_v11 = vpop.f32.mrf.mxu0  ;;  %4758 = vmatprep.mubr.msk.bf16.mxu1 %vm5225_vm1, %v5224_v1  ;;  %v836_v33 = vadd.f32 %v835_v44, %v5655_v31  ;;  %v1299_v31 = vld [vmem:[%s5291_s29 + $0x147] sm:$0xff] }
 0x197   : > { %v4572_v62 = vpop.f32.mrf.mxu1  ;;  %v1323_v16 = vpack.c.bf16 %v1300_v15, %v1299_v31  ;;  %v1673_v31 = vld [vmem:[%s5291_s29 + $0x158] sm:$0xf] }
 0x198   : > { %v1161_v43 = vpop.f32.mrf.mxu0 }
 0x199   : > { %v838_v58 = vpop.f32.mrf.mxu1  ;;  %v6009_v9 = vadd.f32 %v1161_v43, %v831_v14  ;;  %v1301_v14 = vld [vmem:[%s5291_s29 + $0x157] sm:$0xf] }
 0x19a   : > { %v4655_v32 = vpop.f32.mrf.mxu0  ;;  %v839_v20 = vadd.f32 %v838_v58, %v5670_v47  ;;  %v1671_v47 = vld [vmem:[%s5291_s29 + $0x148] sm:$0xff] }
 0x19b   : > { %v4573_v23 = vpop.f32.mrf.mxu1 }
 0x19c   : > { %v1166_v13 = vpop.f32.mrf.mxu0  ;;  %4841 = vmatmul.mubr.msk.bf16.gmra.mxu0 %vm355_vm2, %v1693_v55  ;;  %v1695_v55 = vpack.c.bf16 %v1672_v3, %v1671_v47 }
 0x19d   : > { %v843_v48 = vpop.f32.mrf.mxu1  ;;  %v6013_v57 = vadd.f32 %v1166_v13, %v836_v33  ;;  %4759 = vmatmul.mubr.msk.bf16.gmra.mxu1 %vm355_vm2, %v5709_v35  ;;  %4844 = vmatprep.mubr.msk.bf16.mxu0 %vm5225_vm1, %v5224_v1  ;;  %v1324_v33 = vpack.c.bf16 %v1301_v14, %v1301_v14 }
 0x19e   : > { %v4658_v54 = vpop.f32.mrf.mxu0  ;;  %4762 = vmatprep.mubr.msk.bf16.mxu1 %vm5225_vm1, %v5224_v1  ;;  %v844_v6 = vadd.f32 %v843_v48, %v5676_v56 }
 0x19f   : > { %v4576_v60 = vpop.f32.mrf.mxu1 }
 0x1a0   : > { %v1169_v49 = vpop.f32.mrf.mxu0 }
 0x1a1   : > { %v846_v51 = vpop.f32.mrf.mxu1  ;;  %v6026_v35 = vadd.f32 %v1169_v49, %v839_v20  ;;  %v2006_v20 = vld [vmem:[%s5291_s29 + $0x21] sm:$0xff] }
 0x1a2   : > { %v4659_v45 = vpop.f32.mrf.mxu0  ;;  %v847_v56 = vadd.f32 %v846_v51, %v5691_v10  ;;  %v4180_v10 = vld [vmem:[%s7074_s1 + $0x1c] sm:$0xf] }
 0x1a3   : > { %v4577_v2 = vpop.f32.mrf.mxu1 }
 0x1a4   : > { %v1174_v0 = vpop.f32.mrf.mxu0  ;;  %4845 = vmatmul.mubr.msk.bf16.gmra.mxu0 %vm355_vm2, %v1694_v25  ;;  %v2813_v25 = vpack.c.bf16 %v4180_v10, %v4180_v10 }
 0x1a5   : > { %v851_v44 = vpop.f32.mrf.mxu1  ;;  %v6030_v8 = vadd.f32 %v1174_v0, %v844_v6  ;;  %4763 = vmatmul.mubr.msk.bf16.gmra.mxu1 %vm355_vm2, %v1323_v16  ;;  %4848 = vmatprep.mubr.msk.bf16.mxu0 %vm5225_vm1, %v5224_v1  ;;  %v1696_v16 = vpack.c.bf16 %v1673_v31, %v1673_v31 }
 0x1a6   : > { %v4662_v11 = vpop.f32.mrf.mxu0  ;;  %4766 = vmatprep.mubr.msk.bf16.mxu1 %vm5225_vm1, %v5224_v1  ;;  %v852_v13 = vadd.f32 %v851_v44, %v5697_v18  ;;  %v2005_v18 = vld [vmem:[%s5291_s29 + $0x19] sm:$0xff] }
 0x1a7   : > { %v4580_v62 = vpop.f32.mrf.mxu1  ;;  %v2048_v2 = vpack.c.bf16 %v2006_v20, %v2005_v18  ;;  %v7087_v44 = vld [vmem:[#allocation2_spill] sm:$0xff]  ;;  %v2878_v11 = vsel %vm419_vm0, %v2813_v25, 0  ;;  %v7089_v20 = vld [vmem:[#allocation4_spill] sm:$0xff] }
 0x1a8   : > { %v1177_v43 = vpop.f32.mrf.mxu0 }
 0x1a9   : > { %v854_v58 = vpop.f32.mrf.mxu1  ;;  %v6041_v32 = vadd.f32 %v1177_v43, %v847_v56  ;;  %v2007_v43 = vld [vmem:[%s5291_s29 + $0x29] sm:$0xff] }
 0x1aa   : > { %v4663_v23 = vpop.f32.mrf.mxu0  ;;  %v855_v60 = vadd.f32 %v854_v58, %v5711_v36  ;;  %v4202_v36 = vld [vmem:[%s7074_s1 + $0x20] sm:$0xf] }
 0x1ab   : > { %v4581_v48 = vpop.f32.mrf.mxu1  ;;  %v7088_v23 = vld [vmem:[#allocation3_spill] sm:$0xff] }
 0x1ac   : > { %v1182_v24 = vpop.f32.mrf.mxu0  ;;  %4849 = vmatmul.mubr.msk.bf16.gmra.mxu0 %vm355_vm2, %v1695_v55  ;;  %v2008_v55 = vld [vmem:[%s5291_s29 + $0x31] sm:$0xff] }
 0x1ad   : > { %v859_v61 = vpop.f32.mrf.mxu1  ;;  %v6048_v54 = vadd.f32 %v1182_v24, %v852_v13  ;;  %4767 = vmatmul.mubr.msk.bf16.gmra.mxu1 %vm355_vm2, %v1324_v33  ;;  %4852 = vmatprep.mubr.msk.bf16.mxu0 %vm5225_vm1, %v5224_v1  ;;  %v3185_v33 = vpack.c.bf16 %v4202_v36, %v4202_v36  ;;  %v2049_v10 = vpack.c.bf16 %v2008_v55, %v2007_v43  ;;  %v7091_v55 = vld [vmem:[#allocation6_spill] sm:$0xff] }
 0x1ae   : > { %v4666_v15 = vpop.f32.mrf.mxu0  ;;  %4858 = vmatprep.mubr.msk.bf16.mxu1 %vm5225_vm1, %v5224_v1  ;;  %v860_v47 = vadd.f32 %v859_v61, %v7087_v44  ;;  %v7090_v44 = vld [vmem:[#allocation5_spill] sm:$0xff] }
 0x1af   : > { %v4584_v49 = vpop.f32.mrf.mxu1  ;;  %v3250_v18 = vsel %vm419_vm0, %v3185_v33, 0 }
 0x1b0   : > { %v1185_v51 = vpop.f32.mrf.mxu0 }
 0x1b1   : > { %v862_v45 = vpop.f32.mrf.mxu1  ;;  %v6059_v6 = vadd.f32 %v1185_v51, %v855_v60 }
 0x1b2   : > { %v4667_v0 = vpop.f32.mrf.mxu0  ;;  %v863_v13 = vadd.f32 %v862_v45, %v7088_v23  ;;  %v2009_v45 = vld [vmem:[%s5291_s29 + $0x39] sm:$0xff] }
 0x1b3   : > { %v4585_v3 = vpop.f32.mrf.mxu1 }
 0x1b4   : > { %v1190_v14 = vpop.f32.mrf.mxu0  ;;  %4853 = vmatmul.mubr.msk.bf16.gmra.mxu0 %vm355_vm2, %v1696_v16 }
 0x1b5   : > { %v867_v56 = vpop.f32.mrf.mxu1  ;;  %v6067_v62 = vadd.f32 %v1190_v14, %v860_v47  ;;  %4859 = vmatmul.mubr.msk.bf16.vlgmr.msra.gmra.mxu1 %vm355_vm2, %v2048_v2  ;;  %4944 = vmatprep.mubr.msk.bf16.mxu0 %vm5225_vm1, %v5224_v1  ;;  %v2010_v2 = vld [vmem:[%s5291_s29 + $0x41] sm:$0xff] }
 0x1b6   : > { %v4670_v58 = vpop.f32.mrf.mxu0  ;;  %5029 = vmatpush3.bf16.msra.mxu1 %v2878_v11  ;;  %4862 = vmatprep.mubr.msk.bf16.mxu1 %vm5225_vm1, %v5224_v1  ;;  %v868_v60 = vadd.f32 %v867_v56, %v7089_v20  ;;  %v2050_v36 = vpack.c.bf16 %v2010_v2, %v2009_v45  ;;  %v7093_v2 = vld [vmem:[#allocation8_spill] sm:$0xff] }
 0x1b7   : > { %v4588_v48 = vpop.f32.mrf.mxu1 }
 0x1b8   : > { %v1193_v24 = vpop.f32.mrf.mxu0 }
 0x1b9   : > { %v870_v61 = vpop.f32.mrf.mxu1  ;;  %v6077_v31 = vadd.f32 %v1193_v24, %v863_v13  ;;  %v2011_v24 = vld [vmem:[%s5291_s29 + $0x49] sm:$0xff] }
 0x1ba   : > { %v4671_v15 = vpop.f32.mrf.mxu0  ;;  %v871_v47 = vadd.f32 %v870_v61, %v7090_v44 }
 0x1bb   : > { %v4589_v49 = vpop.f32.mrf.mxu1  ;;  %v7092_v15 = vld [vmem:[#allocation7_spill] sm:$0xff] }
 0x1bc   : > { %v1198_v25 = vpop.f32.mrf.mxu0  ;;  %4945 = vmatmul.mubr.msk.bf16.vlgmr.msra.gmra.mxu0 %vm355_vm2, %v2049_v10 }
 0x1bd   : > { %v875_v51 = vpop.f32.mrf.mxu1  ;;  %v6082_v16 = vadd.f32 %v1198_v25, %v868_v60  ;;  %4863 = vmatmul.mubr.msk.bf16.gmra.mxu1 %vm355_vm2, %v2049_v10  ;;  %5115 = vmatpush3.bf16.msra.mxu0 %v3250_v18  ;;  %v2012_v10 = vld [vmem:[%s5291_s29 + $0x51] sm:$0xff] }
 0x1be   : > { %v4674_v0 = vpop.f32.mrf.mxu0  ;;  %4866 = vmatprep.mubr.msk.bf16.mxu1 %vm5225_vm1, %v5224_v1  ;;  %4948 = vmatprep.mubr.msk.bf16.mxu0 %vm5225_vm1, %v5224_v1  ;;  %v876_v58 = vadd.f32 %v875_v51, %v7091_v55  ;;  %v2051_v49 = vpack.c.bf16 %v2012_v10, %v2011_v24 }
 0x1bf   : > { %v4592_v3 = vpop.f32.mrf.mxu1 }
 0x1c0   : > { %v1201_v11 = vpop.f32.mrf.mxu0 }
 0x1c1   : > { %v878_v14 = vpop.f32.mrf.mxu1  ;;  %v6092_v56 = vadd.f32 %v1201_v11, %v871_v47 }
 0x1c2   : > { %v4675_v43 = vpop.f32.mrf.mxu0  ;;  %v879_v18 = vadd.f32 %v878_v14, %v7092_v15  ;;  %v2014_v14 = vld [vmem:[%s5291_s29 + $0x61] sm:$0xff] }
 0x1c3   : > { %v4593_v33 = vpop.f32.mrf.mxu1  ;;  %v7094_v43 = vld [vmem:[#allocation9_spill] sm:$0xff] }
 0x1c4   : > { %v1206_v23 = vpop.f32.mrf.mxu0  ;;  %4949 = vmatmul.mubr.msk.bf16.gmra.mxu0 %vm355_vm2, %v2050_v36 }
 0x1c5   : > { %v883_v13 = vpop.f32.mrf.mxu1  ;;  %v6096_v48 = vadd.f32 %v1206_v23, %v876_v58  ;;  %4867 = vmatmul.mubr.msk.bf16.gmra.mxu1 %vm355_vm2, %v2050_v36  ;;  %4952 = vmatprep.mubr.msk.bf16.mxu0 %vm5225_vm1, %v5224_v1  ;;  %v2013_v36 = vld [vmem:[%s5291_s29 + $0x59] sm:$0xff] }
 0x1c6   : > { %v4678_v61 = vpop.f32.mrf.mxu0  ;;  %4870 = vmatprep.mubr.msk.bf16.mxu1 %vm5225_vm1, %v5224_v1  ;;  %v884_v0 = vadd.f32 %v883_v13, %v7093_v2  ;;  %v2052_v13 = vpack.c.bf16 %v2014_v14, %v2013_v36 }
 0x1c7   : > { %v4596_v20 = vpop.f32.mrf.mxu1 }
 0x1c8   : > { %v1209_v60 = vpop.f32.mrf.mxu0 }
 0x1c9   : > { %v886_v25 = vpop.f32.mrf.mxu1  ;;  %v6106_v51 = vadd.f32 %v1209_v60, %v879_v18 }
 0x1ca   : > { %v4679_v45 = vpop.f32.mrf.mxu0  ;;  %v2016_v25 = vld [vmem:[%s5291_s29 + $0x71] sm:$0xff] }
 0x1cb   : > { %v4597_v44 = vpop.f32.mrf.mxu1 }
 0x1cc   : > { %v1214_v47 = vpop.f32.mrf.mxu0  ;;  %4953 = vmatmul.mubr.msk.bf16.gmra.mxu0 %vm355_vm2, %v2051_v49 }
 0x1cd   : > { %v6110_v3 = vadd.f32 %v1214_v47, %v884_v0  ;;  %v1426_v11 = vpop.f32.mrf.mxu1  ;;  %4871 = vmatmul.mubr.msk.bf16.gmra.mxu1 %vm355_vm2, %v2051_v49  ;;  %4956 = vmatprep.mubr.msk.bf16.mxu0 %vm5225_vm1, %v5224_v1  ;;  %v2015_v49 = vld [vmem:[%s5291_s29 + $0x69] sm:$0xff] }
 0x1ce   : > { %v1592_v55 = vadd.f32 %v1426_v11, %v7094_v43  ;;  %v4682_v58 = vpop.f32.mrf.mxu0  ;;  %4874 = vmatprep.mubr.msk.bf16.mxu1 %vm5225_vm1, %v5224_v1  ;;  %v2053_v44 = vpack.c.bf16 %v2016_v25, %v2015_v49 }
 0x1cf   : > { %v4688_v33 = vpop.f32.mrf.mxu1 }
 0x1d0   : > { %v1217_v23 = vpop.f32.mrf.mxu0  ;;  %v2017_v33 = vld [vmem:[%s5291_s29 + $0x79] sm:$0xff] }
 0x1d1   : > { %v1429_v24 = vpop.f32.mrf.mxu1  ;;  %v2018_v23 = vld [vmem:[%s5291_s29 + $0x81] sm:$0xff] }
 0x1d2   : > { %v1593_v10 = vadd.f32 %v1429_v24, %v5814_v34  ;;  %v4683_v61 = vpop.f32.mrf.mxu0 }
 0x1d3   : > { %v4689_v15 = vpop.f32.mrf.mxu1  ;;  %v2054_v61 = vpack.c.bf16 %v2018_v23, %v2017_v33 }
 0x1d4   : > { %v1798_v18 = vpop.f32.mrf.mxu0  ;;  %4957 = vmatmul.mubr.msk.bf16.gmra.mxu0 %vm355_vm2, %v2052_v13 }
 0x1d5   : > { %v1434_v20 = vpop.f32.mrf.mxu1  ;;  %v6122_v60 = vadd.f32 %v1798_v18, %v1592_v55  ;;  %4875 = vmatmul.mubr.msk.bf16.gmra.mxu1 %vm355_vm2, %v2052_v13  ;;  %4960 = vmatprep.mubr.msk.bf16.mxu0 %vm5225_vm1, %v5224_v1 }
 0x1d6   : > { %v1594_v45 = vadd.f32 %v1434_v20, %v5818_v50  ;;  %v4774_v2 = vpop.f32.mrf.mxu0  ;;  %4878 = vmatprep.mubr.msk.bf16.mxu1 %vm5225_vm1, %v5224_v1 }
 0x1d7   : > { %v4692_v34 = vpop.f32.mrf.mxu1 }
 0x1d8   : > { %v1801_v0 = vpop.f32.mrf.mxu0  ;;  %v2019_v34 = vld [vmem:[%s5291_s29 + $0x89] sm:$0xff] }
 0x1d9   : > { %v1437_v47 = vpop.f32.mrf.mxu1  ;;  %v6132_v11 = vadd.f32 %v1801_v0, %v1593_v10  ;;  %v2020_v0 = vld [vmem:[%s5291_s29 + $0x91] sm:$0xff] }
 0x1da   : > { %v1595_v36 = vadd.f32 %v1437_v47, %v5829_v40  ;;  %v4775_v14 = vpop.f32.mrf.mxu0 }
 0x1db   : > { %v4693_v43 = vpop.f32.mrf.mxu1  ;;  %v2055_v14 = vpack.c.bf16 %v2020_v0, %v2019_v34 }
 0x1dc   : > { %v1806_v55 = vpop.f32.mrf.mxu0  ;;  %4961 = vmatmul.mubr.msk.bf16.gmra.mxu0 %vm355_vm2, %v2053_v44 }
 0x1dd   : > { %v1442_v50 = vpop.f32.mrf.mxu1  ;;  %v6136_v58 = vadd.f32 %v1806_v55, %v1594_v45  ;;  %4879 = vmatmul.mubr.msk.bf16.gmra.mxu1 %vm355_vm2, %v2053_v44  ;;  %4964 = vmatprep.mubr.msk.bf16.mxu0 %vm5225_vm1, %v5224_v1 }
 0x1de   : > { %v1596_v13 = vadd.f32 %v1442_v50, %v5833_v46  ;;  %v4778_v24 = vpop.f32.mrf.mxu0  ;;  %4882 = vmatprep.mubr.msk.bf16.mxu1 %vm5225_vm1, %v5224_v1 }
 0x1df   : > { %v4696_v40 = vpop.f32.mrf.mxu1 }
 0x1e0   : > { %v1809_v10 = vpop.f32.mrf.mxu0  ;;  %v2021_v40 = vld [vmem:[%s5291_s29 + $0x99] sm:$0xff] }
 0x1e1   : > { %v1445_v15 = vpop.f32.mrf.mxu1  ;;  %v6146_v18 = vadd.f32 %v1809_v10, %v1595_v36  ;;  %v2022_v10 = vld [vmem:[%s5291_s29 + $0xa1] sm:$0xff] }
 0x1e2   : > { %v1597_v20 = vadd.f32 %v1445_v15, %v5844_v27  ;;  %v4779_v49 = vpop.f32.mrf.mxu0 }
 0x1e3   : > { %v4697_v25 = vpop.f32.mrf.mxu1  ;;  %v2056_v49 = vpack.c.bf16 %v2022_v10, %v2021_v40 }
 0x1e4   : > { %v1814_v45 = vpop.f32.mrf.mxu0  ;;  %4965 = vmatmul.mubr.msk.bf16.gmra.mxu0 %vm355_vm2, %v2054_v61 }
 0x1e5   : > { %v1450_v46 = vpop.f32.mrf.mxu1  ;;  %v6150_v2 = vadd.f32 %v1814_v45, %v1596_v13  ;;  %4883 = vmatmul.mubr.msk.bf16.gmra.mxu1 %vm355_vm2, %v2054_v61  ;;  %4968 = vmatprep.mubr.msk.bf16.mxu0 %vm5225_vm1, %v5224_v1 }
 0x1e6   : > { %v1598_v44 = vadd.f32 %v1450_v46, %v5848_v28  ;;  %v4782_v47 = vpop.f32.mrf.mxu0  ;;  %4886 = vmatprep.mubr.msk.bf16.mxu1 %vm5225_vm1, %v5224_v1 }
 0x1e7   : > { %v4700_v27 = vpop.f32.mrf.mxu1 }
 0x1e8   : > { %v1817_v36 = vpop.f32.mrf.mxu0  ;;  %v2023_v27 = vld [vmem:[%s5291_s29 + $0xa9] sm:$0xff] }
 0x1e9   : > { %v1453_v43 = vpop.f32.mrf.mxu1  ;;  %v6160_v55 = vadd.f32 %v1817_v36, %v1597_v20  ;;  %v2024_v36 = vld [vmem:[%s5291_s29 + $0xb1] sm:$0xff] }
 0x1ea   : > { %v1599_v50 = vadd.f32 %v1453_v43, %v5859_v12  ;;  %v4783_v33 = vpop.f32.mrf.mxu0 }
 0x1eb   : > { %v4701_v23 = vpop.f32.mrf.mxu1  ;;  %v2057_v33 = vpack.c.bf16 %v2024_v36, %v2023_v27 }
 0x1ec   : > { %v1822_v13 = vpop.f32.mrf.mxu0  ;;  %4969 = vmatmul.mubr.msk.bf16.gmra.mxu0 %vm355_vm2, %v2055_v14 }
 0x1ed   : > { %v1458_v28 = vpop.f32.mrf.mxu1  ;;  %v6164_v24 = vadd.f32 %v1822_v13, %v1598_v44  ;;  %4887 = vmatmul.mubr.msk.bf16.gmra.mxu1 %vm355_vm2, %v2055_v14  ;;  %4972 = vmatprep.mubr.msk.bf16.mxu0 %vm5225_vm1, %v5224_v1 }
 0x1ee   : > { %v1600_v61 = vadd.f32 %v1458_v28, %v5863_v63  ;;  %v4786_v15 = vpop.f32.mrf.mxu0  ;;  %4890 = vmatprep.mubr.msk.bf16.mxu1 %vm5225_vm1, %v5224_v1 }
 0x1ef   : > { %v4704_v12 = vpop.f32.mrf.mxu1 }
 0x1f0   : > { %v1825_v20 = vpop.f32.mrf.mxu0  ;;  %v2025_v12 = vld [vmem:[%s5291_s29 + $0xb9] sm:$0xff] }
 0x1f1   : > { %v1461_v25 = vpop.f32.mrf.mxu1  ;;  %v6174_v45 = vadd.f32 %v1825_v20, %v1599_v50  ;;  %v2026_v20 = vld [vmem:[%s5291_s29 + $0xc1] sm:$0xff] }
 0x1f2   : > { %v1601_v46 = vadd.f32 %v1461_v25, %v5874_v52  ;;  %v4787_v34 = vpop.f32.mrf.mxu0 }
 0x1f3   : > { %v4705_v0 = vpop.f32.mrf.mxu1  ;;  %v2058_v34 = vpack.c.bf16 %v2026_v20, %v2025_v12 }
 0x1f4   : > { %v1830_v44 = vpop.f32.mrf.mxu0  ;;  %4973 = vmatmul.mubr.msk.bf16.gmra.mxu0 %vm355_vm2, %v2056_v49 }
 0x1f5   : > { %v1466_v63 = vpop.f32.mrf.mxu1  ;;  %v6178_v47 = vadd.f32 %v1830_v44, %v1600_v61  ;;  %4891 = vmatmul.mubr.msk.bf16.gmra.mxu1 %vm355_vm2, %v2056_v49  ;;  %4976 = vmatprep.mubr.msk.bf16.mxu0 %vm5225_vm1, %v5224_v1 }
 0x1f6   : > { %v1602_v14 = vadd.f32 %v1466_v63, %v5878_v7  ;;  %v4790_v43 = vpop.f32.mrf.mxu0  ;;  %4894 = vmatprep.mubr.msk.bf16.mxu1 %vm5225_vm1, %v5224_v1 }
 0x1f7   : > { %v4708_v52 = vpop.f32.mrf.mxu1 }
 0x1f8   : > { %v1833_v50 = vpop.f32.mrf.mxu0  ;;  %v2027_v52 = vld [vmem:[%s5291_s29 + $0xc9] sm:$0xff] }
 0x1f9   : > { %v1469_v23 = vpop.f32.mrf.mxu1  ;;  %v6188_v13 = vadd.f32 %v1833_v50, %v1601_v46  ;;  %v2028_v50 = vld [vmem:[%s5291_s29 + $0xd1] sm:$0xff] }
 0x1fa   : > { %v1603_v28 = vadd.f32 %v1469_v23, %v5889_v59  ;;  %v4791_v40 = vpop.f32.mrf.mxu0 }
 0x1fb   : > { %v4709_v10 = vpop.f32.mrf.mxu1  ;;  %v2059_v40 = vpack.c.bf16 %v2028_v50, %v2027_v52 }
 0x1fc   : > { %v1838_v61 = vpop.f32.mrf.mxu0  ;;  %4977 = vmatmul.mubr.msk.bf16.gmra.mxu0 %vm355_vm2, %v2057_v33 }
 0x1fd   : > { %v1474_v7 = vpop.f32.mrf.mxu1  ;;  %v6192_v15 = vadd.f32 %v1838_v61, %v1602_v14  ;;  %4895 = vmatmul.mubr.msk.bf16.gmra.mxu1 %vm355_vm2, %v2057_v33  ;;  %4980 = vmatprep.mubr.msk.bf16.mxu0 %vm5225_vm1, %v5224_v1 }
 0x1fe   : > { %v1604_v49 = vadd.f32 %v1474_v7, %v5893_v22  ;;  %v4794_v25 = vpop.f32.mrf.mxu0  ;;  %4898 = vmatprep.mubr.msk.bf16.mxu1 %vm5225_vm1, %v5224_v1 }
 0x1ff   : > { %v4712_v59 = vpop.f32.mrf.mxu1 }
 0x200   : > { %v1841_v46 = vpop.f32.mrf.mxu0  ;;  %v2029_v59 = vld [vmem:[%s5291_s29 + $0xd9] sm:$0xff] }
 0x201   : > { %v1477_v0 = vpop.f32.mrf.mxu1  ;;  %v6202_v44 = vadd.f32 %v1841_v46, %v1603_v28  ;;  %v2030_v46 = vld [vmem:[%s5291_s29 + $0xe1] sm:$0xff] }
 0x202   : > { %v1605_v63 = vadd.f32 %v1477_v0, %v5904_v4  ;;  %v4795_v27 = vpop.f32.mrf.mxu0 }
 0x203   : > { %v4713_v36 = vpop.f32.mrf.mxu1  ;;  %v2060_v27 = vpack.c.bf16 %v2030_v46, %v2029_v59 }
 0x204   : > { %v1846_v14 = vpop.f32.mrf.mxu0  ;;  %4981 = vmatmul.mubr.msk.bf16.gmra.mxu0 %vm355_vm2, %v2058_v34 }
 0x205   : > { %v1482_v22 = vpop.f32.mrf.mxu1  ;;  %v6206_v43 = vadd.f32 %v1846_v14, %v1604_v49  ;;  %4899 = vmatmul.mubr.msk.bf16.gmra.mxu1 %vm355_vm2, %v2058_v34  ;;  %4984 = vmatprep.mubr.msk.bf16.mxu0 %vm5225_vm1, %v5224_v1 }
 0x206   : > { %v1606_v33 = vadd.f32 %v1482_v22, %v5908_v29  ;;  %v4798_v23 = vpop.f32.mrf.mxu0  ;;  %4902 = vmatprep.mubr.msk.bf16.mxu1 %vm5225_vm1, %v5224_v1 }
 0x207   : > { %v4716_v4 = vpop.f32.mrf.mxu1 }
 0x208   : > { %v1849_v28 = vpop.f32.mrf.mxu0  ;;  %v2031_v4 = vld [vmem:[%s5291_s29 + $0xe9] sm:$0xff] }
 0x209   : > { %v1485_v10 = vpop.f32.mrf.mxu1  ;;  %v6216_v61 = vadd.f32 %v1849_v28, %v1605_v63  ;;  %v2032_v28 = vld [vmem:[%s5291_s29 + $0xf1] sm:$0xff] }
 0x20a   : > { %v1607_v7 = vadd.f32 %v1485_v10, %v5919_v21  ;;  %v4799_v12 = vpop.f32.mrf.mxu0 }
 0x20b   : > { %v4717_v20 = vpop.f32.mrf.mxu1  ;;  %v2061_v12 = vpack.c.bf16 %v2032_v28, %v2031_v4 }
 0x20c   : > { %v1854_v49 = vpop.f32.mrf.mxu0  ;;  %4985 = vmatmul.mubr.msk.bf16.gmra.mxu0 %vm355_vm2, %v2059_v40 }
 0x20d   : > { %v1490_v29 = vpop.f32.mrf.mxu1  ;;  %v6220_v25 = vadd.f32 %v1854_v49, %v1606_v33  ;;  %4903 = vmatmul.mubr.msk.bf16.gmra.mxu1 %vm355_vm2, %v2059_v40  ;;  %4988 = vmatprep.mubr.msk.bf16.mxu0 %vm5225_vm1, %v5224_v1 }
 0x20e   : > { %v1608_v34 = vadd.f32 %v1490_v29, %v5923_v30  ;;  %v4802_v0 = vpop.f32.mrf.mxu0  ;;  %4906 = vmatprep.mubr.msk.bf16.mxu1 %vm5225_vm1, %v5224_v1 }
 0x20f   : > { %v4720_v21 = vpop.f32.mrf.mxu1 }
 0x210   : > { %v1857_v63 = vpop.f32.mrf.mxu0  ;;  %v2033_v21 = vld [vmem:[%s5291_s29 + $0xf9] sm:$0xff] }
 0x211   : > { %v1493_v36 = vpop.f32.mrf.mxu1  ;;  %v6230_v14 = vadd.f32 %v1857_v63, %v1607_v7  ;;  %v2034_v63 = vld [vmem:[%s5291_s29 + $0x101] sm:$0xff] }
 0x212   : > { %v1609_v22 = vadd.f32 %v1493_v36, %v5934_v17  ;;  %v4803_v52 = vpop.f32.mrf.mxu0 }
 0x213   : > { %v4721_v50 = vpop.f32.mrf.mxu1  ;;  %v2062_v52 = vpack.c.bf16 %v2034_v63, %v2033_v21 }
 0x214   : > { %v1862_v33 = vpop.f32.mrf.mxu0  ;;  %4989 = vmatmul.mubr.msk.bf16.gmra.mxu0 %vm355_vm2, %v2060_v27 }
 0x215   : > { %v1498_v30 = vpop.f32.mrf.mxu1  ;;  %v6234_v23 = vadd.f32 %v1862_v33, %v1608_v34  ;;  %4907 = vmatmul.mubr.msk.bf16.gmra.mxu1 %vm355_vm2, %v2060_v27  ;;  %4992 = vmatprep.mubr.msk.bf16.mxu0 %vm5225_vm1, %v5224_v1 }
 0x216   : > { %v1610_v40 = vadd.f32 %v1498_v30, %v5938_v26  ;;  %v4806_v10 = vpop.f32.mrf.mxu0  ;;  %4910 = vmatprep.mubr.msk.bf16.mxu1 %vm5225_vm1, %v5224_v1 }
 0x217   : > { %v4724_v17 = vpop.f32.mrf.mxu1 }
 0x218   : > { %v1865_v7 = vpop.f32.mrf.mxu0  ;;  %v2035_v17 = vld [vmem:[%s5291_s29 + $0x109] sm:$0xff] }
 0x219   : > { %v1501_v20 = vpop.f32.mrf.mxu1  ;;  %v6244_v49 = vadd.f32 %v1865_v7, %v1609_v22  ;;  %v2036_v7 = vld [vmem:[%s5291_s29 + $0x111] sm:$0xff] }
 0x21a   : > { %v1611_v29 = vadd.f32 %v1501_v20, %v5949_v42  ;;  %v4807_v59 = vpop.f32.mrf.mxu0 }
 0x21b   : > { %v4725_v46 = vpop.f32.mrf.mxu1  ;;  %v2063_v59 = vpack.c.bf16 %v2036_v7, %v2035_v17  ;;  %v3630_v17 = vld [vmem:[%s7075_s2] sm:$0xff] }
 0x21c   : > { %v1870_v34 = vpop.f32.mrf.mxu0  ;;  %4993 = vmatmul.mubr.msk.bf16.gmra.mxu0 %vm355_vm2, %v2061_v12 }
 0x21d   : > { %v1506_v26 = vpop.f32.mrf.mxu1  ;;  %v6248_v0 = vadd.f32 %v1870_v34, %v1610_v40  ;;  %4911 = vmatmul.mubr.msk.bf16.gmra.mxu1 %vm355_vm2, %v2061_v12  ;;  %4996 = vmatprep.mubr.msk.bf16.mxu0 %vm5225_vm1, %v5224_v1 }
 0x21e   : > { %v1612_v27 = vadd.f32 %v1506_v26, %v5953_v5  ;;  %v4810_v36 = vpop.f32.mrf.mxu0  ;;  %4914 = vmatprep.mubr.msk.bf16.mxu1 %vm5225_vm1, %v5224_v1 }
 0x21f   : > { %v4728_v42 = vpop.f32.mrf.mxu1 }
 0x220   : > { %v1873_v22 = vpop.f32.mrf.mxu0  ;;  %v2037_v42 = vld [vmem:[%s5291_s29 + $0x119] sm:$0xff] }
 0x221   : > { %v1509_v50 = vpop.f32.mrf.mxu1  ;;  %v6258_v33 = vadd.f32 %v1873_v22, %v1611_v29  ;;  %v2038_v22 = vld [vmem:[%s5291_s29 + $0x121] sm:$0xff] }
 0x222   : > { %v1613_v30 = vadd.f32 %v1509_v50, %v5964_v41  ;;  %v4811_v4 = vpop.f32.mrf.mxu0 }
 0x223   : > { %v4729_v28 = vpop.f32.mrf.mxu1  ;;  %v2064_v4 = vpack.c.bf16 %v2038_v22, %v2037_v42 }
 0x224   : > { %v1878_v40 = vpop.f32.mrf.mxu0  ;;  %4997 = vmatmul.mubr.msk.bf16.gmra.mxu0 %vm355_vm2, %v2062_v52  ;;  %v5226_v28 = vmov 0  }
 0x225   : > { %v1514_v5 = vpop.f32.mrf.mxu1  ;;  %v6262_v10 = vadd.f32 %v1878_v40, %v1612_v27  ;;  %4915 = vmatmul.mubr.msk.bf16.gmra.mxu1 %vm355_vm2, %v2062_v52  ;;  %5000 = vmatprep.mubr.msk.bf16.mxu0 %vm5225_vm1, %v5224_v1 }
 0x226   : > { %v1614_v12 = vadd.f32 %v1514_v5, %v5968_v19  ;;  %v4814_v20 = vpop.f32.mrf.mxu0  ;;  %4918 = vmatprep.mubr.msk.bf16.mxu1 %vm5225_vm1, %v5224_v1  ;;  %5214 = vset.pattern.permute.xlu0 %v5226_v28 }
 0x227   : > { %v4732_v41 = vpop.f32.mrf.mxu1  ;;  %5215 = vset.pattern.permute.xlu1 %v5226_v28  ;;  %3673 = vperm.xlu0 %5214, %v3630_v17   ;;  %v2041_v28 = vld [vmem:[%s5291_s29 + $0x139] sm:$0xff] }
 0x228   : > { %v1881_v29 = vpop.f32.mrf.mxu0 }
 0x229   : > { %v1517_v46 = vpop.f32.mrf.mxu1  ;;  %v6272_v34 = vadd.f32 %v1881_v29, %v1613_v30 }
 0x22a   : > { %v1615_v26 = vadd.f32 %v1517_v46, %v5979_v53  ;;  %v4815_v21 = vpop.f32.mrf.mxu0  ;;  %v2040_v46 = vld [vmem:[%s5291_s29 + $0x131] sm:$0xff] }
 0x22b   : > { %v4733_v63 = vpop.f32.mrf.mxu1 }
 0x22c   : > { %v1886_v27 = vpop.f32.mrf.mxu0  ;;  %5001 = vmatmul.mubr.msk.bf16.gmra.mxu0 %vm355_vm2, %v2063_v59 }
 0x22d   : > { %v1522_v19 = vpop.f32.mrf.mxu1  ;;  %v6276_v36 = vadd.f32 %v1886_v27, %v1614_v12  ;;  %4919 = vmatmul.mubr.msk.bf16.gmra.mxu1 %vm355_vm2, %v2063_v59  ;;  %5004 = vmatprep.mubr.msk.bf16.mxu0 %vm5225_vm1, %v5224_v1  ;;  %v2039_v59 = vld [vmem:[%s5291_s29 + $0x129] sm:$0xff] }
 0x22e   : > { %v1616_v52 = vadd.f32 %v1522_v19, %v5983_v37  ;;  %v4818_v50 = vpop.f32.mrf.mxu0  ;;  %4922 = vmatprep.mubr.msk.bf16.mxu1 %vm5225_vm1, %v5224_v1  ;;  %v2065_v19 = vpack.c.bf16 %v2040_v46, %v2039_v59 }
 0x22f   : > { %v4736_v53 = vpop.f32.mrf.mxu1 }
 0x230   : > { %v1889_v30 = vpop.f32.mrf.mxu0 }
 0x231   : > { %v1525_v40 = vpop.f32.mrf.mxu1  ;;  %v6286_v5 = vadd.f32 %v1889_v30, %v1615_v26 }
 0x232   : > { %v1617_v37 = vadd.f32 %v1525_v40, %v5994_v39  ;;  %v4819_v7 = vpop.f32.mrf.mxu0  ;;  %v3631_v39 = vld [vmem:[%s7075_s2 + $0x8] sm:$0xff] }
 0x233   : > { %v4737_v12 = vpop.f32.mrf.mxu1  ;;  %3678 = vperm.xlu0 %5214, %v3631_v39   ;;  %v3636_v7 = vld [vmem:[%s7075_s2 + $0x30] sm:$0xff] }
 0x234   : > { %v1894_v20 = vpop.f32.mrf.mxu0  ;;  %5005 = vmatmul.mubr.msk.bf16.gmra.mxu0 %vm355_vm2, %v2064_v4 }
 0x235   : > { %v1530_v41 = vpop.f32.mrf.mxu1  ;;  %v6293_v29 = vadd.f32 %v1894_v20, %v1616_v52  ;;  %4923 = vmatmul.mubr.msk.bf16.gmra.mxu1 %vm355_vm2, %v2064_v4  ;;  %5008 = vmatprep.mubr.msk.bf16.mxu0 %vm5225_vm1, %v5224_v1  ;;  %v3632_v52 = vld [vmem:[%s7075_s2 + $0x10] sm:$0xff] }
 0x236   : > { %v1618_v26 = vadd.f32 %v1530_v41, %v5998_v38  ;;  %v4822_v21 = vpop.f32.mrf.mxu0  ;;  %4926 = vmatprep.mubr.msk.bf16.mxu1 %vm5225_vm1, %v5224_v1  ;;  %v3634_v38 = vld [vmem:[%s7075_s2 + $0x20] sm:$0xff]  ;;  %3683 = vperm.xlu1 %5215, %v3632_v52   ;;  %v2043_v52 = vld [vmem:[%s5291_s29 + $0x149] sm:$0xff] }
 0x237   : > { %v4740_v63 = vpop.f32.mrf.mxu1  ;;  %3693 = vperm.xlu0 %5214, %v3634_v38   ;;  %v3635_v21 = vld [vmem:[%s7075_s2 + $0x28] sm:$0xff] }
 0x238   : > { %v1897_v27 = vpop.f32.mrf.mxu0 }
 0x239   : > { %v1533_v42 = vpop.f32.mrf.mxu1  ;;  %v6306_v22 = vadd.f32 %v1897_v27, %v1617_v37  ;;  %v2042_v37 = vld [vmem:[%s5291_s29 + $0x141] sm:$0xff] }
 0x23a   : > { %v1619_v50 = vadd.f32 %v1533_v42, %v6009_v9  ;;  %v4823_v53 = vpop.f32.mrf.mxu0  ;;  %v3633_v9 = vld [vmem:[%s7075_s2 + $0x18] sm:$0xff]  ;;  %v2066_v46 = vpack.c.bf16 %v2042_v37, %v2041_v28 }
 0x23b   : > { %v4741_v30 = vpop.f32.mrf.mxu1  ;;  %3688 = vperm.xlu1 %5215, %v3633_v9   ;;  %3703 = vperm.xlu0 %5214, %v3636_v7   ;;  %v2044_v53 = vld [vmem:[%s5291_s29 + $0x151] sm:$0xff] }
 0x23c   : > { %v1902_v4 = vpop.f32.mrf.mxu0  ;;  %5009 = vmatmul.mubr.msk.bf16.gmra.mxu0 %vm355_vm2, %v2065_v19  ;;  %v3640_v30 = vld [vmem:[%s7075_s2 + $0x50] sm:$0xff]  ;;  %v2067_v9 = vpack.c.bf16 %v2044_v53, %v2043_v52 }
 0x23d   : > { %v1538_v40 = vpop.f32.mrf.mxu1  ;;  %v6317_v17 = vadd.f32 %v1902_v4, %v1618_v26  ;;  %4927 = vmatmul.mubr.msk.bf16.gmra.mxu1 %vm355_vm2, %v2065_v19  ;;  %5012 = vmatprep.mubr.msk.bf16.mxu0 %vm5225_vm1, %v5224_v1 }
 0x23e   : > { %v1620_v12 = vadd.f32 %v1538_v40, %v6013_v57  ;;  %v4826_v20 = vpop.f32.mrf.mxu0  ;;  %4930 = vmatprep.mubr.msk.bf16.mxu1 %vm5225_vm1, %v5224_v1  ;;  %v3638_v57 = vld [vmem:[%s7075_s2 + $0x40] sm:$0xff] }
 0x23f   : > { %v4744_v41 = vpop.f32.mrf.mxu1  ;;  %3698 = vperm.xlu1 %5215, %v3635_v21   ;;  %3713 = vperm.xlu0 %5214, %v3638_v57   ;;  %v3639_v20 = vld [vmem:[%s7075_s2 + $0x48] sm:$0xff]  ;;  %v2415_v21 = vld [vmem:[%s5291_s29 + $0x159] sm:$0xff] }
 0x240   : > { %v1905_v59 = vpop.f32.mrf.mxu0 }
 0x241   : > { %v1541_v39 = vpop.f32.mrf.mxu1  ;;  %v6332_v26 = vadd.f32 %v1905_v59, %v1619_v50 }
 0x242   : > { %v1621_v63 = vadd.f32 %v1541_v39, %v6026_v35  ;;  %v4827_v27 = vpop.f32.mrf.mxu0  ;;  %v3637_v35 = vld [vmem:[%s7075_s2 + $0x38] sm:$0xff] }
 0x243   : > { %v4745_v19 = vpop.f32.mrf.mxu1  ;;  %3708 = vperm.xlu1 %5215, %v3637_v35   ;;  %3723 = vperm.xlu0 %5214, %v3640_v30   ;;  %v2416_v27 = vld [vmem:[%s5291_s29 + $0x161] sm:$0xff] }
 0x244   : > { %v1910_v42 = vpop.f32.mrf.mxu0  ;;  %5013 = vmatmul.mubr.msk.bf16.gmra.mxu0 %vm355_vm2, %v2066_v46  ;;  %v3644_v19 = vld [vmem:[%s7075_s2 + $0x70] sm:$0xff]  ;;  %v2439_v30 = vpack.c.bf16 %v2416_v27, %v2415_v21 }
 0x245   : > { %v1546_v38 = vpop.f32.mrf.mxu1  ;;  %v6343_v50 = vadd.f32 %v1910_v42, %v1620_v12  ;;  %4931 = vmatmul.mubr.msk.bf16.gmra.mxu1 %vm355_vm2, %v2066_v46  ;;  %5016 = vmatprep.mubr.msk.bf16.mxu0 %vm5225_vm1, %v5224_v1  ;;  %v2749_v27 = vld [vmem:[%s5291_s29 + $0x2a] sm:$0xff] }
 0x246   : > { %v1622_v4 = vadd.f32 %v1546_v38, %v6030_v8  ;;  %v4830_v28 = vpop.f32.mrf.mxu0  ;;  %4934 = vmatprep.mubr.msk.bf16.mxu1 %vm5225_vm1, %v5224_v1  ;;  %v3642_v8 = vld [vmem:[%s7075_s2 + $0x60] sm:$0xff]  ;;  %v2045_v38 = vld [vmem:[%s5291_s29 + $0x159] sm:$0xf] }
 0x247   : > { %v4748_v40 = vpop.f32.mrf.mxu1  ;;  %3718 = vperm.xlu1 %5215, %v3639_v20   ;;  %3733 = vperm.xlu0 %5214, %v3642_v8  }
 0x248   : > { %v1913_v37 = vpop.f32.mrf.mxu0  ;;  %v2068_v40 = vpack.c.bf16 %v2045_v38, %v2045_v38 }
 0x249   : > { %v1549_v7 = vpop.f32.mrf.mxu1  ;;  %v6358_v12 = vadd.f32 %v1913_v37, %v1621_v63  ;;  %v3643_v37 = vld [vmem:[%s7075_s2 + $0x68] sm:$0xff] }
 0x24a   : > { %v1623_v41 = vadd.f32 %v1549_v7, %v6041_v32  ;;  %v4831_v59 = vpop.f32.mrf.mxu0  ;;  %v3641_v32 = vld [vmem:[%s7075_s2 + $0x58] sm:$0xff] }
 0x24b   : > { %v4749_v46 = vpop.f32.mrf.mxu1  ;;  %3728 = vperm.xlu1 %5215, %v3641_v32   ;;  %3743 = vperm.xlu0 %5214, %v3644_v19   ;;  %v2750_v32 = vld [vmem:[%s5291_s29 + $0x32] sm:$0xff] }
 0x24c   : > { %v1918_v39 = vpop.f32.mrf.mxu0  ;;  %5017 = vmatmul.mubr.msk.bf16.gmra.mxu0 %vm355_vm2, %v2067_v9  ;;  %v2417_v46 = vld [vmem:[%s5291_s29 + $0x169] sm:$0xf] }
 0x24d   : > { %v1554_v57 = vpop.f32.mrf.mxu1  ;;  %v6369_v63 = vadd.f32 %v1918_v39, %v1622_v4  ;;  %4935 = vmatmul.mubr.msk.bf16.gmra.mxu1 %vm355_vm2, %v2067_v9  ;;  %5020 = vmatprep.mubr.msk.bf16.mxu0 %vm5225_vm1, %v5224_v1  ;;  %v3648_v39 = vld [vmem:[%s7075_s2 + $0x90] sm:$0xff] }
 0x24e   : > { %v1624_v42 = vadd.f32 %v1554_v57, %v6048_v54  ;;  %v4834_v52 = vpop.f32.mrf.mxu0  ;;  %4938 = vmatprep.mubr.msk.bf16.mxu1 %vm5225_vm1, %v5224_v1  ;;  %v3646_v54 = vld [vmem:[%s7075_s2 + $0x80] sm:$0xff] }
 0x24f   : > { %v4752_v53 = vpop.f32.mrf.mxu1  ;;  %3738 = vperm.xlu1 %5215, %v3643_v37   ;;  %3753 = vperm.xlu0 %5214, %v3646_v54   ;;  %v2440_v52 = vpack.c.bf16 %v2417_v46, %v2417_v46 }
 0x250   : > { %v1921_v35 = vpop.f32.mrf.mxu0 }
 0x251   : > { %v1557_v4 = vpop.f32.mrf.mxu1  ;;  %v6385_v28 = vadd.f32 %v1921_v35, %v1623_v41  ;;  %v2792_v35 = vpack.c.bf16 %v2750_v32, %v2749_v27 }
 0x252   : > { %v1625_v9 = vadd.f32 %v1557_v4, %v6059_v6  ;;  %v4835_v7 = vpop.f32.mrf.mxu0  ;;  %v3645_v6 = vld [vmem:[%s7075_s2 + $0x78] sm:$0xff] }
 0x253   : > { %v4753_v20 = vpop.f32.mrf.mxu1  ;;  %3748 = vperm.xlu1 %5215, %v3645_v6   ;;  %3763 = vperm.xlu0 %5214, %v3648_v39   ;;  %v2751_v39 = vld [vmem:[%s5291_s29 + $0x3a] sm:$0xff] }
 0x254   : > { %v1926_v8 = vpop.f32.mrf.mxu0  ;;  %5021 = vmatmul.mubr.msk.bf16.gmra.mxu0 %vm355_vm2, %v2439_v30  ;;  %v3650_v30 = vld [vmem:[%s7075_s2 + $0xa0] sm:$0xff] }
 0x255   : > { %v1562_v41 = vpop.f32.mrf.mxu1  ;;  %v6395_v59 = vadd.f32 %v1926_v8, %v1624_v42  ;;  %4939 = vmatmul.mubr.msk.bf16.gmra.mxu1 %vm355_vm2, %v2068_v40  ;;  %5024 = vmatprep.mubr.msk.bf16.mxu0 %vm5225_vm1, %v5224_v1  ;;  %v3122_v8 = vld [vmem:[%s5291_s29 + $0x33] sm:$0xff] }
 0x256   : > { %v1626_v21 = vadd.f32 %v1562_v41, %v6067_v62  ;;  %v4838_v57 = vpop.f32.mrf.mxu0  ;;  %5030 = vmatprep.mubr.msk.bf16.mxu1 %vm5225_vm1, %v5224_v1  ;;  %v3647_v62 = vld [vmem:[%s7075_s2 + $0x88] sm:$0xff]  ;;  %v3652_v41 = vld [vmem:[%s7075_s2 + $0xb0] sm:$0xff] }
 0x257   : > { %v4756_v19 = vpop.f32.mrf.mxu1  ;;  %3758 = vperm.xlu1 %5215, %v3647_v62   ;;  %3773 = vperm.xlu0 %5214, %v3650_v30  }
 0x258   : > { %v1929_v42 = vpop.f32.mrf.mxu0 }
 0x259   : > { %v1565_v38 = vpop.f32.mrf.mxu1  ;;  %v6412_v53 = vadd.f32 %v1929_v42, %v1625_v9  ;;  %v3121_v9 = vld [vmem:[%s5291_s29 + $0x2b] sm:$0xff] }
 0x25a   : > { %v1627_v4 = vadd.f32 %v1565_v38, %v6077_v31  ;;  %v4839_v40 = vpop.f32.mrf.mxu0  ;;  %v3649_v31 = vld [vmem:[%s7075_s2 + $0x98] sm:$0xff]  ;;  %v3164_v32 = vpack.c.bf16 %v3122_v8, %v3121_v9  ;;  %v3654_v38 = vld [vmem:[%s7075_s2 + $0xc0] sm:$0xff] }
 0x25b   : > { %v4757_v37 = vpop.f32.mrf.mxu1  ;;  %3768 = vperm.xlu1 %5215, %v3649_v31   ;;  %3783 = vperm.xlu0 %5214, %v3652_v41   ;;  %v3123_v40 = vld [vmem:[%s5291_s29 + $0x3b] sm:$0xff]  ;;  %v3124_v9 = vld [vmem:[%s5291_s29 + $0x43] sm:$0xff] }
 0x25c   : > { %v1934_v54 = vpop.f32.mrf.mxu0  ;;  %5025 = vmatmul.mubr.msk.bf16.gmra.mxu0 %vm355_vm2, %v2440_v52  ;;  %v2753_v41 = vld [vmem:[%s5291_s29 + $0x4a] sm:$0xff] }
 0x25d   : > { %v1570_v7 = vpop.f32.mrf.mxu1  ;;  %v6423_v20 = vadd.f32 %v1934_v54, %v1626_v21  ;;  %5031 = vmatmul.mubr.msk.bf16.vlgmr.msra.gmra.mxu1 %vm355_vm2, %v2792_v35  ;;  %5116 = vmatprep.mubr.msk.bf16.mxu0 %vm5225_vm1, %v5224_v1  ;;  %v2752_v21 = vld [vmem:[%s5291_s29 + $0x42] sm:$0xff] }
 0x25e   : > { %v1628_v46 = vadd.f32 %v1570_v7, %v6082_v16  ;;  %v4842_v6 = vpop.f32.mrf.mxu0  ;;  %5034 = vmatprep.mubr.msk.bf16.mxu1 %vm5225_vm1, %v5224_v1  ;;  %v2793_v52 = vpack.c.bf16 %v2752_v21, %v2751_v39  ;;  %v3651_v16 = vld [vmem:[%s7075_s2 + $0xa8] sm:$0xff]  ;;  %v3656_v7 = vld [vmem:[%s7075_s2 + $0xd0] sm:$0xff]  ;;  %v3165_v21 = vpack.c.bf16 %v3124_v9, %v3123_v40 }
 0x25f   : > { %v4760_v57 = vpop.f32.mrf.mxu1  ;;  %3778 = vperm.xlu1 %5215, %v3651_v16   ;;  %3793 = vperm.xlu0 %5214, %v3654_v38   ;;  %v3126_v40 = vld [vmem:[%s5291_s29 + $0x53] sm:$0xff] }
 0x260   : > { %v1937_v27 = vpop.f32.mrf.mxu0 }
 0x261   : > { %v1573_v19 = vpop.f32.mrf.mxu1  ;;  %v6440_v42 = vadd.f32 %v1937_v27, %v1627_v4 }
 0x262   : > { %v1629_v35 = vadd.f32 %v1573_v19, %v6092_v56  ;;  %v4843_v62 = vpop.f32.mrf.mxu0  ;;  %v3653_v56 = vld [vmem:[%s7075_s2 + $0xb8] sm:$0xff]  ;;  %v3658_v19 = vld [vmem:[%s7075_s2 + $0xe0] sm:$0xff] }
 0x263   : > { %v4761_v30 = vpop.f32.mrf.mxu1  ;;  %3788 = vperm.xlu1 %5215, %v3653_v56   ;;  %3803 = vperm.xlu0 %5214, %v3656_v7   ;;  %v3125_v62 = vld [vmem:[%s5291_s29 + $0x4b] sm:$0xff]  ;;  %v2755_v7 = vld [vmem:[%s5291_s29 + $0x5a] sm:$0xff] }
 0x264   : > { %v1942_v4 = vpop.f32.mrf.mxu0  ;;  %5117 = vmatmul.mubr.msk.bf16.vlgmr.msra.gmra.mxu0 %vm355_vm2, %v3164_v32 }
 0x265   : > { %v1578_v37 = vpop.f32.mrf.mxu1  ;;  %v6451_v54 = vadd.f32 %v1942_v4, %v1628_v46  ;;  %5035 = vmatmul.mubr.msk.bf16.gmra.mxu1 %vm355_vm2, %v2793_v52  ;;  %5120 = vmatprep.mubr.msk.bf16.mxu0 %vm5225_vm1, %v5224_v1  ;;  %v2754_v46 = vld [vmem:[%s5291_s29 + $0x52] sm:$0xff] }
 0x266   : > { %v1630_v8 = vadd.f32 %v1578_v37, %v6096_v48  ;;  %v4846_v31 = vpop.f32.mrf.mxu0  ;;  %5038 = vmatprep.mubr.msk.bf16.mxu1 %vm5225_vm1, %v5224_v1  ;;  %v2794_v32 = vpack.c.bf16 %v2754_v46, %v2753_v41  ;;  %v3655_v48 = vld [vmem:[%s7075_s2 + $0xc8] sm:$0xff]  ;;  %v3660_v37 = vld [vmem:[%s7075_s2 + $0xf0] sm:$0xff]  ;;  %v3166_v46 = vpack.c.bf16 %v3126_v40, %v3125_v62  ;;  %v3661_v62 = vld [vmem:[%s7075_s2 + $0xf8] sm:$0xff] }
 0x267   : > { %v4764_v6 = vpop.f32.mrf.mxu1  ;;  %3798 = vperm.xlu1 %5215, %v3655_v48   ;;  %3813 = vperm.xlu0 %5214, %v3658_v19  }
 0x268   : > { %v1945_v39 = vpop.f32.mrf.mxu0 }
 0x269   : > { %v1581_v57 = vpop.f32.mrf.mxu1  ;;  %v6468_v27 = vadd.f32 %v1945_v39, %v1629_v35 }
 0x26a   : > { %v1631_v52 = vadd.f32 %v1581_v57, %v6106_v51  ;;  %v4847_v16 = vpop.f32.mrf.mxu0  ;;  %v3657_v51 = vld [vmem:[%s7075_s2 + $0xd8] sm:$0xff]  ;;  %v3662_v57 = vld [vmem:[%s7075_s2 + $0x100] sm:$0xff] }
 0x26b   : > { %v4765_v38 = vpop.f32.mrf.mxu1  ;;  %3808 = vperm.xlu1 %5215, %v3657_v51   ;;  %3823 = vperm.xlu0 %5214, %v3660_v37   ;;  %v2757_v37 = vld [vmem:[%s5291_s29 + $0x6a] sm:$0xff] }
 0x26c   : > { %v1950_v35 = vpop.f32.mrf.mxu0  ;;  %5121 = vmatmul.mubr.msk.bf16.gmra.mxu0 %vm355_vm2, %v3165_v21 }
 0x26d   : > { %v1586_v30 = vpop.f32.mrf.mxu1  ;;  %v6479_v4 = vadd.f32 %v1950_v35, %v1630_v8  ;;  %5039 = vmatmul.mubr.msk.bf16.gmra.mxu1 %vm355_vm2, %v2794_v32  ;;  %5124 = vmatprep.mubr.msk.bf16.mxu0 %vm5225_vm1, %v5224_v1  ;;  %v2756_v8 = vld [vmem:[%s5291_s29 + $0x62] sm:$0xff] }
 0x26e   : > { %v1632_v9 = vadd.f32 %v1586_v30, %v6110_v3  ;;  %v4850_v56 = vpop.f32.mrf.mxu0  ;;  %5042 = vmatprep.mubr.msk.bf16.mxu1 %vm5225_vm1, %v5224_v1  ;;  %v2795_v21 = vpack.c.bf16 %v2756_v8, %v2755_v7  ;;  %v3659_v3 = vld [vmem:[%s7075_s2 + $0xe8] sm:$0xff]  ;;  %v3664_v30 = vld [vmem:[%s7075_s2 + $0x110] sm:$0xff] }
 0x26f   : > { %v4768_v31 = vpop.f32.mrf.mxu1  ;;  %3818 = vperm.xlu1 %5215, %v3659_v3   ;;  %3833 = vperm.xlu0 %5214, %v3662_v57   ;;  %v3128_v35 = vld [vmem:[%s5291_s29 + $0x63] sm:$0xff] }
 0x270   : > { %v1953_v41 = vpop.f32.mrf.mxu0 }
 0x271   : > { %v1589_v6 = vpop.f32.mrf.mxu1  ;;  %v6496_v39 = vadd.f32 %v1953_v41, %v1631_v52  ;;  %v3127_v52 = vld [vmem:[%s5291_s29 + $0x5b] sm:$0xff] }
 0x272   : > { %v4851_v32 = vpop.f32.mrf.mxu0  ;;  %v3167_v8 = vpack.c.bf16 %v3128_v35, %v3127_v52  ;;  %v3130_v52 = vld [vmem:[%s5291_s29 + $0x73] sm:$0xff] }
 0x273   : > { %v4769_v48 = vpop.f32.mrf.mxu1  ;;  %3828 = vperm.xlu1 %5215, %v3661_v62   ;;  %3843 = vperm.xlu0 %5214, %v3664_v30   ;;  %v3129_v32 = vld [vmem:[%s5291_s29 + $0x6b] sm:$0xff]  ;;  %v2759_v30 = vld [vmem:[%s5291_s29 + $0x7a] sm:$0xff] }
 0x274   : > { %v1958_v19 = vpop.f32.mrf.mxu0  ;;  %5125 = vmatmul.mubr.msk.bf16.gmra.mxu0 %vm355_vm2, %v3166_v46  ;;  %v3663_v46 = vld [vmem:[%s7075_s2 + $0x108] sm:$0xff] }
 0x275   : > { %v6506_v16 = vadd.f32 %v1958_v19, %v1632_v9  ;;  %v2170_v38 = vpop.f32.mrf.mxu1  ;;  %5043 = vmatmul.mubr.msk.bf16.gmra.mxu1 %vm355_vm2, %v2795_v21  ;;  %5128 = vmatprep.mubr.msk.bf16.mxu0 %vm5225_vm1, %v5224_v1  ;;  %v2758_v9 = vld [vmem:[%s5291_s29 + $0x72] sm:$0xff] }
 0x276   : > { %v2336_v40 = vadd.f32 %v2170_v38, %v6122_v60  ;;  %v4854_v51 = vpop.f32.mrf.mxu0  ;;  %5046 = vmatprep.mubr.msk.bf16.mxu1 %vm5225_vm1, %v5224_v1  ;;  %v2796_v41 = vpack.c.bf16 %v2758_v9, %v2757_v37  ;;  %v3666_v60 = vld [vmem:[%s7075_s2 + $0x120] sm:$0xff]  ;;  %v3668_v38 = vld [vmem:[%s7075_s2 + $0x130] sm:$0xff]  ;;  %v3168_v9 = vpack.c.bf16 %v3130_v52, %v3129_v32 }
 0x277   : > { %v4860_v56 = vpop.f32.mrf.mxu1  ;;  %3838 = vperm.xlu1 %5215, %v3663_v46   ;;  %3853 = vperm.xlu0 %5214, %v3666_v60   ;;  %v3132_v32 = vld [vmem:[%s5291_s29 + $0x83] sm:$0xff] }
 0x278   : > { %v1961_v7 = vpop.f32.mrf.mxu0 }
 0x279   : > { %v2173_v31 = vpop.f32.mrf.mxu1 }
 0x27a   : > { %v2337_v6 = vadd.f32 %v2173_v31, %v6132_v11  ;;  %v4855_v21 = vpop.f32.mrf.mxu0  ;;  %v3665_v11 = vld [vmem:[%s7075_s2 + $0x118] sm:$0xff]  ;;  %v3670_v31 = vld [vmem:[%s7075_s2 + $0x140] sm:$0xf] }
 0x27b   : > { %v4861_v3 = vpop.f32.mrf.mxu1  ;;  %3848 = vperm.xlu1 %5215, %v3665_v11   ;;  %3863 = vperm.xlu0 %5214, %v3668_v38   ;;  %v2761_v11 = vld [vmem:[%s5291_s29 + $0x8a] sm:$0xff]  ;;  %v2762_v38 = vld [vmem:[%s5291_s29 + $0x92] sm:$0xff] }
 0x27c   : > { %v2542_v57 = vpop.f32.mrf.mxu0  ;;  %5129 = vmatmul.mubr.msk.bf16.gmra.mxu0 %vm355_vm2, %v3167_v8 }
 0x27d   : > { %v2178_v48 = vpop.f32.mrf.mxu1  ;;  %v6532_v19 = vadd.f32 %v2542_v57, %v2336_v40  ;;  %5047 = vmatmul.mubr.msk.bf16.gmra.mxu1 %vm355_vm2, %v2796_v41  ;;  %5132 = vmatprep.mubr.msk.bf16.mxu0 %vm5225_vm1, %v5224_v1  ;;  %v2760_v40 = vld [vmem:[%s5291_s29 + $0x82] sm:$0xff] }
 0x27e   : > { %v2338_v35 = vadd.f32 %v2178_v48, %v6136_v58  ;;  %v4946_v62 = vpop.f32.mrf.mxu0  ;;  %5050 = vmatprep.mubr.msk.bf16.mxu1 %vm5225_vm1, %v5224_v1  ;;  %v2797_v8 = vpack.c.bf16 %v2760_v40, %v2759_v30  ;;  %v3667_v58 = vld [vmem:[%s7075_s2 + $0x128] sm:$0xff]  ;;  %v3131_v57 = vld [vmem:[%s5291_s29 + $0x7b] sm:$0xff] }
 0x27f   : > { %v4864_v51 = vpop.f32.mrf.mxu1  ;;  %3858 = vperm.xlu1 %5215, %v3667_v58   ;;  %3873 = vperm.xlu0 %5214, %v3670_v31   ;;  %v3169_v30 = vpack.c.bf16 %v3132_v32, %v3131_v57 }
 0x280   : > { %v2545_v37 = vpop.f32.mrf.mxu0 }
 0x281   : > { %v2181_v56 = vpop.f32.mrf.mxu1  ;;  %v6549_v7 = vadd.f32 %v2545_v37, %v2337_v6  ;;  %v2798_v37 = vpack.c.bf16 %v2762_v38, %v2761_v11 }
 0x282   : > { %v2339_v41 = vadd.f32 %v2181_v56, %v6146_v18  ;;  %v4947_v46 = vpop.f32.mrf.mxu0  ;;  %v3669_v18 = vld [vmem:[%s7075_s2 + $0x138] sm:$0xff] }
 0x283   : > { %v4865_v60 = vpop.f32.mrf.mxu1  ;;  %3868 = vperm.xlu1 %5215, %v3669_v18   ;;  %v3134_v46 = vld [vmem:[%s5291_s29 + $0x93] sm:$0xff] }
 0x284   : > { %v2550_v6 = vpop.f32.mrf.mxu0  ;;  %5133 = vmatmul.mubr.msk.bf16.gmra.mxu0 %vm355_vm2, %v3168_v9 }
 0x285   : > { %v2186_v21 = vpop.f32.mrf.mxu1  ;;  %v6559_v3 = vadd.f32 %v2550_v6, %v2338_v35  ;;  %5051 = vmatmul.mubr.msk.bf16.gmra.mxu1 %vm355_vm2, %v2797_v8  ;;  %5136 = vmatprep.mubr.msk.bf16.mxu0 %vm5225_vm1, %v5224_v1 }
 0x286   : > { %v2340_v48 = vadd.f32 %v2186_v21, %v6150_v2  ;;  %v4950_v52 = vpop.f32.mrf.mxu0  ;;  %5054 = vmatprep.mubr.msk.bf16.mxu1 %vm5225_vm1, %v5224_v1  ;;  %v2764_v21 = vld [vmem:[%s5291_s29 + $0xa2] sm:$0xff] }
 0x287   : > { %v4868_v35 = vpop.f32.mrf.mxu1 }
 0x288   : > { %v2553_v62 = vpop.f32.mrf.mxu0 }
 0x289   : > { %v2189_v40 = vpop.f32.mrf.mxu1  ;;  %v6574_v51 = vadd.f32 %v2553_v62, %v2339_v41  ;;  %v3133_v41 = vld [vmem:[%s5291_s29 + $0x8b] sm:$0xff] }
 0x28a   : > { %v2341_v2 = vadd.f32 %v2189_v40, %v6160_v55  ;;  %v4951_v9 = vpop.f32.mrf.mxu0  ;;  %v2763_v55 = vld [vmem:[%s5291_s29 + $0x9a] sm:$0xff]  ;;  %v3170_v18 = vpack.c.bf16 %v3134_v46, %v3133_v41 }
 0x28b   : > { %v4869_v56 = vpop.f32.mrf.mxu1  ;;  %v2799_v11 = vpack.c.bf16 %v2764_v21, %v2763_v55 }
 0x28c   : > { %v2558_v8 = vpop.f32.mrf.mxu0  ;;  %5137 = vmatmul.mubr.msk.bf16.gmra.mxu0 %vm355_vm2, %v3169_v30 }
 0x28d   : > { %v2194_v58 = vpop.f32.mrf.mxu1  ;;  %v6578_v31 = vadd.f32 %v2558_v8, %v2340_v48  ;;  %5055 = vmatmul.mubr.msk.bf16.gmra.mxu1 %vm355_vm2, %v2798_v37  ;;  %5140 = vmatprep.mubr.msk.bf16.mxu0 %vm5225_vm1, %v5224_v1  ;;  %v3135_v37 = vld [vmem:[%s5291_s29 + $0x9b] sm:$0xff]  ;;  %v2766_v8 = vld [vmem:[%s5291_s29 + $0xb2] sm:$0xff] }
 0x28e   : > { %v2342_v60 = vadd.f32 %v2194_v58, %v6164_v24  ;;  %v4954_v6 = vpop.f32.mrf.mxu0  ;;  %5058 = vmatprep.mubr.msk.bf16.mxu1 %vm5225_vm1, %v5224_v1 }
 0x28f   : > { %v4872_v57 = vpop.f32.mrf.mxu1 }
 0x290   : > { %v2561_v32 = vpop.f32.mrf.mxu0 }
 0x291   : > { %v2197_v48 = vpop.f32.mrf.mxu1  ;;  %v6590_v52 = vadd.f32 %v2561_v32, %v2341_v2  ;;  %v3136_v2 = vld [vmem:[%s5291_s29 + $0xa3] sm:$0xff] }
 0x292   : > { %v2343_v38 = vadd.f32 %v2197_v48, %v6174_v45  ;;  %v4955_v24 = vpop.f32.mrf.mxu0  ;;  %v2765_v45 = vld [vmem:[%s5291_s29 + $0xaa] sm:$0xff]  ;;  %v3171_v46 = vpack.c.bf16 %v3136_v2, %v3135_v37 }
 0x293   : > { %v4873_v35 = vpop.f32.mrf.mxu1  ;;  %v2800_v55 = vpack.c.bf16 %v2766_v8, %v2765_v45 }
 0x294   : > { %v2566_v62 = vpop.f32.mrf.mxu0  ;;  %5141 = vmatmul.mubr.msk.bf16.gmra.mxu0 %vm355_vm2, %v3170_v18 }
 0x295   : > { %v2202_v30 = vpop.f32.mrf.mxu1  ;;  %v6594_v40 = vadd.f32 %v2566_v62, %v2342_v60  ;;  %5059 = vmatmul.mubr.msk.bf16.gmra.mxu1 %vm355_vm2, %v2799_v11  ;;  %5144 = vmatprep.mubr.msk.bf16.mxu0 %vm5225_vm1, %v5224_v1  ;;  %v3137_v11 = vld [vmem:[%s5291_s29 + $0xab] sm:$0xff]  ;;  %v2768_v62 = vld [vmem:[%s5291_s29 + $0xc2] sm:$0xff] }
 0x296   : > { %v2344_v9 = vadd.f32 %v2202_v30, %v6178_v47  ;;  %v4958_v56 = vpop.f32.mrf.mxu0  ;;  %5062 = vmatprep.mubr.msk.bf16.mxu1 %vm5225_vm1, %v5224_v1 }
 0x297   : > { %v4876_v58 = vpop.f32.mrf.mxu1 }
 0x298   : > { %v2569_v41 = vpop.f32.mrf.mxu0 }
 0x299   : > { %v2205_v60 = vpop.f32.mrf.mxu1  ;;  %v6606_v6 = vadd.f32 %v2569_v41, %v2343_v38  ;;  %v3138_v38 = vld [vmem:[%s5291_s29 + $0xb3] sm:$0xff] }
 0x29a   : > { %v2345_v21 = vadd.f32 %v2205_v60, %v6188_v13  ;;  %v4959_v47 = vpop.f32.mrf.mxu0  ;;  %v2767_v13 = vld [vmem:[%s5291_s29 + $0xba] sm:$0xff]  ;;  %v3172_v2 = vpack.c.bf16 %v3138_v38, %v3137_v11 }
 0x29b   : > { %v4877_v57 = vpop.f32.mrf.mxu1  ;;  %v2801_v45 = vpack.c.bf16 %v2768_v62, %v2767_v13 }
 0x29c   : > { %v2574_v32 = vpop.f32.mrf.mxu0  ;;  %5145 = vmatmul.mubr.msk.bf16.gmra.mxu0 %vm355_vm2, %v3171_v46 }
 0x29d   : > { %v2210_v18 = vpop.f32.mrf.mxu1  ;;  %v6610_v48 = vadd.f32 %v2574_v32, %v2344_v9  ;;  %5063 = vmatmul.mubr.msk.bf16.gmra.mxu1 %vm355_vm2, %v2800_v55  ;;  %5148 = vmatprep.mubr.msk.bf16.mxu0 %vm5225_vm1, %v5224_v1  ;;  %v3139_v55 = vld [vmem:[%s5291_s29 + $0xbb] sm:$0xff]  ;;  %v2770_v32 = vld [vmem:[%s5291_s29 + $0xd2] sm:$0xff] }
 0x29e   : > { %v2346_v24 = vadd.f32 %v2210_v18, %v6192_v15  ;;  %v4962_v35 = vpop.f32.mrf.mxu0  ;;  %5066 = vmatprep.mubr.msk.bf16.mxu1 %vm5225_vm1, %v5224_v1 }
 0x29f   : > { %v4880_v30 = vpop.f32.mrf.mxu1 }
 0x2a0   : > { %v2577_v37 = vpop.f32.mrf.mxu0 }
 0x2a1   : > { %v2213_v9 = vpop.f32.mrf.mxu1  ;;  %v6622_v56 = vadd.f32 %v2577_v37, %v2345_v21  ;;  %v3140_v21 = vld [vmem:[%s5291_s29 + $0xc3] sm:$0xff] }
 0x2a2   : > { %v2347_v8 = vadd.f32 %v2213_v9, %v6202_v44  ;;  %v4963_v15 = vpop.f32.mrf.mxu0  ;;  %v2769_v44 = vld [vmem:[%s5291_s29 + $0xca] sm:$0xff]  ;;  %v3173_v38 = vpack.c.bf16 %v3140_v21, %v3139_v55 }
 0x2a3   : > { %v4881_v58 = vpop.f32.mrf.mxu1  ;;  %v2802_v13 = vpack.c.bf16 %v2770_v32, %v2769_v44  ;;  %v3141_v9 = vld [vmem:[%s5291_s29 + $0xcb] sm:$0xff] }
 0x2a4   : > { %v2582_v41 = vpop.f32.mrf.mxu0  ;;  %5149 = vmatmul.mubr.msk.bf16.gmra.mxu0 %vm355_vm2, %v3172_v2  ;;  %v2771_v58 = vld [vmem:[%s5291_s29 + $0xda] sm:$0xff] }
 0x2a5   : > { %v2218_v46 = vpop.f32.mrf.mxu1  ;;  %v6626_v60 = vadd.f32 %v2582_v41, %v2346_v24  ;;  %5067 = vmatmul.mubr.msk.bf16.gmra.mxu1 %vm355_vm2, %v2801_v45  ;;  %5152 = vmatprep.mubr.msk.bf16.mxu0 %vm5225_vm1, %v5224_v1  ;;  %v3142_v45 = vld [vmem:[%s5291_s29 + $0xd3] sm:$0xff]  ;;  %v2772_v41 = vld [vmem:[%s5291_s29 + $0xe2] sm:$0xff] }
 0x2a6   : > { %v2348_v47 = vadd.f32 %v2218_v46, %v6206_v43  ;;  %v4966_v57 = vpop.f32.mrf.mxu0  ;;  %5070 = vmatprep.mubr.msk.bf16.mxu1 %vm5225_vm1, %v5224_v1  ;;  %v3174_v21 = vpack.c.bf16 %v3142_v45, %v3141_v9  ;;  %v2803_v44 = vpack.c.bf16 %v2772_v41, %v2771_v58 }
 0x2a7   : > { %v4884_v18 = vpop.f32.mrf.mxu1 }
 0x2a8   : > { %v2585_v11 = vpop.f32.mrf.mxu0 }
 0x2a9   : > { %v2221_v24 = vpop.f32.mrf.mxu1  ;;  %v6638_v35 = vadd.f32 %v2585_v11, %v2347_v8 }
 0x2aa   : > { %v2349_v62 = vadd.f32 %v2221_v24, %v6216_v61  ;;  %v4967_v30 = vpop.f32.mrf.mxu0 }
 0x2ab   : > { %v4885_v37 = vpop.f32.mrf.mxu1 }
 0x2ac   : > { %v2590_v43 = vpop.f32.mrf.mxu0  ;;  %5153 = vmatmul.mubr.msk.bf16.gmra.mxu0 %vm355_vm2, %v3173_v38 }
 0x2ad   : > { %v2226_v61 = vpop.f32.mrf.mxu1  ;;  %v6667_v2 = vadd.f32 %v2590_v43, %v2348_v47  ;;  %5071 = vmatmul.mubr.msk.bf16.gmra.mxu1 %vm355_vm2, %v2802_v13  ;;  %5156 = vmatprep.mubr.msk.bf16.mxu0 %vm5225_vm1, %v5224_v1  ;;  %v3143_v13 = vld [vmem:[%s5291_s29 + $0xdb] sm:$0xff]  ;;  %v2774_v43 = vld [vmem:[%s5291_s29 + $0xf2] sm:$0xff] }
 0x2ae   : > { %v2350_v8 = vadd.f32 %v2226_v61, %v6220_v25  ;;  %v4970_v15 = vpop.f32.mrf.mxu0  ;;  %5074 = vmatprep.mubr.msk.bf16.mxu1 %vm5225_vm1, %v5224_v1 }
 0x2af   : > { %v4888_v46 = vpop.f32.mrf.mxu1 }
 0x2b0   : > { %v2593_v55 = vpop.f32.mrf.mxu0 }
 0x2b1   : > { %v2229_v47 = vpop.f32.mrf.mxu1  ;;  %v6679_v57 = vadd.f32 %v2593_v55, %v2349_v62  ;;  %v3144_v62 = vld [vmem:[%s5291_s29 + $0xe3] sm:$0xff] }
 0x2b2   : > { %v2351_v32 = vadd.f32 %v2229_v47, %v6230_v14  ;;  %v4971_v25 = vpop.f32.mrf.mxu0  ;;  %v2773_v14 = vld [vmem:[%s5291_s29 + $0xea] sm:$0xff]  ;;  %v3175_v45 = vpack.c.bf16 %v3144_v62, %v3143_v13 }
 0x2b3   : > { %v4889_v18 = vpop.f32.mrf.mxu1  ;;  %v2804_v58 = vpack.c.bf16 %v2774_v43, %v2773_v14 }
 0x2b4   : > { %v2598_v11 = vpop.f32.mrf.mxu0  ;;  %5157 = vmatmul.mubr.msk.bf16.gmra.mxu0 %vm355_vm2, %v3174_v21 }
 0x2b5   : > { %v2234_v38 = vpop.f32.mrf.mxu1  ;;  %v6683_v24 = vadd.f32 %v2598_v11, %v2350_v8  ;;  %5075 = vmatmul.mubr.msk.bf16.gmra.mxu1 %vm355_vm2, %v2803_v44  ;;  %5160 = vmatprep.mubr.msk.bf16.mxu0 %vm5225_vm1, %v5224_v1  ;;  %v3145_v44 = vld [vmem:[%s5291_s29 + $0xeb] sm:$0xff]  ;;  %v2776_v11 = vld [vmem:[%s5291_s29 + $0x102] sm:$0xff] }
 0x2b6   : > { %v2352_v30 = vadd.f32 %v2234_v38, %v6234_v23  ;;  %v4974_v37 = vpop.f32.mrf.mxu0  ;;  %5078 = vmatprep.mubr.msk.bf16.mxu1 %vm5225_vm1, %v5224_v1 }
 0x2b7   : > { %v4892_v61 = vpop.f32.mrf.mxu1 }
 0x2b8   : > { %v2601_v9 = vpop.f32.mrf.mxu0 }
 0x2b9   : > { %v2237_v8 = vpop.f32.mrf.mxu1  ;;  %v6695_v15 = vadd.f32 %v2601_v9, %v2351_v32  ;;  %v3146_v32 = vld [vmem:[%s5291_s29 + $0xf3] sm:$0xff] }
 0x2ba   : > { %v2353_v41 = vadd.f32 %v2237_v8, %v6244_v49  ;;  %v4975_v23 = vpop.f32.mrf.mxu0  ;;  %v2775_v49 = vld [vmem:[%s5291_s29 + $0xfa] sm:$0xff]  ;;  %v3176_v62 = vpack.c.bf16 %v3146_v32, %v3145_v44 }
 0x2bb   : > { %v4893_v46 = vpop.f32.mrf.mxu1  ;;  %v2805_v14 = vpack.c.bf16 %v2776_v11, %v2775_v49 }
 0x2bc   : > { %v2606_v55 = vpop.f32.mrf.mxu0  ;;  %5161 = vmatmul.mubr.msk.bf16.gmra.mxu0 %vm355_vm2, %v3175_v45 }
 0x2bd   : > { %v2242_v21 = vpop.f32.mrf.mxu1  ;;  %v6699_v47 = vadd.f32 %v2606_v55, %v2352_v30  ;;  %5079 = vmatmul.mubr.msk.bf16.gmra.mxu1 %vm355_vm2, %v2804_v58  ;;  %5164 = vmatprep.mubr.msk.bf16.mxu0 %vm5225_vm1, %v5224_v1  ;;  %v3147_v58 = vld [vmem:[%s5291_s29 + $0xfb] sm:$0xff]  ;;  %v2778_v55 = vld [vmem:[%s5291_s29 + $0x112] sm:$0xff] }
 0x2be   : > { %v2354_v25 = vadd.f32 %v2242_v21, %v6248_v0  ;;  %v4978_v18 = vpop.f32.mrf.mxu0  ;;  %5082 = vmatprep.mubr.msk.bf16.mxu1 %vm5225_vm1, %v5224_v1 }
 0x2bf   : > { %v4896_v38 = vpop.f32.mrf.mxu1 }
 0x2c0   : > { %v2609_v13 = vpop.f32.mrf.mxu0 }
 0x2c1   : > { %v2245_v30 = vpop.f32.mrf.mxu1  ;;  %v6711_v37 = vadd.f32 %v2609_v13, %v2353_v41  ;;  %v3148_v41 = vld [vmem:[%s5291_s29 + $0x103] sm:$0xff] }
 0x2c2   : > { %v2355_v43 = vadd.f32 %v2245_v30, %v6258_v33  ;;  %v4979_v0 = vpop.f32.mrf.mxu0  ;;  %v2777_v33 = vld [vmem:[%s5291_s29 + $0x10a] sm:$0xff]  ;;  %v3177_v32 = vpack.c.bf16 %v3148_v41, %v3147_v58 }
 0x2c3   : > { %v4897_v61 = vpop.f32.mrf.mxu1  ;;  %v2806_v49 = vpack.c.bf16 %v2778_v55, %v2777_v33 }
 0x2c4   : > { %v2614_v9 = vpop.f32.mrf.mxu0  ;;  %5165 = vmatmul.mubr.msk.bf16.gmra.mxu0 %vm355_vm2, %v3176_v62 }
 0x2c5   : > { %v2250_v45 = vpop.f32.mrf.mxu1  ;;  %v6715_v8 = vadd.f32 %v2614_v9, %v2354_v25  ;;  %5083 = vmatmul.mubr.msk.bf16.gmra.mxu1 %vm355_vm2, %v2805_v14  ;;  %5168 = vmatprep.mubr.msk.bf16.mxu0 %vm5225_vm1, %v5224_v1  ;;  %v3149_v14 = vld [vmem:[%s5291_s29 + $0x10b] sm:$0xff]  ;;  %v2780_v9 = vld [vmem:[%s5291_s29 + $0x122] sm:$0xff] }
 0x2c6   : > { %v2356_v23 = vadd.f32 %v2250_v45, %v6262_v10  ;;  %v4982_v46 = vpop.f32.mrf.mxu0  ;;  %5086 = vmatprep.mubr.msk.bf16.mxu1 %vm5225_vm1, %v5224_v1 }
 0x2c7   : > { %v4900_v21 = vpop.f32.mrf.mxu1 }
 0x2c8   : > { %v2617_v44 = vpop.f32.mrf.mxu0 }
 0x2c9   : > { %v2253_v25 = vpop.f32.mrf.mxu1  ;;  %v6727_v18 = vadd.f32 %v2617_v44, %v2355_v43  ;;  %v3150_v43 = vld [vmem:[%s5291_s29 + $0x113] sm:$0xff] }
 0x2ca   : > { %v2357_v11 = vadd.f32 %v2253_v25, %v6272_v34  ;;  %v4983_v10 = vpop.f32.mrf.mxu0  ;;  %v2779_v34 = vld [vmem:[%s5291_s29 + $0x11a] sm:$0xff]  ;;  %v3178_v41 = vpack.c.bf16 %v3150_v43, %v3149_v14 }
 0x2cb   : > { %v4901_v38 = vpop.f32.mrf.mxu1  ;;  %v2807_v33 = vpack.c.bf16 %v2780_v9, %v2779_v34 }
 0x2cc   : > { %v2622_v13 = vpop.f32.mrf.mxu0  ;;  %5169 = vmatmul.mubr.msk.bf16.gmra.mxu0 %vm355_vm2, %v3177_v32 }
 0x2cd   : > { %v2258_v62 = vpop.f32.mrf.mxu1  ;;  %v6731_v30 = vadd.f32 %v2622_v13, %v2356_v23  ;;  %5087 = vmatmul.mubr.msk.bf16.gmra.mxu1 %vm355_vm2, %v2806_v49  ;;  %5172 = vmatprep.mubr.msk.bf16.mxu0 %vm5225_vm1, %v5224_v1  ;;  %v3151_v49 = vld [vmem:[%s5291_s29 + $0x11b] sm:$0xff]  ;;  %v2782_v13 = vld [vmem:[%s5291_s29 + $0x132] sm:$0xff] }
 0x2ce   : > { %v2358_v0 = vadd.f32 %v2258_v62, %v6276_v36  ;;  %v4986_v61 = vpop.f32.mrf.mxu0  ;;  %5090 = vmatprep.mubr.msk.bf16.mxu1 %vm5225_vm1, %v5224_v1 }
 0x2cf   : > { %v4904_v45 = vpop.f32.mrf.mxu1 }
 0x2d0   : > { %v2625_v58 = vpop.f32.mrf.mxu0 }
 0x2d1   : > { %v2261_v23 = vpop.f32.mrf.mxu1  ;;  %v6743_v46 = vadd.f32 %v2625_v58, %v2357_v11  ;;  %v3152_v11 = vld [vmem:[%s5291_s29 + $0x123] sm:$0xff] }
 0x2d2   : > { %v2359_v55 = vadd.f32 %v2261_v23, %v6286_v5  ;;  %v4987_v36 = vpop.f32.mrf.mxu0  ;;  %v2781_v5 = vld [vmem:[%s5291_s29 + $0x12a] sm:$0xff]  ;;  %v3179_v43 = vpack.c.bf16 %v3152_v11, %v3151_v49 }
 0x2d3   : > { %v4905_v21 = vpop.f32.mrf.mxu1  ;;  %v2808_v34 = vpack.c.bf16 %v2782_v13, %v2781_v5 }
 0x2d4   : > { %v2630_v44 = vpop.f32.mrf.mxu0  ;;  %5173 = vmatmul.mubr.msk.bf16.gmra.mxu0 %vm355_vm2, %v3178_v41 }
 0x2d5   : > { %v2266_v32 = vpop.f32.mrf.mxu1  ;;  %v6747_v25 = vadd.f32 %v2630_v44, %v2358_v0  ;;  %5091 = vmatmul.mubr.msk.bf16.gmra.mxu1 %vm355_vm2, %v2807_v33  ;;  %5176 = vmatprep.mubr.msk.bf16.mxu0 %vm5225_vm1, %v5224_v1  ;;  %v3153_v33 = vld [vmem:[%s5291_s29 + $0x12b] sm:$0xff]  ;;  %v2784_v44 = vld [vmem:[%s5291_s29 + $0x142] sm:$0xff] }
 0x2d6   : > { %v2360_v10 = vadd.f32 %v2266_v32, %v6293_v29  ;;  %v4990_v38 = vpop.f32.mrf.mxu0  ;;  %5094 = vmatprep.mubr.msk.bf16.mxu1 %vm5225_vm1, %v5224_v1 }
 0x2d7   : > { %v4908_v62 = vpop.f32.mrf.mxu1 }
 0x2d8   : > { %v2633_v14 = vpop.f32.mrf.mxu0 }
 0x2d9   : > { %v2269_v0 = vpop.f32.mrf.mxu1  ;;  %v6759_v61 = vadd.f32 %v2633_v14, %v2359_v55  ;;  %v3154_v55 = vld [vmem:[%s5291_s29 + $0x133] sm:$0xff] }
 0x2da   : > { %v2361_v9 = vadd.f32 %v2269_v0, %v6306_v22  ;;  %v4991_v29 = vpop.f32.mrf.mxu0  ;;  %v2783_v22 = vld [vmem:[%s5291_s29 + $0x13a] sm:$0xff]  ;;  %v3180_v11 = vpack.c.bf16 %v3154_v55, %v3153_v33 }
 0x2db   : > { %v4909_v45 = vpop.f32.mrf.mxu1  ;;  %v2809_v5 = vpack.c.bf16 %v2784_v44, %v2783_v22 }
 0x2dc   : > { %v2638_v58 = vpop.f32.mrf.mxu0  ;;  %5177 = vmatmul.mubr.msk.bf16.gmra.mxu0 %vm355_vm2, %v3179_v43 }
 0x2dd   : > { %v2274_v41 = vpop.f32.mrf.mxu1  ;;  %v6763_v23 = vadd.f32 %v2638_v58, %v2360_v10  ;;  %5095 = vmatmul.mubr.msk.bf16.gmra.mxu1 %vm355_vm2, %v2808_v34  ;;  %5180 = vmatprep.mubr.msk.bf16.mxu0 %vm5225_vm1, %v5224_v1  ;;  %v3155_v34 = vld [vmem:[%s5291_s29 + $0x13b] sm:$0xff]  ;;  %v2786_v58 = vld [vmem:[%s5291_s29 + $0x152] sm:$0xff] }
 0x2de   : > { %v2362_v36 = vadd.f32 %v2274_v41, %v6317_v17  ;;  %v4994_v21 = vpop.f32.mrf.mxu0  ;;  %5098 = vmatprep.mubr.msk.bf16.mxu1 %vm5225_vm1, %v5224_v1 }
 0x2df   : > { %v4912_v32 = vpop.f32.mrf.mxu1 }
 0x2e0   : > { %v2641_v49 = vpop.f32.mrf.mxu0 }
 0x2e1   : > { %v2277_v10 = vpop.f32.mrf.mxu1  ;;  %v6775_v38 = vadd.f32 %v2641_v49, %v2361_v9  ;;  %v3156_v9 = vld [vmem:[%s5291_s29 + $0x143] sm:$0xff] }
 0x2e2   : > { %v2363_v13 = vadd.f32 %v2277_v10, %v6332_v26  ;;  %v4995_v17 = vpop.f32.mrf.mxu0  ;;  %v2785_v26 = vld [vmem:[%s5291_s29 + $0x14a] sm:$0xff]  ;;  %v3181_v55 = vpack.c.bf16 %v3156_v9, %v3155_v34 }
 0x2e3   : > { %v4913_v62 = vpop.f32.mrf.mxu1  ;;  %v2810_v22 = vpack.c.bf16 %v2786_v58, %v2785_v26 }
 0x2e4   : > { %v2646_v14 = vpop.f32.mrf.mxu0  ;;  %5181 = vmatmul.mubr.msk.bf16.gmra.mxu0 %vm355_vm2, %v3180_v11 }
 0x2e5   : > { %v2282_v43 = vpop.f32.mrf.mxu1  ;;  %v6779_v0 = vadd.f32 %v2646_v14, %v2362_v36  ;;  %5099 = vmatmul.mubr.msk.bf16.gmra.mxu1 %vm355_vm2, %v2809_v5  ;;  %5184 = vmatprep.mubr.msk.bf16.mxu0 %vm5225_vm1, %v5224_v1  ;;  %v3157_v5 = vld [vmem:[%s5291_s29 + $0x14b] sm:$0xff]  ;;  %v2788_v14 = vld [vmem:[%s5291_s29 + $0x162] sm:$0xff] }
 0x2e6   : > { %v2364_v29 = vadd.f32 %v2282_v43, %v6343_v50  ;;  %v4998_v45 = vpop.f32.mrf.mxu0  ;;  %5102 = vmatprep.mubr.msk.bf16.mxu1 %vm5225_vm1, %v5224_v1 }
 0x2e7   : > { %v4916_v41 = vpop.f32.mrf.mxu1 }
 0x2e8   : > { %v2649_v33 = vpop.f32.mrf.mxu0 }
 0x2e9   : > { %v2285_v36 = vpop.f32.mrf.mxu1  ;;  %v6791_v21 = vadd.f32 %v2649_v33, %v2363_v13  ;;  %v3158_v13 = vld [vmem:[%s5291_s29 + $0x153] sm:$0xff] }
 0x2ea   : > { %v2365_v44 = vadd.f32 %v2285_v36, %v6358_v12  ;;  %v4999_v50 = vpop.f32.mrf.mxu0  ;;  %v2787_v12 = vld [vmem:[%s5291_s29 + $0x15a] sm:$0xff]  ;;  %v3182_v9 = vpack.c.bf16 %v3158_v13, %v3157_v5 }
 0x2eb   : > { %v4917_v32 = vpop.f32.mrf.mxu1  ;;  %v2811_v26 = vpack.c.bf16 %v2788_v14, %v2787_v12 }
 0x2ec   : > { %v2654_v49 = vpop.f32.mrf.mxu0  ;;  %5185 = vmatmul.mubr.msk.bf16.gmra.mxu0 %vm355_vm2, %v3181_v55 }
 0x2ed   : > { %v2290_v11 = vpop.f32.mrf.mxu1  ;;  %v6795_v10 = vadd.f32 %v2654_v49, %v2364_v29  ;;  %5103 = vmatmul.mubr.msk.bf16.gmra.mxu1 %vm355_vm2, %v2810_v22  ;;  %5188 = vmatprep.mubr.msk.bf16.mxu0 %vm5225_vm1, %v5224_v1  ;;  %v3159_v22 = vld [vmem:[%s5291_s29 + $0x15b] sm:$0xff] }
 0x2ee   : > { %v2366_v17 = vadd.f32 %v2290_v11, %v6369_v63  ;;  %v5002_v62 = vpop.f32.mrf.mxu0  ;;  %5106 = vmatprep.mubr.msk.bf16.mxu1 %vm5225_vm1, %v5224_v1 }
 0x2ef   : > { %v4920_v43 = vpop.f32.mrf.mxu1 }
 0x2f0   : > { %v2657_v34 = vpop.f32.mrf.mxu0 }
 0x2f1   : > { %v2293_v29 = vpop.f32.mrf.mxu1  ;;  %v6807_v45 = vadd.f32 %v2657_v34, %v2365_v44  ;;  %v3160_v44 = vld [vmem:[%s5291_s29 + $0x163] sm:$0xff] }
 0x2f2   : > { %v2367_v58 = vadd.f32 %v2293_v29, %v6385_v28  ;;  %v5003_v41 = vpop.f32.mrf.mxu0  ;;  %v2789_v28 = vld [vmem:[%s5291_s29 + $0x16a] sm:$0xf]  ;;  %v3183_v5 = vpack.c.bf16 %v3160_v44, %v3159_v22 }
 0x2f3   : > { %v4921_v63 = vpop.f32.mrf.mxu1  ;;  %v2812_v62 = vpack.c.bf16 %v2789_v28, %v2789_v28  ;;  %v3161_v29 = vld [vmem:[%s5291_s29 + $0x16b] sm:$0xf] }
 0x2f4   : > { %v2662_v33 = vpop.f32.mrf.mxu0  ;;  %5189 = vmatmul.mubr.msk.bf16.gmra.mxu0 %vm355_vm2, %v3182_v9 }
 0x2f5   : > { %v2298_v55 = vpop.f32.mrf.mxu1  ;;  %v6811_v36 = vadd.f32 %v2662_v33, %v2366_v17  ;;  %5107 = vmatmul.mubr.msk.bf16.gmra.mxu1 %vm355_vm2, %v2811_v26  ;;  %5192 = vmatprep.mubr.msk.bf16.mxu0 %vm5225_vm1, %v5224_v1 }
 0x2f6   : > { %v2368_v50 = vadd.f32 %v2298_v55, %v6395_v59  ;;  %v5006_v32 = vpop.f32.mrf.mxu0  ;;  %5110 = vmatprep.mubr.msk.bf16.mxu1 %vm5225_vm1, %v5224_v1 }
 0x2f7   : > { %v4924_v49 = vpop.f32.mrf.mxu1 }
 0x2f8   : > { %v2665_v11 = vpop.f32.mrf.mxu0 }
 0x2f9   : > { %v2301_v13 = vpop.f32.mrf.mxu1  ;;  %v6822_v17 = vadd.f32 %v2665_v11, %v2367_v58 }
 0x2fa   : > { %v2369_v12 = vadd.f32 %v2301_v13, %v6412_v53  ;;  %v5007_v14 = vpop.f32.mrf.mxu0  ;;  %v3184_v53 = vpack.c.bf16 %v3161_v29, %v3161_v29 }
 0x2fb   : > { %v4925_v43 = vpop.f32.mrf.mxu1 }
 0x2fc   : > { %v2670_v34 = vpop.f32.mrf.mxu0  ;;  %5193 = vmatmul.mubr.msk.bf16.gmra.mxu0 %vm355_vm2, %v3183_v5 }
 0x2fd   : > { %v2306_v59 = vpop.f32.mrf.mxu1  ;;  %v6826_v9 = vadd.f32 %v2670_v34, %v2368_v50  ;;  %5111 = vmatmul.mubr.msk.bf16.gmra.mxu1 %vm355_vm2, %v2812_v62  ;;  %5196 = vmatprep.mubr.msk.bf16.mxu0 %vm5225_vm1, %v5224_v1 }
 0x2fe   : > { %v2370_v26 = vadd.f32 %v2306_v59, %v6423_v20  ;;  %v5010_v58 = vpop.f32.mrf.mxu0 }
 0x2ff   : > { %v4928_v41 = vpop.f32.mrf.mxu1 }
 0x300   : > { %v2673_v63 = vpop.f32.mrf.mxu0 }
 0x301   : > { %v2309_v33 = vpop.f32.mrf.mxu1  ;;  %v6833_v55 = vadd.f32 %v2673_v63, %v2369_v12 }
 0x302   : > { %v2371_v22 = vadd.f32 %v2309_v33, %v6440_v42  ;;  %v5011_v44 = vpop.f32.mrf.mxu0 }
 0x303   : > { %v4929_v50 = vpop.f32.mrf.mxu1 }
 0x304   : > { %v2678_v32 = vpop.f32.mrf.mxu0  ;;  %5197 = vmatmul.mubr.msk.bf16.gmra.mxu0 %vm355_vm2, %v3184_v53 }
 0x305   : > { %v2314_v28 = vpop.f32.mrf.mxu1  ;;  %v6837_v49 = vadd.f32 %v2678_v32, %v2370_v26 }
 0x306   : > { %v2372_v1 = vadd.f32 %v2314_v28, %v6451_v54  ;;  %v5014_v20 = vpop.f32.mrf.mxu0 }
 0x307   : > { %v4932_v11 = vpop.f32.mrf.mxu1 }
 0x308   : > { %v2681_v5 = vpop.f32.mrf.mxu0 }
 0x309   : > { %v2317_v13 = vpop.f32.mrf.mxu1  ;;  %v6840_v62 = vadd.f32 %v2681_v5, %v2371_v22 }
 0x30a   : > { %v2373_v12 = vadd.f32 %v2317_v13, %v6468_v27  ;;  %v5015_v14 = vpop.f32.mrf.mxu0 }
 0x30b   : > { %v4933_v42 = vpop.f32.mrf.mxu1 }
 0x30c   : > { %v2686_v43 = vpop.f32.mrf.mxu0 }
 0x30d   : > { %v2322_v34 = vpop.f32.mrf.mxu1  ;;  %v6843_v59 = vadd.f32 %v2686_v43, %v2372_v1 }
 0x30e   : > { %v2374_v29 = vadd.f32 %v2322_v34, %v6479_v4  ;;  %v5018_v26 = vpop.f32.mrf.mxu0 }
 0x30f   : > { %v4936_v58 = vpop.f32.mrf.mxu1 }
 0x310   : > { %v2689_v41 = vpop.f32.mrf.mxu0 }
 0x311   : > { %v2325_v54 = vpop.f32.mrf.mxu1  ;;  %v6846_v63 = vadd.f32 %v2689_v41, %v2373_v12 }
 0x312   : > { %v2375_v53 = vadd.f32 %v2325_v54, %v6496_v39  ;;  %v5019_v33 = vpop.f32.mrf.mxu0  ;;  %v6860_v54 = vld [vmem:[%s7076_s3] ss:$0 sm:$0xff] }
 0x313   : > { %v4937_v22 = vpop.f32.mrf.mxu1 }
 0x314   : > { %v2694_v44 = vpop.f32.mrf.mxu0 }
 0x315   : > { %v2330_v27 = vpop.f32.mrf.mxu1  ;;  %v6849_v50 = vadd.f32 %v2694_v44, %v2374_v29  ;;  %v6865_v44 = vld [vmem:[%s7077_s4] ss:$0 sm:$0xff] }
 0x316   : > { %v2376_v32 = vadd.f32 %v2330_v27, %v6506_v16  ;;  %v5022_v28 = vpop.f32.mrf.mxu0 }
 0x317   : > { %v4940_v1 = vpop.f32.mrf.mxu1 }
 0x318   : > { %v2697_v20 = vpop.f32.mrf.mxu0  ;;  %v3674_v1 = vpop.permute.xlu0 %3673 }
 0x319   : > { %v2333_v4 = vpop.f32.mrf.mxu1  ;;  %v6852_v11 = vadd.f32 %v2697_v20, %v2375_v53 }
 0x31a   : > { %v5023_v5 = vpop.f32.mrf.mxu0 }
 0x31b   : > { %v4941_v13 = vpop.f32.mrf.mxu1 }
 0x31c   : > { %v2702_v12 = vpop.f32.mrf.mxu0 }
 0x31d   : > { %v6854_v14 = vadd.f32 %v2702_v12, %v2376_v32  ;;  %v2914_v39 = vpop.f32.mrf.mxu1 }
 0x31e   : > { %v5026_v42 = vpop.f32.mrf.mxu0  ;;  %v3080_v58 = vadd.f32 %v2914_v39, %v6532_v19 }
 0x31f   : > { %v5032_v43 = vpop.f32.mrf.mxu1 }
 0x320   : > { %v2705_v34 = vpop.f32.mrf.mxu0 }
 0x321   : > { %v2917_v26 = vpop.f32.mrf.mxu1 }
 0x322   : > { %v5027_v29 = vpop.f32.mrf.mxu0  ;;  %v3081_v27 = vadd.f32 %v2917_v26, %v6549_v7 }
 0x323   : > { %v5033_v16 = vpop.f32.mrf.mxu1 }
 0x324   : > { %v3286_v41 = vpop.f32.mrf.mxu0 }
 0x325   : > { %v2922_v53 = vpop.f32.mrf.mxu1  ;;  %v3452_v33 = vadd.f32 %v3286_v41, %v3080_v58  ;;  %v3679_v41 = vpop.permute.xlu0 %3678 }
 0x326   : > { %v5118_v22 = vpop.f32.mrf.mxu0  ;;  %v3082_v12 = vadd.f32 %v2922_v53, %v6559_v3 }
 0x327   : > { %v3500_v32 = vmul.f32 %v6860_v54, %v3452_v33  ;;  %v5036_v19 = vpop.f32.mrf.mxu1 }
 0x328   : > { %v3289_v28 = vpop.f32.mrf.mxu0 }
 0x329   : > { %v2925_v20 = vpop.f32.mrf.mxu1  ;;  %v3453_v4 = vadd.f32 %v3289_v28, %v3081_v27  ;;  %v3548_v5 = vadd.f32 %v6865_v44, %v3500_v32  ;;  %v3684_v32 = vpop.permute.xlu1 %3683 }
 0x32a   : > { %v5119_v13 = vpop.f32.mrf.mxu0  ;;  %v3083_v33 = vadd.f32 %v2925_v20, %v6574_v51 }
 0x32b   : > { %v3501_v39 = vmul.f32 %v6860_v54, %v3453_v4  ;;  %v5037_v42 = vpop.f32.mrf.mxu1  ;;  %v3589_v43 = vmax.f32 %v3548_v5, 0.0 }
 0x32c   : > { %v3294_v34 = vpop.f32.mrf.mxu0 }
 0x32d   : > { %v3876_v29 = vmul.f32 %v3674_v1, %v3589_v43  ;;  %v2930_v7 = vpop.f32.mrf.mxu1  ;;  %v3454_v26 = vadd.f32 %v3294_v34, %v3082_v12  ;;  %v3549_v58 = vadd.f32 %v6865_v44, %v3501_v39 }
 0x32e   : > { %v5122_v16 = vpop.f32.mrf.mxu0  ;;  %v3084_v13 = vadd.f32 %v2930_v7, %v6578_v31 }
 0x32f   : > { %3920 = vst.msk [vmem:[%s6646_s17 + $0x18] sm:$0xff] %vm355_vm2, %v3876_v29  ;;  %v3502_v22 = vmul.f32 %v6860_v54, %v3454_v26  ;;  %v5040_v3 = vpop.f32.mrf.mxu1  ;;  %v3590_v53 = vmax.f32 %v3549_v58, 0.0  ;;  %v3689_v58 = vpop.permute.xlu1 %3688 }
 0x330   : > { %v3297_v27 = vpop.f32.mrf.mxu0 }
 0x331   : > { %v3877_v19 = vmul.f32 %v3679_v41, %v3590_v53  ;;  %v2933_v28 = vpop.f32.mrf.mxu1  ;;  %v3455_v1 = vadd.f32 %v3297_v27, %v3083_v33  ;;  %v3550_v4 = vadd.f32 %v6865_v44, %v3502_v22 }
 0x332   : > { %v5123_v5 = vpop.f32.mrf.mxu0  ;;  %v3085_v16 = vadd.f32 %v2933_v28, %v6590_v52 }
 0x333   : > { %3921 = vst.msk [vmem:[%s6646_s17 + $0x20] sm:$0xff] %vm355_vm2, %v3877_v19  ;;  %v3503_v51 = vmul.f32 %v6860_v54, %v3455_v1  ;;  %v5041_v20 = vpop.f32.mrf.mxu1  ;;  %v3591_v12 = vmax.f32 %v3550_v4, 0.0  ;;  %v3694_v4 = vpop.permute.xlu0 %3693 }
 0x334   : > { %v3302_v39 = vpop.f32.mrf.mxu0 }
 0x335   : > { %v3878_v42 = vmul.f32 %v3684_v32, %v3591_v12  ;;  %v2938_v43 = vpop.f32.mrf.mxu1  ;;  %v3456_v34 = vadd.f32 %v3302_v39, %v3084_v13  ;;  %v3551_v29 = vadd.f32 %v6865_v44, %v3503_v51 }
 0x336   : > { %v5126_v26 = vpop.f32.mrf.mxu0  ;;  %v3086_v19 = vadd.f32 %v2938_v43, %v6594_v40 }
 0x337   : > { %3922 = vst.msk [vmem:[%s6646_s17 + $0x28] sm:$0xff] %vm355_vm2, %v3878_v42  ;;  %v3504_v31 = vmul.f32 %v6860_v54, %v3456_v34  ;;  %v5044_v7 = vpop.f32.mrf.mxu1  ;;  %v3592_v41 = vmax.f32 %v3551_v29, 0.0  ;;  %v3699_v29 = vpop.permute.xlu1 %3698 }
 0x338   : > { %v3305_v33 = vpop.f32.mrf.mxu0 }
 0x339   : > { %v3552_v22 = vadd.f32 %v6865_v44, %v3504_v31  ;;  %v3879_v3 = vmul.f32 %v3689_v58, %v3592_v41  ;;  %v2941_v53 = vpop.f32.mrf.mxu1  ;;  %v3457_v27 = vadd.f32 %v3305_v33, %v3085_v16 }
 0x33a   : > { %v5127_v32 = vpop.f32.mrf.mxu0  ;;  %v3087_v42 = vadd.f32 %v2941_v53, %v6606_v6  ;;  %v3704_v53 = vpop.permute.xlu0 %3703 }
 0x33b   : > { %v3593_v1 = vmax.f32 %v3552_v22, 0.0  ;;  %3923 = vst.msk [vmem:[%s6646_s17 + $0x30] sm:$0xff] %vm355_vm2, %v3879_v3  ;;  %v3505_v52 = vmul.f32 %v6860_v54, %v3457_v27  ;;  %v5045_v28 = vpop.f32.mrf.mxu1 }
 0x33c   : > { %v3310_v5 = vpop.f32.mrf.mxu0 }
 0x33d   : > { %v3880_v13 = vmul.f32 %v3694_v4, %v3593_v1  ;;  %v3553_v51 = vadd.f32 %v6865_v44, %v3505_v52  ;;  %v2946_v20 = vpop.f32.mrf.mxu1  ;;  %v3458_v12 = vadd.f32 %v3310_v5, %v3086_v19 }
 0x33e   : > { %v5130_v39 = vpop.f32.mrf.mxu0  ;;  %v3088_v33 = vadd.f32 %v2946_v20, %v6610_v48 }
 0x33f   : > { %3924 = vst.msk [vmem:[%s6646_s17 + $0x38] sm:$0xff] %vm355_vm2, %v3880_v13  ;;  %v3594_v40 = vmax.f32 %v3553_v51, 0.0  ;;  %v3506_v43 = vmul.f32 %v6860_v54, %v3458_v12  ;;  %v5048_v34 = vpop.f32.mrf.mxu1  ;;  %v3709_v51 = vpop.permute.xlu1 %3708 }
 0x340   : > { %v3313_v26 = vpop.f32.mrf.mxu0 }
 0x341   : > { %v3881_v58 = vmul.f32 %v3699_v29, %v3594_v40  ;;  %v3554_v16 = vadd.f32 %v6865_v44, %v3506_v43  ;;  %v2949_v31 = vpop.f32.mrf.mxu1  ;;  %v3459_v7 = vadd.f32 %v3313_v26, %v3087_v42 }
 0x342   : > { %v5131_v41 = vpop.f32.mrf.mxu0  ;;  %v3089_v4 = vadd.f32 %v2949_v31, %v6622_v56 }
 0x343   : > { %3925 = vst.msk [vmem:[%s6646_s17 + $0x40] sm:$0xff] %vm355_vm2, %v3881_v58  ;;  %v3595_v22 = vmax.f32 %v3554_v16, 0.0  ;;  %v3507_v6 = vmul.f32 %v6860_v54, %v3459_v7  ;;  %v5049_v3 = vpop.f32.mrf.mxu1  ;;  %v3714_v58 = vpop.permute.xlu0 %3713 }
 0x344   : > { %v3318_v27 = vpop.f32.mrf.mxu0 }
 0x345   : > { %v3882_v32 = vmul.f32 %v3704_v53, %v3595_v22  ;;  %v3555_v19 = vadd.f32 %v6865_v44, %v3507_v6  ;;  %v2954_v1 = vpop.f32.mrf.mxu1  ;;  %v3460_v52 = vadd.f32 %v3318_v27, %v3088_v33  ;;  %v3719_v27 = vpop.permute.xlu1 %3718 }
 0x346   : > { %v5134_v28 = vpop.f32.mrf.mxu0  ;;  %v3090_v34 = vadd.f32 %v2954_v1, %v6626_v60 }
 0x347   : > { %3926 = vst.msk [vmem:[%s6646_s17 + $0x48] sm:$0xff] %vm355_vm2, %v3882_v32  ;;  %v3596_v5 = vmax.f32 %v3555_v19, 0.0  ;;  %v3508_v48 = vmul.f32 %v6860_v54, %v3460_v52  ;;  %v5052_v13 = vpop.f32.mrf.mxu1 }
 0x348   : > { %v3321_v20 = vpop.f32.mrf.mxu0 }
 0x349   : > { %v3883_v12 = vmul.f32 %v3709_v51, %v3596_v5  ;;  %v3556_v39 = vadd.f32 %v6865_v44, %v3508_v48  ;;  %v2957_v42 = vpop.f32.mrf.mxu1  ;;  %v3461_v40 = vadd.f32 %v3321_v20, %v3089_v4  ;;  %v3724_v51 = vpop.permute.xlu0 %3723 }
 0x34a   : > { %v5135_v43 = vpop.f32.mrf.mxu0  ;;  %v3091_v6 = vadd.f32 %v2957_v42, %v6638_v35 }
 0x34b   : > { %3927 = vst.msk [vmem:[%s6646_s17 + $0x50] sm:$0xff] %vm355_vm2, %v3883_v12  ;;  %v3597_v29 = vmax.f32 %v3556_v39, 0.0  ;;  %v3509_v56 = vmul.f32 %v6860_v54, %v3461_v40  ;;  %v5053_v26 = vpop.f32.mrf.mxu1 }
 0x34c   : > { %v3326_v16 = vpop.f32.mrf.mxu0  ;;  %v3729_v26 = vpop.permute.xlu1 %3728 }
 0x34d   : > { %v3884_v31 = vmul.f32 %v3714_v58, %v3597_v29  ;;  %v3557_v7 = vadd.f32 %v6865_v44, %v3509_v56  ;;  %v2962_v41 = vpop.f32.mrf.mxu1  ;;  %v3462_v33 = vadd.f32 %v3326_v16, %v3090_v34 }
 0x34e   : > { %v5138_v22 = vpop.f32.mrf.mxu0  ;;  %v3092_v5 = vadd.f32 %v2962_v41, %v6667_v2 }
 0x34f   : > { %3928 = vst.msk [vmem:[%s6646_s17 + $0x58] sm:$0xff] %vm355_vm2, %v3884_v31  ;;  %v3598_v3 = vmax.f32 %v3557_v7, 0.0  ;;  %v3510_v60 = vmul.f32 %v6860_v54, %v3462_v33  ;;  %v5056_v53 = vpop.f32.mrf.mxu1 }
 0x350   : > { %v3329_v32 = vpop.f32.mrf.mxu0 }
 0x351   : > { %v3885_v19 = vmul.f32 %v3719_v27, %v3598_v3  ;;  %v3558_v1 = vadd.f32 %v6865_v44, %v3510_v60  ;;  %v2965_v52 = vpop.f32.mrf.mxu1  ;;  %v3463_v28 = vadd.f32 %v3329_v32, %v3091_v6  ;;  %v3734_v60 = vpop.permute.xlu0 %3733 }
 0x352   : > { %v5139_v4 = vpop.f32.mrf.mxu0  ;;  %v3093_v34 = vadd.f32 %v2965_v52, %v6679_v57 }
 0x353   : > { %3929 = vst.msk [vmem:[%s6646_s17 + $0x60] sm:$0xff] %vm355_vm2, %v3885_v19  ;;  %v3599_v48 = vmax.f32 %v3558_v1, 0.0  ;;  %v3511_v35 = vmul.f32 %v6860_v54, %v3463_v28  ;;  %v5057_v13 = vpop.f32.mrf.mxu1 }
 0x354   : > { %v3334_v20 = vpop.f32.mrf.mxu0 }
 0x355   : > { %v3886_v12 = vmul.f32 %v3724_v51, %v3599_v48  ;;  %v3559_v39 = vadd.f32 %v6865_v44, %v3511_v35  ;;  %v2970_v42 = vpop.f32.mrf.mxu1  ;;  %v3464_v40 = vadd.f32 %v3334_v20, %v3092_v5  ;;  %v3739_v48 = vpop.permute.xlu1 %3738 }
 0x356   : > { %v5142_v43 = vpop.f32.mrf.mxu0  ;;  %v3094_v22 = vadd.f32 %v2970_v42, %v6683_v24 }
 0x357   : > { %3930 = vst.msk [vmem:[%s6646_s17 + $0x68] sm:$0xff] %vm355_vm2, %v3886_v12  ;;  %v3600_v29 = vmax.f32 %v3559_v39, 0.0  ;;  %v3512_v2 = vmul.f32 %v6860_v54, %v3464_v40  ;;  %v5060_v56 = vpop.f32.mrf.mxu1 }
 0x358   : > { %v3337_v58 = vpop.f32.mrf.mxu0 }
 0x359   : > { %v3887_v16 = vmul.f32 %v3729_v26, %v3600_v29  ;;  %v3560_v31 = vadd.f32 %v6865_v44, %v3512_v2  ;;  %v2973_v7 = vpop.f32.mrf.mxu1  ;;  %v3465_v41 = vadd.f32 %v3337_v58, %v3093_v34  ;;  %v3744_v34 = vpop.permute.xlu0 %3743 }
 0x35a   : > { %v5143_v33 = vpop.f32.mrf.mxu0  ;;  %v3095_v28 = vadd.f32 %v2973_v7, %v6695_v15 }
 0x35b   : > { %3931 = vst.msk [vmem:[%s6646_s17 + $0x70] sm:$0xff] %vm355_vm2, %v3887_v16  ;;  %v3601_v6 = vmax.f32 %v3560_v31, 0.0  ;;  %v3513_v57 = vmul.f32 %v6860_v54, %v3465_v41  ;;  %v5061_v3 = vpop.f32.mrf.mxu1  ;;  %v3749_v33 = vpop.permute.xlu1 %3748 }
 0x35c   : > { %v3342_v53 = vpop.f32.mrf.mxu0 }
 0x35d   : > { %v3888_v27 = vmul.f32 %v3734_v60, %v3601_v6  ;;  %v3561_v32 = vadd.f32 %v6865_v44, %v3513_v57  ;;  %v2978_v19 = vpop.f32.mrf.mxu1  ;;  %v3466_v1 = vadd.f32 %v3342_v53, %v3094_v22 }
 0x35e   : > { %v5146_v52 = vpop.f32.mrf.mxu0  ;;  %v3096_v42 = vadd.f32 %v2978_v19, %v6699_v47 }
 0x35f   : > { %3932 = vst.msk [vmem:[%s6646_s17 + $0x78] sm:$0xff] %vm355_vm2, %v3888_v27  ;;  %v3602_v4 = vmax.f32 %v3561_v32, 0.0  ;;  %v3514_v24 = vmul.f32 %v6860_v54, %v3466_v1  ;;  %v5064_v5 = vpop.f32.mrf.mxu1  ;;  %v3754_v1 = vpop.permute.xlu0 %3753 }
 0x360   : > { %v3345_v35 = vpop.f32.mrf.mxu0 }
 0x361   : > { %v3889_v13 = vmul.f32 %v3739_v48, %v3602_v4  ;;  %v3562_v51 = vadd.f32 %v6865_v44, %v3514_v24  ;;  %v2981_v20 = vpop.f32.mrf.mxu1  ;;  %v3467_v12 = vadd.f32 %v3345_v35, %v3095_v28 }
 0x362   : > { %v5147_v39 = vpop.f32.mrf.mxu0  ;;  %v3097_v31 = vadd.f32 %v2981_v20, %v6711_v37  ;;  %v3759_v20 = vpop.permute.xlu1 %3758 }
 0x363   : > { %3933 = vst.msk [vmem:[%s6646_s17 + $0x80] sm:$0xff] %vm355_vm2, %v3889_v13  ;;  %v3603_v40 = vmax.f32 %v3562_v51, 0.0  ;;  %v3515_v15 = vmul.f32 %v6860_v54, %v3467_v12  ;;  %v5065_v43 = vpop.f32.mrf.mxu1 }
 0x364   : > { %v3350_v29 = vpop.f32.mrf.mxu0 }
 0x365   : > { %v3890_v2 = vmul.f32 %v3744_v34, %v3603_v40  ;;  %v3563_v56 = vadd.f32 %v6865_v44, %v3515_v15  ;;  %v2986_v26 = vpop.f32.mrf.mxu1  ;;  %v3468_v58 = vadd.f32 %v3350_v29, %v3096_v42 }
 0x366   : > { %v5150_v16 = vpop.f32.mrf.mxu0  ;;  %v3098_v27 = vadd.f32 %v2986_v26, %v6715_v8 }
 0x367   : > { %3934 = vst.msk [vmem:[%s6646_s17 + $0x88] sm:$0xff] %vm355_vm2, %v3890_v2  ;;  %v3604_v7 = vmax.f32 %v3563_v56, 0.0  ;;  %v3516_v47 = vmul.f32 %v6860_v54, %v3468_v58  ;;  %v5068_v41 = vpop.f32.mrf.mxu1  ;;  %v3764_v56 = vpop.permute.xlu0 %3763 }
 0x368   : > { %v3353_v22 = vpop.f32.mrf.mxu0 }
 0x369   : > { %v3891_v6 = vmul.f32 %v3749_v33, %v3604_v7  ;;  %v3564_v57 = vadd.f32 %v6865_v44, %v3516_v47  ;;  %v2989_v3 = vpop.f32.mrf.mxu1  ;;  %v3469_v60 = vadd.f32 %v3353_v22, %v3097_v31 }
 0x36a   : > { %v5151_v53 = vpop.f32.mrf.mxu0  ;;  %v3099_v35 = vadd.f32 %v2989_v3, %v6727_v18 }
 0x36b   : > { %3935 = vst.msk [vmem:[%s6646_s17 + $0x90] sm:$0xff] %vm355_vm2, %v3891_v6  ;;  %v3605_v32 = vmax.f32 %v3564_v57, 0.0  ;;  %v3517_v37 = vmul.f32 %v6860_v54, %v3469_v60  ;;  %v5069_v19 = vpop.f32.mrf.mxu1  ;;  %v3769_v6 = vpop.permute.xlu1 %3768 }
 0x36c   : > { %v3358_v52 = vpop.f32.mrf.mxu0 }
 0x36d   : > { %v3892_v28 = vmul.f32 %v3754_v1, %v3605_v32  ;;  %v3565_v4 = vadd.f32 %v6865_v44, %v3517_v37  ;;  %v2994_v24 = vpop.f32.mrf.mxu1  ;;  %v3470_v5 = vadd.f32 %v3358_v52, %v3098_v27  ;;  %v3774_v52 = vpop.permute.xlu0 %3773 }
 0x36e   : > { %v5154_v48 = vpop.f32.mrf.mxu0  ;;  %v3100_v34 = vadd.f32 %v2994_v24, %v6731_v30 }
 0x36f   : > { %3936 = vst.msk [vmem:[%s6646_s17 + $0x98] sm:$0xff] %vm355_vm2, %v3892_v28  ;;  %v3606_v13 = vmax.f32 %v3565_v4, 0.0  ;;  %v3518_v8 = vmul.f32 %v6860_v54, %v3470_v5  ;;  %v5072_v51 = vpop.f32.mrf.mxu1 }
 0x370   : > { %v3361_v12 = vpop.f32.mrf.mxu0 }
 0x371   : > { %v3893_v39 = vmul.f32 %v3759_v20, %v3606_v13  ;;  %v3566_v42 = vadd.f32 %v6865_v44, %v3518_v8  ;;  %v2997_v40 = vpop.f32.mrf.mxu1  ;;  %v3471_v15 = vadd.f32 %v3361_v12, %v3099_v35  ;;  %v3779_v20 = vpop.permute.xlu1 %3778 }
 0x372   : > { %v5155_v43 = vpop.f32.mrf.mxu0  ;;  %v3101_v41 = vadd.f32 %v2997_v40, %v6743_v46 }
 0x373   : > { %3937 = vst.msk [vmem:[%s6646_s17 + $0xa0] sm:$0xff] %vm355_vm2, %v3893_v39  ;;  %v3607_v29 = vmax.f32 %v3566_v42, 0.0  ;;  %v3519_v18 = vmul.f32 %v6860_v54, %v3471_v15  ;;  %v5073_v2 = vpop.f32.mrf.mxu1 }
 0x374   : > { %v3366_v26 = vpop.f32.mrf.mxu0  ;;  %v3784_v2 = vpop.permute.xlu0 %3783 }
 0x375   : > { %v3894_v58 = vmul.f32 %v3764_v56, %v3607_v29  ;;  %v3567_v16 = vadd.f32 %v6865_v44, %v3519_v18  ;;  %v3002_v31 = vpop.f32.mrf.mxu1  ;;  %v3472_v7 = vadd.f32 %v3366_v26, %v3100_v34 }
 0x376   : > { %v5158_v47 = vpop.f32.mrf.mxu0  ;;  %v3102_v37 = vadd.f32 %v3002_v31, %v6747_v25 }
 0x377   : > { %3938 = vst.msk [vmem:[%s6646_s17 + $0xa8] sm:$0xff] %vm355_vm2, %v3894_v58  ;;  %v3608_v33 = vmax.f32 %v3567_v16, 0.0  ;;  %v3520_v30 = vmul.f32 %v6860_v54, %v3472_v7  ;;  %v5076_v22 = vpop.f32.mrf.mxu1 }
 0x378   : > { %v3369_v57 = vpop.f32.mrf.mxu0 }
 0x379   : > { %v3895_v3 = vmul.f32 %v3769_v6, %v3608_v33  ;;  %v3568_v60 = vadd.f32 %v6865_v44, %v3520_v30  ;;  %v3005_v53 = vpop.f32.mrf.mxu1  ;;  %v3473_v27 = vadd.f32 %v3369_v57, %v3101_v41  ;;  %v3789_v30 = vpop.permute.xlu1 %3788 }
 0x37a   : > { %v5159_v32 = vpop.f32.mrf.mxu0  ;;  %v3103_v13 = vadd.f32 %v3005_v53, %v6759_v61 }
 0x37b   : > { %3939 = vst.msk [vmem:[%s6646_s17 + $0xb0] sm:$0xff] %vm355_vm2, %v3895_v3  ;;  %v3609_v19 = vmax.f32 %v3568_v60, 0.0  ;;  %v3521_v46 = vmul.f32 %v6860_v54, %v3473_v27  ;;  %v5077_v1 = vpop.f32.mrf.mxu1 }
 0x37c   : > { %v3374_v28 = vpop.f32.mrf.mxu0 }
 0x37d   : > { %v3896_v4 = vmul.f32 %v3774_v52, %v3609_v19  ;;  %v3569_v24 = vadd.f32 %v6865_v44, %v3521_v46  ;;  %v3010_v5 = vpop.f32.mrf.mxu1  ;;  %v3474_v48 = vadd.f32 %v3374_v28, %v3102_v37  ;;  %v3794_v19 = vpop.permute.xlu0 %3793 }
 0x37e   : > { %v5162_v35 = vpop.f32.mrf.mxu0  ;;  %v3104_v34 = vadd.f32 %v3010_v5, %v6763_v23 }
 0x37f   : > { %3940 = vst.msk [vmem:[%s6646_s17 + $0xb8] sm:$0xff] %vm355_vm2, %v3896_v4  ;;  %v3610_v8 = vmax.f32 %v3569_v24, 0.0  ;;  %v3522_v25 = vmul.f32 %v6860_v54, %v3474_v48  ;;  %v5080_v51 = vpop.f32.mrf.mxu1 }
 0x380   : > { %v3377_v12 = vpop.f32.mrf.mxu0 }
 0x381   : > { %v3897_v39 = vmul.f32 %v3779_v20, %v3610_v8  ;;  %v3570_v42 = vadd.f32 %v6865_v44, %v3522_v25  ;;  %v3013_v40 = vpop.f32.mrf.mxu1  ;;  %v3475_v15 = vadd.f32 %v3377_v12, %v3103_v13  ;;  %v3799_v13 = vpop.permute.xlu1 %3798 }
 0x382   : > { %v5163_v43 = vpop.f32.mrf.mxu0  ;;  %v3105_v47 = vadd.f32 %v3013_v40, %v6775_v38 }
 0x383   : > { %3941 = vst.msk [vmem:[%s6646_s17 + $0xc0] sm:$0xff] %vm355_vm2, %v3897_v39  ;;  %v3611_v29 = vmax.f32 %v3570_v42, 0.0  ;;  %v3523_v61 = vmul.f32 %v6860_v54, %v3475_v15  ;;  %v5081_v18 = vpop.f32.mrf.mxu1  ;;  %v3804_v43 = vpop.permute.xlu0 %3803 }
 0x384   : > { %v3382_v56 = vpop.f32.mrf.mxu0 }
 0x385   : > { %v3898_v26 = vmul.f32 %v3784_v2, %v3611_v29  ;;  %v3571_v58 = vadd.f32 %v6865_v44, %v3523_v61  ;;  %v3018_v16 = vpop.f32.mrf.mxu1  ;;  %v3476_v31 = vadd.f32 %v3382_v56, %v3104_v34 }
 0x386   : > { %v5166_v7 = vpop.f32.mrf.mxu0  ;;  %v3106_v27 = vadd.f32 %v3018_v16, %v6779_v0 }
 0x387   : > { %3942 = vst.msk [vmem:[%s6646_s17 + $0xc8] sm:$0xff] %vm355_vm2, %v3898_v26  ;;  %v3612_v41 = vmax.f32 %v3571_v58, 0.0  ;;  %v3524_v23 = vmul.f32 %v6860_v54, %v3476_v31  ;;  %v5084_v33 = vpop.f32.mrf.mxu1  ;;  %v3809_v31 = vpop.permute.xlu1 %3808 }
 0x388   : > { %v3385_v22 = vpop.f32.mrf.mxu0 }
 0x389   : > { %v3899_v6 = vmul.f32 %v3789_v30, %v3612_v41  ;;  %v3572_v57 = vadd.f32 %v6865_v44, %v3524_v23  ;;  %v3021_v3 = vpop.f32.mrf.mxu1  ;;  %v3477_v60 = vadd.f32 %v3385_v22, %v3105_v47 }
 0x38a   : > { %v5167_v53 = vpop.f32.mrf.mxu0  ;;  %v3107_v5 = vadd.f32 %v3021_v3, %v6791_v21  ;;  %v3814_v3 = vpop.permute.xlu0 %3813 }
 0x38b   : > { %3943 = vst.msk [vmem:[%s6646_s17 + $0xd0] sm:$0xff] %vm355_vm2, %v3899_v6  ;;  %v3613_v32 = vmax.f32 %v3572_v57, 0.0  ;;  %v3525_v38 = vmul.f32 %v6860_v54, %v3477_v60  ;;  %v5085_v37 = vpop.f32.mrf.mxu1 }
 0x38c   : > { %v3390_v46 = vpop.f32.mrf.mxu0 }
 0x38d   : > { %v3900_v1 = vmul.f32 %v3794_v19, %v3613_v32  ;;  %v3573_v52 = vadd.f32 %v6865_v44, %v3525_v38  ;;  %v3026_v28 = vpop.f32.mrf.mxu1  ;;  %v3478_v4 = vadd.f32 %v3390_v46, %v3106_v27 }
 0x38e   : > { %v5170_v24 = vpop.f32.mrf.mxu0  ;;  %v3108_v42 = vadd.f32 %v3026_v28, %v6795_v10 }
 0x38f   : > { %3944 = vst.msk [vmem:[%s6646_s17 + $0xd8] sm:$0xff] %vm355_vm2, %v3900_v1  ;;  %v3614_v48 = vmax.f32 %v3573_v52, 0.0  ;;  %v3526_v0 = vmul.f32 %v6860_v54, %v3478_v4  ;;  %v5088_v35 = vpop.f32.mrf.mxu1  ;;  %v3819_v52 = vpop.permute.xlu1 %3818 }
 0x390   : > { %v3393_v8 = vpop.f32.mrf.mxu0 }
 0x391   : > { %v3901_v25 = vmul.f32 %v3799_v13, %v3614_v48  ;;  %v3574_v51 = vadd.f32 %v6865_v44, %v3526_v0  ;;  %v3029_v20 = vpop.f32.mrf.mxu1  ;;  %v3479_v12 = vadd.f32 %v3393_v8, %v3107_v5 }
 0x392   : > { %v5171_v39 = vpop.f32.mrf.mxu0  ;;  %v3109_v26 = vadd.f32 %v3029_v20, %v6807_v45 }
 0x393   : > { %3945 = vst.msk [vmem:[%s6646_s17 + $0xe0] sm:$0xff] %vm355_vm2, %v3901_v25  ;;  %v3615_v40 = vmax.f32 %v3574_v51, 0.0  ;;  %v3527_v21 = vmul.f32 %v6860_v54, %v3479_v12  ;;  %v5089_v15 = vpop.f32.mrf.mxu1  ;;  %v3824_v25 = vpop.permute.xlu0 %3823 }
 0x394   : > { %v3398_v34 = vpop.f32.mrf.mxu0 }
 0x395   : > { %v3902_v29 = vmul.f32 %v3804_v43, %v3615_v40  ;;  %v3575_v61 = vadd.f32 %v6865_v44, %v3527_v21  ;;  %v3034_v18 = vpop.f32.mrf.mxu1  ;;  %v3480_v2 = vadd.f32 %v3398_v34, %v3108_v42  ;;  %v3829_v34 = vpop.permute.xlu1 %3828 }
 0x396   : > { %v5174_v56 = vpop.f32.mrf.mxu0  ;;  %v3110_v22 = vadd.f32 %v3034_v18, %v6811_v36 }
 0x397   : > { %3946 = vst.msk [vmem:[%s6646_s17 + $0xe8] sm:$0xff] %vm355_vm2, %v3902_v29  ;;  %v3616_v58 = vmax.f32 %v3575_v61, 0.0  ;;  %v3528_v10 = vmul.f32 %v6860_v54, %v3480_v2  ;;  %v5092_v16 = vpop.f32.mrf.mxu1 }
 0x398   : > { %v3401_v7 = vpop.f32.mrf.mxu0 }
 0x399   : > { %v3903_v47 = vmul.f32 %v3809_v31, %v3616_v58  ;;  %v3576_v41 = vadd.f32 %v6865_v44, %v3528_v10  ;;  %v3037_v23 = vpop.f32.mrf.mxu1  ;;  %v3481_v33 = vadd.f32 %v3401_v7, %v3109_v26  ;;  %v3834_v31 = vpop.permute.xlu0 %3833 }
 0x39a   : > { %v5175_v30 = vpop.f32.mrf.mxu0  ;;  %v3111_v19 = vadd.f32 %v3037_v23, %v6822_v17 }
 0x39b   : > { %3947 = vst.msk [vmem:[%s6646_s17 + $0xf0] sm:$0xff] %vm355_vm2, %v3903_v47  ;;  %v3617_v6 = vmax.f32 %v3576_v41, 0.0  ;;  %v3529_v45 = vmul.f32 %v6860_v54, %v3481_v33  ;;  %v5093_v57 = vpop.f32.mrf.mxu1 }
 0x39c   : > { %v3406_v60 = vpop.f32.mrf.mxu0  ;;  %v3839_v57 = vpop.permute.xlu1 %3838 }
 0x39d   : > { %v3904_v53 = vmul.f32 %v3814_v3, %v3617_v6  ;;  %v3577_v27 = vadd.f32 %v6865_v44, %v3529_v45  ;;  %v3042_v32 = vpop.f32.mrf.mxu1  ;;  %v3482_v38 = vadd.f32 %v3406_v60, %v3110_v22 }
 0x39e   : > { %v5178_v37 = vpop.f32.mrf.mxu0  ;;  %v3112_v35 = vadd.f32 %v3042_v32, %v6826_v9 }
 0x39f   : > { %3948 = vst.msk [vmem:[%s6646_s17 + $0xf8] sm:$0xff] %vm355_vm2, %v3904_v53  ;;  %v3618_v46 = vmax.f32 %v3577_v27, 0.0  ;;  %v3530_v36 = vmul.f32 %v6860_v54, %v3482_v38  ;;  %v5096_v1 = vpop.f32.mrf.mxu1 }
 0x3a0   : > { %v3409_v28 = vpop.f32.mrf.mxu0 }
 0x3a1   : > { %v3905_v4 = vmul.f32 %v3819_v52, %v3618_v46  ;;  %v3578_v24 = vadd.f32 %v6865_v44, %v3530_v36  ;;  %v3045_v5 = vpop.f32.mrf.mxu1  ;;  %v3483_v48 = vadd.f32 %v3409_v28, %v3111_v19  ;;  %v3844_v36 = vpop.permute.xlu0 %3843 }
 0x3a2   : > { %v5179_v0 = vpop.f32.mrf.mxu0  ;;  %v3113_v21 = vadd.f32 %v3045_v5, %v6833_v55 }
 0x3a3   : > { %3949 = vst.msk [vmem:[%s6646_s17 + $0x100] sm:$0xff] %vm355_vm2, %v3905_v4  ;;  %v3619_v13 = vmax.f32 %v3578_v24, 0.0  ;;  %v3531_v17 = vmul.f32 %v6860_v54, %v3483_v48  ;;  %v5097_v8 = vpop.f32.mrf.mxu1 }
 0x3a4   : > { %v3414_v51 = vpop.f32.mrf.mxu0 }
 0x3a5   : > { %v3906_v20 = vmul.f32 %v3824_v25, %v3619_v13  ;;  %v3579_v12 = vadd.f32 %v6865_v44, %v3531_v17  ;;  %v3050_v39 = vpop.f32.mrf.mxu1  ;;  %v3484_v42 = vadd.f32 %v3414_v51, %v3112_v35  ;;  %v3849_v13 = vpop.permute.xlu1 %3848 }
 0x3a6   : > { %v5182_v40 = vpop.f32.mrf.mxu0  ;;  %v3114_v58 = vadd.f32 %v3050_v39, %v6837_v49 }
 0x3a7   : > { %3950 = vst.msk [vmem:[%s6646_s17 + $0x108] sm:$0xff] %vm355_vm2, %v3906_v20  ;;  %v3620_v15 = vmax.f32 %v3579_v12, 0.0  ;;  %v3532_v9 = vmul.f32 %v6860_v54, %v3484_v42  ;;  %v5100_v43 = vpop.f32.mrf.mxu1 }
 0x3a8   : > { %v3417_v29 = vpop.f32.mrf.mxu0 }
 0x3a9   : > { %v3907_v61 = vmul.f32 %v3829_v34, %v3620_v15  ;;  %v3580_v18 = vadd.f32 %v6865_v44, %v3532_v9  ;;  %v3053_v2 = vpop.f32.mrf.mxu1  ;;  %v3485_v56 = vadd.f32 %v3417_v29, %v3113_v21  ;;  %v3854_v21 = vpop.permute.xlu0 %3853 }
 0x3aa   : > { %v5183_v26 = vpop.f32.mrf.mxu0  ;;  %v3115_v22 = vadd.f32 %v3053_v2, %v6840_v62 }
 0x3ab   : > { %3951 = vst.msk [vmem:[%s6646_s17 + $0x110] sm:$0xff] %vm355_vm2, %v3907_v61  ;;  %v3621_v10 = vmax.f32 %v3580_v18, 0.0  ;;  %v3533_v55 = vmul.f32 %v6860_v54, %v3485_v56  ;;  %v5101_v16 = vpop.f32.mrf.mxu1  ;;  %v3859_v26 = vpop.permute.xlu1 %3858 }
 0x3ac   : > { %v3422_v7 = vpop.f32.mrf.mxu0 }
 0x3ad   : > { %v3908_v47 = vmul.f32 %v3834_v31, %v3621_v10  ;;  %v3581_v41 = vadd.f32 %v6865_v44, %v3533_v55  ;;  %v3058_v23 = vpop.f32.mrf.mxu1  ;;  %v3486_v33 = vadd.f32 %v3422_v7, %v3114_v58 }
 0x3ae   : > { %v5186_v30 = vpop.f32.mrf.mxu0  ;;  %v3116_v37 = vadd.f32 %v3058_v23, %v6843_v59 }
 0x3af   : > { %3952 = vst.msk [vmem:[%s6646_s17 + $0x118] sm:$0xff] %vm355_vm2, %v3908_v47  ;;  %v3622_v6 = vmax.f32 %v3581_v41, 0.0  ;;  %v3534_v49 = vmul.f32 %v6860_v54, %v3486_v33  ;;  %v5104_v45 = vpop.f32.mrf.mxu1  ;;  %v3864_v33 = vpop.permute.xlu0 %3863 }
 0x3b0   : > { %v3425_v3 = vpop.f32.mrf.mxu0 }
 0x3b1   : > { %v3909_v60 = vmul.f32 %v3839_v57, %v3622_v6  ;;  %v3582_v53 = vadd.f32 %v6865_v44, %v3534_v49  ;;  %v3061_v27 = vpop.f32.mrf.mxu1  ;;  %v3487_v32 = vadd.f32 %v3425_v3, %v3115_v22 }
 0x3b2   : > { %v5187_v38 = vpop.f32.mrf.mxu0  ;;  %v3117_v48 = vadd.f32 %v3061_v27, %v6846_v63 }
 0x3b3   : > { %3953 = vst.msk [vmem:[%s6646_s17 + $0x120] sm:$0xff] %vm355_vm2, %v3909_v60  ;;  %v3623_v19 = vmax.f32 %v3582_v53, 0.0  ;;  %v3535_v62 = vmul.f32 %v6860_v54, %v3487_v32  ;;  %v5105_v46 = vpop.f32.mrf.mxu1  ;;  %v3869_v60 = vpop.permute.xlu1 %3868 }
 0x3b4   : > { %v3430_v1 = vpop.f32.mrf.mxu0 }
 0x3b5   : > { %v3910_v52 = vmul.f32 %v3844_v36, %v3623_v19  ;;  %v3583_v28 = vadd.f32 %v6865_v44, %v3535_v62  ;;  %v3066_v4 = vpop.f32.mrf.mxu1  ;;  %v3488_v24 = vadd.f32 %v3430_v1, %v3116_v37  ;;  %v3874_v37 = vpop.permute.xlu0 %3873 }
 0x3b6   : > { %v5190_v5 = vpop.f32.mrf.mxu0  ;;  %v3118_v39 = vadd.f32 %v3066_v4, %v6849_v50 }
 0x3b7   : > { %3954 = vst.msk [vmem:[%s6646_s17 + $0x128] sm:$0xff] %vm355_vm2, %v3910_v52  ;;  %v3624_v0 = vmax.f32 %v3583_v28, 0.0  ;;  %v3536_v59 = vmul.f32 %v6860_v54, %v3488_v24  ;;  %v5108_v35 = vpop.f32.mrf.mxu1 }
 0x3b8   : > { %v3433_v17 = vpop.f32.mrf.mxu0 }
 0x3b9   : > { %v3911_v8 = vmul.f32 %v3849_v13, %v3624_v0  ;;  %v3584_v25 = vadd.f32 %v6865_v44, %v3536_v59  ;;  %v3069_v51 = vpop.f32.mrf.mxu1  ;;  %v3489_v20 = vadd.f32 %v3433_v17, %v3117_v48 }
 0x3ba   : > { %v5191_v12 = vpop.f32.mrf.mxu0  ;;  %v3119_v18 = vadd.f32 %v3069_v51, %v6852_v11 }
 0x3bb   : > { %3955 = vst.msk [vmem:[%s6646_s17 + $0x130] sm:$0xff] %vm355_vm2, %v3911_v8  ;;  %v3625_v42 = vmax.f32 %v3584_v25, 0.0  ;;  %v3537_v63 = vmul.f32 %v6860_v54, %v3489_v20  ;;  %v5109_v40 = vpop.f32.mrf.mxu1 }
 0x3bc   : > { %v3438_v15 = vpop.f32.mrf.mxu0 }
 0x3bd   : > { %v3912_v9 = vmul.f32 %v3854_v21, %v3625_v42  ;;  %v3585_v43 = vadd.f32 %v6865_v44, %v3537_v63  ;;  %v3074_v34 = vpop.f32.mrf.mxu1  ;;  %v3490_v29 = vadd.f32 %v3438_v15, %v3118_v39 }
 0x3be   : > { %v5194_v61 = vpop.f32.mrf.mxu0  ;;  %v3120_v47 = vadd.f32 %v3074_v34, %v6854_v14 }
 0x3bf   : > { %3956 = vst.msk [vmem:[%s6646_s17 + $0x138] sm:$0xff] %vm355_vm2, %v3912_v9  ;;  %v3626_v2 = vmax.f32 %v3585_v43, 0.0  ;;  %v3538_v50 = vmul.f32 %v6860_v54, %v3490_v29  ;;  %v5112_v56 = vpop.f32.mrf.mxu1 }
 0x3c0   : > { %v3441_v58 = vpop.f32.mrf.mxu0 }
 0x3c1   : > { %v3913_v10 = vmul.f32 %v3859_v26, %v3626_v2  ;;  %v3586_v55 = vadd.f32 %v6865_v44, %v3538_v50  ;;  %v3077_v16 = vpop.f32.mrf.mxu1  ;;  %v3491_v31 = vadd.f32 %v3441_v58, %v3119_v18 }
 0x3c2   : > { %v5195_v7 = vpop.f32.mrf.mxu0 }
 0x3c3   : > { %3957 = vst.msk [vmem:[%s6646_s17 + $0x140] sm:$0xff] %vm355_vm2, %v3913_v10  ;;  %v3627_v41 = vmax.f32 %v3586_v55, 0.0  ;;  %v3539_v11 = vmul.f32 %v6860_v54, %v3491_v31  ;;  %v5113_v23 = vpop.f32.mrf.mxu1 }
 0x3c4   : > { %v3446_v30 = vpop.f32.mrf.mxu0 }
 0x3c5   : > { %v3914_v22 = vmul.f32 %v3864_v33, %v3627_v41  ;;  %v3587_v6 = vadd.f32 %v6865_v44, %v3539_v11  ;;  %v3492_v49 = vadd.f32 %v3446_v30, %v3120_v47 }
 0x3c6   : > { %v5198_v45 = vpop.f32.mrf.mxu0 }
 0x3c7   : > { %3958 = vst.msk [vmem:[%s6646_s17 + $0x148] sm:$0xff] %vm355_vm2, %v3914_v22  ;;  %v3628_v57 = vmax.f32 %v3587_v6, 0.0  ;;  %v3540_v3 = vmul.f32 %v6860_v54, %v3492_v49 }
 0x3c8   : > { %v3449_v14 = vpop.f32.mrf.mxu0 }
 0x3c9   : > { %v3915_v53 = vmul.f32 %v3869_v60, %v3628_v57  ;;  %v3588_v27 = vadd.f32 %v6865_v44, %v3540_v3 }
 0x3ca   : > { %v5199_v32 = vpop.f32.mrf.mxu0 }
 0x3cb   : > { %3959 = vst.msk [vmem:[%s6646_s17 + $0x150] sm:$0xff] %vm355_vm2, %v3915_v53  ;;  %v3629_v38 = vmax.f32 %v3588_v27, 0.0 }
 0x3cd   : > { %v3916_v19 = vmul.f32 %v3874_v37, %v3629_v38 }
 0x3cf   : > { %3961 = vst.msk [vmem:[%s6646_s17 + $0x158] sm:$0xf] %vm3960_vm3, %v3916_v19 }
 0x3d0 PF: > { %s15_s18 = sadd.s32 1, %s5222_s18  }
 0x3d1   : > { %p12_p4 = scmp.ge.s32.totalorder %s15_s18, 4  }
 0x3d3   :  { %14 = sbr.rel (!%p12_p4) target bundleno = 1 (0x1), region = 78 }

// kernel: residual_block_forward.7
= control target key start
LH: loop header
LB: loop body
LE: loop exit
PB: predicated region body
PF: predicated region fallthrough
CT: control target
= control target key end

     0   :  { %s5076_s18 = smov 0   ;;  %s6798_s0 = inlined_call_operand.vmem [shape: f32[2,372,4], index: 0, kind: input, shape index: {}]   ;;  %s6799_s1 = inlined_call_operand.vmem [shape: f32[9,4,4], index: 1, kind: input, shape index: {}]   ;;  %s6800_s2 = inlined_call_operand.vmem [shape: f32[1,4], index: 2, kind: input, shape index: {}]   ;;  %s6801_s3 = inlined_call_operand.vmem [shape: f32[1,4], index: 3, kind: input, shape index: {}]   ;;  %s6802_s4 = inlined_call_operand.vmem [shape: f32[2,372,4], index: 4, kind: input, shape index: {}]   ;;  %s6803_s5 = inlined_call_operand.vmem [shape: f32[2,324,4], index: 5, kind: output, shape index: {}]  }
   0x1 LB: > { %s3841_s19 = sadd.s32 4294967295, %s5042_s18   ;;  %p3845_p0 = scmp.ge.s32.totalorder %s5042_s18, 1  ;;  %s5042_s18 = sphi %s5076_s18, %s15_s18  }
   0x2   : > { %p197_p1 = scmp.lt.s32.totalorder %s5042_s18, 3 }
   0x4   : > { %p198_p2 = pnand %p3845_p0, %p197_p1 }
   0x6   : > { %201 = sbr.rel (%p198_p2) target bundleno = 976 (0x3d0), region = 40 }
   0xb   : > { %v3849_v0 = vld [vmem:[%s6799_s1 + $0x4] sm:$0xf]  ;;  %vm439_vm0 = vcmask 1041408   ;;  %p230_p3 = scmp.lt.s32.totalorder %s3841_s19, 1  ;;  %v5044_v1 = vmov 0.0   ;;  %vm5045_vm1 = vmmov 0  }
   0xc   : > { %4248 = vmatprep.subr.bf16.mxu0 %v5044_v1  ;;  %5022 = vmatprep.subr.bf16.mxu1 %v5044_v1  ;;  %v374_v2 = vpack.c.bf16 %v3849_v0, %v3849_v0  ;;  %v3892_v3 = vld [vmem:[%s6799_s1 + $0x8] sm:$0xf]  ;;  %v287_v4 = vld [vmem:[%s6799_s1] sm:$0xf]  ;;  %vm375_vm2 = vcmask 31744   ;;  %vm3772_vm3 = vcmask 27648  }
   0xd   : > { %4250 = vmatprep.mubr.msk.bf16.mxu0 %vm5045_vm1, %v5044_v1  ;;  %4294 = vmatprep.mubr.msk.bf16.mxu1 %vm5045_vm1, %v5044_v1  ;;  %s6821_s19 = smov (!%p230_p3, %s3841_s19), 1  ;;  %v973_v6 = vpack.c.bf16 %v3892_v3, %v3892_v3  ;;  %v309_v7 = vpack.c.bf16 %v287_v4, %v287_v4 }
   0xe   : > { %v441_v5 = vsel %vm439_vm0, %v374_v2, 0  ;;  %s5024_s26 = smul.u32 376, %s6821_s19 }
   0xf   : > { %4249 = vmatpush3.bf16.msra.mxu0 %v441_v5  ;;  %5023 = vmatpush3.bf16.msra.mxu1 %v441_v5  ;;  %v1038_v13 = vsel %vm439_vm0, %v973_v6, 0  ;;  %v707_v15 = vsel %vm439_vm0, %v309_v7, 0  ;;  %v3914_v6 = vld [vmem:[%s6799_s1 + $0xc] sm:$0xf]  ;;  %s5025_s27 = smul.u32 328, %s6821_s19 }
  0x10   : > { %4420 = vmatprep.subr.bf16.mxu0 %v5044_v1  ;;  %4334 = vmatprep.subr.bf16.mxu1 %v5044_v1  ;;  %s5110_s29 = scalar_lea.vmem %s6798_s0, %s5024_s26  ;;  %s6538_s23 = scalar_lea.vmem %s6802_s4, %s5024_s26 }
  0x11   : > { %v310_v8 = vld [vmem:[%s5110_s29 + $0x6] sm:$0xff]  ;;  %v311_v9 = vld [vmem:[%s5110_s29 + $0xe] sm:$0xff]  ;;  %v332_v10 = vld [vmem:[%s5110_s29 + $0xb6] sm:$0xff] }
  0x12   : > { %v353_v11 = vpack.c.bf16 %v311_v9, %v310_v8  ;;  %v333_v12 = vld [vmem:[%s5110_s29 + $0xbe] sm:$0xff]  ;;  %v312_v16 = vld [vmem:[%s5110_s29 + $0x16] sm:$0xff]  ;;  %v334_v18 = vld [vmem:[%s5110_s29 + $0xc6] sm:$0xff] }
  0x13   : > { %v364_v14 = vpack.c.bf16 %v333_v12, %v332_v10  ;;  %v313_v17 = vld [vmem:[%s5110_s29 + $0x1e] sm:$0xff]  ;;  %v335_v19 = vld [vmem:[%s5110_s29 + $0xce] sm:$0xff]  ;;  %v314_v22 = vld [vmem:[%s5110_s29 + $0x26] sm:$0xff] }
  0x14   : > { %4251 = vmatmul.mubr.msk.bf16.vlgmr.msra.gmra.mxu0 %vm375_vm2, %v353_v11  ;;  %v354_v20 = vpack.c.bf16 %v313_v17, %v312_v16  ;;  %v365_v21 = vpack.c.bf16 %v335_v19, %v334_v18  ;;  %v315_v23 = vld [vmem:[%s5110_s29 + $0x2e] sm:$0xff]  ;;  %v336_v24 = vld [vmem:[%s5110_s29 + $0xd6] sm:$0xff]  ;;  %v337_v25 = vld [vmem:[%s5110_s29 + $0xde] sm:$0xff]  ;;  %v1345_v11 = vpack.c.bf16 %v3914_v6, %v3914_v6 }
  0x15   : > { %4295 = vmatmul.mubr.msk.bf16.vlgmr.msra.gmra.mxu1 %vm375_vm2, %v364_v14  ;;  %4421 = vmatpush3.bf16.msra.mxu0 %v1038_v13  ;;  %v355_v26 = vpack.c.bf16 %v315_v23, %v314_v22  ;;  %v366_v27 = vpack.c.bf16 %v337_v25, %v336_v24  ;;  %v316_v28 = vld [vmem:[%s5110_s29 + $0x36] sm:$0xff]  ;;  %v317_v29 = vld [vmem:[%s5110_s29 + $0x3e] sm:$0xff]  ;;  %v338_v30 = vld [vmem:[%s5110_s29 + $0xe6] sm:$0xff] }
  0x16   : > { %4335 = vmatpush3.bf16.msra.mxu1 %v707_v15  ;;  %4254 = vmatprep.mubr.msk.bf16.mxu0 %vm5045_vm1, %v5044_v1  ;;  %v339_v31 = vld [vmem:[%s5110_s29 + $0xee] sm:$0xff]  ;;  %v356_v32 = vpack.c.bf16 %v317_v29, %v316_v28  ;;  %v318_v34 = vld [vmem:[%s5110_s29 + $0x46] sm:$0xff]  ;;  %v340_v36 = vld [vmem:[%s5110_s29 + $0xf6] sm:$0xff]  ;;  %v1410_v14 = vsel %vm439_vm0, %v1345_v11, 0 }
  0x17   : > { %4298 = vmatprep.mubr.msk.bf16.mxu1 %vm5045_vm1, %v5044_v1  ;;  %4506 = vmatprep.subr.bf16.mxu1 %v5044_v1  ;;  %v367_v33 = vpack.c.bf16 %v339_v31, %v338_v30  ;;  %v319_v35 = vld [vmem:[%s5110_s29 + $0x4e] sm:$0xff]  ;;  %v341_v37 = vld [vmem:[%s5110_s29 + $0xfe] sm:$0xff]  ;;  %v320_v40 = vld [vmem:[%s5110_s29 + $0x56] sm:$0xff] }
  0x18   : > { %4592 = vmatprep.subr.bf16.mxu0 %v5044_v1  ;;  %v357_v38 = vpack.c.bf16 %v319_v35, %v318_v34  ;;  %v368_v39 = vpack.c.bf16 %v341_v37, %v340_v36  ;;  %v321_v41 = vld [vmem:[%s5110_s29 + $0x5e] sm:$0xff]  ;;  %v342_v42 = vld [vmem:[%s5110_s29 + $0x106] sm:$0xff]  ;;  %v343_v43 = vld [vmem:[%s5110_s29 + $0x10e] sm:$0xff] }
  0x19   : > { %v358_v44 = vpack.c.bf16 %v321_v41, %v320_v40  ;;  %v369_v45 = vpack.c.bf16 %v343_v43, %v342_v42  ;;  %v322_v46 = vld [vmem:[%s5110_s29 + $0x66] sm:$0xff]  ;;  %v323_v47 = vld [vmem:[%s5110_s29 + $0x6e] sm:$0xff]  ;;  %v344_v48 = vld [vmem:[%s5110_s29 + $0x116] sm:$0xff] }
  0x1a   : > { %v345_v49 = vld [vmem:[%s5110_s29 + $0x11e] sm:$0xff]  ;;  %v359_v50 = vpack.c.bf16 %v323_v47, %v322_v46  ;;  %v324_v52 = vld [vmem:[%s5110_s29 + $0x76] sm:$0xff]  ;;  %v346_v54 = vld [vmem:[%s5110_s29 + $0x126] sm:$0xff] }
  0x1b   : > { %v370_v51 = vpack.c.bf16 %v345_v49, %v344_v48  ;;  %v325_v53 = vld [vmem:[%s5110_s29 + $0x7e] sm:$0xff]  ;;  %v347_v55 = vld [vmem:[%s5110_s29 + $0x12e] sm:$0xff]  ;;  %v326_v58 = vld [vmem:[%s5110_s29 + $0x86] sm:$0xff] }
  0x1c   : > { %4255 = vmatmul.mubr.msk.bf16.gmra.mxu0 %vm375_vm2, %v354_v20  ;;  %v360_v56 = vpack.c.bf16 %v325_v53, %v324_v52  ;;  %v371_v57 = vpack.c.bf16 %v347_v55, %v346_v54  ;;  %v327_v59 = vld [vmem:[%s5110_s29 + $0x8e] sm:$0xff]  ;;  %v348_v60 = vld [vmem:[%s5110_s29 + $0x136] sm:$0xff]  ;;  %v349_v61 = vld [vmem:[%s5110_s29 + $0x13e] sm:$0xff] }
  0x1d   : > { %4299 = vmatmul.mubr.msk.bf16.gmra.mxu1 %vm375_vm2, %v365_v21  ;;  %4258 = vmatprep.mubr.msk.bf16.mxu0 %vm5045_vm1, %v5044_v1  ;;  %v361_v62 = vpack.c.bf16 %v327_v59, %v326_v58  ;;  %v372_v63 = vpack.c.bf16 %v349_v61, %v348_v60  ;;  %v328_v0 = vld [vmem:[%s5110_s29 + $0x96] sm:$0xff]  ;;  %v329_v2 = vld [vmem:[%s5110_s29 + $0x9e] sm:$0xff]  ;;  %v350_v3 = vld [vmem:[%s5110_s29 + $0x146] sm:$0xf] }
  0x1e   : > { %4302 = vmatprep.mubr.msk.bf16.mxu1 %vm5045_vm1, %v5044_v1  ;;  %v362_v4 = vpack.c.bf16 %v329_v2, %v328_v0  ;;  %v373_v5 = vpack.c.bf16 %v350_v3, %v350_v3  ;;  %v330_v7 = vld [vmem:[%s5110_s29 + $0xa6] sm:$0xff]  ;;  %v331_v8 = vld [vmem:[%s5110_s29 + $0xae] sm:$0xff]  ;;  %v249_v19 = vld [vmem:[%s5110_s29 + $0x1d] sm:$0xff] }
  0x1f   : > { %v246_v9 = vld [vmem:[%s5110_s29 + $0x5] sm:$0xff]  ;;  %v247_v10 = vld [vmem:[%s5110_s29 + $0xd] sm:$0xff]  ;;  %v363_v12 = vpack.c.bf16 %v331_v8, %v330_v7  ;;  %v248_v18 = vld [vmem:[%s5110_s29 + $0x15] sm:$0xff] }
  0x20   : > { %v288_v13 = vpack.c.bf16 %v247_v10, %v246_v9  ;;  %v3936_v15 = vld [vmem:[%s6799_s1 + $0x10] sm:$0xf]  ;;  %v909_v16 = vld [vmem:[%s5110_s29 + $0x7] sm:$0xff]  ;;  %v289_v22 = vpack.c.bf16 %v249_v19, %v248_v18  ;;  %v911_v24 = vld [vmem:[%s5110_s29 + $0x17] sm:$0xff] }
  0x21   : > { %v910_v17 = vld [vmem:[%s5110_s29 + $0xf] sm:$0xff]  ;;  %v1717_v20 = vpack.c.bf16 %v3936_v15, %v3936_v15  ;;  %v912_v25 = vld [vmem:[%s5110_s29 + $0x1f] sm:$0xff]  ;;  %v913_v30 = vld [vmem:[%s5110_s29 + $0x27] sm:$0xff] }
  0x22   : > { %v952_v21 = vpack.c.bf16 %v910_v17, %v909_v16  ;;  %v5249_v28 = vpack.c.bf16 %v912_v25, %v911_v24  ;;  %v914_v31 = vld [vmem:[%s5110_s29 + $0x2f] sm:$0xff]  ;;  %v915_v36 = vld [vmem:[%s5110_s29 + $0x37] sm:$0xff]  ;;  %v916_v37 = vld [vmem:[%s5110_s29 + $0x3f] sm:$0xff] }
  0x23   : > { %v1782_v23 = vsel %vm439_vm0, %v1717_v20, 0  ;;  %v5262_v34 = vpack.c.bf16 %v914_v31, %v913_v30  ;;  %v5275_v40 = vpack.c.bf16 %v916_v37, %v915_v36  ;;  %v917_v42 = vld [vmem:[%s5110_s29 + $0x47] sm:$0xff]  ;;  %v918_v43 = vld [vmem:[%s5110_s29 + $0x4f] sm:$0xff]  ;;  %v919_v48 = vld [vmem:[%s5110_s29 + $0x57] sm:$0xff] }
  0x24   : > { %4259 = vmatmul.mubr.msk.bf16.gmra.mxu0 %vm375_vm2, %v355_v26  ;;  %v250_v26 = vld [vmem:[%s5110_s29 + $0x25] sm:$0xff]  ;;  %v5288_v46 = vpack.c.bf16 %v918_v43, %v917_v42  ;;  %v922_v55 = vld [vmem:[%s5110_s29 + $0x6f] sm:$0xff]  ;;  %v923_v60 = vld [vmem:[%s5110_s29 + $0x77] sm:$0xff] }
  0x25   : > { %4303 = vmatmul.mubr.msk.bf16.gmra.mxu1 %vm375_vm2, %v366_v27  ;;  %4262 = vmatprep.mubr.msk.bf16.mxu0 %vm5045_vm1, %v5044_v1  ;;  %v251_v27 = vld [vmem:[%s5110_s29 + $0x2d] sm:$0xff]  ;;  %v920_v49 = vld [vmem:[%s5110_s29 + $0x5f] sm:$0xff]  ;;  %v927_v9 = vld [vmem:[%s5110_s29 + $0x97] sm:$0xff] }
  0x26   : > { %4306 = vmatprep.mubr.msk.bf16.mxu1 %vm5045_vm1, %v5044_v1  ;;  %v290_v29 = vpack.c.bf16 %v251_v27, %v250_v26  ;;  %v5301_v52 = vpack.c.bf16 %v920_v49, %v919_v48  ;;  %v921_v54 = vld [vmem:[%s5110_s29 + $0x67] sm:$0xff]  ;;  %v924_v61 = vld [vmem:[%s5110_s29 + $0x7f] sm:$0xff]  ;;  %v930_v16 = vld [vmem:[%s5110_s29 + $0xaf] sm:$0xff] }
  0x27   : > { %v5314_v58 = vpack.c.bf16 %v922_v55, %v921_v54  ;;  %v5327_v0 = vpack.c.bf16 %v924_v61, %v923_v60  ;;  %v925_v3 = vld [vmem:[%s5110_s29 + $0x87] sm:$0xff]  ;;  %v265_v6 = vld [vmem:[%s5110_s29 + $0x9d] sm:$0xff]  ;;  %v268_v17 = vld [vmem:[%s5110_s29 + $0xb5] sm:$0xff] }
  0x28   : > { %v928_v10 = vld [vmem:[%s5110_s29 + $0x9f] sm:$0xff]  ;;  %v929_v15 = vld [vmem:[%s5110_s29 + $0xa7] sm:$0xff]  ;;  %v272_v30 = vld [vmem:[%s5110_s29 + $0xd5] sm:$0xff] }
  0x29   : > { %v266_v11 = vld [vmem:[%s5110_s29 + $0xa5] sm:$0xff]  ;;  %v269_v18 = vld [vmem:[%s5110_s29 + $0xbd] sm:$0xff]  ;;  %v5366_v19 = vpack.c.bf16 %v930_v16, %v929_v15  ;;  %v271_v24 = vld [vmem:[%s5110_s29 + $0xcd] sm:$0xff] }
  0x2a   : > { %v299_v20 = vpack.c.bf16 %v269_v18, %v268_v17  ;;  %v933_v27 = vld [vmem:[%s5110_s29 + $0xc7] sm:$0xff]  ;;  %v273_v31 = vld [vmem:[%s5110_s29 + $0xdd] sm:$0xff]  ;;  %v276_v48 = vld [vmem:[%s5110_s29 + $0xf5] sm:$0xff] }
  0x2b   : > { %v936_v36 = vld [vmem:[%s5110_s29 + $0xdf] sm:$0xff]  ;;  %v939_v61 = vld [vmem:[%s5110_s29 + $0xf7] sm:$0xff]  ;;  %v941_v15 = vld [vmem:[%s5110_s29 + $0x107] sm:$0xff] }
  0x2c   : > { %4263 = vmatmul.mubr.msk.bf16.gmra.mxu0 %vm375_vm2, %v356_v32  ;;  %v252_v32 = vld [vmem:[%s5110_s29 + $0x35] sm:$0xff]  ;;  %v274_v37 = vld [vmem:[%s5110_s29 + $0xe5] sm:$0xff]  ;;  %v277_v49 = vld [vmem:[%s5110_s29 + $0xfd] sm:$0xff] }
  0x2d   : > { %4307 = vmatmul.mubr.msk.bf16.gmra.mxu1 %vm375_vm2, %v367_v33  ;;  %4266 = vmatprep.mubr.msk.bf16.mxu0 %vm5045_vm1, %v5044_v1  ;;  %v253_v33 = vld [vmem:[%s5110_s29 + $0x3d] sm:$0xff]  ;;  %v303_v55 = vpack.c.bf16 %v277_v49, %v276_v48  ;;  %v942_v16 = vld [vmem:[%s5110_s29 + $0x10f] sm:$0xff] }
  0x2e   : > { %4310 = vmatprep.mubr.msk.bf16.mxu1 %vm5045_vm1, %v5044_v1  ;;  %v291_v35 = vpack.c.bf16 %v253_v33, %v252_v32  ;;  %v301_v33 = vpack.c.bf16 %v273_v31, %v272_v30  ;;  %v280_v18 = vld [vmem:[%s5110_s29 + $0x115] sm:$0xff] }
  0x34   : > { %4267 = vmatmul.mubr.msk.bf16.gmra.mxu0 %vm375_vm2, %v357_v38  ;;  %v254_v38 = vld [vmem:[%s5110_s29 + $0x45] sm:$0xff] }
  0x35   : > { %4311 = vmatmul.mubr.msk.bf16.gmra.mxu1 %vm375_vm2, %v368_v39  ;;  %4270 = vmatprep.mubr.msk.bf16.mxu0 %vm5045_vm1, %v5044_v1  ;;  %v255_v39 = vld [vmem:[%s5110_s29 + $0x4d] sm:$0xff] }
  0x36   : > { %4314 = vmatprep.mubr.msk.bf16.mxu1 %vm5045_vm1, %v5044_v1  ;;  %v292_v41 = vpack.c.bf16 %v255_v39, %v254_v38  ;;  %v275_v38 = vld [vmem:[%s5110_s29 + $0xed] sm:$0xff] }
  0x3c   : > { %4271 = vmatmul.mubr.msk.bf16.gmra.mxu0 %vm375_vm2, %v358_v44  ;;  %v256_v44 = vld [vmem:[%s5110_s29 + $0x55] sm:$0xff] }
  0x3d   : > { %4315 = vmatmul.mubr.msk.bf16.gmra.mxu1 %vm375_vm2, %v369_v45  ;;  %4274 = vmatprep.mubr.msk.bf16.mxu0 %vm5045_vm1, %v5044_v1  ;;  %v257_v45 = vld [vmem:[%s5110_s29 + $0x5d] sm:$0xff] }
  0x3e   : > { %4318 = vmatprep.mubr.msk.bf16.mxu1 %vm5045_vm1, %v5044_v1  ;;  %v293_v47 = vpack.c.bf16 %v257_v45, %v256_v44  ;;  %v937_v44 = vld [vmem:[%s5110_s29 + $0xe7] sm:$0xff]  ;;  %v938_v45 = vld [vmem:[%s5110_s29 + $0xef] sm:$0xff] }
  0x44   : > { %4275 = vmatmul.mubr.msk.bf16.gmra.mxu0 %vm375_vm2, %v359_v50  ;;  %v258_v50 = vld [vmem:[%s5110_s29 + $0x65] sm:$0xff] }
  0x45   : > { %4319 = vmatmul.mubr.msk.bf16.gmra.mxu1 %vm375_vm2, %v370_v51  ;;  %4278 = vmatprep.mubr.msk.bf16.mxu0 %vm5045_vm1, %v5044_v1  ;;  %v259_v51 = vld [vmem:[%s5110_s29 + $0x6d] sm:$0xff] }
  0x46   : > { %4322 = vmatprep.mubr.msk.bf16.mxu1 %vm5045_vm1, %v5044_v1  ;;  %v294_v53 = vpack.c.bf16 %v259_v51, %v258_v50 }
  0x4c   : > { %4279 = vmatmul.mubr.msk.bf16.gmra.mxu0 %vm375_vm2, %v360_v56  ;;  %v260_v56 = vld [vmem:[%s5110_s29 + $0x75] sm:$0xff] }
  0x4d   : > { %4323 = vmatmul.mubr.msk.bf16.gmra.mxu1 %vm375_vm2, %v371_v57  ;;  %4282 = vmatprep.mubr.msk.bf16.mxu0 %vm5045_vm1, %v5044_v1  ;;  %v261_v57 = vld [vmem:[%s5110_s29 + $0x7d] sm:$0xff] }
  0x4e   : > { %4326 = vmatprep.mubr.msk.bf16.mxu1 %vm5045_vm1, %v5044_v1  ;;  %v295_v59 = vpack.c.bf16 %v261_v57, %v260_v56 }
  0x54   : > { %4283 = vmatmul.mubr.msk.bf16.gmra.mxu0 %vm375_vm2, %v361_v62  ;;  %v262_v62 = vld [vmem:[%s5110_s29 + $0x85] sm:$0xff] }
  0x55   : > { %4327 = vmatmul.mubr.msk.bf16.gmra.mxu1 %vm375_vm2, %v372_v63  ;;  %4286 = vmatprep.mubr.msk.bf16.mxu0 %vm5045_vm1, %v5044_v1  ;;  %v263_v63 = vld [vmem:[%s5110_s29 + $0x8d] sm:$0xff] }
  0x56   : > { %4330 = vmatprep.mubr.msk.bf16.mxu1 %vm5045_vm1, %v5044_v1  ;;  %v296_v2 = vpack.c.bf16 %v263_v63, %v262_v62  ;;  %v940_v62 = vld [vmem:[%s5110_s29 + $0xff] sm:$0xff] }
  0x5c   : > { %4287 = vmatmul.mubr.msk.bf16.gmra.mxu0 %vm375_vm2, %v362_v4  ;;  %v926_v4 = vld [vmem:[%s5110_s29 + $0x8f] sm:$0xff] }
  0x5d   : > { %4331 = vmatmul.mubr.msk.bf16.gmra.mxu1 %vm375_vm2, %v373_v5  ;;  %4290 = vmatprep.mubr.msk.bf16.mxu0 %vm5045_vm1, %v5044_v1  ;;  %v264_v5 = vld [vmem:[%s5110_s29 + $0x95] sm:$0xff]  ;;  %v5340_v7 = vpack.c.bf16 %v926_v4, %v925_v3  ;;  %v279_v3 = vld [vmem:[%s5110_s29 + $0x10d] sm:$0xff] }
  0x5e   : > { %4336 = vmatprep.mubr.msk.bf16.mxu1 %vm5045_vm1, %v5044_v1  ;;  %v297_v8 = vpack.c.bf16 %v265_v6, %v264_v5  ;;  %v5445_v6 = vpack.c.bf16 %v940_v62, %v939_v61  ;;  %v946_v61 = vld [vmem:[%s5110_s29 + $0x12f] sm:$0xff] }
  0x64   : > { %4291 = vmatmul.mubr.msk.bf16.gmra.mxu0 %vm375_vm2, %v363_v12  ;;  %v267_v12 = vld [vmem:[%s5110_s29 + $0xad] sm:$0xff] }
  0x65   : > { %4337 = vmatmul.mubr.msk.bf16.vlgmr.msra.gmra.mxu1 %vm375_vm2, %v288_v13  ;;  %4422 = vmatprep.mubr.msk.bf16.mxu0 %vm5045_vm1, %v5044_v1  ;;  %v5353_v13 = vpack.c.bf16 %v928_v10, %v927_v9 }
  0x66   : > { %4507 = vmatpush3.bf16.msra.mxu1 %v1410_v14  ;;  %4340 = vmatprep.mubr.msk.bf16.mxu1 %vm5045_vm1, %v5044_v1  ;;  %v298_v14 = vpack.c.bf16 %v267_v12, %v266_v11 }
  0x67   : > { %4678 = vmatprep.subr.bf16.mxu1 %v5044_v1 }
  0x6c   : > { %4423 = vmatmul.mubr.msk.bf16.vlgmr.msra.gmra.mxu0 %vm375_vm2, %v952_v21  ;;  %v931_v21 = vld [vmem:[%s5110_s29 + $0xb7] sm:$0xff] }
  0x6d   : > { %4341 = vmatmul.mubr.msk.bf16.gmra.mxu1 %vm375_vm2, %v289_v22  ;;  %4593 = vmatpush3.bf16.msra.mxu0 %v1782_v23  ;;  %v932_v22 = vld [vmem:[%s5110_s29 + $0xbf] sm:$0xff] }
  0x6e   : > { %4344 = vmatprep.mubr.msk.bf16.mxu1 %vm5045_vm1, %v5044_v1  ;;  %4426 = vmatprep.mubr.msk.bf16.mxu0 %vm5045_vm1, %v5044_v1  ;;  %v270_v23 = vld [vmem:[%s5110_s29 + $0xc5] sm:$0xff]  ;;  %v5379_v25 = vpack.c.bf16 %v932_v22, %v931_v21 }
  0x6f   : > { %4764 = vmatprep.subr.bf16.mxu0 %v5044_v1  ;;  %v300_v26 = vpack.c.bf16 %v271_v24, %v270_v23  ;;  %v5466_v23 = vpack.c.bf16 %v942_v16, %v941_v15 }
  0x74   : > { %4427 = vmatmul.mubr.msk.bf16.gmra.mxu0 %vm375_vm2, %v5249_v28 }
  0x75   : > { %4345 = vmatmul.mubr.msk.bf16.gmra.mxu1 %vm375_vm2, %v290_v29  ;;  %4430 = vmatprep.mubr.msk.bf16.mxu0 %vm5045_vm1, %v5044_v1  ;;  %v934_v29 = vld [vmem:[%s5110_s29 + $0xcf] sm:$0xff] }
  0x76   : > { %4348 = vmatprep.mubr.msk.bf16.mxu1 %vm5045_vm1, %v5044_v1  ;;  %v5392_v32 = vpack.c.bf16 %v934_v29, %v933_v27 }
  0x7c   : > { %4431 = vmatmul.mubr.msk.bf16.gmra.mxu0 %vm375_vm2, %v5262_v34 }
  0x7d   : > { %4349 = vmatmul.mubr.msk.bf16.gmra.mxu1 %vm375_vm2, %v291_v35  ;;  %4434 = vmatprep.mubr.msk.bf16.mxu0 %vm5045_vm1, %v5044_v1  ;;  %v935_v35 = vld [vmem:[%s5110_s29 + $0xd7] sm:$0xff] }
  0x7e   : > { %4352 = vmatprep.mubr.msk.bf16.mxu1 %vm5045_vm1, %v5044_v1  ;;  %v5405_v39 = vpack.c.bf16 %v936_v36, %v935_v35  ;;  %v944_v35 = vld [vmem:[%s5110_s29 + $0x11f] sm:$0xff] }
  0x84   : > { %4435 = vmatmul.mubr.msk.bf16.gmra.mxu0 %vm375_vm2, %v5275_v40 }
  0x85   : > { %4353 = vmatmul.mubr.msk.bf16.gmra.mxu1 %vm375_vm2, %v292_v41  ;;  %4438 = vmatprep.mubr.msk.bf16.mxu0 %vm5045_vm1, %v5044_v1  ;;  %v302_v41 = vpack.c.bf16 %v275_v38, %v274_v37  ;;  %v282_v37 = vld [vmem:[%s5110_s29 + $0x125] sm:$0xff]  ;;  %v283_v38 = vld [vmem:[%s5110_s29 + $0x12d] sm:$0xff] }
  0x86   : > { %4356 = vmatprep.mubr.msk.bf16.mxu1 %vm5045_vm1, %v5044_v1  ;;  %v306_v48 = vpack.c.bf16 %v283_v38, %v282_v37 }
  0x8c   : > { %4439 = vmatmul.mubr.msk.bf16.gmra.mxu0 %vm375_vm2, %v5288_v46 }
  0x8d   : > { %4357 = vmatmul.mubr.msk.bf16.gmra.mxu1 %vm375_vm2, %v293_v47  ;;  %4442 = vmatprep.mubr.msk.bf16.mxu0 %vm5045_vm1, %v5044_v1 }
  0x8e   : > { %4360 = vmatprep.mubr.msk.bf16.mxu1 %vm5045_vm1, %v5044_v1 }
  0x94   : > { %4443 = vmatmul.mubr.msk.bf16.gmra.mxu0 %vm375_vm2, %v5301_v52 }
  0x95   : > { %4361 = vmatmul.mubr.msk.bf16.gmra.mxu1 %vm375_vm2, %v294_v53  ;;  %4446 = vmatprep.mubr.msk.bf16.mxu0 %vm5045_vm1, %v5044_v1  ;;  %v5424_v53 = vpack.c.bf16 %v938_v45, %v937_v44 }
  0x96   : > { %4364 = vmatprep.mubr.msk.bf16.mxu1 %vm5045_vm1, %v5044_v1 }
  0x9c   : > { %4447 = vmatmul.mubr.msk.bf16.gmra.mxu0 %vm375_vm2, %v5314_v58 }
  0x9d   : > { %4365 = vmatmul.mubr.msk.bf16.gmra.mxu1 %vm375_vm2, %v295_v59  ;;  %4450 = vmatprep.mubr.msk.bf16.mxu0 %vm5045_vm1, %v5044_v1 }
  0x9e   : > { %4368 = vmatprep.mubr.msk.bf16.mxu1 %vm5045_vm1, %v5044_v1 }
  0xa4   : > { %4451 = vmatmul.mubr.msk.bf16.gmra.mxu0 %vm375_vm2, %v5327_v0 }
  0xa5   : > { %4369 = vmatmul.mubr.msk.bf16.gmra.mxu1 %vm375_vm2, %v296_v2  ;;  %4454 = vmatprep.mubr.msk.bf16.mxu0 %vm5045_vm1, %v5044_v1  ;;  %v278_v2 = vld [vmem:[%s5110_s29 + $0x105] sm:$0xff] }
  0xa6   : > { %4372 = vmatprep.mubr.msk.bf16.mxu1 %vm5045_vm1, %v5044_v1  ;;  %v304_v9 = vpack.c.bf16 %v279_v3, %v278_v2  ;;  %v285_v2 = vld [vmem:[%s5110_s29 + $0x13d] sm:$0xff] }
  0xac   : > { %4455 = vmatmul.mubr.msk.bf16.gmra.mxu0 %vm375_vm2, %v5340_v7 }
  0xad   : > { %4373 = vmatmul.mubr.msk.bf16.gmra.mxu1 %vm375_vm2, %v297_v8  ;;  %4458 = vmatprep.mubr.msk.bf16.mxu0 %vm5045_vm1, %v5044_v1 }
  0xae   : > { %4376 = vmatprep.mubr.msk.bf16.mxu1 %vm5045_vm1, %v5044_v1 }
  0xb4   : > { %4459 = vmatmul.mubr.msk.bf16.gmra.mxu0 %vm375_vm2, %v5353_v13 }
  0xb5   : > { %4377 = vmatmul.mubr.msk.bf16.gmra.mxu1 %vm375_vm2, %v298_v14  ;;  %4462 = vmatprep.mubr.msk.bf16.mxu0 %vm5045_vm1, %v5044_v1 }
  0xb6   : > { %4380 = vmatprep.mubr.msk.bf16.mxu1 %vm5045_vm1, %v5044_v1 }
  0xbc   : > { %4463 = vmatmul.mubr.msk.bf16.gmra.mxu0 %vm375_vm2, %v5366_v19 }
  0xbd   : > { %4381 = vmatmul.mubr.msk.bf16.gmra.mxu1 %vm375_vm2, %v299_v20  ;;  %4466 = vmatprep.mubr.msk.bf16.mxu0 %vm5045_vm1, %v5044_v1  ;;  %v281_v20 = vld [vmem:[%s5110_s29 + $0x11d] sm:$0xff] }
  0xbe   : > { %4384 = vmatprep.mubr.msk.bf16.mxu1 %vm5045_vm1, %v5044_v1 }
  0xc4   : > { %4467 = vmatmul.mubr.msk.bf16.gmra.mxu0 %vm375_vm2, %v5379_v25 }
  0xc5   : > { %4385 = vmatmul.mubr.msk.bf16.gmra.mxu1 %vm375_vm2, %v300_v26  ;;  %4470 = vmatprep.mubr.msk.bf16.mxu0 %vm5045_vm1, %v5044_v1  ;;  %v305_v26 = vpack.c.bf16 %v281_v20, %v280_v18  ;;  %v947_v20 = vld [vmem:[%s5110_s29 + $0x137] sm:$0xff] }
  0xc6   : > { %4388 = vmatprep.mubr.msk.bf16.mxu1 %vm5045_vm1, %v5044_v1 }
  0xcc   : > { %4471 = vmatmul.mubr.msk.bf16.gmra.mxu0 %vm375_vm2, %v5392_v32 }
  0xcd   : > { %4389 = vmatmul.mubr.msk.bf16.gmra.mxu1 %vm375_vm2, %v301_v33  ;;  %4474 = vmatprep.mubr.msk.bf16.mxu0 %vm5045_vm1, %v5044_v1  ;;  %v943_v33 = vld [vmem:[%s5110_s29 + $0x117] sm:$0xff] }
  0xce   : > { %4392 = vmatprep.mubr.msk.bf16.mxu1 %vm5045_vm1, %v5044_v1  ;;  %v5487_v45 = vpack.c.bf16 %v944_v35, %v943_v33 }
  0xd4   : > { %v5407_v42 = vpop.f32.mrf.mxu0  ;;  %4475 = vmatmul.mubr.msk.bf16.gmra.mxu0 %vm375_vm2, %v5405_v39 }
  0xd5   : > { %v5411_v43 = vpop.f32.mrf.mxu1  ;;  %4393 = vmatmul.mubr.msk.bf16.gmra.mxu1 %vm375_vm2, %v302_v41  ;;  %4478 = vmatprep.mubr.msk.bf16.mxu0 %vm5045_vm1, %v5044_v1 }
  0xd6   : > { %v4252_v47 = vpop.f32.mrf.mxu0  ;;  %4396 = vmatprep.mubr.msk.bf16.mxu1 %vm5045_vm1, %v5044_v1 }
  0xd7   : > { %v4296_v50 = vpop.f32.mrf.mxu1 }
  0xd8   : > { %v5422_v51 = vpop.f32.mrf.mxu0 }
  0xd9   : > { %v5426_v54 = vpop.f32.mrf.mxu1 }
  0xda   : > { %v4253_v56 = vpop.f32.mrf.mxu0 }
  0xdb   : > { %v4297_v57 = vpop.f32.mrf.mxu1 }
  0xdc   : > { %v5428_v59 = vpop.f32.mrf.mxu0  ;;  %4479 = vmatmul.mubr.msk.bf16.gmra.mxu0 %vm375_vm2, %v5424_v53  ;;  %v945_v57 = vld [vmem:[%s5110_s29 + $0x127] sm:$0xff] }
  0xdd   : > { %v5432_v60 = vpop.f32.mrf.mxu1  ;;  %4397 = vmatmul.mubr.msk.bf16.gmra.mxu1 %vm375_vm2, %v303_v55  ;;  %4482 = vmatprep.mubr.msk.bf16.mxu0 %vm5045_vm1, %v5044_v1 }
  0xde   : > { %v4256_v63 = vpop.f32.mrf.mxu0  ;;  %4400 = vmatprep.mubr.msk.bf16.mxu1 %vm5045_vm1, %v5044_v1 }
  0xdf   : > { %v4300_v4 = vpop.f32.mrf.mxu1  ;;  %v284_v63 = vld [vmem:[%s5110_s29 + $0x135] sm:$0xff] }
  0xe0   : > { %v5443_v5 = vpop.f32.mrf.mxu0 }
  0xe1   : > { %v5447_v8 = vpop.f32.mrf.mxu1 }
  0xe2   : > { %v4257_v10 = vpop.f32.mrf.mxu0 }
  0xe3   : > { %v4301_v11 = vpop.f32.mrf.mxu1 }
  0xe4   : > { %v5449_v12 = vpop.f32.mrf.mxu0  ;;  %4483 = vmatmul.mubr.msk.bf16.gmra.mxu0 %vm375_vm2, %v5445_v6  ;;  %v307_v11 = vpack.c.bf16 %v285_v2, %v284_v63 }
  0xe5   : > { %v5453_v14 = vpop.f32.mrf.mxu1  ;;  %4401 = vmatmul.mubr.msk.bf16.gmra.mxu1 %vm375_vm2, %v304_v9  ;;  %4486 = vmatprep.mubr.msk.bf16.mxu0 %vm5045_vm1, %v5044_v1  ;;  %v5508_v9 = vpack.c.bf16 %v946_v61, %v945_v57  ;;  %v949_v57 = vld [vmem:[%s5110_s29 + $0x147] sm:$0xf] }
  0xe6   : > { %v4260_v17 = vpop.f32.mrf.mxu0  ;;  %4404 = vmatprep.mubr.msk.bf16.mxu1 %vm5045_vm1, %v5044_v1 }
  0xe7   : > { %v4304_v21 = vpop.f32.mrf.mxu1 }
  0xe8   : > { %v5464_v22 = vpop.f32.mrf.mxu0  ;;  %v948_v21 = vld [vmem:[%s5110_s29 + $0x13f] sm:$0xff] }
  0xe9   : > { %v5468_v24 = vpop.f32.mrf.mxu1  ;;  %v5528_v35 = vpack.c.bf16 %v948_v21, %v947_v20  ;;  %v3980_v21 = vld [vmem:[%s6799_s1 + $0x18] sm:$0xf] }
  0xea   : > { %v4261_v27 = vpop.f32.mrf.mxu0 }
  0xeb   : > { %v4305_v29 = vpop.f32.mrf.mxu1  ;;  %v286_v27 = vld [vmem:[%s5110_s29 + $0x145] sm:$0xf] }
  0xec   : > { %v5470_v30 = vpop.f32.mrf.mxu0  ;;  %4487 = vmatmul.mubr.msk.bf16.gmra.mxu0 %vm375_vm2, %v5466_v23  ;;  %v308_v37 = vpack.c.bf16 %v286_v27, %v286_v27 }
  0xed   : > { %v5474_v31 = vpop.f32.mrf.mxu1  ;;  %4405 = vmatmul.mubr.msk.bf16.gmra.mxu1 %vm375_vm2, %v305_v26  ;;  %4490 = vmatprep.mubr.msk.bf16.mxu0 %vm5045_vm1, %v5044_v1 }
  0xee   : > { %v4264_v36 = vpop.f32.mrf.mxu0  ;;  %4408 = vmatprep.mubr.msk.bf16.mxu1 %vm5045_vm1, %v5044_v1 }
  0xef   : > { %v4308_v41 = vpop.f32.mrf.mxu1 }
  0xf0   : > { %v5485_v44 = vpop.f32.mrf.mxu0 }
  0xf1   : > { %v5489_v47 = vpop.f32.mrf.mxu1 }
  0xf2   : > { %v4265_v49 = vpop.f32.mrf.mxu0 }
  0xf3   : > { %v4309_v50 = vpop.f32.mrf.mxu1  ;;  %v3958_v49 = vld [vmem:[%s6799_s1 + $0x14] sm:$0xf] }
  0xf4   : > { %v5491_v55 = vpop.f32.mrf.mxu0  ;;  %4491 = vmatmul.mubr.msk.bf16.gmra.mxu0 %vm375_vm2, %v5487_v45  ;;  %v2089_v63 = vpack.c.bf16 %v3958_v49, %v3958_v49 }
  0xf5   : > { %v5495_v56 = vpop.f32.mrf.mxu1  ;;  %4409 = vmatmul.mubr.msk.bf16.gmra.mxu1 %vm375_vm2, %v306_v48  ;;  %4494 = vmatprep.mubr.msk.bf16.mxu0 %vm5045_vm1, %v5044_v1 }
  0xf6   : > { %v4268_v62 = vpop.f32.mrf.mxu0  ;;  %4412 = vmatprep.mubr.msk.bf16.mxu1 %vm5045_vm1, %v5044_v1  ;;  %v2154_v20 = vsel %vm439_vm0, %v2089_v63, 0 }
  0xf7   : > { %v4312_v3 = vpop.f32.mrf.mxu1 }
  0xf8   : > { %v5506_v4 = vpop.f32.mrf.mxu0  ;;  %v972_v3 = vpack.c.bf16 %v949_v57, %v949_v57 }
  0xf9   : > { %v5510_v10 = vpop.f32.mrf.mxu1 }
  0xfa   : > { %v4269_v15 = vpop.f32.mrf.mxu0 }
  0xfb   : > { %v4313_v16 = vpop.f32.mrf.mxu1 }
  0xfc   : > { %v5512_v17 = vpop.f32.mrf.mxu0  ;;  %4495 = vmatmul.mubr.msk.bf16.gmra.mxu0 %vm375_vm2, %v5508_v9 }
  0xfd   : > { %v5516_v18 = vpop.f32.mrf.mxu1  ;;  %4413 = vmatmul.mubr.msk.bf16.gmra.mxu1 %vm375_vm2, %v307_v11  ;;  %4498 = vmatprep.mubr.msk.bf16.mxu0 %vm5045_vm1, %v5044_v1 }
  0xfe   : > { %v4272_v26 = vpop.f32.mrf.mxu0  ;;  %4416 = vmatprep.mubr.msk.bf16.mxu1 %vm5045_vm1, %v5044_v1 }
  0xff   : > { %v4316_v29 = vpop.f32.mrf.mxu1 }
 0x100   : > { %v5526_v33 = vpop.f32.mrf.mxu0  ;;  %v1653_v29 = vld [vmem:[%s5110_s29 + $0x18] sm:$0xff] }
 0x101   : > { %v5530_v36 = vpop.f32.mrf.mxu1 }
 0x102   : > { %v4273_v38 = vpop.f32.mrf.mxu0 }
 0x103   : > { %v4317_v41 = vpop.f32.mrf.mxu1 }
 0x104   : > { %v5532_v48 = vpop.f32.mrf.mxu0  ;;  %4499 = vmatmul.mubr.msk.bf16.gmra.mxu0 %vm375_vm2, %v5528_v35  ;;  %v2461_v41 = vpack.c.bf16 %v3980_v21, %v3980_v21  ;;  %v1656_v21 = vld [vmem:[%s5110_s29 + $0x30] sm:$0xff] }
 0x105   : > { %v5539_v50 = vpop.f32.mrf.mxu1  ;;  %4417 = vmatmul.mubr.msk.bf16.gmra.mxu1 %vm375_vm2, %v308_v37  ;;  %4502 = vmatprep.mubr.msk.bf16.mxu0 %vm5045_vm1, %v5044_v1  ;;  %v1654_v37 = vld [vmem:[%s5110_s29 + $0x20] sm:$0xff] }
 0x106   : > { %6804 = vst [vmem:[#allocation2_spill] sm:$0xff] %v5539_v50  ;;  %v4276_v61 = vpop.f32.mrf.mxu0  ;;  %4508 = vmatprep.mubr.msk.bf16.mxu1 %vm5045_vm1, %v5044_v1  ;;  %v2526_v63 = vsel %vm439_vm0, %v2461_v41, 0 }
 0x107   : > { %v4320_v62 = vpop.f32.mrf.mxu1  ;;  %v1696_v61 = vpack.c.bf16 %v1654_v37, %v1653_v29 }
 0x108   : > { %v5547_v2 = vpop.f32.mrf.mxu0 }
 0x109   : > { %v5549_v11 = vpop.f32.mrf.mxu1 }
 0x10a   : > { %6805 = vst [vmem:[#allocation3_spill] sm:$0xff] %v5549_v11  ;;  %v4277_v15 = vpop.f32.mrf.mxu0 }
 0x10b   : > { %v4321_v16 = vpop.f32.mrf.mxu1 }
 0x10c   : > { %v5555_v26 = vpop.f32.mrf.mxu0  ;;  %4503 = vmatmul.mubr.msk.bf16.gmra.mxu0 %vm375_vm2, %v972_v3 }
 0x10d   : > { %v5558_v27 = vpop.f32.mrf.mxu1  ;;  %4509 = vmatmul.mubr.msk.bf16.vlgmr.msra.gmra.mxu1 %vm375_vm2, %v5249_v28  ;;  %4594 = vmatprep.mubr.msk.bf16.mxu0 %vm5045_vm1, %v5044_v1 }
 0x10e   : > { %6806 = vst [vmem:[#allocation4_spill] sm:$0xff] %v5558_v27  ;;  %v4280_v38 = vpop.f32.mrf.mxu0  ;;  %4679 = vmatpush3.bf16.msra.mxu1 %v2154_v20  ;;  %4512 = vmatprep.mubr.msk.bf16.mxu1 %vm5045_vm1, %v5044_v1  ;;  %v1655_v20 = vld [vmem:[%s5110_s29 + $0x28] sm:$0xff] }
 0x10f   : > { %v4324_v49 = vpop.f32.mrf.mxu1  ;;  %4850 = vmatprep.subr.bf16.mxu1 %v5044_v1  ;;  %v1697_v41 = vpack.c.bf16 %v1656_v21, %v1655_v20  ;;  %v1658_v20 = vld [vmem:[%s5110_s29 + $0x40] sm:$0xff] }
 0x110   : > { %v5569_v57 = vpop.f32.mrf.mxu0 }
 0x111   : > { %v5571_v28 = vpop.f32.mrf.mxu1 }
 0x112   : > { %6807 = vst [vmem:[#allocation5_spill] sm:$0xff] %v5571_v28  ;;  %v4281_v62 = vpop.f32.mrf.mxu0 }
 0x113   : > { %v4325_v3 = vpop.f32.mrf.mxu1 }
 0x114   : > { %v5574_v15 = vpop.f32.mrf.mxu0  ;;  %4595 = vmatmul.mubr.msk.bf16.vlgmr.msra.gmra.mxu0 %vm375_vm2, %v1696_v61  ;;  %v1657_v3 = vld [vmem:[%s5110_s29 + $0x38] sm:$0xff] }
 0x115   : > { %v5577_v16 = vpop.f32.mrf.mxu1  ;;  %4513 = vmatmul.mubr.msk.bf16.gmra.mxu1 %vm375_vm2, %v5262_v34  ;;  %4765 = vmatpush3.bf16.msra.mxu0 %v2526_v63 }
 0x116   : > { %6808 = vst [vmem:[#allocation6_spill] sm:$0xff] %v5577_v16  ;;  %v4284_v29 = vpop.f32.mrf.mxu0  ;;  %4516 = vmatprep.mubr.msk.bf16.mxu1 %vm5045_vm1, %v5044_v1  ;;  %4598 = vmatprep.mubr.msk.bf16.mxu0 %vm5045_vm1, %v5044_v1  ;;  %v1660_v16 = vld [vmem:[%s5110_s29 + $0x50] sm:$0xff] }
 0x117   : > { %v4328_v37 = vpop.f32.mrf.mxu1  ;;  %4936 = vmatprep.subr.bf16.mxu0 %v5044_v1 }
 0x118   : > { %v5588_v38 = vpop.f32.mrf.mxu0 }
 0x119   : > { %v5590_v49 = vpop.f32.mrf.mxu1 }
 0x11a   : > { %6809 = vst [vmem:[#allocation7_spill] sm:$0xff] %v5590_v49  ;;  %v4285_v34 = vpop.f32.mrf.mxu0 }
 0x11b   : > { %v4329_v61 = vpop.f32.mrf.mxu1 }
 0x11c   : > { %v5592_v62 = vpop.f32.mrf.mxu0  ;;  %4599 = vmatmul.mubr.msk.bf16.gmra.mxu0 %vm375_vm2, %v1697_v41  ;;  %v1698_v41 = vpack.c.bf16 %v1658_v20, %v1657_v3 }
 0x11d   : > { %v5595_v63 = vpop.f32.mrf.mxu1  ;;  %4517 = vmatmul.mubr.msk.bf16.gmra.mxu1 %vm375_vm2, %v5275_v40  ;;  %4602 = vmatprep.mubr.msk.bf16.mxu0 %vm5045_vm1, %v5044_v1 }
 0x11e   : > { %6810 = vst [vmem:[#allocation8_spill] sm:$0xff] %v5595_v63  ;;  %v4288_v21 = vpop.f32.mrf.mxu0  ;;  %4520 = vmatprep.mubr.msk.bf16.mxu1 %vm5045_vm1, %v5044_v1 }
 0x11f   : > { %v4332_v29 = vpop.f32.mrf.mxu1  ;;  %v1659_v21 = vld [vmem:[%s5110_s29 + $0x48] sm:$0xff] }
 0x120   : > { %v5605_v37 = vpop.f32.mrf.mxu0  ;;  %v1699_v20 = vpack.c.bf16 %v1660_v16, %v1659_v21 }
 0x121   : > { %v640_v34 = vpop.f32.mrf.mxu1 }
 0x122   : > { %v4289_v61 = vpop.f32.mrf.mxu0 }
 0x123   : > { %v4333_v63 = vpop.f32.mrf.mxu1 }
 0x124   : > { %v5607_v49 = vpop.f32.mrf.mxu0  ;;  %4603 = vmatmul.mubr.msk.bf16.gmra.mxu0 %vm375_vm2, %v1698_v41 }
 0x125   : > { %v743_v40 = vpop.f32.mrf.mxu1  ;;  %4521 = vmatmul.mubr.msk.bf16.gmra.mxu1 %vm375_vm2, %v5288_v46  ;;  %4606 = vmatprep.mubr.msk.bf16.mxu0 %vm5045_vm1, %v5044_v1 }
 0x126   : > { %v4292_v29 = vpop.f32.mrf.mxu0  ;;  %4524 = vmatprep.mubr.msk.bf16.mxu1 %vm5045_vm1, %v5044_v1  ;;  %v744_v61 = vadd.f32 %v743_v40, %v5407_v42 }
 0x127   : > { %v4338_v63 = vpop.f32.mrf.mxu1  ;;  %v1661_v29 = vld [vmem:[%s5110_s29 + $0x58] sm:$0xff] }
 0x128   : > { %v5618_v3 = vpop.f32.mrf.mxu0  ;;  %v1662_v63 = vld [vmem:[%s5110_s29 + $0x60] sm:$0xff] }
 0x129   : > { %v746_v41 = vpop.f32.mrf.mxu1 }
 0x12a   : > { %v4293_v34 = vpop.f32.mrf.mxu0  ;;  %v747_v42 = vadd.f32 %v746_v41, %v5422_v51  ;;  %v1663_v51 = vld [vmem:[%s5110_s29 + $0x68] sm:$0xff]  ;;  %v1664_v41 = vld [vmem:[%s5110_s29 + $0x70] sm:$0xff] }
 0x12b   : > { %v4339_v46 = vpop.f32.mrf.mxu1 }
 0x12c   : > { %v1074_v28 = vpop.f32.mrf.mxu0  ;;  %4607 = vmatmul.mubr.msk.bf16.gmra.mxu0 %vm375_vm2, %v1699_v20 }
 0x12d   : > { %v751_v27 = vpop.f32.mrf.mxu1  ;;  %v5622_v11 = vadd.f32 %v1074_v28, %v744_v61  ;;  %4525 = vmatmul.mubr.msk.bf16.gmra.mxu1 %vm375_vm2, %v5301_v52  ;;  %4610 = vmatprep.mubr.msk.bf16.mxu0 %vm5045_vm1, %v5044_v1  ;;  %v1700_v28 = vpack.c.bf16 %v1662_v63, %v1661_v29 }
 0x12e   : > { %v4424_v16 = vpop.f32.mrf.mxu0  ;;  %4528 = vmatprep.mubr.msk.bf16.mxu1 %vm5045_vm1, %v5044_v1  ;;  %v752_v61 = vadd.f32 %v751_v27, %v5428_v59 }
 0x12f   : > { %6811 = vst [vmem:[#allocation9_spill] sm:$0xff] %v5622_v11  ;;  %v4342_v40 = vpop.f32.mrf.mxu1 }
 0x130   : > { %v1077_v21 = vpop.f32.mrf.mxu0 }
 0x131   : > { %v754_v20 = vpop.f32.mrf.mxu1  ;;  %v5633_v34 = vadd.f32 %v1077_v21, %v747_v42 }
 0x132   : > { %v4425_v52 = vpop.f32.mrf.mxu0  ;;  %v755_v59 = vadd.f32 %v754_v20, %v5443_v5  ;;  %v1665_v5 = vld [vmem:[%s5110_s29 + $0x78] sm:$0xff]  ;;  %v1666_v20 = vld [vmem:[%s5110_s29 + $0x80] sm:$0xff] }
 0x133   : > { %v4343_v46 = vpop.f32.mrf.mxu1 }
 0x134   : > { %v1082_v11 = vpop.f32.mrf.mxu0  ;;  %4611 = vmatmul.mubr.msk.bf16.gmra.mxu0 %vm375_vm2, %v1700_v28 }
 0x135   : > { %v759_v16 = vpop.f32.mrf.mxu1  ;;  %v5637_v50 = vadd.f32 %v1082_v11, %v752_v61  ;;  %4529 = vmatmul.mubr.msk.bf16.gmra.mxu1 %vm375_vm2, %v5314_v58  ;;  %4614 = vmatprep.mubr.msk.bf16.mxu0 %vm5045_vm1, %v5044_v1  ;;  %v1701_v11 = vpack.c.bf16 %v1664_v41, %v1663_v51 }
 0x136   : > { %v4428_v29 = vpop.f32.mrf.mxu0  ;;  %4532 = vmatprep.mubr.msk.bf16.mxu1 %vm5045_vm1, %v5044_v1  ;;  %v760_v21 = vadd.f32 %v759_v16, %v5449_v12 }
 0x137   : > { %v4346_v27 = vpop.f32.mrf.mxu1  ;;  %v1702_v29 = vpack.c.bf16 %v1666_v20, %v1665_v5 }
 0x138   : > { %v1085_v63 = vpop.f32.mrf.mxu0 }
 0x139   : > { %v762_v42 = vpop.f32.mrf.mxu1  ;;  %v5648_v40 = vadd.f32 %v1085_v63, %v755_v59 }
 0x13a   : > { %v4429_v58 = vpop.f32.mrf.mxu0  ;;  %v763_v12 = vadd.f32 %v762_v42, %v5464_v22  ;;  %v1667_v22 = vld [vmem:[%s5110_s29 + $0x88] sm:$0xff]  ;;  %v1668_v42 = vld [vmem:[%s5110_s29 + $0x90] sm:$0xff] }
 0x13b   : > { %v4347_v28 = vpop.f32.mrf.mxu1  ;;  %v1703_v20 = vpack.c.bf16 %v1668_v42, %v1667_v22 }
 0x13c   : > { %v1090_v52 = vpop.f32.mrf.mxu0  ;;  %4615 = vmatmul.mubr.msk.bf16.gmra.mxu0 %vm375_vm2, %v1701_v11 }
 0x13d   : > { %v767_v61 = vpop.f32.mrf.mxu1  ;;  %v5652_v46 = vadd.f32 %v1090_v52, %v760_v21  ;;  %4533 = vmatmul.mubr.msk.bf16.gmra.mxu1 %vm375_vm2, %v5327_v0  ;;  %4618 = vmatprep.mubr.msk.bf16.mxu0 %vm5045_vm1, %v5044_v1 }
 0x13e   : > { %v4432_v51 = vpop.f32.mrf.mxu0  ;;  %4536 = vmatprep.mubr.msk.bf16.mxu1 %vm5045_vm1, %v5044_v1  ;;  %v768_v63 = vadd.f32 %v767_v61, %v5470_v30 }
 0x13f   : > { %v4350_v16 = vpop.f32.mrf.mxu1 }
 0x140   : > { %v1093_v41 = vpop.f32.mrf.mxu0 }
 0x141   : > { %v770_v59 = vpop.f32.mrf.mxu1  ;;  %v5663_v27 = vadd.f32 %v1093_v41, %v763_v12 }
 0x142   : > { %v4433_v0 = vpop.f32.mrf.mxu0  ;;  %v771_v30 = vadd.f32 %v770_v59, %v5485_v44  ;;  %v1669_v44 = vld [vmem:[%s5110_s29 + $0x98] sm:$0xff]  ;;  %v1670_v59 = vld [vmem:[%s5110_s29 + $0xa0] sm:$0xff] }
 0x143   : > { %v4351_v11 = vpop.f32.mrf.mxu1  ;;  %v1704_v22 = vpack.c.bf16 %v1670_v59, %v1669_v44 }
 0x144   : > { %v1098_v58 = vpop.f32.mrf.mxu0  ;;  %4619 = vmatmul.mubr.msk.bf16.gmra.mxu0 %vm375_vm2, %v1702_v29 }
 0x145   : > { %v775_v21 = vpop.f32.mrf.mxu1  ;;  %v5667_v28 = vadd.f32 %v1098_v58, %v768_v63  ;;  %4537 = vmatmul.mubr.msk.bf16.gmra.mxu1 %vm375_vm2, %v5340_v7  ;;  %4622 = vmatprep.mubr.msk.bf16.mxu0 %vm5045_vm1, %v5044_v1 }
 0x146   : > { %v4436_v52 = vpop.f32.mrf.mxu0  ;;  %4540 = vmatprep.mubr.msk.bf16.mxu1 %vm5045_vm1, %v5044_v1  ;;  %v776_v16 = vadd.f32 %v775_v21, %v5491_v55 }
 0x147   : > { %v4354_v61 = vpop.f32.mrf.mxu1 }
 0x148   : > { %v1101_v5 = vpop.f32.mrf.mxu0 }
 0x149   : > { %v778_v51 = vpop.f32.mrf.mxu1  ;;  %v5678_v12 = vadd.f32 %v1101_v5, %v771_v30 }
 0x14a   : > { %v4437_v7 = vpop.f32.mrf.mxu0  ;;  %v779_v55 = vadd.f32 %v778_v51, %v5506_v4  ;;  %v1671_v4 = vld [vmem:[%s5110_s29 + $0xa8] sm:$0xff]  ;;  %v1672_v51 = vld [vmem:[%s5110_s29 + $0xb0] sm:$0xff] }
 0x14b   : > { %v4355_v41 = vpop.f32.mrf.mxu1 }
 0x14c   : > { %v1106_v29 = vpop.f32.mrf.mxu0  ;;  %4623 = vmatmul.mubr.msk.bf16.gmra.mxu0 %vm375_vm2, %v1703_v20 }
 0x14d   : > { %v783_v0 = vpop.f32.mrf.mxu1  ;;  %v5682_v63 = vadd.f32 %v1106_v29, %v776_v16  ;;  %4541 = vmatmul.mubr.msk.bf16.gmra.mxu1 %vm375_vm2, %v5353_v13  ;;  %4626 = vmatprep.mubr.msk.bf16.mxu0 %vm5045_vm1, %v5044_v1 }
 0x14e   : > { %v4440_v11 = vpop.f32.mrf.mxu0  ;;  %4544 = vmatprep.mubr.msk.bf16.mxu1 %vm5045_vm1, %v5044_v1  ;;  %v784_v30 = vadd.f32 %v783_v0, %v5512_v17  ;;  %v1705_v0 = vpack.c.bf16 %v1672_v51, %v1671_v4 }
 0x14f   : > { %v4358_v58 = vpop.f32.mrf.mxu1 }
 0x150   : > { %v1109_v21 = vpop.f32.mrf.mxu0 }
 0x151   : > { %v786_v42 = vpop.f32.mrf.mxu1  ;;  %v5693_v52 = vadd.f32 %v1109_v21, %v779_v55 }
 0x152   : > { %v4441_v13 = vpop.f32.mrf.mxu0  ;;  %v787_v17 = vadd.f32 %v786_v42, %v5526_v33  ;;  %v1673_v33 = vld [vmem:[%s5110_s29 + $0xb8] sm:$0xff]  ;;  %v1674_v42 = vld [vmem:[%s5110_s29 + $0xc0] sm:$0xff] }
 0x153   : > { %v4359_v61 = vpop.f32.mrf.mxu1 }
 0x154   : > { %v1114_v5 = vpop.f32.mrf.mxu0  ;;  %4627 = vmatmul.mubr.msk.bf16.gmra.mxu0 %vm375_vm2, %v1704_v22 }
 0x155   : > { %v791_v20 = vpop.f32.mrf.mxu1  ;;  %v5697_v7 = vadd.f32 %v1114_v5, %v784_v30  ;;  %4545 = vmatmul.mubr.msk.bf16.gmra.mxu1 %vm375_vm2, %v5366_v19  ;;  %4630 = vmatprep.mubr.msk.bf16.mxu0 %vm5045_vm1, %v5044_v1  ;;  %v1706_v5 = vpack.c.bf16 %v1674_v42, %v1673_v33 }
 0x156   : > { %v4444_v16 = vpop.f32.mrf.mxu0  ;;  %4548 = vmatprep.mubr.msk.bf16.mxu1 %vm5045_vm1, %v5044_v1  ;;  %v792_v11 = vadd.f32 %v791_v20, %v5532_v48 }
 0x157   : > { %v4362_v41 = vpop.f32.mrf.mxu1 }
 0x158   : > { %v1117_v29 = vpop.f32.mrf.mxu0 }
 0x159   : > { %v794_v44 = vpop.f32.mrf.mxu1  ;;  %v5708_v59 = vadd.f32 %v1117_v29, %v787_v17 }
 0x15a   : > { %v4445_v19 = vpop.f32.mrf.mxu0  ;;  %v795_v48 = vadd.f32 %v794_v44, %v5547_v2  ;;  %v1675_v2 = vld [vmem:[%s5110_s29 + $0xc8] sm:$0xff] }
 0x15b   : > { %v4363_v55 = vpop.f32.mrf.mxu1 }
 0x15c   : > { %v1122_v58 = vpop.f32.mrf.mxu0  ;;  %4631 = vmatmul.mubr.msk.bf16.gmra.mxu0 %vm375_vm2, %v1705_v0  ;;  %v1676_v0 = vld [vmem:[%s5110_s29 + $0xd0] sm:$0xff] }
 0x15d   : > { %v799_v21 = vpop.f32.mrf.mxu1  ;;  %v5712_v22 = vadd.f32 %v1122_v58, %v792_v11  ;;  %4549 = vmatmul.mubr.msk.bf16.gmra.mxu1 %vm375_vm2, %v5379_v25  ;;  %4634 = vmatprep.mubr.msk.bf16.mxu0 %vm5045_vm1, %v5044_v1  ;;  %v1707_v55 = vpack.c.bf16 %v1676_v0, %v1675_v2 }
 0x15e   : > { %v4448_v13 = vpop.f32.mrf.mxu0  ;;  %4552 = vmatprep.mubr.msk.bf16.mxu1 %vm5045_vm1, %v5044_v1  ;;  %v800_v51 = vadd.f32 %v799_v21, %v5555_v26 }
 0x15f   : > { %v4366_v30 = vpop.f32.mrf.mxu1 }
 0x160   : > { %v1125_v61 = vpop.f32.mrf.mxu0 }
 0x161   : > { %v802_v20 = vpop.f32.mrf.mxu1  ;;  %v5723_v4 = vadd.f32 %v1125_v61, %v795_v48  ;;  %v1678_v61 = vld [vmem:[%s5110_s29 + $0xe0] sm:$0xff] }
 0x162   : > { %v4449_v25 = vpop.f32.mrf.mxu0  ;;  %v803_v26 = vadd.f32 %v802_v20, %v5569_v57  ;;  %v1677_v57 = vld [vmem:[%s5110_s29 + $0xd8] sm:$0xff] }
 0x163   : > { %v4367_v16 = vpop.f32.mrf.mxu1 }
 0x164   : > { %v1130_v17 = vpop.f32.mrf.mxu0  ;;  %4635 = vmatmul.mubr.msk.bf16.gmra.mxu0 %vm375_vm2, %v1706_v5 }
 0x165   : > { %v807_v41 = vpop.f32.mrf.mxu1  ;;  %v5727_v29 = vadd.f32 %v1130_v17, %v800_v51  ;;  %4553 = vmatmul.mubr.msk.bf16.gmra.mxu1 %vm375_vm2, %v5392_v32  ;;  %4638 = vmatprep.mubr.msk.bf16.mxu0 %vm5045_vm1, %v5044_v1  ;;  %v1708_v51 = vpack.c.bf16 %v1678_v61, %v1677_v57 }
 0x166   : > { %v4452_v44 = vpop.f32.mrf.mxu0  ;;  %4556 = vmatprep.mubr.msk.bf16.mxu1 %vm5045_vm1, %v5044_v1  ;;  %v808_v33 = vadd.f32 %v807_v41, %v5574_v15 }
 0x167   : > { %v4370_v19 = vpop.f32.mrf.mxu1 }
 0x168   : > { %v1133_v11 = vpop.f32.mrf.mxu0  ;;  %v1680_v19 = vld [vmem:[%s5110_s29 + $0xf0] sm:$0xff] }
 0x169   : > { %v810_v58 = vpop.f32.mrf.mxu1  ;;  %v5738_v21 = vadd.f32 %v1133_v11, %v803_v26 }
 0x16a   : > { %v4453_v32 = vpop.f32.mrf.mxu0  ;;  %v811_v15 = vadd.f32 %v810_v58, %v5588_v38  ;;  %v1679_v38 = vld [vmem:[%s5110_s29 + $0xe8] sm:$0xff] }
 0x16b   : > { %v4371_v42 = vpop.f32.mrf.mxu1  ;;  %v1709_v32 = vpack.c.bf16 %v1680_v19, %v1679_v38 }
 0x16c   : > { %v1138_v13 = vpop.f32.mrf.mxu0  ;;  %4639 = vmatmul.mubr.msk.bf16.gmra.mxu0 %vm375_vm2, %v1707_v55 }
 0x16d   : > { %v815_v48 = vpop.f32.mrf.mxu1  ;;  %v5742_v30 = vadd.f32 %v1138_v13, %v808_v33  ;;  %4557 = vmatmul.mubr.msk.bf16.gmra.mxu1 %vm375_vm2, %v5405_v39  ;;  %4642 = vmatprep.mubr.msk.bf16.mxu0 %vm5045_vm1, %v5044_v1 }
 0x16e   : > { %v4456_v5 = vpop.f32.mrf.mxu0  ;;  %4560 = vmatprep.mubr.msk.bf16.mxu1 %vm5045_vm1, %v5044_v1  ;;  %v816_v41 = vadd.f32 %v815_v48, %v5592_v62 }
 0x16f   : > { %v4374_v20 = vpop.f32.mrf.mxu1 }
 0x170   : > { %v1141_v25 = vpop.f32.mrf.mxu0 }
 0x171   : > { %v818_v16 = vpop.f32.mrf.mxu1  ;;  %v5753_v17 = vadd.f32 %v1141_v25, %v811_v15  ;;  %v1682_v15 = vld [vmem:[%s5110_s29 + $0x100] sm:$0xff] }
 0x172   : > { %v4457_v39 = vpop.f32.mrf.mxu0  ;;  %v819_v62 = vadd.f32 %v818_v16, %v5605_v37  ;;  %v1681_v37 = vld [vmem:[%s5110_s29 + $0xf8] sm:$0xff] }
 0x173   : > { %v4375_v2 = vpop.f32.mrf.mxu1  ;;  %v1710_v16 = vpack.c.bf16 %v1682_v15, %v1681_v37  ;;  %v1686_v15 = vld [vmem:[%s5110_s29 + $0x120] sm:$0xff] }
 0x174   : > { %v1146_v0 = vpop.f32.mrf.mxu0  ;;  %4643 = vmatmul.mubr.msk.bf16.gmra.mxu0 %vm375_vm2, %v1708_v51 }
 0x175   : > { %v823_v44 = vpop.f32.mrf.mxu1  ;;  %v5757_v26 = vadd.f32 %v1146_v0, %v816_v41  ;;  %4561 = vmatmul.mubr.msk.bf16.gmra.mxu1 %vm375_vm2, %v5424_v53  ;;  %4646 = vmatprep.mubr.msk.bf16.mxu0 %vm5045_vm1, %v5044_v1 }
 0x176   : > { %v4460_v11 = vpop.f32.mrf.mxu0  ;;  %4564 = vmatprep.mubr.msk.bf16.mxu1 %vm5045_vm1, %v5044_v1  ;;  %v824_v13 = vadd.f32 %v823_v44, %v5607_v49 }
 0x177   : > { %v4378_v55 = vpop.f32.mrf.mxu1  ;;  %v1684_v11 = vld [vmem:[%s5110_s29 + $0x110] sm:$0xff] }
 0x178   : > { %v1149_v58 = vpop.f32.mrf.mxu0 }
 0x179   : > { %v826_v33 = vpop.f32.mrf.mxu1  ;;  %v5768_v42 = vadd.f32 %v1149_v58, %v819_v62 }
 0x17a   : > { %v4461_v53 = vpop.f32.mrf.mxu0  ;;  %v827_v49 = vadd.f32 %v826_v33, %v5618_v3  ;;  %v1683_v3 = vld [vmem:[%s5110_s29 + $0x108] sm:$0xff] }
 0x17b   : > { %v4379_v48 = vpop.f32.mrf.mxu1 }
 0x17c   : > { %v1154_v57 = vpop.f32.mrf.mxu0  ;;  %4647 = vmatmul.mubr.msk.bf16.gmra.mxu0 %vm375_vm2, %v1709_v32  ;;  %v1711_v32 = vpack.c.bf16 %v1684_v11, %v1683_v3  ;;  %v1688_v3 = vld [vmem:[%s5110_s29 + $0x130] sm:$0xff] }
 0x17d   : > { %v831_v61 = vpop.f32.mrf.mxu1  ;;  %v5772_v5 = vadd.f32 %v1154_v57, %v824_v13  ;;  %4565 = vmatmul.mubr.msk.bf16.gmra.mxu1 %vm375_vm2, %v5445_v6  ;;  %4650 = vmatprep.mubr.msk.bf16.mxu0 %vm5045_vm1, %v5044_v1 }
 0x17e   : > { %v4464_v20 = vpop.f32.mrf.mxu0  ;;  %4568 = vmatprep.mubr.msk.bf16.mxu1 %vm5045_vm1, %v5044_v1  ;;  %v832_v2 = vadd.f32 %v831_v61, %v5411_v43 }
 0x17f   : > { %v4382_v25 = vpop.f32.mrf.mxu1 }
 0x180   : > { %v1157_v51 = vpop.f32.mrf.mxu0 }
 0x181   : > { %v834_v39 = vpop.f32.mrf.mxu1  ;;  %v5783_v41 = vadd.f32 %v1157_v51, %v827_v49 }
 0x182   : > { %v4465_v6 = vpop.f32.mrf.mxu0  ;;  %v835_v43 = vadd.f32 %v834_v39, %v5426_v54  ;;  %v1685_v54 = vld [vmem:[%s5110_s29 + $0x118] sm:$0xff] }
 0x183   : > { %v4383_v0 = vpop.f32.mrf.mxu1  ;;  %v1712_v51 = vpack.c.bf16 %v1686_v15, %v1685_v54  ;;  %v1320_v15 = vld [vmem:[%s5110_s29 + $0x14f] sm:$0xff] }
 0x184   : > { %v1162_v44 = vpop.f32.mrf.mxu0  ;;  %4651 = vmatmul.mubr.msk.bf16.gmra.mxu0 %vm375_vm2, %v1710_v16 }
 0x185   : > { %v839_v38 = vpop.f32.mrf.mxu1  ;;  %v5787_v19 = vadd.f32 %v1162_v44, %v832_v2  ;;  %4569 = vmatmul.mubr.msk.bf16.gmra.mxu1 %vm375_vm2, %v5466_v23  ;;  %4654 = vmatprep.mubr.msk.bf16.mxu0 %vm5045_vm1, %v5044_v1 }
 0x186   : > { %v4468_v62 = vpop.f32.mrf.mxu0  ;;  %4572 = vmatprep.mubr.msk.bf16.mxu1 %vm5045_vm1, %v5044_v1  ;;  %v840_v13 = vadd.f32 %v839_v38, %v5432_v60 }
 0x187   : > { %v4386_v55 = vpop.f32.mrf.mxu1 }
 0x188   : > { %v1165_v58 = vpop.f32.mrf.mxu0 }
 0x189   : > { %v842_v33 = vpop.f32.mrf.mxu1  ;;  %v5798_v53 = vadd.f32 %v1165_v58, %v835_v43 }
 0x18a   : > { %v4469_v23 = vpop.f32.mrf.mxu0  ;;  %v843_v60 = vadd.f32 %v842_v33, %v5447_v8  ;;  %v1687_v8 = vld [vmem:[%s5110_s29 + $0x128] sm:$0xff] }
 0x18b   : > { %v4387_v48 = vpop.f32.mrf.mxu1  ;;  %v1713_v55 = vpack.c.bf16 %v1688_v3, %v1687_v8  ;;  %v1692_v3 = vld [vmem:[%s5110_s29 + $0x150] sm:$0xff] }
 0x18c   : > { %v1170_v57 = vpop.f32.mrf.mxu0  ;;  %4655 = vmatmul.mubr.msk.bf16.gmra.mxu0 %vm375_vm2, %v1711_v32 }
 0x18d   : > { %v847_v61 = vpop.f32.mrf.mxu1  ;;  %v5802_v37 = vadd.f32 %v1170_v57, %v840_v13  ;;  %4573 = vmatmul.mubr.msk.bf16.gmra.mxu1 %vm375_vm2, %v5487_v45  ;;  %4658 = vmatprep.mubr.msk.bf16.mxu0 %vm5045_vm1, %v5044_v1 }
 0x18e   : > { %v4472_v20 = vpop.f32.mrf.mxu0  ;;  %4576 = vmatprep.mubr.msk.bf16.mxu1 %vm5045_vm1, %v5044_v1  ;;  %v848_v6 = vadd.f32 %v847_v61, %v5453_v14  ;;  %v1690_v61 = vld [vmem:[%s5110_s29 + $0x140] sm:$0xff] }
 0x18f   : > { %v4390_v49 = vpop.f32.mrf.mxu1 }
 0x190   : > { %v1173_v25 = vpop.f32.mrf.mxu0 }
 0x191   : > { %v850_v16 = vpop.f32.mrf.mxu1  ;;  %v5813_v39 = vadd.f32 %v1173_v25, %v843_v60 }
 0x192   : > { %v4473_v45 = vpop.f32.mrf.mxu0  ;;  %v851_v14 = vadd.f32 %v850_v16, %v5468_v24  ;;  %v1689_v24 = vld [vmem:[%s5110_s29 + $0x138] sm:$0xff] }
 0x193   : > { %v4391_v2 = vpop.f32.mrf.mxu1  ;;  %v1714_v25 = vpack.c.bf16 %v1690_v61, %v1689_v24 }
 0x194   : > { %v1178_v0 = vpop.f32.mrf.mxu0  ;;  %4659 = vmatmul.mubr.msk.bf16.gmra.mxu0 %vm375_vm2, %v1712_v51 }
 0x195   : > { %v855_v44 = vpop.f32.mrf.mxu1  ;;  %v5817_v38 = vadd.f32 %v1178_v0, %v848_v6  ;;  %4577 = vmatmul.mubr.msk.bf16.gmra.mxu1 %vm375_vm2, %v5508_v9  ;;  %4662 = vmatprep.mubr.msk.bf16.mxu0 %vm5045_vm1, %v5044_v1 }
 0x196   : > { %v4476_v11 = vpop.f32.mrf.mxu0  ;;  %4580 = vmatprep.mubr.msk.bf16.mxu1 %vm5045_vm1, %v5044_v1  ;;  %v856_v33 = vadd.f32 %v855_v44, %v5474_v31  ;;  %v1319_v31 = vld [vmem:[%s5110_s29 + $0x147] sm:$0xff] }
 0x197   : > { %v4394_v62 = vpop.f32.mrf.mxu1  ;;  %v1343_v16 = vpack.c.bf16 %v1320_v15, %v1319_v31  ;;  %v1693_v31 = vld [vmem:[%s5110_s29 + $0x158] sm:$0xf] }
 0x198   : > { %v1181_v43 = vpop.f32.mrf.mxu0 }
 0x199   : > { %v858_v58 = vpop.f32.mrf.mxu1  ;;  %v5828_v9 = vadd.f32 %v1181_v43, %v851_v14  ;;  %v1321_v14 = vld [vmem:[%s5110_s29 + $0x157] sm:$0xf] }
 0x19a   : > { %v4477_v32 = vpop.f32.mrf.mxu0  ;;  %v859_v20 = vadd.f32 %v858_v58, %v5489_v47  ;;  %v1691_v47 = vld [vmem:[%s5110_s29 + $0x148] sm:$0xff] }
 0x19b   : > { %v4395_v23 = vpop.f32.mrf.mxu1 }
 0x19c   : > { %v1186_v13 = vpop.f32.mrf.mxu0  ;;  %4663 = vmatmul.mubr.msk.bf16.gmra.mxu0 %vm375_vm2, %v1713_v55  ;;  %v1715_v55 = vpack.c.bf16 %v1692_v3, %v1691_v47 }
 0x19d   : > { %v863_v48 = vpop.f32.mrf.mxu1  ;;  %v5832_v57 = vadd.f32 %v1186_v13, %v856_v33  ;;  %4581 = vmatmul.mubr.msk.bf16.gmra.mxu1 %vm375_vm2, %v5528_v35  ;;  %4666 = vmatprep.mubr.msk.bf16.mxu0 %vm5045_vm1, %v5044_v1  ;;  %v1344_v33 = vpack.c.bf16 %v1321_v14, %v1321_v14 }
 0x19e   : > { %v4480_v54 = vpop.f32.mrf.mxu0  ;;  %4584 = vmatprep.mubr.msk.bf16.mxu1 %vm5045_vm1, %v5044_v1  ;;  %v864_v6 = vadd.f32 %v863_v48, %v5495_v56 }
 0x19f   : > { %v4398_v60 = vpop.f32.mrf.mxu1 }
 0x1a0   : > { %v1189_v49 = vpop.f32.mrf.mxu0 }
 0x1a1   : > { %v866_v51 = vpop.f32.mrf.mxu1  ;;  %v5845_v35 = vadd.f32 %v1189_v49, %v859_v20  ;;  %v2026_v20 = vld [vmem:[%s5110_s29 + $0x21] sm:$0xff] }
 0x1a2   : > { %v4481_v45 = vpop.f32.mrf.mxu0  ;;  %v867_v56 = vadd.f32 %v866_v51, %v5510_v10  ;;  %v4002_v10 = vld [vmem:[%s6799_s1 + $0x1c] sm:$0xf] }
 0x1a3   : > { %v4399_v2 = vpop.f32.mrf.mxu1 }
 0x1a4   : > { %v1194_v0 = vpop.f32.mrf.mxu0  ;;  %4667 = vmatmul.mubr.msk.bf16.gmra.mxu0 %vm375_vm2, %v1714_v25  ;;  %v2833_v25 = vpack.c.bf16 %v4002_v10, %v4002_v10 }
 0x1a5   : > { %v871_v44 = vpop.f32.mrf.mxu1  ;;  %v5849_v8 = vadd.f32 %v1194_v0, %v864_v6  ;;  %4585 = vmatmul.mubr.msk.bf16.gmra.mxu1 %vm375_vm2, %v1343_v16  ;;  %4670 = vmatprep.mubr.msk.bf16.mxu0 %vm5045_vm1, %v5044_v1  ;;  %v1716_v16 = vpack.c.bf16 %v1693_v31, %v1693_v31 }
 0x1a6   : > { %v4484_v11 = vpop.f32.mrf.mxu0  ;;  %4588 = vmatprep.mubr.msk.bf16.mxu1 %vm5045_vm1, %v5044_v1  ;;  %v872_v13 = vadd.f32 %v871_v44, %v5516_v18  ;;  %v2025_v18 = vld [vmem:[%s5110_s29 + $0x19] sm:$0xff] }
 0x1a7   : > { %v4402_v62 = vpop.f32.mrf.mxu1  ;;  %v2068_v2 = vpack.c.bf16 %v2026_v20, %v2025_v18  ;;  %v6812_v44 = vld [vmem:[#allocation2_spill] sm:$0xff]  ;;  %v2898_v11 = vsel %vm439_vm0, %v2833_v25, 0  ;;  %v6814_v20 = vld [vmem:[#allocation4_spill] sm:$0xff] }
 0x1a8   : > { %v1197_v43 = vpop.f32.mrf.mxu0 }
 0x1a9   : > { %v874_v58 = vpop.f32.mrf.mxu1  ;;  %v5860_v32 = vadd.f32 %v1197_v43, %v867_v56  ;;  %v2027_v43 = vld [vmem:[%s5110_s29 + $0x29] sm:$0xff] }
 0x1aa   : > { %v4485_v23 = vpop.f32.mrf.mxu0  ;;  %v875_v60 = vadd.f32 %v874_v58, %v5530_v36  ;;  %v4024_v36 = vld [vmem:[%s6799_s1 + $0x20] sm:$0xf] }
 0x1ab   : > { %v4403_v48 = vpop.f32.mrf.mxu1  ;;  %v6813_v23 = vld [vmem:[#allocation3_spill] sm:$0xff] }
 0x1ac   : > { %v1202_v24 = vpop.f32.mrf.mxu0  ;;  %4671 = vmatmul.mubr.msk.bf16.gmra.mxu0 %vm375_vm2, %v1715_v55  ;;  %v2028_v55 = vld [vmem:[%s5110_s29 + $0x31] sm:$0xff] }
 0x1ad   : > { %v879_v61 = vpop.f32.mrf.mxu1  ;;  %v5867_v54 = vadd.f32 %v1202_v24, %v872_v13  ;;  %4589 = vmatmul.mubr.msk.bf16.gmra.mxu1 %vm375_vm2, %v1344_v33  ;;  %4674 = vmatprep.mubr.msk.bf16.mxu0 %vm5045_vm1, %v5044_v1  ;;  %v3205_v33 = vpack.c.bf16 %v4024_v36, %v4024_v36  ;;  %v2069_v10 = vpack.c.bf16 %v2028_v55, %v2027_v43  ;;  %v6816_v55 = vld [vmem:[#allocation6_spill] sm:$0xff] }
 0x1ae   : > { %v4488_v15 = vpop.f32.mrf.mxu0  ;;  %4680 = vmatprep.mubr.msk.bf16.mxu1 %vm5045_vm1, %v5044_v1  ;;  %v880_v47 = vadd.f32 %v879_v61, %v6812_v44  ;;  %v6815_v44 = vld [vmem:[#allocation5_spill] sm:$0xff] }
 0x1af   : > { %v4406_v49 = vpop.f32.mrf.mxu1  ;;  %v3270_v18 = vsel %vm439_vm0, %v3205_v33, 0 }
 0x1b0   : > { %v1205_v51 = vpop.f32.mrf.mxu0 }
 0x1b1   : > { %v882_v45 = vpop.f32.mrf.mxu1  ;;  %v5878_v6 = vadd.f32 %v1205_v51, %v875_v60 }
 0x1b2   : > { %v4489_v0 = vpop.f32.mrf.mxu0  ;;  %v883_v13 = vadd.f32 %v882_v45, %v6813_v23  ;;  %v2029_v45 = vld [vmem:[%s5110_s29 + $0x39] sm:$0xff] }
 0x1b3   : > { %v4407_v3 = vpop.f32.mrf.mxu1 }
 0x1b4   : > { %v1210_v14 = vpop.f32.mrf.mxu0  ;;  %4675 = vmatmul.mubr.msk.bf16.gmra.mxu0 %vm375_vm2, %v1716_v16 }
 0x1b5   : > { %v887_v56 = vpop.f32.mrf.mxu1  ;;  %v5886_v62 = vadd.f32 %v1210_v14, %v880_v47  ;;  %4681 = vmatmul.mubr.msk.bf16.vlgmr.msra.gmra.mxu1 %vm375_vm2, %v2068_v2  ;;  %4766 = vmatprep.mubr.msk.bf16.mxu0 %vm5045_vm1, %v5044_v1  ;;  %v2030_v2 = vld [vmem:[%s5110_s29 + $0x41] sm:$0xff] }
 0x1b6   : > { %v4492_v58 = vpop.f32.mrf.mxu0  ;;  %4851 = vmatpush3.bf16.msra.mxu1 %v2898_v11  ;;  %4684 = vmatprep.mubr.msk.bf16.mxu1 %vm5045_vm1, %v5044_v1  ;;  %v888_v60 = vadd.f32 %v887_v56, %v6814_v20  ;;  %v2070_v36 = vpack.c.bf16 %v2030_v2, %v2029_v45  ;;  %v6818_v2 = vld [vmem:[#allocation8_spill] sm:$0xff] }
 0x1b7   : > { %v4410_v48 = vpop.f32.mrf.mxu1 }
 0x1b8   : > { %v1213_v24 = vpop.f32.mrf.mxu0 }
 0x1b9   : > { %v890_v61 = vpop.f32.mrf.mxu1  ;;  %v5896_v31 = vadd.f32 %v1213_v24, %v883_v13  ;;  %v2031_v24 = vld [vmem:[%s5110_s29 + $0x49] sm:$0xff] }
 0x1ba   : > { %v4493_v15 = vpop.f32.mrf.mxu0  ;;  %v891_v47 = vadd.f32 %v890_v61, %v6815_v44 }
 0x1bb   : > { %v4411_v49 = vpop.f32.mrf.mxu1  ;;  %v6817_v15 = vld [vmem:[#allocation7_spill] sm:$0xff] }
 0x1bc   : > { %v1218_v25 = vpop.f32.mrf.mxu0  ;;  %4767 = vmatmul.mubr.msk.bf16.vlgmr.msra.gmra.mxu0 %vm375_vm2, %v2069_v10 }
 0x1bd   : > { %v895_v51 = vpop.f32.mrf.mxu1  ;;  %v5901_v16 = vadd.f32 %v1218_v25, %v888_v60  ;;  %4685 = vmatmul.mubr.msk.bf16.gmra.mxu1 %vm375_vm2, %v2069_v10  ;;  %4937 = vmatpush3.bf16.msra.mxu0 %v3270_v18  ;;  %v2032_v10 = vld [vmem:[%s5110_s29 + $0x51] sm:$0xff] }
 0x1be   : > { %v4496_v0 = vpop.f32.mrf.mxu0  ;;  %4688 = vmatprep.mubr.msk.bf16.mxu1 %vm5045_vm1, %v5044_v1  ;;  %4770 = vmatprep.mubr.msk.bf16.mxu0 %vm5045_vm1, %v5044_v1  ;;  %v896_v58 = vadd.f32 %v895_v51, %v6816_v55  ;;  %v2071_v49 = vpack.c.bf16 %v2032_v10, %v2031_v24 }
 0x1bf   : > { %v4414_v3 = vpop.f32.mrf.mxu1 }
 0x1c0   : > { %v1221_v11 = vpop.f32.mrf.mxu0 }
 0x1c1   : > { %v898_v14 = vpop.f32.mrf.mxu1  ;;  %v5911_v56 = vadd.f32 %v1221_v11, %v891_v47 }
 0x1c2   : > { %v4497_v43 = vpop.f32.mrf.mxu0  ;;  %v899_v18 = vadd.f32 %v898_v14, %v6817_v15  ;;  %v2034_v14 = vld [vmem:[%s5110_s29 + $0x61] sm:$0xff] }
 0x1c3   : > { %v4415_v33 = vpop.f32.mrf.mxu1  ;;  %v6819_v43 = vld [vmem:[#allocation9_spill] sm:$0xff] }
 0x1c4   : > { %v1226_v23 = vpop.f32.mrf.mxu0  ;;  %4771 = vmatmul.mubr.msk.bf16.gmra.mxu0 %vm375_vm2, %v2070_v36 }
 0x1c5   : > { %v903_v13 = vpop.f32.mrf.mxu1  ;;  %v5915_v48 = vadd.f32 %v1226_v23, %v896_v58  ;;  %4689 = vmatmul.mubr.msk.bf16.gmra.mxu1 %vm375_vm2, %v2070_v36  ;;  %4774 = vmatprep.mubr.msk.bf16.mxu0 %vm5045_vm1, %v5044_v1  ;;  %v2033_v36 = vld [vmem:[%s5110_s29 + $0x59] sm:$0xff] }
 0x1c6   : > { %v4500_v61 = vpop.f32.mrf.mxu0  ;;  %4692 = vmatprep.mubr.msk.bf16.mxu1 %vm5045_vm1, %v5044_v1  ;;  %v904_v0 = vadd.f32 %v903_v13, %v6818_v2  ;;  %v2072_v13 = vpack.c.bf16 %v2034_v14, %v2033_v36 }
 0x1c7   : > { %v4418_v20 = vpop.f32.mrf.mxu1 }
 0x1c8   : > { %v1229_v60 = vpop.f32.mrf.mxu0 }
 0x1c9   : > { %v906_v25 = vpop.f32.mrf.mxu1  ;;  %v5925_v51 = vadd.f32 %v1229_v60, %v899_v18 }
 0x1ca   : > { %v4501_v45 = vpop.f32.mrf.mxu0  ;;  %v2036_v25 = vld [vmem:[%s5110_s29 + $0x71] sm:$0xff] }
 0x1cb   : > { %v4419_v44 = vpop.f32.mrf.mxu1 }
 0x1cc   : > { %v1234_v47 = vpop.f32.mrf.mxu0  ;;  %4775 = vmatmul.mubr.msk.bf16.gmra.mxu0 %vm375_vm2, %v2071_v49 }
 0x1cd   : > { %v5929_v3 = vadd.f32 %v1234_v47, %v904_v0  ;;  %v1446_v11 = vpop.f32.mrf.mxu1  ;;  %4693 = vmatmul.mubr.msk.bf16.gmra.mxu1 %vm375_vm2, %v2071_v49  ;;  %4778 = vmatprep.mubr.msk.bf16.mxu0 %vm5045_vm1, %v5044_v1  ;;  %v2035_v49 = vld [vmem:[%s5110_s29 + $0x69] sm:$0xff] }
 0x1ce   : > { %v1612_v55 = vadd.f32 %v1446_v11, %v6819_v43  ;;  %v4504_v58 = vpop.f32.mrf.mxu0  ;;  %4696 = vmatprep.mubr.msk.bf16.mxu1 %vm5045_vm1, %v5044_v1  ;;  %v2073_v44 = vpack.c.bf16 %v2036_v25, %v2035_v49 }
 0x1cf   : > { %v4510_v33 = vpop.f32.mrf.mxu1 }
 0x1d0   : > { %v1237_v23 = vpop.f32.mrf.mxu0  ;;  %v2037_v33 = vld [vmem:[%s5110_s29 + $0x79] sm:$0xff] }
 0x1d1   : > { %v1449_v24 = vpop.f32.mrf.mxu1  ;;  %v2038_v23 = vld [vmem:[%s5110_s29 + $0x81] sm:$0xff] }
 0x1d2   : > { %v1613_v10 = vadd.f32 %v1449_v24, %v5633_v34  ;;  %v4505_v61 = vpop.f32.mrf.mxu0 }
 0x1d3   : > { %v4511_v15 = vpop.f32.mrf.mxu1  ;;  %v2074_v61 = vpack.c.bf16 %v2038_v23, %v2037_v33 }
 0x1d4   : > { %v1818_v18 = vpop.f32.mrf.mxu0  ;;  %4779 = vmatmul.mubr.msk.bf16.gmra.mxu0 %vm375_vm2, %v2072_v13 }
 0x1d5   : > { %v1454_v20 = vpop.f32.mrf.mxu1  ;;  %v5941_v60 = vadd.f32 %v1818_v18, %v1612_v55  ;;  %4697 = vmatmul.mubr.msk.bf16.gmra.mxu1 %vm375_vm2, %v2072_v13  ;;  %4782 = vmatprep.mubr.msk.bf16.mxu0 %vm5045_vm1, %v5044_v1 }
 0x1d6   : > { %v1614_v45 = vadd.f32 %v1454_v20, %v5637_v50  ;;  %v4596_v2 = vpop.f32.mrf.mxu0  ;;  %4700 = vmatprep.mubr.msk.bf16.mxu1 %vm5045_vm1, %v5044_v1 }
 0x1d7   : > { %v4514_v34 = vpop.f32.mrf.mxu1 }
 0x1d8   : > { %v1821_v0 = vpop.f32.mrf.mxu0  ;;  %v2039_v34 = vld [vmem:[%s5110_s29 + $0x89] sm:$0xff] }
 0x1d9   : > { %v1457_v47 = vpop.f32.mrf.mxu1  ;;  %v5951_v11 = vadd.f32 %v1821_v0, %v1613_v10  ;;  %v2040_v0 = vld [vmem:[%s5110_s29 + $0x91] sm:$0xff] }
 0x1da   : > { %v1615_v36 = vadd.f32 %v1457_v47, %v5648_v40  ;;  %v4597_v14 = vpop.f32.mrf.mxu0 }
 0x1db   : > { %v4515_v43 = vpop.f32.mrf.mxu1  ;;  %v2075_v14 = vpack.c.bf16 %v2040_v0, %v2039_v34 }
 0x1dc   : > { %v1826_v55 = vpop.f32.mrf.mxu0  ;;  %4783 = vmatmul.mubr.msk.bf16.gmra.mxu0 %vm375_vm2, %v2073_v44 }
 0x1dd   : > { %v1462_v50 = vpop.f32.mrf.mxu1  ;;  %v5955_v58 = vadd.f32 %v1826_v55, %v1614_v45  ;;  %4701 = vmatmul.mubr.msk.bf16.gmra.mxu1 %vm375_vm2, %v2073_v44  ;;  %4786 = vmatprep.mubr.msk.bf16.mxu0 %vm5045_vm1, %v5044_v1 }
 0x1de   : > { %v1616_v13 = vadd.f32 %v1462_v50, %v5652_v46  ;;  %v4600_v24 = vpop.f32.mrf.mxu0  ;;  %4704 = vmatprep.mubr.msk.bf16.mxu1 %vm5045_vm1, %v5044_v1 }
 0x1df   : > { %v4518_v40 = vpop.f32.mrf.mxu1 }
 0x1e0   : > { %v1829_v10 = vpop.f32.mrf.mxu0  ;;  %v2041_v40 = vld [vmem:[%s5110_s29 + $0x99] sm:$0xff] }
 0x1e1   : > { %v1465_v15 = vpop.f32.mrf.mxu1  ;;  %v5965_v18 = vadd.f32 %v1829_v10, %v1615_v36  ;;  %v2042_v10 = vld [vmem:[%s5110_s29 + $0xa1] sm:$0xff] }
 0x1e2   : > { %v1617_v20 = vadd.f32 %v1465_v15, %v5663_v27  ;;  %v4601_v49 = vpop.f32.mrf.mxu0 }
 0x1e3   : > { %v4519_v25 = vpop.f32.mrf.mxu1  ;;  %v2076_v49 = vpack.c.bf16 %v2042_v10, %v2041_v40 }
 0x1e4   : > { %v1834_v45 = vpop.f32.mrf.mxu0  ;;  %4787 = vmatmul.mubr.msk.bf16.gmra.mxu0 %vm375_vm2, %v2074_v61 }
 0x1e5   : > { %v1470_v46 = vpop.f32.mrf.mxu1  ;;  %v5969_v2 = vadd.f32 %v1834_v45, %v1616_v13  ;;  %4705 = vmatmul.mubr.msk.bf16.gmra.mxu1 %vm375_vm2, %v2074_v61  ;;  %4790 = vmatprep.mubr.msk.bf16.mxu0 %vm5045_vm1, %v5044_v1 }
 0x1e6   : > { %v1618_v44 = vadd.f32 %v1470_v46, %v5667_v28  ;;  %v4604_v47 = vpop.f32.mrf.mxu0  ;;  %4708 = vmatprep.mubr.msk.bf16.mxu1 %vm5045_vm1, %v5044_v1 }
 0x1e7   : > { %v4522_v27 = vpop.f32.mrf.mxu1 }
 0x1e8   : > { %v1837_v36 = vpop.f32.mrf.mxu0  ;;  %v2043_v27 = vld [vmem:[%s5110_s29 + $0xa9] sm:$0xff] }
 0x1e9   : > { %v1473_v43 = vpop.f32.mrf.mxu1  ;;  %v5979_v55 = vadd.f32 %v1837_v36, %v1617_v20  ;;  %v2044_v36 = vld [vmem:[%s5110_s29 + $0xb1] sm:$0xff] }
 0x1ea   : > { %v1619_v50 = vadd.f32 %v1473_v43, %v5678_v12  ;;  %v4605_v33 = vpop.f32.mrf.mxu0 }
 0x1eb   : > { %v4523_v23 = vpop.f32.mrf.mxu1  ;;  %v2077_v33 = vpack.c.bf16 %v2044_v36, %v2043_v27 }
 0x1ec   : > { %v1842_v13 = vpop.f32.mrf.mxu0  ;;  %4791 = vmatmul.mubr.msk.bf16.gmra.mxu0 %vm375_vm2, %v2075_v14 }
 0x1ed   : > { %v1478_v28 = vpop.f32.mrf.mxu1  ;;  %v5983_v24 = vadd.f32 %v1842_v13, %v1618_v44  ;;  %4709 = vmatmul.mubr.msk.bf16.gmra.mxu1 %vm375_vm2, %v2075_v14  ;;  %4794 = vmatprep.mubr.msk.bf16.mxu0 %vm5045_vm1, %v5044_v1 }
 0x1ee   : > { %v1620_v61 = vadd.f32 %v1478_v28, %v5682_v63  ;;  %v4608_v15 = vpop.f32.mrf.mxu0  ;;  %4712 = vmatprep.mubr.msk.bf16.mxu1 %vm5045_vm1, %v5044_v1 }
 0x1ef   : > { %v4526_v12 = vpop.f32.mrf.mxu1 }
 0x1f0   : > { %v1845_v20 = vpop.f32.mrf.mxu0  ;;  %v2045_v12 = vld [vmem:[%s5110_s29 + $0xb9] sm:$0xff] }
 0x1f1   : > { %v1481_v25 = vpop.f32.mrf.mxu1  ;;  %v5993_v45 = vadd.f32 %v1845_v20, %v1619_v50  ;;  %v2046_v20 = vld [vmem:[%s5110_s29 + $0xc1] sm:$0xff] }
 0x1f2   : > { %v1621_v46 = vadd.f32 %v1481_v25, %v5693_v52  ;;  %v4609_v34 = vpop.f32.mrf.mxu0 }
 0x1f3   : > { %v4527_v0 = vpop.f32.mrf.mxu1  ;;  %v2078_v34 = vpack.c.bf16 %v2046_v20, %v2045_v12 }
 0x1f4   : > { %v1850_v44 = vpop.f32.mrf.mxu0  ;;  %4795 = vmatmul.mubr.msk.bf16.gmra.mxu0 %vm375_vm2, %v2076_v49 }
 0x1f5   : > { %v1486_v63 = vpop.f32.mrf.mxu1  ;;  %v5997_v47 = vadd.f32 %v1850_v44, %v1620_v61  ;;  %4713 = vmatmul.mubr.msk.bf16.gmra.mxu1 %vm375_vm2, %v2076_v49  ;;  %4798 = vmatprep.mubr.msk.bf16.mxu0 %vm5045_vm1, %v5044_v1 }
 0x1f6   : > { %v1622_v14 = vadd.f32 %v1486_v63, %v5697_v7  ;;  %v4612_v43 = vpop.f32.mrf.mxu0  ;;  %4716 = vmatprep.mubr.msk.bf16.mxu1 %vm5045_vm1, %v5044_v1 }
 0x1f7   : > { %v4530_v52 = vpop.f32.mrf.mxu1 }
 0x1f8   : > { %v1853_v50 = vpop.f32.mrf.mxu0  ;;  %v2047_v52 = vld [vmem:[%s5110_s29 + $0xc9] sm:$0xff] }
 0x1f9   : > { %v1489_v23 = vpop.f32.mrf.mxu1  ;;  %v6007_v13 = vadd.f32 %v1853_v50, %v1621_v46  ;;  %v2048_v50 = vld [vmem:[%s5110_s29 + $0xd1] sm:$0xff] }
 0x1fa   : > { %v1623_v28 = vadd.f32 %v1489_v23, %v5708_v59  ;;  %v4613_v40 = vpop.f32.mrf.mxu0 }
 0x1fb   : > { %v4531_v10 = vpop.f32.mrf.mxu1  ;;  %v2079_v40 = vpack.c.bf16 %v2048_v50, %v2047_v52 }
 0x1fc   : > { %v1858_v61 = vpop.f32.mrf.mxu0  ;;  %4799 = vmatmul.mubr.msk.bf16.gmra.mxu0 %vm375_vm2, %v2077_v33 }
 0x1fd   : > { %v1494_v7 = vpop.f32.mrf.mxu1  ;;  %v6011_v15 = vadd.f32 %v1858_v61, %v1622_v14  ;;  %4717 = vmatmul.mubr.msk.bf16.gmra.mxu1 %vm375_vm2, %v2077_v33  ;;  %4802 = vmatprep.mubr.msk.bf16.mxu0 %vm5045_vm1, %v5044_v1 }
 0x1fe   : > { %v1624_v49 = vadd.f32 %v1494_v7, %v5712_v22  ;;  %v4616_v25 = vpop.f32.mrf.mxu0  ;;  %4720 = vmatprep.mubr.msk.bf16.mxu1 %vm5045_vm1, %v5044_v1 }
 0x1ff   : > { %v4534_v59 = vpop.f32.mrf.mxu1 }
 0x200   : > { %v1861_v46 = vpop.f32.mrf.mxu0  ;;  %v2049_v59 = vld [vmem:[%s5110_s29 + $0xd9] sm:$0xff] }
 0x201   : > { %v1497_v0 = vpop.f32.mrf.mxu1  ;;  %v6021_v44 = vadd.f32 %v1861_v46, %v1623_v28  ;;  %v2050_v46 = vld [vmem:[%s5110_s29 + $0xe1] sm:$0xff] }
 0x202   : > { %v1625_v63 = vadd.f32 %v1497_v0, %v5723_v4  ;;  %v4617_v27 = vpop.f32.mrf.mxu0 }
 0x203   : > { %v4535_v36 = vpop.f32.mrf.mxu1  ;;  %v2080_v27 = vpack.c.bf16 %v2050_v46, %v2049_v59 }
 0x204   : > { %v1866_v14 = vpop.f32.mrf.mxu0  ;;  %4803 = vmatmul.mubr.msk.bf16.gmra.mxu0 %vm375_vm2, %v2078_v34 }
 0x205   : > { %v1502_v22 = vpop.f32.mrf.mxu1  ;;  %v6025_v43 = vadd.f32 %v1866_v14, %v1624_v49  ;;  %4721 = vmatmul.mubr.msk.bf16.gmra.mxu1 %vm375_vm2, %v2078_v34  ;;  %4806 = vmatprep.mubr.msk.bf16.mxu0 %vm5045_vm1, %v5044_v1 }
 0x206   : > { %v1626_v33 = vadd.f32 %v1502_v22, %v5727_v29  ;;  %v4620_v23 = vpop.f32.mrf.mxu0  ;;  %4724 = vmatprep.mubr.msk.bf16.mxu1 %vm5045_vm1, %v5044_v1 }
 0x207   : > { %v4538_v4 = vpop.f32.mrf.mxu1 }
 0x208   : > { %v1869_v28 = vpop.f32.mrf.mxu0  ;;  %v2051_v4 = vld [vmem:[%s5110_s29 + $0xe9] sm:$0xff] }
 0x209   : > { %v1505_v10 = vpop.f32.mrf.mxu1  ;;  %v6035_v61 = vadd.f32 %v1869_v28, %v1625_v63  ;;  %v2052_v28 = vld [vmem:[%s5110_s29 + $0xf1] sm:$0xff] }
 0x20a   : > { %v1627_v7 = vadd.f32 %v1505_v10, %v5738_v21  ;;  %v4621_v12 = vpop.f32.mrf.mxu0 }
 0x20b   : > { %v4539_v20 = vpop.f32.mrf.mxu1  ;;  %v2081_v12 = vpack.c.bf16 %v2052_v28, %v2051_v4 }
 0x20c   : > { %v1874_v49 = vpop.f32.mrf.mxu0  ;;  %4807 = vmatmul.mubr.msk.bf16.gmra.mxu0 %vm375_vm2, %v2079_v40 }
 0x20d   : > { %v1510_v29 = vpop.f32.mrf.mxu1  ;;  %v6039_v25 = vadd.f32 %v1874_v49, %v1626_v33  ;;  %4725 = vmatmul.mubr.msk.bf16.gmra.mxu1 %vm375_vm2, %v2079_v40  ;;  %4810 = vmatprep.mubr.msk.bf16.mxu0 %vm5045_vm1, %v5044_v1 }
 0x20e   : > { %v1628_v34 = vadd.f32 %v1510_v29, %v5742_v30  ;;  %v4624_v0 = vpop.f32.mrf.mxu0  ;;  %4728 = vmatprep.mubr.msk.bf16.mxu1 %vm5045_vm1, %v5044_v1 }
 0x20f   : > { %v4542_v21 = vpop.f32.mrf.mxu1 }
 0x210   : > { %v1877_v63 = vpop.f32.mrf.mxu0  ;;  %v2053_v21 = vld [vmem:[%s5110_s29 + $0xf9] sm:$0xff] }
 0x211   : > { %v1513_v36 = vpop.f32.mrf.mxu1  ;;  %v6049_v14 = vadd.f32 %v1877_v63, %v1627_v7  ;;  %v2054_v63 = vld [vmem:[%s5110_s29 + $0x101] sm:$0xff] }
 0x212   : > { %v1629_v22 = vadd.f32 %v1513_v36, %v5753_v17  ;;  %v4625_v52 = vpop.f32.mrf.mxu0 }
 0x213   : > { %v4543_v50 = vpop.f32.mrf.mxu1  ;;  %v2082_v52 = vpack.c.bf16 %v2054_v63, %v2053_v21 }
 0x214   : > { %v1882_v33 = vpop.f32.mrf.mxu0  ;;  %4811 = vmatmul.mubr.msk.bf16.gmra.mxu0 %vm375_vm2, %v2080_v27 }
 0x215   : > { %v1518_v30 = vpop.f32.mrf.mxu1  ;;  %v6053_v23 = vadd.f32 %v1882_v33, %v1628_v34  ;;  %4729 = vmatmul.mubr.msk.bf16.gmra.mxu1 %vm375_vm2, %v2080_v27  ;;  %4814 = vmatprep.mubr.msk.bf16.mxu0 %vm5045_vm1, %v5044_v1 }
 0x216   : > { %v1630_v40 = vadd.f32 %v1518_v30, %v5757_v26  ;;  %v4628_v10 = vpop.f32.mrf.mxu0  ;;  %4732 = vmatprep.mubr.msk.bf16.mxu1 %vm5045_vm1, %v5044_v1 }
 0x217   : > { %v4546_v17 = vpop.f32.mrf.mxu1 }
 0x218   : > { %v1885_v7 = vpop.f32.mrf.mxu0  ;;  %v2055_v17 = vld [vmem:[%s5110_s29 + $0x109] sm:$0xff] }
 0x219   : > { %v1521_v20 = vpop.f32.mrf.mxu1  ;;  %v6063_v49 = vadd.f32 %v1885_v7, %v1629_v22  ;;  %v2056_v7 = vld [vmem:[%s5110_s29 + $0x111] sm:$0xff] }
 0x21a   : > { %v1631_v29 = vadd.f32 %v1521_v20, %v5768_v42  ;;  %v4629_v59 = vpop.f32.mrf.mxu0 }
 0x21b   : > { %v4547_v46 = vpop.f32.mrf.mxu1  ;;  %v2083_v59 = vpack.c.bf16 %v2056_v7, %v2055_v17 }
 0x21c   : > { %v1890_v34 = vpop.f32.mrf.mxu0  ;;  %4815 = vmatmul.mubr.msk.bf16.gmra.mxu0 %vm375_vm2, %v2081_v12 }
 0x21d   : > { %v1526_v26 = vpop.f32.mrf.mxu1  ;;  %v6067_v0 = vadd.f32 %v1890_v34, %v1630_v40  ;;  %4733 = vmatmul.mubr.msk.bf16.gmra.mxu1 %vm375_vm2, %v2081_v12  ;;  %4818 = vmatprep.mubr.msk.bf16.mxu0 %vm5045_vm1, %v5044_v1 }
 0x21e   : > { %v1632_v27 = vadd.f32 %v1526_v26, %v5772_v5  ;;  %v4632_v36 = vpop.f32.mrf.mxu0  ;;  %4736 = vmatprep.mubr.msk.bf16.mxu1 %vm5045_vm1, %v5044_v1 }
 0x21f   : > { %v4550_v42 = vpop.f32.mrf.mxu1 }
 0x220   : > { %v1893_v22 = vpop.f32.mrf.mxu0  ;;  %v2057_v42 = vld [vmem:[%s5110_s29 + $0x119] sm:$0xff] }
 0x221   : > { %v1529_v50 = vpop.f32.mrf.mxu1  ;;  %v6077_v33 = vadd.f32 %v1893_v22, %v1631_v29  ;;  %v2058_v22 = vld [vmem:[%s5110_s29 + $0x121] sm:$0xff] }
 0x222   : > { %v1633_v30 = vadd.f32 %v1529_v50, %v5783_v41  ;;  %v4633_v4 = vpop.f32.mrf.mxu0 }
 0x223   : > { %v4551_v28 = vpop.f32.mrf.mxu1  ;;  %v2084_v4 = vpack.c.bf16 %v2058_v22, %v2057_v42 }
 0x224   : > { %v1898_v40 = vpop.f32.mrf.mxu0  ;;  %4819 = vmatmul.mubr.msk.bf16.gmra.mxu0 %vm375_vm2, %v2082_v52 }
 0x225   : > { %v1534_v5 = vpop.f32.mrf.mxu1  ;;  %v6081_v10 = vadd.f32 %v1898_v40, %v1632_v27  ;;  %4737 = vmatmul.mubr.msk.bf16.gmra.mxu1 %vm375_vm2, %v2082_v52  ;;  %4822 = vmatprep.mubr.msk.bf16.mxu0 %vm5045_vm1, %v5044_v1 }
 0x226   : > { %v1634_v12 = vadd.f32 %v1534_v5, %v5787_v19  ;;  %v4636_v20 = vpop.f32.mrf.mxu0  ;;  %4740 = vmatprep.mubr.msk.bf16.mxu1 %vm5045_vm1, %v5044_v1 }
 0x227   : > { %v4554_v41 = vpop.f32.mrf.mxu1 }
 0x228   : > { %v1901_v29 = vpop.f32.mrf.mxu0  ;;  %v2059_v41 = vld [vmem:[%s5110_s29 + $0x129] sm:$0xff] }
 0x229   : > { %v1537_v46 = vpop.f32.mrf.mxu1  ;;  %v6091_v34 = vadd.f32 %v1901_v29, %v1633_v30  ;;  %v2060_v29 = vld [vmem:[%s5110_s29 + $0x131] sm:$0xff] }
 0x22a   : > { %v1635_v26 = vadd.f32 %v1537_v46, %v5798_v53  ;;  %v4637_v21 = vpop.f32.mrf.mxu0 }
 0x22b   : > { %v4555_v63 = vpop.f32.mrf.mxu1  ;;  %v2085_v21 = vpack.c.bf16 %v2060_v29, %v2059_v41 }
 0x22c   : > { %v1906_v27 = vpop.f32.mrf.mxu0  ;;  %4823 = vmatmul.mubr.msk.bf16.gmra.mxu0 %vm375_vm2, %v2083_v59 }
 0x22d   : > { %v1542_v19 = vpop.f32.mrf.mxu1  ;;  %v6095_v36 = vadd.f32 %v1906_v27, %v1634_v12  ;;  %4741 = vmatmul.mubr.msk.bf16.gmra.mxu1 %vm375_vm2, %v2083_v59  ;;  %4826 = vmatprep.mubr.msk.bf16.mxu0 %vm5045_vm1, %v5044_v1 }
 0x22e   : > { %v1636_v52 = vadd.f32 %v1542_v19, %v5802_v37  ;;  %v4640_v50 = vpop.f32.mrf.mxu0  ;;  %4744 = vmatprep.mubr.msk.bf16.mxu1 %vm5045_vm1, %v5044_v1 }
 0x22f   : > { %v4558_v53 = vpop.f32.mrf.mxu1 }
 0x230   : > { %v1909_v30 = vpop.f32.mrf.mxu0  ;;  %v2061_v53 = vld [vmem:[%s5110_s29 + $0x139] sm:$0xff] }
 0x231   : > { %v1545_v28 = vpop.f32.mrf.mxu1  ;;  %v6105_v40 = vadd.f32 %v1909_v30, %v1635_v26  ;;  %v2062_v30 = vld [vmem:[%s5110_s29 + $0x141] sm:$0xff] }
 0x232   : > { %v1637_v5 = vadd.f32 %v1545_v28, %v5813_v39  ;;  %v4641_v17 = vpop.f32.mrf.mxu0 }
 0x233   : > { %v4559_v7 = vpop.f32.mrf.mxu1  ;;  %v2086_v17 = vpack.c.bf16 %v2062_v30, %v2061_v53 }
 0x234   : > { %v1914_v12 = vpop.f32.mrf.mxu0  ;;  %4827 = vmatmul.mubr.msk.bf16.gmra.mxu0 %vm375_vm2, %v2084_v4 }
 0x235   : > { %v1550_v37 = vpop.f32.mrf.mxu1  ;;  %v6109_v20 = vadd.f32 %v1914_v12, %v1636_v52  ;;  %4745 = vmatmul.mubr.msk.bf16.gmra.mxu1 %vm375_vm2, %v2084_v4  ;;  %4830 = vmatprep.mubr.msk.bf16.mxu0 %vm5045_vm1, %v5044_v1 }
 0x236   : > { %v1638_v59 = vadd.f32 %v1550_v37, %v5817_v38  ;;  %v4644_v46 = vpop.f32.mrf.mxu0  ;;  %4748 = vmatprep.mubr.msk.bf16.mxu1 %vm5045_vm1, %v5044_v1 }
 0x237   : > { %v4562_v39 = vpop.f32.mrf.mxu1 }
 0x238   : > { %v1917_v26 = vpop.f32.mrf.mxu0  ;;  %v2063_v39 = vld [vmem:[%s5110_s29 + $0x149] sm:$0xff] }
 0x239   : > { %v1553_v63 = vpop.f32.mrf.mxu1  ;;  %v6119_v27 = vadd.f32 %v1917_v26, %v1637_v5  ;;  %v2064_v26 = vld [vmem:[%s5110_s29 + $0x151] sm:$0xff] }
 0x23a   : > { %v1639_v19 = vadd.f32 %v1553_v63, %v5828_v9  ;;  %v4645_v42 = vpop.f32.mrf.mxu0 }
 0x23b   : > { %v4563_v22 = vpop.f32.mrf.mxu1  ;;  %v2087_v42 = vpack.c.bf16 %v2064_v26, %v2063_v39 }
 0x23c   : > { %v1922_v52 = vpop.f32.mrf.mxu0  ;;  %4831 = vmatmul.mubr.msk.bf16.gmra.mxu0 %vm375_vm2, %v2085_v21 }
 0x23d   : > { %v1558_v38 = vpop.f32.mrf.mxu1  ;;  %v6123_v50 = vadd.f32 %v1922_v52, %v1638_v59  ;;  %4749 = vmatmul.mubr.msk.bf16.gmra.mxu1 %vm375_vm2, %v2085_v21  ;;  %4834 = vmatprep.mubr.msk.bf16.mxu0 %vm5045_vm1, %v5044_v1 }
 0x23e   : > { %v1640_v4 = vadd.f32 %v1558_v38, %v5832_v57  ;;  %v4648_v28 = vpop.f32.mrf.mxu0  ;;  %4752 = vmatprep.mubr.msk.bf16.mxu1 %vm5045_vm1, %v5044_v1 }
 0x23f   : > { %v4566_v9 = vpop.f32.mrf.mxu1 }
 0x240   : > { %v1925_v5 = vpop.f32.mrf.mxu0  ;;  %v2435_v9 = vld [vmem:[%s5110_s29 + $0x159] sm:$0xff] }
 0x241   : > { %v1561_v7 = vpop.f32.mrf.mxu1  ;;  %v6133_v12 = vadd.f32 %v1925_v5, %v1639_v19  ;;  %v2436_v5 = vld [vmem:[%s5110_s29 + $0x161] sm:$0xff] }
 0x242   : > { %v1641_v37 = vadd.f32 %v1561_v7, %v5845_v35  ;;  %v4649_v41 = vpop.f32.mrf.mxu0 }
 0x243   : > { %v4567_v29 = vpop.f32.mrf.mxu1 }
 0x244   : > { %v1930_v59 = vpop.f32.mrf.mxu0  ;;  %4835 = vmatmul.mubr.msk.bf16.gmra.mxu0 %vm375_vm2, %v2086_v17  ;;  %v2459_v29 = vpack.c.bf16 %v2436_v5, %v2435_v9 }
 0x245   : > { %v1566_v57 = vpop.f32.mrf.mxu1  ;;  %v6137_v46 = vadd.f32 %v1930_v59, %v1640_v4  ;;  %4753 = vmatmul.mubr.msk.bf16.gmra.mxu1 %vm375_vm2, %v2086_v17  ;;  %4838 = vmatprep.mubr.msk.bf16.mxu0 %vm5045_vm1, %v5044_v1 }
 0x246   : > { %v1642_v21 = vadd.f32 %v1566_v57, %v5849_v8  ;;  %v4652_v63 = vpop.f32.mrf.mxu0  ;;  %4756 = vmatprep.mubr.msk.bf16.mxu1 %vm5045_vm1, %v5044_v1 }
 0x247   : > { %v4570_v35 = vpop.f32.mrf.mxu1 }
 0x248   : > { %v1933_v19 = vpop.f32.mrf.mxu0 }
 0x249   : > { %v1569_v22 = vpop.f32.mrf.mxu1  ;;  %v6147_v52 = vadd.f32 %v1933_v19, %v1641_v37 }
 0x24a   : > { %v1643_v38 = vadd.f32 %v1569_v22, %v5860_v32  ;;  %v4653_v53 = vpop.f32.mrf.mxu0  ;;  %v2065_v32 = vld [vmem:[%s5110_s29 + $0x159] sm:$0xf] }
 0x24b   : > { %v4571_v30 = vpop.f32.mrf.mxu1  ;;  %v2088_v39 = vpack.c.bf16 %v2065_v32, %v2065_v32  ;;  %v2770_v53 = vld [vmem:[%s5110_s29 + $0x32] sm:$0xff] }
 0x24c   : > { %v1938_v4 = vpop.f32.mrf.mxu0  ;;  %4839 = vmatmul.mubr.msk.bf16.gmra.mxu0 %vm375_vm2, %v2087_v42 }
 0x24d   : > { %v1574_v8 = vpop.f32.mrf.mxu1  ;;  %v6151_v28 = vadd.f32 %v1938_v4, %v1642_v21  ;;  %4757 = vmatmul.mubr.msk.bf16.gmra.mxu1 %vm375_vm2, %v2087_v42  ;;  %4842 = vmatprep.mubr.msk.bf16.mxu0 %vm5045_vm1, %v5044_v1  ;;  %v2437_v42 = vld [vmem:[%s5110_s29 + $0x169] sm:$0xf] }
 0x24e   : > { %v1644_v17 = vadd.f32 %v1574_v8, %v5867_v54  ;;  %v4656_v7 = vpop.f32.mrf.mxu0  ;;  %4760 = vmatprep.mubr.msk.bf16.mxu1 %vm5045_vm1, %v5044_v1  ;;  %v2460_v8 = vpack.c.bf16 %v2437_v42, %v2437_v42 }
 0x24f   : > { %v4574_v37 = vpop.f32.mrf.mxu1 }
 0x250   : > { %v1941_v41 = vpop.f32.mrf.mxu0 }
 0x251   : > { %v1577_v59 = vpop.f32.mrf.mxu1  ;;  %v6162_v57 = vadd.f32 %v1941_v41, %v1643_v38 }
 0x252   : > { %v1645_v26 = vadd.f32 %v1577_v59, %v5878_v6  ;;  %v4657_v21 = vpop.f32.mrf.mxu0  ;;  %v2769_v6 = vld [vmem:[%s5110_s29 + $0x2a] sm:$0xff] }
 0x253   : > { %v4575_v63 = vpop.f32.mrf.mxu1  ;;  %v3141_v59 = vld [vmem:[%s5110_s29 + $0x2b] sm:$0xff] }
 0x254   : > { %v1946_v54 = vpop.f32.mrf.mxu0  ;;  %4843 = vmatmul.mubr.msk.bf16.gmra.mxu0 %vm375_vm2, %v2459_v29  ;;  %v2772_v63 = vld [vmem:[%s5110_s29 + $0x42] sm:$0xff] }
 0x255   : > { %v1582_v35 = vpop.f32.mrf.mxu1  ;;  %v6166_v19 = vadd.f32 %v1946_v54, %v1644_v17  ;;  %4761 = vmatmul.mubr.msk.bf16.gmra.mxu1 %vm375_vm2, %v2088_v39  ;;  %4846 = vmatprep.mubr.msk.bf16.mxu0 %vm5045_vm1, %v5044_v1  ;;  %v2812_v17 = vpack.c.bf16 %v2770_v53, %v2769_v6  ;;  %v3142_v39 = vld [vmem:[%s5110_s29 + $0x33] sm:$0xff] }
 0x256   : > { %v1646_v22 = vadd.f32 %v1582_v35, %v5886_v62  ;;  %v4660_v38 = vpop.f32.mrf.mxu0  ;;  %4852 = vmatprep.mubr.msk.bf16.mxu1 %vm5045_vm1, %v5044_v1  ;;  %v3184_v42 = vpack.c.bf16 %v3142_v39, %v3141_v59 }
 0x257   : > { %v4578_v30 = vpop.f32.mrf.mxu1 }
 0x258   : > { %v1949_v4 = vpop.f32.mrf.mxu0 }
 0x259   : > { %v1585_v9 = vpop.f32.mrf.mxu1  ;;  %v6177_v5 = vadd.f32 %v1949_v4, %v1645_v26 }
 0x25a   : > { %v1647_v7 = vadd.f32 %v1585_v9, %v5896_v31  ;;  %v4661_v62 = vpop.f32.mrf.mxu0  ;;  %v2771_v31 = vld [vmem:[%s5110_s29 + $0x3a] sm:$0xff] }
 0x25b   : > { %v4579_v32 = vpop.f32.mrf.mxu1  ;;  %v2813_v6 = vpack.c.bf16 %v2772_v63, %v2771_v31 }
 0x25c   : > { %v1954_v37 = vpop.f32.mrf.mxu0  ;;  %4847 = vmatmul.mubr.msk.bf16.gmra.mxu0 %vm375_vm2, %v2460_v8 }
 0x25d   : > { %v1590_v41 = vpop.f32.mrf.mxu1  ;;  %v6181_v29 = vadd.f32 %v1954_v37, %v1646_v22  ;;  %4853 = vmatmul.mubr.msk.bf16.vlgmr.msra.gmra.mxu1 %vm375_vm2, %v2812_v17  ;;  %4938 = vmatprep.mubr.msk.bf16.mxu0 %vm5045_vm1, %v5044_v1  ;;  %v3143_v17 = vld [vmem:[%s5110_s29 + $0x3b] sm:$0xff]  ;;  %v2774_v37 = vld [vmem:[%s5110_s29 + $0x52] sm:$0xff] }
 0x25e   : > { %v1648_v26 = vadd.f32 %v1590_v41, %v5901_v16  ;;  %v4664_v21 = vpop.f32.mrf.mxu0  ;;  %4856 = vmatprep.mubr.msk.bf16.mxu1 %vm5045_vm1, %v5044_v1 }
 0x25f   : > { %v4582_v54 = vpop.f32.mrf.mxu1 }
 0x260   : > { %v1957_v35 = vpop.f32.mrf.mxu0 }
 0x261   : > { %v1593_v22 = vpop.f32.mrf.mxu1  ;;  %v6193_v38 = vadd.f32 %v1957_v35, %v1647_v7  ;;  %v3144_v7 = vld [vmem:[%s5110_s29 + $0x43] sm:$0xff] }
 0x262   : > { %v1649_v53 = vadd.f32 %v1593_v22, %v5911_v56  ;;  %v4665_v16 = vpop.f32.mrf.mxu0  ;;  %v2773_v56 = vld [vmem:[%s5110_s29 + $0x4a] sm:$0xff]  ;;  %v3185_v39 = vpack.c.bf16 %v3144_v7, %v3143_v17 }
 0x263   : > { %v4583_v30 = vpop.f32.mrf.mxu1  ;;  %v2814_v31 = vpack.c.bf16 %v2774_v37, %v2773_v56 }
 0x264   : > { %v1962_v4 = vpop.f32.mrf.mxu0  ;;  %4939 = vmatmul.mubr.msk.bf16.vlgmr.msra.gmra.mxu0 %vm375_vm2, %v3184_v42 }
 0x265   : > { %v1598_v8 = vpop.f32.mrf.mxu1  ;;  %v6197_v9 = vadd.f32 %v1962_v4, %v1648_v26  ;;  %4857 = vmatmul.mubr.msk.bf16.gmra.mxu1 %vm375_vm2, %v2813_v6  ;;  %4942 = vmatprep.mubr.msk.bf16.mxu0 %vm5045_vm1, %v5044_v1  ;;  %v3145_v6 = vld [vmem:[%s5110_s29 + $0x4b] sm:$0xff]  ;;  %v2776_v4 = vld [vmem:[%s5110_s29 + $0x62] sm:$0xff] }
 0x266   : > { %v1650_v62 = vadd.f32 %v1598_v8, %v5915_v48  ;;  %v4668_v32 = vpop.f32.mrf.mxu0  ;;  %4860 = vmatprep.mubr.msk.bf16.mxu1 %vm5045_vm1, %v5044_v1 }
 0x267   : > { %v4586_v41 = vpop.f32.mrf.mxu1 }
 0x268   : > { %v1965_v59 = vpop.f32.mrf.mxu0 }
 0x269   : > { %v1601_v26 = vpop.f32.mrf.mxu1  ;;  %v6209_v21 = vadd.f32 %v1965_v59, %v1649_v53  ;;  %v3146_v53 = vld [vmem:[%s5110_s29 + $0x53] sm:$0xff] }
 0x26a   : > { %v1651_v63 = vadd.f32 %v1601_v26, %v5925_v51  ;;  %v4669_v48 = vpop.f32.mrf.mxu0  ;;  %v2775_v51 = vld [vmem:[%s5110_s29 + $0x5a] sm:$0xff]  ;;  %v3186_v7 = vpack.c.bf16 %v3146_v53, %v3145_v6 }
 0x26b   : > { %v4587_v54 = vpop.f32.mrf.mxu1  ;;  %v2815_v56 = vpack.c.bf16 %v2776_v4, %v2775_v51  ;;  %v3147_v26 = vld [vmem:[%s5110_s29 + $0x5b] sm:$0xff] }
 0x26c   : > { %v1970_v35 = vpop.f32.mrf.mxu0  ;;  %4943 = vmatmul.mubr.msk.bf16.gmra.mxu0 %vm375_vm2, %v3185_v39  ;;  %v2777_v54 = vld [vmem:[%s5110_s29 + $0x6a] sm:$0xff] }
 0x26d   : > { %v1606_v42 = vpop.f32.mrf.mxu1  ;;  %v6213_v22 = vadd.f32 %v1970_v35, %v1650_v62  ;;  %4861 = vmatmul.mubr.msk.bf16.gmra.mxu1 %vm375_vm2, %v2814_v31  ;;  %4946 = vmatprep.mubr.msk.bf16.mxu0 %vm5045_vm1, %v5044_v1  ;;  %v3148_v31 = vld [vmem:[%s5110_s29 + $0x63] sm:$0xff]  ;;  %v2778_v35 = vld [vmem:[%s5110_s29 + $0x72] sm:$0xff] }
 0x26e   : > { %v1652_v16 = vadd.f32 %v1606_v42, %v5929_v3  ;;  %v4672_v30 = vpop.f32.mrf.mxu0  ;;  %4864 = vmatprep.mubr.msk.bf16.mxu1 %vm5045_vm1, %v5044_v1  ;;  %v3187_v53 = vpack.c.bf16 %v3148_v31, %v3147_v26 }
 0x26f   : > { %v4590_v8 = vpop.f32.mrf.mxu1  ;;  %v2816_v30 = vpack.c.bf16 %v2778_v35, %v2777_v54 }
 0x270   : > { %v1973_v17 = vpop.f32.mrf.mxu0 }
 0x271   : > { %v1609_v62 = vpop.f32.mrf.mxu1  ;;  %v6225_v32 = vadd.f32 %v1973_v17, %v1651_v63 }
 0x272   : > { %v4673_v37 = vpop.f32.mrf.mxu0  ;;  %v3149_v62 = vld [vmem:[%s5110_s29 + $0x6b] sm:$0xff] }
 0x273   : > { %v4591_v41 = vpop.f32.mrf.mxu1 }
 0x274   : > { %v1978_v3 = vpop.f32.mrf.mxu0  ;;  %4947 = vmatmul.mubr.msk.bf16.gmra.mxu0 %vm375_vm2, %v3186_v7 }
 0x275   : > { %v6228_v59 = vadd.f32 %v1978_v3, %v1652_v16  ;;  %v2190_v39 = vpop.f32.mrf.mxu1  ;;  %4865 = vmatmul.mubr.msk.bf16.gmra.mxu1 %vm375_vm2, %v2815_v56  ;;  %4950 = vmatprep.mubr.msk.bf16.mxu0 %vm5045_vm1, %v5044_v1  ;;  %v3150_v56 = vld [vmem:[%s5110_s29 + $0x73] sm:$0xff]  ;;  %v2780_v3 = vld [vmem:[%s5110_s29 + $0x82] sm:$0xff] }
 0x276   : > { %v2356_v63 = vadd.f32 %v2190_v39, %v5941_v60  ;;  %v4676_v48 = vpop.f32.mrf.mxu0  ;;  %4868 = vmatprep.mubr.msk.bf16.mxu1 %vm5045_vm1, %v5044_v1  ;;  %v3188_v31 = vpack.c.bf16 %v3150_v56, %v3149_v62 }
 0x277   : > { %v4682_v42 = vpop.f32.mrf.mxu1 }
 0x278   : > { %v1981_v6 = vpop.f32.mrf.mxu0 }
 0x279   : > { %v2193_v16 = vpop.f32.mrf.mxu1 }
 0x27a   : > { %v2357_v51 = vadd.f32 %v2193_v16, %v5951_v11  ;;  %v4677_v4 = vpop.f32.mrf.mxu0  ;;  %v2779_v11 = vld [vmem:[%s5110_s29 + $0x7a] sm:$0xff] }
 0x27b   : > { %v4683_v8 = vpop.f32.mrf.mxu1  ;;  %v2817_v54 = vpack.c.bf16 %v2780_v3, %v2779_v11 }
 0x27c   : > { %v2562_v60 = vpop.f32.mrf.mxu0  ;;  %4951 = vmatmul.mubr.msk.bf16.gmra.mxu0 %vm375_vm2, %v3187_v53 }
 0x27d   : > { %v2198_v17 = vpop.f32.mrf.mxu1  ;;  %v6242_v7 = vadd.f32 %v2562_v60, %v2356_v63  ;;  %4869 = vmatmul.mubr.msk.bf16.gmra.mxu1 %vm375_vm2, %v2816_v30  ;;  %4954 = vmatprep.mubr.msk.bf16.mxu0 %vm5045_vm1, %v5044_v1  ;;  %v3151_v30 = vld [vmem:[%s5110_s29 + $0x7b] sm:$0xff]  ;;  %v2782_v60 = vld [vmem:[%s5110_s29 + $0x92] sm:$0xff] }
 0x27e   : > { %v2358_v37 = vadd.f32 %v2198_v17, %v5955_v58  ;;  %v4768_v41 = vpop.f32.mrf.mxu0  ;;  %4872 = vmatprep.mubr.msk.bf16.mxu1 %vm5045_vm1, %v5044_v1 }
 0x27f   : > { %v4686_v39 = vpop.f32.mrf.mxu1 }
 0x280   : > { %v2565_v26 = vpop.f32.mrf.mxu0 }
 0x281   : > { %v2201_v63 = vpop.f32.mrf.mxu1  ;;  %v6254_v48 = vadd.f32 %v2565_v26, %v2357_v51  ;;  %v3152_v51 = vld [vmem:[%s5110_s29 + $0x83] sm:$0xff] }
 0x282   : > { %v2359_v35 = vadd.f32 %v2201_v63, %v5965_v18  ;;  %v4769_v58 = vpop.f32.mrf.mxu0  ;;  %v2781_v18 = vld [vmem:[%s5110_s29 + $0x8a] sm:$0xff]  ;;  %v3189_v56 = vpack.c.bf16 %v3152_v51, %v3151_v30 }
 0x283   : > { %v4687_v42 = vpop.f32.mrf.mxu1  ;;  %v2818_v11 = vpack.c.bf16 %v2782_v60, %v2781_v18 }
 0x284   : > { %v2570_v6 = vpop.f32.mrf.mxu0  ;;  %4955 = vmatmul.mubr.msk.bf16.gmra.mxu0 %vm375_vm2, %v3188_v31 }
 0x285   : > { %v2206_v53 = vpop.f32.mrf.mxu1  ;;  %v6258_v16 = vadd.f32 %v2570_v6, %v2358_v37  ;;  %4873 = vmatmul.mubr.msk.bf16.gmra.mxu1 %vm375_vm2, %v2817_v54  ;;  %4958 = vmatprep.mubr.msk.bf16.mxu0 %vm5045_vm1, %v5044_v1  ;;  %v3153_v54 = vld [vmem:[%s5110_s29 + $0x8b] sm:$0xff]  ;;  %v2784_v6 = vld [vmem:[%s5110_s29 + $0xa2] sm:$0xff] }
 0x286   : > { %v2360_v4 = vadd.f32 %v2206_v53, %v5969_v2  ;;  %v4772_v8 = vpop.f32.mrf.mxu0  ;;  %4876 = vmatprep.mubr.msk.bf16.mxu1 %vm5045_vm1, %v5044_v1 }
 0x287   : > { %v4690_v17 = vpop.f32.mrf.mxu1 }
 0x288   : > { %v2573_v62 = vpop.f32.mrf.mxu0 }
 0x289   : > { %v2209_v37 = vpop.f32.mrf.mxu1  ;;  %v6270_v41 = vadd.f32 %v2573_v62, %v2359_v35  ;;  %v3154_v35 = vld [vmem:[%s5110_s29 + $0x93] sm:$0xff] }
 0x28a   : > { %v2361_v3 = vadd.f32 %v2209_v37, %v5979_v55  ;;  %v4773_v2 = vpop.f32.mrf.mxu0  ;;  %v2783_v55 = vld [vmem:[%s5110_s29 + $0x9a] sm:$0xff]  ;;  %v3190_v51 = vpack.c.bf16 %v3154_v35, %v3153_v54 }
 0x28b   : > { %v4691_v39 = vpop.f32.mrf.mxu1  ;;  %v2819_v18 = vpack.c.bf16 %v2784_v6, %v2783_v55 }
 0x28c   : > { %v2578_v26 = vpop.f32.mrf.mxu0  ;;  %4959 = vmatmul.mubr.msk.bf16.gmra.mxu0 %vm375_vm2, %v3189_v56 }
 0x28d   : > { %v2214_v31 = vpop.f32.mrf.mxu1  ;;  %v6274_v63 = vadd.f32 %v2578_v26, %v2360_v4  ;;  %4877 = vmatmul.mubr.msk.bf16.gmra.mxu1 %vm375_vm2, %v2818_v11  ;;  %4962 = vmatprep.mubr.msk.bf16.mxu0 %vm5045_vm1, %v5044_v1  ;;  %v3155_v11 = vld [vmem:[%s5110_s29 + $0x9b] sm:$0xff]  ;;  %v2786_v26 = vld [vmem:[%s5110_s29 + $0xb2] sm:$0xff] }
 0x28e   : > { %v2362_v58 = vadd.f32 %v2214_v31, %v5983_v24  ;;  %v4776_v42 = vpop.f32.mrf.mxu0  ;;  %4880 = vmatprep.mubr.msk.bf16.mxu1 %vm5045_vm1, %v5044_v1 }
 0x28f   : > { %v4694_v53 = vpop.f32.mrf.mxu1 }
 0x290   : > { %v2581_v30 = vpop.f32.mrf.mxu0 }
 0x291   : > { %v2217_v4 = vpop.f32.mrf.mxu1  ;;  %v6286_v8 = vadd.f32 %v2581_v30, %v2361_v3  ;;  %v3156_v3 = vld [vmem:[%s5110_s29 + $0xa3] sm:$0xff] }
 0x292   : > { %v2363_v60 = vadd.f32 %v2217_v4, %v5993_v45  ;;  %v4777_v24 = vpop.f32.mrf.mxu0  ;;  %v2785_v45 = vld [vmem:[%s5110_s29 + $0xaa] sm:$0xff]  ;;  %v3191_v35 = vpack.c.bf16 %v3156_v3, %v3155_v11 }
 0x293   : > { %v4695_v17 = vpop.f32.mrf.mxu1  ;;  %v2820_v55 = vpack.c.bf16 %v2786_v26, %v2785_v45 }
 0x294   : > { %v2586_v62 = vpop.f32.mrf.mxu0  ;;  %4963 = vmatmul.mubr.msk.bf16.gmra.mxu0 %vm375_vm2, %v3190_v51 }
 0x295   : > { %v2222_v56 = vpop.f32.mrf.mxu1  ;;  %v6290_v37 = vadd.f32 %v2586_v62, %v2362_v58  ;;  %4881 = vmatmul.mubr.msk.bf16.gmra.mxu1 %vm375_vm2, %v2819_v18  ;;  %4966 = vmatprep.mubr.msk.bf16.mxu0 %vm5045_vm1, %v5044_v1  ;;  %v3157_v18 = vld [vmem:[%s5110_s29 + $0xab] sm:$0xff]  ;;  %v2788_v62 = vld [vmem:[%s5110_s29 + $0xc2] sm:$0xff] }
 0x296   : > { %v2364_v2 = vadd.f32 %v2222_v56, %v5997_v47  ;;  %v4780_v39 = vpop.f32.mrf.mxu0  ;;  %4884 = vmatprep.mubr.msk.bf16.mxu1 %vm5045_vm1, %v5044_v1 }
 0x297   : > { %v4698_v31 = vpop.f32.mrf.mxu1 }
 0x298   : > { %v2589_v54 = vpop.f32.mrf.mxu0 }
 0x299   : > { %v2225_v58 = vpop.f32.mrf.mxu1  ;;  %v6302_v42 = vadd.f32 %v2589_v54, %v2363_v60  ;;  %v3158_v60 = vld [vmem:[%s5110_s29 + $0xb3] sm:$0xff] }
 0x29a   : > { %v2365_v6 = vadd.f32 %v2225_v58, %v6007_v13  ;;  %v4781_v47 = vpop.f32.mrf.mxu0  ;;  %v2787_v13 = vld [vmem:[%s5110_s29 + $0xba] sm:$0xff]  ;;  %v3192_v3 = vpack.c.bf16 %v3158_v60, %v3157_v18 }
 0x29b   : > { %v4699_v53 = vpop.f32.mrf.mxu1  ;;  %v2821_v45 = vpack.c.bf16 %v2788_v62, %v2787_v13 }
 0x29c   : > { %v2594_v30 = vpop.f32.mrf.mxu0  ;;  %4967 = vmatmul.mubr.msk.bf16.gmra.mxu0 %vm375_vm2, %v3191_v35 }
 0x29d   : > { %v2230_v51 = vpop.f32.mrf.mxu1  ;;  %v6306_v4 = vadd.f32 %v2594_v30, %v2364_v2  ;;  %4885 = vmatmul.mubr.msk.bf16.gmra.mxu1 %vm375_vm2, %v2820_v55  ;;  %4970 = vmatprep.mubr.msk.bf16.mxu0 %vm5045_vm1, %v5044_v1  ;;  %v3159_v55 = vld [vmem:[%s5110_s29 + $0xbb] sm:$0xff]  ;;  %v2790_v30 = vld [vmem:[%s5110_s29 + $0xd2] sm:$0xff] }
 0x29e   : > { %v2366_v24 = vadd.f32 %v2230_v51, %v6011_v15  ;;  %v4784_v17 = vpop.f32.mrf.mxu0  ;;  %4888 = vmatprep.mubr.msk.bf16.mxu1 %vm5045_vm1, %v5044_v1 }
 0x29f   : > { %v4702_v56 = vpop.f32.mrf.mxu1 }
 0x2a0   : > { %v2597_v11 = vpop.f32.mrf.mxu0 }
 0x2a1   : > { %v2233_v2 = vpop.f32.mrf.mxu1  ;;  %v6318_v39 = vadd.f32 %v2597_v11, %v2365_v6  ;;  %v3160_v6 = vld [vmem:[%s5110_s29 + $0xc3] sm:$0xff] }
 0x2a2   : > { %v2367_v26 = vadd.f32 %v2233_v2, %v6021_v44  ;;  %v4785_v15 = vpop.f32.mrf.mxu0  ;;  %v2789_v44 = vld [vmem:[%s5110_s29 + $0xca] sm:$0xff]  ;;  %v3193_v60 = vpack.c.bf16 %v3160_v6, %v3159_v55 }
 0x2a3   : > { %v4703_v31 = vpop.f32.mrf.mxu1  ;;  %v2822_v13 = vpack.c.bf16 %v2790_v30, %v2789_v44 }
 0x2a4   : > { %v2602_v54 = vpop.f32.mrf.mxu0  ;;  %4971 = vmatmul.mubr.msk.bf16.gmra.mxu0 %vm375_vm2, %v3192_v3 }
 0x2a5   : > { %v2238_v35 = vpop.f32.mrf.mxu1  ;;  %v6322_v58 = vadd.f32 %v2602_v54, %v2366_v24  ;;  %4889 = vmatmul.mubr.msk.bf16.gmra.mxu1 %vm375_vm2, %v2821_v45  ;;  %4974 = vmatprep.mubr.msk.bf16.mxu0 %vm5045_vm1, %v5044_v1  ;;  %v3161_v45 = vld [vmem:[%s5110_s29 + $0xcb] sm:$0xff]  ;;  %v2792_v54 = vld [vmem:[%s5110_s29 + $0xe2] sm:$0xff] }
 0x2a6   : > { %v2368_v47 = vadd.f32 %v2238_v35, %v6025_v43  ;;  %v4788_v53 = vpop.f32.mrf.mxu0  ;;  %4892 = vmatprep.mubr.msk.bf16.mxu1 %vm5045_vm1, %v5044_v1 }
 0x2a7   : > { %v4706_v51 = vpop.f32.mrf.mxu1 }
 0x2a8   : > { %v2605_v18 = vpop.f32.mrf.mxu0 }
 0x2a9   : > { %v2241_v24 = vpop.f32.mrf.mxu1  ;;  %v6334_v17 = vadd.f32 %v2605_v18, %v2367_v26  ;;  %v3162_v26 = vld [vmem:[%s5110_s29 + $0xd3] sm:$0xff] }
 0x2aa   : > { %v2369_v62 = vadd.f32 %v2241_v24, %v6035_v61  ;;  %v4789_v43 = vpop.f32.mrf.mxu0  ;;  %v2791_v61 = vld [vmem:[%s5110_s29 + $0xda] sm:$0xff]  ;;  %v3194_v6 = vpack.c.bf16 %v3162_v26, %v3161_v45 }
 0x2ab   : > { %v4707_v56 = vpop.f32.mrf.mxu1  ;;  %v2823_v44 = vpack.c.bf16 %v2792_v54, %v2791_v61 }
 0x2ac   : > { %v2610_v11 = vpop.f32.mrf.mxu0  ;;  %4975 = vmatmul.mubr.msk.bf16.gmra.mxu0 %vm375_vm2, %v3193_v60 }
 0x2ad   : > { %v2246_v3 = vpop.f32.mrf.mxu1  ;;  %v6338_v2 = vadd.f32 %v2610_v11, %v2368_v47  ;;  %4893 = vmatmul.mubr.msk.bf16.gmra.mxu1 %vm375_vm2, %v2822_v13  ;;  %4978 = vmatprep.mubr.msk.bf16.mxu0 %vm5045_vm1, %v5044_v1  ;;  %v3163_v13 = vld [vmem:[%s5110_s29 + $0xdb] sm:$0xff]  ;;  %v2794_v11 = vld [vmem:[%s5110_s29 + $0xf2] sm:$0xff] }
 0x2ae   : > { %v2370_v15 = vadd.f32 %v2246_v3, %v6039_v25  ;;  %v4792_v31 = vpop.f32.mrf.mxu0  ;;  %4896 = vmatprep.mubr.msk.bf16.mxu1 %vm5045_vm1, %v5044_v1 }
 0x2af   : > { %v4710_v35 = vpop.f32.mrf.mxu1 }
 0x2b0   : > { %v2613_v55 = vpop.f32.mrf.mxu0 }
 0x2b1   : > { %v2249_v47 = vpop.f32.mrf.mxu1  ;;  %v6350_v53 = vadd.f32 %v2613_v55, %v2369_v62  ;;  %v3164_v62 = vld [vmem:[%s5110_s29 + $0xe3] sm:$0xff] }
 0x2b2   : > { %v2371_v30 = vadd.f32 %v2249_v47, %v6049_v14  ;;  %v4793_v25 = vpop.f32.mrf.mxu0  ;;  %v2793_v14 = vld [vmem:[%s5110_s29 + $0xea] sm:$0xff]  ;;  %v3195_v26 = vpack.c.bf16 %v3164_v62, %v3163_v13 }
 0x2b3   : > { %v4711_v51 = vpop.f32.mrf.mxu1  ;;  %v2824_v61 = vpack.c.bf16 %v2794_v11, %v2793_v14 }
 0x2b4   : > { %v2618_v18 = vpop.f32.mrf.mxu0  ;;  %4979 = vmatmul.mubr.msk.bf16.gmra.mxu0 %vm375_vm2, %v3194_v6 }
 0x2b5   : > { %v2254_v60 = vpop.f32.mrf.mxu1  ;;  %v6354_v24 = vadd.f32 %v2618_v18, %v2370_v15  ;;  %4897 = vmatmul.mubr.msk.bf16.gmra.mxu1 %vm375_vm2, %v2823_v44  ;;  %4982 = vmatprep.mubr.msk.bf16.mxu0 %vm5045_vm1, %v5044_v1  ;;  %v3165_v44 = vld [vmem:[%s5110_s29 + $0xeb] sm:$0xff]  ;;  %v2796_v18 = vld [vmem:[%s5110_s29 + $0x102] sm:$0xff] }
 0x2b6   : > { %v2372_v43 = vadd.f32 %v2254_v60, %v6053_v23  ;;  %v4796_v56 = vpop.f32.mrf.mxu0  ;;  %4900 = vmatprep.mubr.msk.bf16.mxu1 %vm5045_vm1, %v5044_v1 }
 0x2b7   : > { %v4714_v3 = vpop.f32.mrf.mxu1 }
 0x2b8   : > { %v2621_v45 = vpop.f32.mrf.mxu0 }
 0x2b9   : > { %v2257_v15 = vpop.f32.mrf.mxu1  ;;  %v6366_v31 = vadd.f32 %v2621_v45, %v2371_v30  ;;  %v3166_v30 = vld [vmem:[%s5110_s29 + $0xf3] sm:$0xff] }
 0x2ba   : > { %v2373_v54 = vadd.f32 %v2257_v15, %v6063_v49  ;;  %v4797_v23 = vpop.f32.mrf.mxu0  ;;  %v2795_v49 = vld [vmem:[%s5110_s29 + $0xfa] sm:$0xff]  ;;  %v3196_v62 = vpack.c.bf16 %v3166_v30, %v3165_v44 }
 0x2bb   : > { %v4715_v35 = vpop.f32.mrf.mxu1  ;;  %v2825_v14 = vpack.c.bf16 %v2796_v18, %v2795_v49 }
 0x2bc   : > { %v2626_v55 = vpop.f32.mrf.mxu0  ;;  %4983 = vmatmul.mubr.msk.bf16.gmra.mxu0 %vm375_vm2, %v3195_v26 }
 0x2bd   : > { %v2262_v6 = vpop.f32.mrf.mxu1  ;;  %v6370_v47 = vadd.f32 %v2626_v55, %v2372_v43  ;;  %4901 = vmatmul.mubr.msk.bf16.gmra.mxu1 %vm375_vm2, %v2824_v61  ;;  %4986 = vmatprep.mubr.msk.bf16.mxu0 %vm5045_vm1, %v5044_v1  ;;  %v3167_v61 = vld [vmem:[%s5110_s29 + $0xfb] sm:$0xff]  ;;  %v2798_v55 = vld [vmem:[%s5110_s29 + $0x112] sm:$0xff] }
 0x2be   : > { %v2374_v25 = vadd.f32 %v2262_v6, %v6067_v0  ;;  %v4800_v51 = vpop.f32.mrf.mxu0  ;;  %4904 = vmatprep.mubr.msk.bf16.mxu1 %vm5045_vm1, %v5044_v1 }
 0x2bf   : > { %v4718_v60 = vpop.f32.mrf.mxu1 }
 0x2c0   : > { %v2629_v13 = vpop.f32.mrf.mxu0 }
 0x2c1   : > { %v2265_v43 = vpop.f32.mrf.mxu1  ;;  %v6382_v56 = vadd.f32 %v2629_v13, %v2373_v54  ;;  %v3168_v54 = vld [vmem:[%s5110_s29 + $0x103] sm:$0xff] }
 0x2c2   : > { %v2375_v11 = vadd.f32 %v2265_v43, %v6077_v33  ;;  %v4801_v0 = vpop.f32.mrf.mxu0  ;;  %v2797_v33 = vld [vmem:[%s5110_s29 + $0x10a] sm:$0xff]  ;;  %v3197_v30 = vpack.c.bf16 %v3168_v54, %v3167_v61 }
 0x2c3   : > { %v4719_v3 = vpop.f32.mrf.mxu1  ;;  %v2826_v49 = vpack.c.bf16 %v2798_v55, %v2797_v33 }
 0x2c4   : > { %v2634_v45 = vpop.f32.mrf.mxu0  ;;  %4987 = vmatmul.mubr.msk.bf16.gmra.mxu0 %vm375_vm2, %v3196_v62 }
 0x2c5   : > { %v2270_v26 = vpop.f32.mrf.mxu1  ;;  %v6386_v15 = vadd.f32 %v2634_v45, %v2374_v25  ;;  %4905 = vmatmul.mubr.msk.bf16.gmra.mxu1 %vm375_vm2, %v2825_v14  ;;  %4990 = vmatprep.mubr.msk.bf16.mxu0 %vm5045_vm1, %v5044_v1  ;;  %v3169_v14 = vld [vmem:[%s5110_s29 + $0x10b] sm:$0xff]  ;;  %v2800_v45 = vld [vmem:[%s5110_s29 + $0x122] sm:$0xff] }
 0x2c6   : > { %v2376_v23 = vadd.f32 %v2270_v26, %v6081_v10  ;;  %v4804_v35 = vpop.f32.mrf.mxu0  ;;  %4908 = vmatprep.mubr.msk.bf16.mxu1 %vm5045_vm1, %v5044_v1 }
 0x2c7   : > { %v4722_v6 = vpop.f32.mrf.mxu1 }
 0x2c8   : > { %v2637_v44 = vpop.f32.mrf.mxu0 }
 0x2c9   : > { %v2273_v25 = vpop.f32.mrf.mxu1  ;;  %v6398_v51 = vadd.f32 %v2637_v44, %v2375_v11  ;;  %v3170_v11 = vld [vmem:[%s5110_s29 + $0x113] sm:$0xff] }
 0x2ca   : > { %v2377_v18 = vadd.f32 %v2273_v25, %v6091_v34  ;;  %v4805_v10 = vpop.f32.mrf.mxu0  ;;  %v2799_v34 = vld [vmem:[%s5110_s29 + $0x11a] sm:$0xff]  ;;  %v3198_v54 = vpack.c.bf16 %v3170_v11, %v3169_v14 }
 0x2cb   : > { %v4723_v60 = vpop.f32.mrf.mxu1  ;;  %v2827_v33 = vpack.c.bf16 %v2800_v45, %v2799_v34 }
 0x2cc   : > { %v2642_v13 = vpop.f32.mrf.mxu0  ;;  %4991 = vmatmul.mubr.msk.bf16.gmra.mxu0 %vm375_vm2, %v3197_v30 }
 0x2cd   : > { %v2278_v62 = vpop.f32.mrf.mxu1  ;;  %v6402_v43 = vadd.f32 %v2642_v13, %v2376_v23  ;;  %4909 = vmatmul.mubr.msk.bf16.gmra.mxu1 %vm375_vm2, %v2826_v49  ;;  %4994 = vmatprep.mubr.msk.bf16.mxu0 %vm5045_vm1, %v5044_v1  ;;  %v3171_v49 = vld [vmem:[%s5110_s29 + $0x11b] sm:$0xff]  ;;  %v2802_v13 = vld [vmem:[%s5110_s29 + $0x132] sm:$0xff] }
 0x2ce   : > { %v2378_v0 = vadd.f32 %v2278_v62, %v6095_v36  ;;  %v4808_v3 = vpop.f32.mrf.mxu0  ;;  %4912 = vmatprep.mubr.msk.bf16.mxu1 %vm5045_vm1, %v5044_v1 }
 0x2cf   : > { %v4726_v26 = vpop.f32.mrf.mxu1 }
 0x2d0   : > { %v2645_v61 = vpop.f32.mrf.mxu0 }
 0x2d1   : > { %v2281_v23 = vpop.f32.mrf.mxu1  ;;  %v6414_v35 = vadd.f32 %v2645_v61, %v2377_v18  ;;  %v3172_v18 = vld [vmem:[%s5110_s29 + $0x123] sm:$0xff] }
 0x2d2   : > { %v2379_v55 = vadd.f32 %v2281_v23, %v6105_v40  ;;  %v4809_v36 = vpop.f32.mrf.mxu0  ;;  %v2801_v40 = vld [vmem:[%s5110_s29 + $0x12a] sm:$0xff]  ;;  %v3199_v11 = vpack.c.bf16 %v3172_v18, %v3171_v49 }
 0x2d3   : > { %v4727_v6 = vpop.f32.mrf.mxu1  ;;  %v2828_v34 = vpack.c.bf16 %v2802_v13, %v2801_v40 }
 0x2d4   : > { %v2650_v44 = vpop.f32.mrf.mxu0  ;;  %4995 = vmatmul.mubr.msk.bf16.gmra.mxu0 %vm375_vm2, %v3198_v54 }
 0x2d5   : > { %v2286_v30 = vpop.f32.mrf.mxu1  ;;  %v6418_v25 = vadd.f32 %v2650_v44, %v2378_v0  ;;  %4913 = vmatmul.mubr.msk.bf16.gmra.mxu1 %vm375_vm2, %v2827_v33  ;;  %4998 = vmatprep.mubr.msk.bf16.mxu0 %vm5045_vm1, %v5044_v1  ;;  %v3173_v33 = vld [vmem:[%s5110_s29 + $0x12b] sm:$0xff]  ;;  %v2804_v44 = vld [vmem:[%s5110_s29 + $0x142] sm:$0xff] }
 0x2d6   : > { %v2380_v10 = vadd.f32 %v2286_v30, %v6109_v20  ;;  %v4812_v60 = vpop.f32.mrf.mxu0  ;;  %4916 = vmatprep.mubr.msk.bf16.mxu1 %vm5045_vm1, %v5044_v1 }
 0x2d7   : > { %v4730_v62 = vpop.f32.mrf.mxu1 }
 0x2d8   : > { %v2653_v14 = vpop.f32.mrf.mxu0 }
 0x2d9   : > { %v2289_v0 = vpop.f32.mrf.mxu1  ;;  %v6430_v3 = vadd.f32 %v2653_v14, %v2379_v55  ;;  %v3174_v55 = vld [vmem:[%s5110_s29 + $0x133] sm:$0xff] }
 0x2da   : > { %v2381_v45 = vadd.f32 %v2289_v0, %v6119_v27  ;;  %v4813_v20 = vpop.f32.mrf.mxu0  ;;  %v2803_v27 = vld [vmem:[%s5110_s29 + $0x13a] sm:$0xff]  ;;  %v3200_v18 = vpack.c.bf16 %v3174_v55, %v3173_v33 }
 0x2db   : > { %v4731_v26 = vpop.f32.mrf.mxu1  ;;  %v2829_v40 = vpack.c.bf16 %v2804_v44, %v2803_v27 }
 0x2dc   : > { %v2658_v61 = vpop.f32.mrf.mxu0  ;;  %4999 = vmatmul.mubr.msk.bf16.gmra.mxu0 %vm375_vm2, %v3199_v11 }
 0x2dd   : > { %v2294_v54 = vpop.f32.mrf.mxu1  ;;  %v6434_v23 = vadd.f32 %v2658_v61, %v2380_v10  ;;  %4917 = vmatmul.mubr.msk.bf16.gmra.mxu1 %vm375_vm2, %v2828_v34  ;;  %5002 = vmatprep.mubr.msk.bf16.mxu0 %vm5045_vm1, %v5044_v1  ;;  %v3175_v34 = vld [vmem:[%s5110_s29 + $0x13b] sm:$0xff]  ;;  %v2806_v61 = vld [vmem:[%s5110_s29 + $0x152] sm:$0xff] }
 0x2de   : > { %v2382_v36 = vadd.f32 %v2294_v54, %v6123_v50  ;;  %v4816_v6 = vpop.f32.mrf.mxu0  ;;  %4920 = vmatprep.mubr.msk.bf16.mxu1 %vm5045_vm1, %v5044_v1 }
 0x2df   : > { %v4734_v30 = vpop.f32.mrf.mxu1 }
 0x2e0   : > { %v2661_v49 = vpop.f32.mrf.mxu0 }
 0x2e1   : > { %v2297_v10 = vpop.f32.mrf.mxu1  ;;  %v6446_v60 = vadd.f32 %v2661_v49, %v2381_v45  ;;  %v3176_v45 = vld [vmem:[%s5110_s29 + $0x143] sm:$0xff] }
 0x2e2   : > { %v2383_v13 = vadd.f32 %v2297_v10, %v6133_v12  ;;  %v4817_v50 = vpop.f32.mrf.mxu0  ;;  %v2805_v12 = vld [vmem:[%s5110_s29 + $0x14a] sm:$0xff]  ;;  %v3201_v55 = vpack.c.bf16 %v3176_v45, %v3175_v34 }
 0x2e3   : > { %v4735_v62 = vpop.f32.mrf.mxu1  ;;  %v2830_v27 = vpack.c.bf16 %v2806_v61, %v2805_v12 }
 0x2e4   : > { %v2666_v14 = vpop.f32.mrf.mxu0  ;;  %5003 = vmatmul.mubr.msk.bf16.gmra.mxu0 %vm375_vm2, %v3200_v18 }
 0x2e5   : > { %v2302_v11 = vpop.f32.mrf.mxu1  ;;  %v6450_v0 = vadd.f32 %v2666_v14, %v2382_v36  ;;  %4921 = vmatmul.mubr.msk.bf16.gmra.mxu1 %vm375_vm2, %v2829_v40  ;;  %5006 = vmatprep.mubr.msk.bf16.mxu0 %vm5045_vm1, %v5044_v1  ;;  %v3177_v40 = vld [vmem:[%s5110_s29 + $0x14b] sm:$0xff]  ;;  %v2808_v14 = vld [vmem:[%s5110_s29 + $0x162] sm:$0xff] }
 0x2e6   : > { %v2384_v20 = vadd.f32 %v2302_v11, %v6137_v46  ;;  %v4820_v26 = vpop.f32.mrf.mxu0  ;;  %4924 = vmatprep.mubr.msk.bf16.mxu1 %vm5045_vm1, %v5044_v1 }
 0x2e7   : > { %v4738_v54 = vpop.f32.mrf.mxu1 }
 0x2e8   : > { %v2669_v33 = vpop.f32.mrf.mxu0 }
 0x2e9   : > { %v2305_v36 = vpop.f32.mrf.mxu1  ;;  %v6462_v6 = vadd.f32 %v2669_v33, %v2383_v13  ;;  %v3178_v13 = vld [vmem:[%s5110_s29 + $0x153] sm:$0xff] }
 0x2ea   : > { %v2385_v44 = vadd.f32 %v2305_v36, %v6147_v52  ;;  %v4821_v46 = vpop.f32.mrf.mxu0  ;;  %v2807_v52 = vld [vmem:[%s5110_s29 + $0x15a] sm:$0xff]  ;;  %v3202_v45 = vpack.c.bf16 %v3178_v13, %v3177_v40 }
 0x2eb   : > { %v4739_v30 = vpop.f32.mrf.mxu1  ;;  %v2831_v12 = vpack.c.bf16 %v2808_v14, %v2807_v52 }
 0x2ec   : > { %v2674_v49 = vpop.f32.mrf.mxu0  ;;  %5007 = vmatmul.mubr.msk.bf16.gmra.mxu0 %vm375_vm2, %v3201_v55 }
 0x2ed   : > { %v2310_v18 = vpop.f32.mrf.mxu1  ;;  %v6466_v10 = vadd.f32 %v2674_v49, %v2384_v20  ;;  %4925 = vmatmul.mubr.msk.bf16.gmra.mxu1 %vm375_vm2, %v2830_v27  ;;  %5010 = vmatprep.mubr.msk.bf16.mxu0 %vm5045_vm1, %v5044_v1  ;;  %v3179_v27 = vld [vmem:[%s5110_s29 + $0x15b] sm:$0xff] }
 0x2ee   : > { %v2386_v50 = vadd.f32 %v2310_v18, %v6151_v28  ;;  %v4824_v62 = vpop.f32.mrf.mxu0  ;;  %4928 = vmatprep.mubr.msk.bf16.mxu1 %vm5045_vm1, %v5044_v1 }
 0x2ef   : > { %v4742_v11 = vpop.f32.mrf.mxu1 }
 0x2f0   : > { %v2677_v34 = vpop.f32.mrf.mxu0 }
 0x2f1   : > { %v2313_v20 = vpop.f32.mrf.mxu1  ;;  %v6478_v26 = vadd.f32 %v2677_v34, %v2385_v44  ;;  %v3180_v44 = vld [vmem:[%s5110_s29 + $0x163] sm:$0xff] }
 0x2f2   : > { %v2387_v61 = vadd.f32 %v2313_v20, %v6162_v57  ;;  %v4825_v54 = vpop.f32.mrf.mxu0  ;;  %v2809_v57 = vld [vmem:[%s5110_s29 + $0x16a] sm:$0xf]  ;;  %v3203_v40 = vpack.c.bf16 %v3180_v44, %v3179_v27 }
 0x2f3   : > { %v4743_v28 = vpop.f32.mrf.mxu1  ;;  %v2832_v62 = vpack.c.bf16 %v2809_v57, %v2809_v57  ;;  %v3181_v20 = vld [vmem:[%s5110_s29 + $0x16b] sm:$0xf]  ;;  %s6555_s29 = scalar_lea.vmem %s6803_s5, %s5025_s27 }
 0x2f4   : > { %v2682_v33 = vpop.f32.mrf.mxu0  ;;  %5011 = vmatmul.mubr.msk.bf16.gmra.mxu0 %vm375_vm2, %v3202_v45 }
 0x2f5   : > { %v2318_v55 = vpop.f32.mrf.mxu1  ;;  %v6482_v36 = vadd.f32 %v2682_v33, %v2386_v50  ;;  %4929 = vmatmul.mubr.msk.bf16.gmra.mxu1 %vm375_vm2, %v2831_v12  ;;  %5014 = vmatprep.mubr.msk.bf16.mxu0 %vm5045_vm1, %v5044_v1 }
 0x2f6   : > { %v2388_v46 = vadd.f32 %v2318_v55, %v6166_v19  ;;  %v4828_v30 = vpop.f32.mrf.mxu0  ;;  %4932 = vmatprep.mubr.msk.bf16.mxu1 %vm5045_vm1, %v5044_v1 }
 0x2f7   : > { %v4746_v49 = vpop.f32.mrf.mxu1 }
 0x2f8   : > { %v2685_v18 = vpop.f32.mrf.mxu0 }
 0x2f9   : > { %v2321_v13 = vpop.f32.mrf.mxu1  ;;  %v6493_v50 = vadd.f32 %v2685_v18, %v2387_v61 }
 0x2fa   : > { %v2389_v52 = vadd.f32 %v2321_v13, %v6177_v5  ;;  %v4829_v14 = vpop.f32.mrf.mxu0  ;;  %v3204_v5 = vpack.c.bf16 %v3181_v20, %v3181_v20 }
 0x2fb   : > { %v4747_v11 = vpop.f32.mrf.mxu1 }
 0x2fc   : > { %v2690_v34 = vpop.f32.mrf.mxu0  ;;  %5015 = vmatmul.mubr.msk.bf16.gmra.mxu0 %vm375_vm2, %v3203_v40 }
 0x2fd   : > { %v2326_v19 = vpop.f32.mrf.mxu1  ;;  %v6497_v45 = vadd.f32 %v2690_v34, %v2388_v46  ;;  %4933 = vmatmul.mubr.msk.bf16.gmra.mxu1 %vm375_vm2, %v2832_v62  ;;  %5018 = vmatprep.mubr.msk.bf16.mxu0 %vm5045_vm1, %v5044_v1 }
 0x2fe   : > { %v2390_v12 = vadd.f32 %v2326_v19, %v6181_v29  ;;  %v4832_v61 = vpop.f32.mrf.mxu0 }
 0x2ff   : > { %v4750_v54 = vpop.f32.mrf.mxu1 }
 0x300   : > { %v2693_v28 = vpop.f32.mrf.mxu0 }
 0x301   : > { %v2329_v33 = vpop.f32.mrf.mxu1  ;;  %v6504_v55 = vadd.f32 %v2693_v28, %v2389_v52 }
 0x302   : > { %v2391_v27 = vadd.f32 %v2329_v33, %v6193_v38  ;;  %v4833_v44 = vpop.f32.mrf.mxu0 }
 0x303   : > { %v4751_v46 = vpop.f32.mrf.mxu1 }
 0x304   : > { %v2698_v30 = vpop.f32.mrf.mxu0  ;;  %5019 = vmatmul.mubr.msk.bf16.gmra.mxu0 %vm375_vm2, %v3204_v5 }
 0x305   : > { %v2334_v57 = vpop.f32.mrf.mxu1  ;;  %v6508_v49 = vadd.f32 %v2698_v30, %v2390_v12 }
 0x306   : > { %v2392_v1 = vadd.f32 %v2334_v57, %v6197_v9  ;;  %v4836_v29 = vpop.f32.mrf.mxu0 }
 0x307   : > { %v4754_v18 = vpop.f32.mrf.mxu1 }
 0x308   : > { %v2701_v40 = vpop.f32.mrf.mxu0 }
 0x309   : > { %v2337_v13 = vpop.f32.mrf.mxu1  ;;  %v6511_v62 = vadd.f32 %v2701_v40, %v2391_v27 }
 0x30a   : > { %v2393_v52 = vadd.f32 %v2337_v13, %v6209_v21  ;;  %v4837_v14 = vpop.f32.mrf.mxu0 }
 0x30b   : > { %v4755_v38 = vpop.f32.mrf.mxu1 }
 0x30c   : > { %v2706_v11 = vpop.f32.mrf.mxu0 }
 0x30d   : > { %v2342_v34 = vpop.f32.mrf.mxu1  ;;  %v6514_v19 = vadd.f32 %v2706_v11, %v2392_v1 }
 0x30e   : > { %v2394_v20 = vadd.f32 %v2342_v34, %v6213_v22  ;;  %v4840_v12 = vpop.f32.mrf.mxu0 }
 0x30f   : > { %v4758_v61 = vpop.f32.mrf.mxu1 }
 0x310   : > { %v2709_v54 = vpop.f32.mrf.mxu0 }
 0x311   : > { %v2345_v9 = vpop.f32.mrf.mxu1  ;;  %v6517_v28 = vadd.f32 %v2709_v54, %v2393_v52 }
 0x312   : > { %v2395_v5 = vadd.f32 %v2345_v9, %v6225_v32  ;;  %v4841_v33 = vpop.f32.mrf.mxu0  ;;  %v6531_v9 = vld [vmem:[%s6800_s2] ss:$0 sm:$0xff] }
 0x313   : > { %v4759_v27 = vpop.f32.mrf.mxu1 }
 0x314   : > { %v2714_v44 = vpop.f32.mrf.mxu0 }
 0x315   : > { %v2350_v21 = vpop.f32.mrf.mxu1  ;;  %v6520_v46 = vadd.f32 %v2714_v44, %v2394_v20 }
 0x316   : > { %v2396_v30 = vadd.f32 %v2350_v21, %v6228_v59  ;;  %v4844_v57 = vpop.f32.mrf.mxu0 }
 0x317   : > { %v4762_v1 = vpop.f32.mrf.mxu1  ;;  %v3513_v57 = vld [vmem:[%s6538_s23 + $0x18] sm:$0xff] }
 0x318   : > { %v2717_v29 = vpop.f32.mrf.mxu0 }
 0x319   : > { %v2353_v22 = vpop.f32.mrf.mxu1  ;;  %v6523_v18 = vadd.f32 %v2717_v29, %v2395_v5 }
 0x31a   : > { %v4845_v40 = vpop.f32.mrf.mxu0 }
 0x31b   : > { %v4763_v13 = vpop.f32.mrf.mxu1 }
 0x31c   : > { %v2722_v52 = vpop.f32.mrf.mxu0 }
 0x31d   : > { %v6525_v14 = vadd.f32 %v2722_v52, %v2396_v30  ;;  %v2934_v32 = vpop.f32.mrf.mxu1 }
 0x31e   : > { %v4848_v38 = vpop.f32.mrf.mxu0  ;;  %v3100_v59 = vadd.f32 %v2934_v32, %v6242_v7  ;;  %v6543_v7 = vld [vmem:[%s6801_s3] ss:$0 sm:$0xff] }
 0x31f   : > { %v4854_v11 = vpop.f32.mrf.mxu1 }
 0x320   : > { %v2725_v34 = vpop.f32.mrf.mxu0 }
 0x321   : > { %v2937_v20 = vpop.f32.mrf.mxu1 }
 0x322   : > { %v4849_v12 = vpop.f32.mrf.mxu0  ;;  %v3101_v44 = vadd.f32 %v2937_v20, %v6254_v48  ;;  %v3514_v48 = vld [vmem:[%s6538_s23 + $0x20] sm:$0xff] }
 0x323   : > { %v4855_v61 = vpop.f32.mrf.mxu1 }
 0x324   : > { %v3306_v54 = vpop.f32.mrf.mxu0 }
 0x325   : > { %v2942_v5 = vpop.f32.mrf.mxu1  ;;  %v3472_v33 = vadd.f32 %v3306_v54, %v3100_v59 }
 0x326   : > { %v4940_v27 = vpop.f32.mrf.mxu0  ;;  %v3102_v52 = vadd.f32 %v2942_v5, %v6258_v16 }
 0x327   : > { %v3561_v21 = vmul.f32 %v6531_v9, %v3472_v33  ;;  %v4858_v30 = vpop.f32.mrf.mxu1 }
 0x328   : > { %v3309_v1 = vpop.f32.mrf.mxu0 }
 0x329   : > { %v3609_v29 = vadd.f32 %v6543_v7, %v3561_v21  ;;  %v2945_v22 = vpop.f32.mrf.mxu1  ;;  %v3473_v40 = vadd.f32 %v3309_v1, %v3101_v44  ;;  %v3515_v44 = vld [vmem:[%s6538_s23 + $0x28] sm:$0xff] }
 0x32a   : > { %v4941_v13 = vpop.f32.mrf.mxu0  ;;  %v3103_v54 = vadd.f32 %v2945_v22, %v6270_v41 }
 0x32b   : > { %v3650_v32 = vadd.f32 %v3609_v29, %v3513_v57  ;;  %v3562_v38 = vmul.f32 %v6531_v9, %v3473_v40  ;;  %v4859_v11 = vpop.f32.mrf.mxu1 }
 0x32c   : > { %v3314_v34 = vpop.f32.mrf.mxu0 }
 0x32d   : > { %v3691_v20 = vmax.f32 %v3650_v32, 0.0  ;;  %v3610_v12 = vadd.f32 %v6543_v7, %v3562_v38  ;;  %v2950_v59 = vpop.f32.mrf.mxu1  ;;  %v3474_v61 = vadd.f32 %v3314_v34, %v3102_v52  ;;  %v3516_v32 = vld [vmem:[%s6538_s23 + $0x30] sm:$0xff] }
 0x32e   : > { %v4944_v16 = vpop.f32.mrf.mxu0  ;;  %v3104_v13 = vadd.f32 %v2950_v59, %v6274_v63 }
 0x32f   : > { %3732 = vst.msk [vmem:[%s6555_s29] sm:$0xff] %vm375_vm2, %v3691_v20  ;;  %v3651_v5 = vadd.f32 %v3610_v12, %v3514_v48  ;;  %v3563_v33 = vmul.f32 %v6531_v9, %v3474_v61  ;;  %v4862_v27 = vpop.f32.mrf.mxu1 }
 0x330   : > { %v3317_v21 = vpop.f32.mrf.mxu0 }
 0x331   : > { %v3692_v30 = vmax.f32 %v3651_v5, 0.0  ;;  %v3611_v57 = vadd.f32 %v6543_v7, %v3563_v33  ;;  %v2953_v1 = vpop.f32.mrf.mxu1  ;;  %v3475_v29 = vadd.f32 %v3317_v21, %v3103_v54  ;;  %v3517_v54 = vld [vmem:[%s6538_s23 + $0x38] sm:$0xff] }
 0x332   : > { %v4945_v40 = vpop.f32.mrf.mxu0  ;;  %v3105_v61 = vadd.f32 %v2953_v1, %v6286_v8 }
 0x333   : > { %3733 = vst.msk [vmem:[%s6555_s29 + $0x8] sm:$0xff] %vm375_vm2, %v3692_v30  ;;  %v3652_v41 = vadd.f32 %v3611_v57, %v3515_v44  ;;  %v3564_v22 = vmul.f32 %v6531_v9, %v3475_v29  ;;  %v4863_v52 = vpop.f32.mrf.mxu1  ;;  %v3518_v40 = vld [vmem:[%s6538_s23 + $0x40] sm:$0xff] }
 0x334   : > { %v3322_v38 = vpop.f32.mrf.mxu0 }
 0x335   : > { %v3693_v11 = vmax.f32 %v3652_v41, 0.0  ;;  %v3612_v48 = vadd.f32 %v6543_v7, %v3564_v22  ;;  %v2958_v34 = vpop.f32.mrf.mxu1  ;;  %v3476_v20 = vadd.f32 %v3322_v38, %v3104_v13 }
 0x336   : > { %v4948_v12 = vpop.f32.mrf.mxu0  ;;  %v3106_v57 = vadd.f32 %v2958_v34, %v6290_v37 }
 0x337   : > { %3734 = vst.msk [vmem:[%s6555_s29 + $0x10] sm:$0xff] %vm375_vm2, %v3693_v11  ;;  %v3653_v63 = vadd.f32 %v3612_v48, %v3516_v32  ;;  %v3565_v59 = vmul.f32 %v6531_v9, %v3476_v20  ;;  %v4866_v16 = vpop.f32.mrf.mxu1  ;;  %v3519_v20 = vld [vmem:[%s6538_s23 + $0x48] sm:$0xff] }
 0x338   : > { %v3325_v5 = vpop.f32.mrf.mxu0 }
 0x339   : > { %v3694_v33 = vmax.f32 %v3653_v63, 0.0  ;;  %v3613_v27 = vadd.f32 %v6543_v7, %v3565_v59  ;;  %v2961_v44 = vpop.f32.mrf.mxu1  ;;  %v3477_v21 = vadd.f32 %v3325_v5, %v3105_v61 }
 0x33a   : > { %v4949_v30 = vpop.f32.mrf.mxu0  ;;  %v3107_v11 = vadd.f32 %v2961_v44, %v6302_v42  ;;  %v3520_v44 = vld [vmem:[%s6538_s23 + $0x50] sm:$0xff] }
 0x33b   : > { %3735 = vst.msk [vmem:[%s6555_s29 + $0x18] sm:$0xff] %vm375_vm2, %v3694_v33  ;;  %v3654_v8 = vadd.f32 %v3613_v27, %v3517_v54  ;;  %v3566_v1 = vmul.f32 %v6531_v9, %v3477_v21  ;;  %v4867_v29 = vpop.f32.mrf.mxu1 }
 0x33c   : > { %v3330_v13 = vpop.f32.mrf.mxu0 }
 0x33d   : > { %v3695_v41 = vmax.f32 %v3654_v8, 0.0  ;;  %v3614_v22 = vadd.f32 %v6543_v7, %v3566_v1  ;;  %v2966_v52 = vpop.f32.mrf.mxu1  ;;  %v3478_v32 = vadd.f32 %v3330_v13, %v3106_v57 }
 0x33e   : > { %v4952_v38 = vpop.f32.mrf.mxu0  ;;  %v3108_v5 = vadd.f32 %v2966_v52, %v6306_v4 }
 0x33f   : > { %3736 = vst.msk [vmem:[%s6555_s29 + $0x20] sm:$0xff] %vm375_vm2, %v3695_v41  ;;  %v3655_v37 = vadd.f32 %v3614_v22, %v3518_v40  ;;  %v3567_v48 = vmul.f32 %v6531_v9, %v3478_v32  ;;  %v4870_v34 = vpop.f32.mrf.mxu1  ;;  %v3521_v22 = vld [vmem:[%s6538_s23 + $0x58] sm:$0xff] }
 0x340   : > { %v3333_v12 = vpop.f32.mrf.mxu0 }
 0x341   : > { %v3696_v61 = vmax.f32 %v3655_v37, 0.0  ;;  %v3615_v63 = vadd.f32 %v6543_v7, %v3567_v48  ;;  %v2969_v59 = vpop.f32.mrf.mxu1  ;;  %v3479_v16 = vadd.f32 %v3333_v12, %v3107_v11 }
 0x342   : > { %v4953_v54 = vpop.f32.mrf.mxu0  ;;  %v3109_v40 = vadd.f32 %v2969_v59, %v6318_v39 }
 0x343   : > { %3737 = vst.msk [vmem:[%s6555_s29 + $0x28] sm:$0xff] %vm375_vm2, %v3696_v61  ;;  %v3656_v42 = vadd.f32 %v3615_v63, %v3519_v20  ;;  %v3568_v33 = vmul.f32 %v6531_v9, %v3479_v16  ;;  %v4871_v27 = vpop.f32.mrf.mxu1  ;;  %v3522_v61 = vld [vmem:[%s6538_s23 + $0x60] sm:$0xff] }
 0x344   : > { %v3338_v21 = vpop.f32.mrf.mxu0 }
 0x345   : > { %v3697_v30 = vmax.f32 %v3656_v42, 0.0  ;;  %v3616_v57 = vadd.f32 %v6543_v7, %v3568_v33  ;;  %v2974_v8 = vpop.f32.mrf.mxu1  ;;  %v3480_v1 = vadd.f32 %v3338_v21, %v3108_v5  ;;  %v3523_v21 = vld [vmem:[%s6538_s23 + $0x68] sm:$0xff] }
 0x346   : > { %v4956_v29 = vpop.f32.mrf.mxu0  ;;  %v3110_v34 = vadd.f32 %v2974_v8, %v6322_v58 }
 0x347   : > { %3738 = vst.msk [vmem:[%s6555_s29 + $0x30] sm:$0xff] %vm375_vm2, %v3697_v30  ;;  %v3657_v4 = vadd.f32 %v3616_v57, %v3520_v44  ;;  %v3569_v13 = vmul.f32 %v6531_v9, %v3480_v1  ;;  %v4874_v41 = vpop.f32.mrf.mxu1 }
 0x348   : > { %v3341_v52 = vpop.f32.mrf.mxu0 }
 0x349   : > { %v3698_v32 = vmax.f32 %v3657_v4, 0.0  ;;  %v3617_v38 = vadd.f32 %v6543_v7, %v3569_v13  ;;  %v2977_v11 = vpop.f32.mrf.mxu1  ;;  %v3481_v37 = vadd.f32 %v3341_v52, %v3109_v40 }
 0x34a   : > { %v4957_v48 = vpop.f32.mrf.mxu0  ;;  %v3111_v33 = vadd.f32 %v2977_v11, %v6334_v17 }
 0x34b   : > { %3739 = vst.msk [vmem:[%s6555_s29 + $0x38] sm:$0xff] %vm375_vm2, %v3698_v32  ;;  %v3658_v39 = vadd.f32 %v3617_v38, %v3521_v22  ;;  %v3570_v20 = vmul.f32 %v6531_v9, %v3481_v37  ;;  %v4875_v12 = vpop.f32.mrf.mxu1  ;;  %v3524_v22 = vld [vmem:[%s6538_s23 + $0x70] sm:$0xff] }
 0x34c   : > { %v3346_v63 = vpop.f32.mrf.mxu0  ;;  %v3525_v12 = vld [vmem:[%s6538_s23 + $0x78] sm:$0xff] }
 0x34d   : > { %v3699_v59 = vmax.f32 %v3658_v39, 0.0  ;;  %v3618_v16 = vadd.f32 %v6543_v7, %v3570_v20  ;;  %v2982_v54 = vpop.f32.mrf.mxu1  ;;  %v3482_v5 = vadd.f32 %v3346_v63, %v3110_v34 }
 0x34e   : > { %v4960_v42 = vpop.f32.mrf.mxu0  ;;  %v3112_v4 = vadd.f32 %v2982_v54, %v6338_v2 }
 0x34f   : > { %3740 = vst.msk [vmem:[%s6555_s29 + $0x40] sm:$0xff] %vm375_vm2, %v3699_v59  ;;  %v3659_v58 = vadd.f32 %v3618_v16, %v3522_v61  ;;  %v3571_v27 = vmul.f32 %v6531_v9, %v3482_v5  ;;  %v4878_v44 = vpop.f32.mrf.mxu1 }
 0x350   : > { %v3349_v30 = vpop.f32.mrf.mxu0 }
 0x351   : > { %v3700_v57 = vmax.f32 %v3659_v58, 0.0  ;;  %v3619_v8 = vadd.f32 %v6543_v7, %v3571_v27  ;;  %v2985_v1 = vpop.f32.mrf.mxu1  ;;  %v3483_v29 = vadd.f32 %v3349_v30, %v3111_v33  ;;  %v3526_v27 = vld [vmem:[%s6538_s23 + $0x80] sm:$0xff] }
 0x352   : > { %v4961_v40 = vpop.f32.mrf.mxu0  ;;  %v3113_v34 = vadd.f32 %v2985_v1, %v6350_v53 }
 0x353   : > { %3741 = vst.msk [vmem:[%s6555_s29 + $0x48] sm:$0xff] %vm375_vm2, %v3700_v57  ;;  %v3660_v17 = vadd.f32 %v3619_v8, %v3523_v21  ;;  %v3572_v13 = vmul.f32 %v6531_v9, %v3483_v29  ;;  %v4879_v41 = vpop.f32.mrf.mxu1 }
 0x354   : > { %v3354_v52 = vpop.f32.mrf.mxu0 }
 0x355   : > { %v3701_v32 = vmax.f32 %v3660_v17, 0.0  ;;  %v3620_v38 = vadd.f32 %v6543_v7, %v3572_v13  ;;  %v2990_v11 = vpop.f32.mrf.mxu1  ;;  %v3484_v37 = vadd.f32 %v3354_v52, %v3112_v4  ;;  %v3527_v17 = vld [vmem:[%s6538_s23 + $0x88] sm:$0xff] }
 0x356   : > { %v4964_v48 = vpop.f32.mrf.mxu0  ;;  %v3114_v42 = vadd.f32 %v2990_v11, %v6354_v24 }
 0x357   : > { %3742 = vst.msk [vmem:[%s6555_s29 + $0x50] sm:$0xff] %vm375_vm2, %v3701_v32  ;;  %v3661_v2 = vadd.f32 %v3620_v38, %v3524_v22  ;;  %v3573_v39 = vmul.f32 %v6531_v9, %v3484_v37  ;;  %v4882_v20 = vpop.f32.mrf.mxu1 }
 0x358   : > { %v3357_v61 = vpop.f32.mrf.mxu0 }
 0x359   : > { %v3702_v63 = vmax.f32 %v3661_v2, 0.0  ;;  %v3621_v59 = vadd.f32 %v6543_v7, %v3573_v39  ;;  %v2993_v16 = vpop.f32.mrf.mxu1  ;;  %v3485_v54 = vadd.f32 %v3357_v61, %v3113_v34  ;;  %v3528_v34 = vld [vmem:[%s6538_s23 + $0x90] sm:$0xff] }
 0x35a   : > { %v4965_v5 = vpop.f32.mrf.mxu0  ;;  %v3115_v29 = vadd.f32 %v2993_v16, %v6366_v31 }
 0x35b   : > { %3743 = vst.msk [vmem:[%s6555_s29 + $0x58] sm:$0xff] %vm375_vm2, %v3702_v63  ;;  %v3662_v53 = vadd.f32 %v3621_v59, %v3525_v12  ;;  %v3574_v33 = vmul.f32 %v6531_v9, %v3485_v54  ;;  %v4883_v58 = vpop.f32.mrf.mxu1  ;;  %v3529_v5 = vld [vmem:[%s6538_s23 + $0x98] sm:$0xff] }
 0x35c   : > { %v3362_v44 = vpop.f32.mrf.mxu0 }
 0x35d   : > { %v3703_v21 = vmax.f32 %v3662_v53, 0.0  ;;  %v3622_v30 = vadd.f32 %v6543_v7, %v3574_v33  ;;  %v2998_v57 = vpop.f32.mrf.mxu1  ;;  %v3486_v8 = vadd.f32 %v3362_v44, %v3114_v42 }
 0x35e   : > { %v4968_v1 = vpop.f32.mrf.mxu0  ;;  %v3116_v11 = vadd.f32 %v2998_v57, %v6370_v47 }
 0x35f   : > { %3744 = vst.msk [vmem:[%s6555_s29 + $0x60] sm:$0xff] %vm375_vm2, %v3703_v21  ;;  %v3663_v24 = vadd.f32 %v3622_v30, %v3526_v27  ;;  %v3575_v40 = vmul.f32 %v6531_v9, %v3486_v8  ;;  %v4886_v4 = vpop.f32.mrf.mxu1  ;;  %v3530_v8 = vld [vmem:[%s6538_s23 + $0xa0] sm:$0xff] }
 0x360   : > { %v3365_v13 = vpop.f32.mrf.mxu0 }
 0x361   : > { %v3704_v41 = vmax.f32 %v3663_v24, 0.0  ;;  %v3623_v22 = vadd.f32 %v6543_v7, %v3575_v40  ;;  %v3001_v52 = vpop.f32.mrf.mxu1  ;;  %v3487_v32 = vadd.f32 %v3365_v13, %v3115_v29 }
 0x362   : > { %v4969_v38 = vpop.f32.mrf.mxu0  ;;  %v3117_v59 = vadd.f32 %v3001_v52, %v6382_v56  ;;  %v3531_v52 = vld [vmem:[%s6538_s23 + $0xa8] sm:$0xff] }
 0x363   : > { %3745 = vst.msk [vmem:[%s6555_s29 + $0x68] sm:$0xff] %vm375_vm2, %v3704_v41  ;;  %v3664_v31 = vadd.f32 %v3623_v22, %v3527_v17  ;;  %v3576_v37 = vmul.f32 %v6531_v9, %v3487_v32  ;;  %v4887_v48 = vpop.f32.mrf.mxu1 }
 0x364   : > { %v3370_v2 = vpop.f32.mrf.mxu0 }
 0x365   : > { %v3705_v39 = vmax.f32 %v3664_v31, 0.0  ;;  %v3624_v20 = vadd.f32 %v6543_v7, %v3576_v37  ;;  %v3006_v12 = vpop.f32.mrf.mxu1  ;;  %v3488_v61 = vadd.f32 %v3370_v2, %v3116_v11 }
 0x366   : > { %v4972_v63 = vpop.f32.mrf.mxu0  ;;  %v3118_v21 = vadd.f32 %v3006_v12, %v6386_v15 }
 0x367   : > { %3746 = vst.msk [vmem:[%s6555_s29 + $0x70] sm:$0xff] %vm375_vm2, %v3705_v39  ;;  %v3665_v47 = vadd.f32 %v3624_v20, %v3528_v34  ;;  %v3577_v16 = vmul.f32 %v6531_v9, %v3488_v61  ;;  %v4890_v54 = vpop.f32.mrf.mxu1  ;;  %v3532_v20 = vld [vmem:[%s6538_s23 + $0xb0] sm:$0xff] }
 0x368   : > { %v3373_v42 = vpop.f32.mrf.mxu0 }
 0x369   : > { %v3706_v53 = vmax.f32 %v3665_v47, 0.0  ;;  %v3625_v33 = vadd.f32 %v6543_v7, %v3577_v16  ;;  %v3009_v58 = vpop.f32.mrf.mxu1  ;;  %v3489_v27 = vadd.f32 %v3373_v42, %v3117_v59 }
 0x36a   : > { %v4973_v44 = vpop.f32.mrf.mxu0  ;;  %v3119_v13 = vadd.f32 %v3009_v58, %v6398_v51 }
 0x36b   : > { %3747 = vst.msk [vmem:[%s6555_s29 + $0x78] sm:$0xff] %vm375_vm2, %v3706_v53  ;;  %v3666_v56 = vadd.f32 %v3625_v33, %v3529_v5  ;;  %v3578_v30 = vmul.f32 %v6531_v9, %v3489_v27  ;;  %v4891_v57 = vpop.f32.mrf.mxu1  ;;  %v3533_v53 = vld [vmem:[%s6538_s23 + $0xb8] sm:$0xff] }
 0x36c   : > { %v3378_v1 = vpop.f32.mrf.mxu0 }
 0x36d   : > { %v3707_v29 = vmax.f32 %v3666_v56, 0.0  ;;  %v3626_v24 = vadd.f32 %v6543_v7, %v3578_v30  ;;  %v3014_v40 = vpop.f32.mrf.mxu1  ;;  %v3490_v4 = vadd.f32 %v3378_v1, %v3118_v21  ;;  %v3534_v1 = vld [vmem:[%s6538_s23 + $0xc0] sm:$0xff] }
 0x36e   : > { %v4976_v17 = vpop.f32.mrf.mxu0  ;;  %v3120_v34 = vadd.f32 %v3014_v40, %v6402_v43 }
 0x36f   : > { %3748 = vst.msk [vmem:[%s6555_s29 + $0x80] sm:$0xff] %vm375_vm2, %v3707_v29  ;;  %v3667_v15 = vadd.f32 %v3626_v24, %v3530_v8  ;;  %v3579_v41 = vmul.f32 %v6531_v9, %v3490_v4  ;;  %v4894_v22 = vpop.f32.mrf.mxu1 }
 0x370   : > { %v3381_v32 = vpop.f32.mrf.mxu0 }
 0x371   : > { %v3708_v38 = vmax.f32 %v3667_v15, 0.0  ;;  %v3627_v11 = vadd.f32 %v6543_v7, %v3579_v41  ;;  %v3017_v31 = vpop.f32.mrf.mxu1  ;;  %v3491_v37 = vadd.f32 %v3381_v32, %v3119_v13 }
 0x372   : > { %v4977_v48 = vpop.f32.mrf.mxu0  ;;  %v3121_v54 = vadd.f32 %v3017_v31, %v6414_v35 }
 0x373   : > { %3749 = vst.msk [vmem:[%s6555_s29 + $0x88] sm:$0xff] %vm375_vm2, %v3708_v38  ;;  %v3668_v51 = vadd.f32 %v3627_v11, %v3531_v52  ;;  %v3580_v2 = vmul.f32 %v6531_v9, %v3491_v37  ;;  %v4895_v39 = vpop.f32.mrf.mxu1  ;;  %v3535_v52 = vld [vmem:[%s6538_s23 + $0xc8] sm:$0xff] }
 0x374   : > { %v3386_v12 = vpop.f32.mrf.mxu0  ;;  %v3536_v39 = vld [vmem:[%s6538_s23 + $0xd0] sm:$0xff] }
 0x375   : > { %v3709_v61 = vmax.f32 %v3668_v51, 0.0  ;;  %v3628_v63 = vadd.f32 %v6543_v7, %v3580_v2  ;;  %v3022_v59 = vpop.f32.mrf.mxu1  ;;  %v3492_v47 = vadd.f32 %v3386_v12, %v3120_v34 }
 0x376   : > { %v4980_v16 = vpop.f32.mrf.mxu0  ;;  %v3122_v30 = vadd.f32 %v3022_v59, %v6418_v25 }
 0x377   : > { %3750 = vst.msk [vmem:[%s6555_s29 + $0x90] sm:$0xff] %vm375_vm2, %v3709_v61  ;;  %v3669_v43 = vadd.f32 %v3628_v63, %v3532_v20  ;;  %v3581_v5 = vmul.f32 %v6531_v9, %v3492_v47  ;;  %v4898_v42 = vpop.f32.mrf.mxu1 }
 0x378   : > { %v3389_v33 = vpop.f32.mrf.mxu0 }
 0x379   : > { %v3710_v58 = vmax.f32 %v3669_v43, 0.0  ;;  %v3629_v27 = vadd.f32 %v6543_v7, %v3581_v5  ;;  %v3025_v44 = vpop.f32.mrf.mxu1  ;;  %v3493_v21 = vadd.f32 %v3389_v33, %v3121_v54  ;;  %v3537_v5 = vld [vmem:[%s6538_s23 + $0xd8] sm:$0xff] }
 0x37a   : > { %v4981_v56 = vpop.f32.mrf.mxu0  ;;  %v3123_v15 = vadd.f32 %v3025_v44, %v6430_v3 }
 0x37b   : > { %3751 = vst.msk [vmem:[%s6555_s29 + $0x98] sm:$0xff] %vm375_vm2, %v3710_v58  ;;  %v3670_v35 = vadd.f32 %v3629_v27, %v3533_v53  ;;  %v3582_v57 = vmul.f32 %v6531_v9, %v3493_v21  ;;  %v4899_v8 = vpop.f32.mrf.mxu1 }
 0x37c   : > { %v3394_v29 = vpop.f32.mrf.mxu0 }
 0x37d   : > { %v3711_v24 = vmax.f32 %v3670_v35, 0.0  ;;  %v3630_v40 = vadd.f32 %v6543_v7, %v3582_v57  ;;  %v3030_v4 = vpop.f32.mrf.mxu1  ;;  %v3494_v17 = vadd.f32 %v3394_v29, %v3122_v30  ;;  %v3538_v35 = vld [vmem:[%s6538_s23 + $0xe0] sm:$0xff] }
 0x37e   : > { %v4984_v13 = vpop.f32.mrf.mxu0  ;;  %v3124_v34 = vadd.f32 %v3030_v4, %v6434_v23 }
 0x37f   : > { %3752 = vst.msk [vmem:[%s6555_s29 + $0xa0] sm:$0xff] %vm375_vm2, %v3711_v24  ;;  %v3671_v25 = vadd.f32 %v3630_v40, %v3534_v1  ;;  %v3583_v41 = vmul.f32 %v6531_v9, %v3494_v17  ;;  %v4902_v22 = vpop.f32.mrf.mxu1 }
 0x380   : > { %v3397_v32 = vpop.f32.mrf.mxu0 }
 0x381   : > { %v3712_v38 = vmax.f32 %v3671_v25, 0.0  ;;  %v3631_v11 = vadd.f32 %v6543_v7, %v3583_v41  ;;  %v3033_v31 = vpop.f32.mrf.mxu1  ;;  %v3495_v37 = vadd.f32 %v3397_v32, %v3123_v15  ;;  %v3539_v15 = vld [vmem:[%s6538_s23 + $0xe8] sm:$0xff] }
 0x382   : > { %v4985_v48 = vpop.f32.mrf.mxu0  ;;  %v3125_v16 = vadd.f32 %v3033_v31, %v6446_v60 }
 0x383   : > { %3753 = vst.msk [vmem:[%s6555_s29 + $0xa8] sm:$0xff] %vm375_vm2, %v3712_v38  ;;  %v3672_v3 = vadd.f32 %v3631_v11, %v3535_v52  ;;  %v3584_v51 = vmul.f32 %v6531_v9, %v3495_v37  ;;  %v4903_v2 = vpop.f32.mrf.mxu1  ;;  %v3540_v48 = vld [vmem:[%s6538_s23 + $0xf0] sm:$0xff] }
 0x384   : > { %v3402_v20 = vpop.f32.mrf.mxu0 }
 0x385   : > { %v3713_v12 = vmax.f32 %v3672_v3, 0.0  ;;  %v3632_v61 = vadd.f32 %v6543_v7, %v3584_v51  ;;  %v3038_v63 = vpop.f32.mrf.mxu1  ;;  %v3496_v59 = vadd.f32 %v3402_v20, %v3124_v34 }
 0x386   : > { %v4988_v47 = vpop.f32.mrf.mxu0  ;;  %v3126_v21 = vadd.f32 %v3038_v63, %v6450_v0 }
 0x387   : > { %3754 = vst.msk [vmem:[%s6555_s29 + $0xb0] sm:$0xff] %vm375_vm2, %v3713_v12  ;;  %v3673_v23 = vadd.f32 %v3632_v61, %v3536_v39  ;;  %v3585_v54 = vmul.f32 %v6531_v9, %v3496_v59  ;;  %v4906_v43 = vpop.f32.mrf.mxu1  ;;  %v3541_v59 = vld [vmem:[%s6538_s23 + $0xf8] sm:$0xff] }
 0x388   : > { %v3405_v42 = vpop.f32.mrf.mxu0 }
 0x389   : > { %v3714_v53 = vmax.f32 %v3673_v23, 0.0  ;;  %v3633_v33 = vadd.f32 %v6543_v7, %v3585_v54  ;;  %v3041_v58 = vpop.f32.mrf.mxu1  ;;  %v3497_v27 = vadd.f32 %v3405_v42, %v3125_v16 }
 0x38a   : > { %v4989_v44 = vpop.f32.mrf.mxu0  ;;  %v3127_v4 = vadd.f32 %v3041_v58, %v6462_v6  ;;  %v3542_v58 = vld [vmem:[%s6538_s23 + $0x100] sm:$0xff] }
 0x38b   : > { %3755 = vst.msk [vmem:[%s6555_s29 + $0xb8] sm:$0xff] %vm375_vm2, %v3714_v53  ;;  %v3674_v60 = vadd.f32 %v3633_v33, %v3537_v5  ;;  %v3586_v56 = vmul.f32 %v6531_v9, %v3497_v27  ;;  %v4907_v30 = vpop.f32.mrf.mxu1 }
 0x38c   : > { %v3410_v57 = vpop.f32.mrf.mxu0 }
 0x38d   : > { %v3715_v8 = vmax.f32 %v3674_v60, 0.0  ;;  %v3634_v1 = vadd.f32 %v6543_v7, %v3586_v56  ;;  %v3046_v29 = vpop.f32.mrf.mxu1  ;;  %v3498_v24 = vadd.f32 %v3410_v57, %v3126_v21 }
 0x38e   : > { %v4992_v40 = vpop.f32.mrf.mxu0  ;;  %v3128_v11 = vadd.f32 %v3046_v29, %v6466_v10 }
 0x38f   : > { %3756 = vst.msk [vmem:[%s6555_s29 + $0xc0] sm:$0xff] %vm375_vm2, %v3715_v8  ;;  %v3675_v0 = vadd.f32 %v3634_v1, %v3538_v35  ;;  %v3587_v17 = vmul.f32 %v6531_v9, %v3498_v24  ;;  %v4910_v13 = vpop.f32.mrf.mxu1  ;;  %v3543_v1 = vld [vmem:[%s6538_s23 + $0x108] sm:$0xff] }
 0x390   : > { %v3413_v25 = vpop.f32.mrf.mxu0 }
 0x391   : > { %v3716_v41 = vmax.f32 %v3675_v0, 0.0  ;;  %v3635_v22 = vadd.f32 %v6543_v7, %v3587_v17  ;;  %v3049_v52 = vpop.f32.mrf.mxu1  ;;  %v3499_v32 = vadd.f32 %v3413_v25, %v3127_v4 }
 0x392   : > { %v4993_v38 = vpop.f32.mrf.mxu0  ;;  %v3129_v12 = vadd.f32 %v3049_v52, %v6478_v26 }
 0x393   : > { %3757 = vst.msk [vmem:[%s6555_s29 + $0xc8] sm:$0xff] %vm375_vm2, %v3716_v41  ;;  %v3676_v6 = vadd.f32 %v3635_v22, %v3539_v15  ;;  %v3588_v31 = vmul.f32 %v6531_v9, %v3499_v32  ;;  %v4911_v37 = vpop.f32.mrf.mxu1  ;;  %v3544_v41 = vld [vmem:[%s6538_s23 + $0x110] sm:$0xff] }
 0x394   : > { %v3418_v34 = vpop.f32.mrf.mxu0 }
 0x395   : > { %v3717_v3 = vmax.f32 %v3676_v6, 0.0  ;;  %v3636_v51 = vadd.f32 %v6543_v7, %v3588_v31  ;;  %v3054_v2 = vpop.f32.mrf.mxu1  ;;  %v3500_v39 = vadd.f32 %v3418_v34, %v3128_v11  ;;  %v3545_v34 = vld [vmem:[%s6538_s23 + $0x118] sm:$0xff] }
 0x396   : > { %v4996_v20 = vpop.f32.mrf.mxu0  ;;  %v3130_v42 = vadd.f32 %v3054_v2, %v6482_v36 }
 0x397   : > { %3758 = vst.msk [vmem:[%s6555_s29 + $0xd0] sm:$0xff] %vm375_vm2, %v3717_v3  ;;  %v3677_v10 = vadd.f32 %v3636_v51, %v3540_v48  ;;  %v3589_v61 = vmul.f32 %v6531_v9, %v3500_v39  ;;  %v4914_v63 = vpop.f32.mrf.mxu1 }
 0x398   : > { %v3421_v47 = vpop.f32.mrf.mxu0 }
 0x399   : > { %v3718_v16 = vmax.f32 %v3677_v10, 0.0  ;;  %v3637_v23 = vadd.f32 %v6543_v7, %v3589_v61  ;;  %v3057_v54 = vpop.f32.mrf.mxu1  ;;  %v3501_v43 = vadd.f32 %v3421_v47, %v3129_v12 }
 0x39a   : > { %v4997_v5 = vpop.f32.mrf.mxu0  ;;  %v3131_v35 = vadd.f32 %v3057_v54, %v6493_v50 }
 0x39b   : > { %3759 = vst.msk [vmem:[%s6555_s29 + $0xd8] sm:$0xff] %vm375_vm2, %v3718_v16  ;;  %v3678_v26 = vadd.f32 %v3637_v23, %v3541_v59  ;;  %v3590_v53 = vmul.f32 %v6531_v9, %v3501_v43  ;;  %v4915_v33 = vpop.f32.mrf.mxu1  ;;  %v3546_v59 = vld [vmem:[%s6538_s23 + $0x120] sm:$0xff] }
 0x39c   : > { %v3426_v27 = vpop.f32.mrf.mxu0  ;;  %v3547_v33 = vld [vmem:[%s6538_s23 + $0x128] sm:$0xff] }
 0x39d   : > { %v3719_v44 = vmax.f32 %v3678_v26, 0.0  ;;  %v3638_v21 = vadd.f32 %v6543_v7, %v3590_v53  ;;  %v3062_v60 = vpop.f32.mrf.mxu1  ;;  %v3502_v56 = vadd.f32 %v3426_v27, %v3130_v42 }
 0x39e   : > { %v5000_v30 = vpop.f32.mrf.mxu0  ;;  %v3132_v13 = vadd.f32 %v3062_v60, %v6497_v45 }
 0x39f   : > { %3760 = vst.msk [vmem:[%s6555_s29 + $0xe0] sm:$0xff] %vm375_vm2, %v3719_v44  ;;  %v3679_v36 = vadd.f32 %v3638_v21, %v3542_v58  ;;  %v3591_v57 = vmul.f32 %v6531_v9, %v3502_v56  ;;  %v4918_v8 = vpop.f32.mrf.mxu1 }
 0x3a0   : > { %v3429_v29 = vpop.f32.mrf.mxu0 }
 0x3a1   : > { %v3720_v24 = vmax.f32 %v3679_v36, 0.0  ;;  %v3639_v40 = vadd.f32 %v6543_v7, %v3591_v57  ;;  %v3065_v4 = vpop.f32.mrf.mxu1  ;;  %v3503_v0 = vadd.f32 %v3429_v29, %v3131_v35  ;;  %v3548_v57 = vld [vmem:[%s6538_s23 + $0x130] sm:$0xff] }
 0x3a2   : > { %v5001_v17 = vpop.f32.mrf.mxu0  ;;  %v3133_v31 = vadd.f32 %v3065_v4, %v6504_v55 }
 0x3a3   : > { %3761 = vst.msk [vmem:[%s6555_s29 + $0xe8] sm:$0xff] %vm375_vm2, %v3720_v24  ;;  %v3680_v50 = vadd.f32 %v3639_v40, %v3543_v1  ;;  %v3592_v15 = vmul.f32 %v6531_v9, %v3503_v0  ;;  %v4919_v25 = vpop.f32.mrf.mxu1 }
 0x3a4   : > { %v3434_v22 = vpop.f32.mrf.mxu0 }
 0x3a5   : > { %v3721_v52 = vmax.f32 %v3680_v50, 0.0  ;;  %v3640_v32 = vadd.f32 %v6543_v7, %v3592_v15  ;;  %v3070_v38 = vpop.f32.mrf.mxu1  ;;  %v3504_v11 = vadd.f32 %v3434_v22, %v3132_v13  ;;  %v3549_v50 = vld [vmem:[%s6538_s23 + $0x138] sm:$0xff] }
 0x3a6   : > { %v5004_v6 = vpop.f32.mrf.mxu0  ;;  %v3134_v10 = vadd.f32 %v3070_v38, %v6508_v49 }
 0x3a7   : > { %3762 = vst.msk [vmem:[%s6555_s29 + $0xf0] sm:$0xff] %vm375_vm2, %v3721_v52  ;;  %v3681_v45 = vadd.f32 %v3640_v32, %v3544_v41  ;;  %v3593_v37 = vmul.f32 %v6531_v9, %v3504_v11  ;;  %v4922_v48 = vpop.f32.mrf.mxu1 }
 0x3a8   : > { %v3437_v3 = vpop.f32.mrf.mxu0 }
 0x3a9   : > { %v3722_v51 = vmax.f32 %v3681_v45, 0.0  ;;  %v3641_v2 = vadd.f32 %v6543_v7, %v3593_v37  ;;  %v3073_v39 = vpop.f32.mrf.mxu1  ;;  %v3505_v20 = vadd.f32 %v3437_v3, %v3133_v31  ;;  %v3550_v31 = vld [vmem:[%s6538_s23 + $0x140] sm:$0xff] }
 0x3aa   : > { %v5005_v12 = vpop.f32.mrf.mxu0  ;;  %v3135_v42 = vadd.f32 %v3073_v39, %v6511_v62 }
 0x3ab   : > { %3763 = vst.msk [vmem:[%s6555_s29 + $0xf8] sm:$0xff] %vm375_vm2, %v3722_v51  ;;  %v3682_v55 = vadd.f32 %v3641_v2, %v3545_v34  ;;  %v3594_v61 = vmul.f32 %v6531_v9, %v3505_v20  ;;  %v4923_v63 = vpop.f32.mrf.mxu1  ;;  %v3551_v12 = vld [vmem:[%s6538_s23 + $0x148] sm:$0xff] }
 0x3ac   : > { %v3442_v47 = vpop.f32.mrf.mxu0 }
 0x3ad   : > { %v3723_v16 = vmax.f32 %v3682_v55, 0.0  ;;  %v3642_v23 = vadd.f32 %v6543_v7, %v3594_v61  ;;  %v3078_v54 = vpop.f32.mrf.mxu1  ;;  %v3506_v43 = vadd.f32 %v3442_v47, %v3134_v10 }
 0x3ae   : > { %v5008_v5 = vpop.f32.mrf.mxu0  ;;  %v3136_v30 = vadd.f32 %v3078_v54, %v6514_v19 }
 0x3af   : > { %3764 = vst.msk [vmem:[%s6555_s29 + $0x100] sm:$0xff] %vm375_vm2, %v3723_v16  ;;  %v3683_v49 = vadd.f32 %v3642_v23, %v3546_v59  ;;  %v3595_v26 = vmul.f32 %v6531_v9, %v3506_v43  ;;  %v4926_v53 = vpop.f32.mrf.mxu1  ;;  %v3552_v43 = vld [vmem:[%s6538_s23 + $0x150] sm:$0xff] }
 0x3b0   : > { %v3445_v58 = vpop.f32.mrf.mxu0 }
 0x3b1   : > { %v3724_v27 = vmax.f32 %v3683_v49, 0.0  ;;  %v3643_v44 = vadd.f32 %v6543_v7, %v3595_v26  ;;  %v3081_v21 = vpop.f32.mrf.mxu1  ;;  %v3507_v60 = vadd.f32 %v3445_v58, %v3135_v42 }
 0x3b2   : > { %v5009_v56 = vpop.f32.mrf.mxu0  ;;  %v3137_v0 = vadd.f32 %v3081_v21, %v6517_v28 }
 0x3b3   : > { %3765 = vst.msk [vmem:[%s6555_s29 + $0x108] sm:$0xff] %vm375_vm2, %v3724_v27  ;;  %v3684_v62 = vadd.f32 %v3643_v44, %v3547_v33  ;;  %v3596_v35 = vmul.f32 %v6531_v9, %v3507_v60  ;;  %v4927_v36 = vpop.f32.mrf.mxu1  ;;  %v3553_v27 = vld [vmem:[%s6538_s23 + $0x158] sm:$0xf] }
 0x3b4   : > { %v3450_v8 = vpop.f32.mrf.mxu0 }
 0x3b5   : > { %v3725_v1 = vmax.f32 %v3684_v62, 0.0  ;;  %v3644_v29 = vadd.f32 %v6543_v7, %v3596_v35  ;;  %v3086_v24 = vpop.f32.mrf.mxu1  ;;  %v3508_v40 = vadd.f32 %v3450_v8, %v3136_v30 }
 0x3b6   : > { %v5012_v4 = vpop.f32.mrf.mxu0  ;;  %v3138_v38 = vadd.f32 %v3086_v24, %v6520_v46 }
 0x3b7   : > { %3766 = vst.msk [vmem:[%s6555_s29 + $0x110] sm:$0xff] %vm375_vm2, %v3725_v1  ;;  %v3685_v19 = vadd.f32 %v3644_v29, %v3548_v57  ;;  %v3597_v17 = vmul.f32 %v6531_v9, %v3508_v40  ;;  %v4930_v13 = vpop.f32.mrf.mxu1 }
 0x3b8   : > { %v3453_v15 = vpop.f32.mrf.mxu0 }
 0x3b9   : > { %v3726_v25 = vmax.f32 %v3685_v19, 0.0  ;;  %v3645_v41 = vadd.f32 %v6543_v7, %v3597_v17  ;;  %v3089_v22 = vpop.f32.mrf.mxu1  ;;  %v3509_v52 = vadd.f32 %v3453_v15, %v3137_v0 }
 0x3ba   : > { %v5013_v32 = vpop.f32.mrf.mxu0  ;;  %v3139_v2 = vadd.f32 %v3089_v22, %v6523_v18 }
 0x3bb   : > { %3767 = vst.msk [vmem:[%s6555_s29 + $0x118] sm:$0xff] %vm375_vm2, %v3726_v25  ;;  %v3686_v28 = vadd.f32 %v3645_v41, %v3549_v50  ;;  %v3598_v11 = vmul.f32 %v6531_v9, %v3509_v52  ;;  %v4931_v6 = vpop.f32.mrf.mxu1 }
 0x3bc   : > { %v3458_v45 = vpop.f32.mrf.mxu0 }
 0x3bd   : > { %v3727_v37 = vmax.f32 %v3686_v28, 0.0  ;;  %v3646_v48 = vadd.f32 %v6543_v7, %v3598_v11  ;;  %v3094_v34 = vpop.f32.mrf.mxu1  ;;  %v3510_v3 = vadd.f32 %v3458_v45, %v3138_v38 }
 0x3be   : > { %v5016_v51 = vpop.f32.mrf.mxu0  ;;  %v3140_v16 = vadd.f32 %v3094_v34, %v6525_v14 }
 0x3bf   : > { %3768 = vst.msk [vmem:[%s6555_s29 + $0x120] sm:$0xff] %vm375_vm2, %v3727_v37  ;;  %v3687_v46 = vadd.f32 %v3646_v48, %v3550_v31  ;;  %v3599_v39 = vmul.f32 %v6531_v9, %v3510_v3  ;;  %v4934_v20 = vpop.f32.mrf.mxu1 }
 0x3c0   : > { %v3461_v10 = vpop.f32.mrf.mxu0 }
 0x3c1   : > { %v3728_v55 = vmax.f32 %v3687_v46, 0.0  ;;  %v3647_v61 = vadd.f32 %v6543_v7, %v3599_v39  ;;  %v3097_v63 = vpop.f32.mrf.mxu1  ;;  %v3511_v59 = vadd.f32 %v3461_v10, %v3139_v2 }
 0x3c2   : > { %v5017_v47 = vpop.f32.mrf.mxu0 }
 0x3c3   : > { %3769 = vst.msk [vmem:[%s6555_s29 + $0x128] sm:$0xff] %vm375_vm2, %v3728_v55  ;;  %v3688_v18 = vadd.f32 %v3647_v61, %v3551_v12  ;;  %v3600_v23 = vmul.f32 %v6531_v9, %v3511_v59  ;;  %v4935_v54 = vpop.f32.mrf.mxu1 }
 0x3c4   : > { %v3466_v5 = vpop.f32.mrf.mxu0 }
 0x3c5   : > { %v3729_v42 = vmax.f32 %v3688_v18, 0.0  ;;  %v3648_v49 = vadd.f32 %v6543_v7, %v3600_v23  ;;  %v3512_v26 = vadd.f32 %v3466_v5, %v3140_v16 }
 0x3c6   : > { %v5020_v53 = vpop.f32.mrf.mxu0 }
 0x3c7   : > { %3770 = vst.msk [vmem:[%s6555_s29 + $0x130] sm:$0xff] %vm375_vm2, %v3729_v42  ;;  %v3689_v33 = vadd.f32 %v3648_v49, %v3552_v43  ;;  %v3601_v58 = vmul.f32 %v6531_v9, %v3512_v26 }
 0x3c8   : > { %v3469_v14 = vpop.f32.mrf.mxu0 }
 0x3c9   : > { %v3730_v44 = vmax.f32 %v3689_v33, 0.0  ;;  %v3649_v21 = vadd.f32 %v6543_v7, %v3601_v58 }
 0x3ca   : > { %v5021_v60 = vpop.f32.mrf.mxu0 }
 0x3cb   : > { %3771 = vst.msk [vmem:[%s6555_s29 + $0x138] sm:$0xff] %vm375_vm2, %v3730_v44  ;;  %v3690_v56 = vadd.f32 %v3649_v21, %v3553_v27 }
 0x3cd   : > { %v3731_v30 = vmax.f32 %v3690_v56, 0.0 }
 0x3cf   : > { %3773 = vst.msk [vmem:[%s6555_s29 + $0x140] sm:$0xf] %vm3772_vm3, %v3731_v30 }
 0x3d0 PF: > { %s15_s18 = sadd.s32 1, %s5042_s18  }
 0x3d1   : > { %p12_p4 = scmp.ge.s32.totalorder %s15_s18, 4  }
 0x3d3   :  { %14 = sbr.rel (!%p12_p4) target bundleno = 1 (0x1), region = 81 }

</bundles_post_ra>
